<compile_context>
chip_gen: v6e
topology: v6e:2x2x1
jax: 0.10.0
libtpu: 0.0.40
codegen_flags: <defaults>
</compile_context>

<pallas_src>
import jax
import jax.numpy as jnp
from jax import lax
from jax.experimental import pallas as pl
from jax.experimental.pallas import tpu as pltpu

_EPS = 1e-5

_VMEM_LIMIT_CACHE = None


def _vmem_limit_bytes():
    """~80% of physical VMEM, capped at 100 MiB (v7x: 64 MiB phys -> ~51 MiB)."""
    global _VMEM_LIMIT_CACHE
    if _VMEM_LIMIT_CACHE is None:
        cap = 128 * 1024 * 1024
        try:
            info = pltpu.get_tpu_info()
            cap = int(getattr(info, "vmem_capacity_bytes", cap))
        except Exception:
            pass
        _VMEM_LIMIT_CACHE = int(min(100 * 1024 * 1024, (cap * 4) // 5))
    return _VMEM_LIMIT_CACHE


# ----------------------------------------------------------------------------
# In-kernel helpers (operate on VMEM-resident f32 values)
# ----------------------------------------------------------------------------
def _pad_rows(xp_ref, x):
    """Write x into rows [1, H] of the (H+2, W, C) scratch; zero the halo rows."""
    H, W, C = x.shape
    zrow = jnp.zeros((1, W, C), jnp.float32)
    xp_ref[0:1] = zrow
    xp_ref[H + 1:H + 2] = zrow
    xp_ref[1:H + 1] = x


def _dw3x3_padded(xp_ref, w, b):
    """Depthwise 3x3, stride 1, zero pad 1, reading an H-padded VMEM scratch.

    H shifts: static leading-dim row selects on the scratch ref.
    W shifts: pltpu.roll on the sublane axis (XLU slot) + boundary mask.
    xp_ref: (H+2, W, C) ref, w: (3, 3, C), b: (1, 1, C)  ->  (H, W, C) f32
    """
    Hp, W, C = xp_ref.shape
    H = Hp - 2
    col = lax.broadcasted_iota(jnp.int32, (H, W, C), 1)
    valid_l = col >= 1            # contribution reading column w-1 (invalid at w=0)
    valid_r = col < (W - 1)       # contribution reading column w+1 (invalid at w=W-1)

    acc = jnp.zeros((H, W, C), jnp.float32) + b
    for kh in range(3):
        xk = xp_ref[kh:kh + H]                       # (H, W, C), cheap leading-dim slice
        for kw in range(3):
            sw = 1 - kw                               # +1, 0, -1
            if sw == 0:
                xs = xk
            else:
                xs = pltpu.roll(xk, shift=sw % W, axis=1)
                xs = jnp.where(valid_l if sw > 0 else valid_r, xs, 0.0)
            acc = acc + xs * w[kh, kw, :]
    return acc


def _bn_scale_shift(bn):
    """bn: (4, C) rows = [mean, var, gamma, beta] -> (scale, shift), each (1, C)."""
    scale = bn[2:3, :] * lax.rsqrt(bn[1:2, :] + _EPS)
    shift = bn[3:4, :] - bn[0:1, :] * scale
    return scale, shift


# ----------------------------------------------------------------------------
# Stage A: conv1 (dw + pw on MXU) + downsample-conv BN partial stats
# ----------------------------------------------------------------------------
def _stage_a_kernel(x_ref, dw_w_ref, dw_b_ref, pw_w_ref, pw_b_ref,
                    ds_w_ref, ds_b_ref,
                    p1_ref, s1_ref, q1_ref, sd_ref, qd_ref,
                    xp_ref):
    _, H, W, cin = x_ref.shape
    cout = p1_ref.shape[-1]
    x = x_ref[0].astype(jnp.float32)                              # (H, W, Cin)

    _pad_rows(xp_ref, x)
    d1 = _dw3x3_padded(xp_ref, dw_w_ref[...].astype(jnp.float32),
                       dw_b_ref[...].astype(jnp.float32))          # (H, W, Cin)

    # pointwise 1x1 convs on the MXU
    x2d = x.reshape(H * W, cin)
    p1 = jnp.dot(d1.reshape(H * W, cin), pw_w_ref[...].astype(jnp.float32),
                 preferred_element_type=jnp.float32) + pw_b_ref[...]
    ds = jnp.dot(x2d, ds_w_ref[...].astype(jnp.float32),
                 preferred_element_type=jnp.float32) + ds_b_ref[...]

    p1_ref[0] = p1.reshape(H, W, cout).astype(p1_ref.dtype)
    s1_ref[...] = jnp.sum(p1, axis=0).reshape(1, 1, cout)
    q1_ref[...] = jnp.sum(p1 * p1, axis=0).reshape(1, 1, cout)
    sd_ref[...] = jnp.sum(ds, axis=0).reshape(1, 1, cout)          # ds image is discarded
    qd_ref[...] = jnp.sum(ds * ds, axis=0).reshape(1, 1, cout)


def _stage_a(x, p):
    N, H, W, Cin = x.shape
    Cout = p["pw1_w"].shape[1]
    img_in = pl.BlockSpec((1, H, W, Cin), lambda n: (n, 0, 0, 0))
    img_out = pl.BlockSpec((1, H, W, Cout), lambda n: (n, 0, 0, 0))
    stat = pl.BlockSpec((1, 1, Cout), lambda n: (n, 0, 0))

    def full(shape):
        return pl.BlockSpec(shape, lambda n: (0,) * len(shape))

    return pl.pallas_call(
        _stage_a_kernel,
        out_shape=(
            jax.ShapeDtypeStruct((N, H, W, Cout), jnp.float32),    # p1
            jax.ShapeDtypeStruct((N, 1, Cout), jnp.float32),       # sum(p1)
            jax.ShapeDtypeStruct((N, 1, Cout), jnp.float32),       # sum(p1^2)
            jax.ShapeDtypeStruct((N, 1, Cout), jnp.float32),       # sum(ds)
            jax.ShapeDtypeStruct((N, 1, Cout), jnp.float32),       # sum(ds^2)
        ),
        grid=(N,),
        in_specs=[
            img_in,
            full((3, 3, Cin)), full((1, 1, Cin)),
            full((Cin, Cout)), full((1, Cout)),
            full((Cin, Cout)), full((1, Cout)),
        ],
        out_specs=(img_out, stat, stat, stat, stat),
        scratch_shapes=[pltpu.VMEM((H + 2, W, Cin), jnp.float32)],
        compiler_params=pltpu.CompilerParams(
            dimension_semantics=("parallel",),
            vmem_limit_bytes=_vmem_limit_bytes()),
    )(x,
      p["dw1_w"], p["dw1_b"].reshape(1, 1, Cin),
      p["pw1_w"], p["pw1_b"].reshape(1, Cout),
      p["ds_w"], p["ds_b"].reshape(1, Cout))


# ----------------------------------------------------------------------------
# Stage B: bn1 affine + relu (fused on load) -> conv2 (dw + pw on MXU) + BN2 stats
# ----------------------------------------------------------------------------
def _stage_b_kernel(p1_ref, bn1_ref, dw_w_ref, dw_b_ref, pw_w_ref, pw_b_ref,
                    p2_ref, s2_ref, q2_ref, xp_ref):
    _, H, W, cout = p1_ref.shape
    scale, shift = _bn_scale_shift(bn1_ref[...].astype(jnp.float32))

    y1 = jnp.maximum(p1_ref[0].astype(jnp.float32) * scale + shift, 0.0)

    _pad_rows(xp_ref, y1)
    d2 = _dw3x3_padded(xp_ref, dw_w_ref[...].astype(jnp.float32),
                       dw_b_ref[...].astype(jnp.float32))

    p2 = jnp.dot(d2.reshape(H * W, cout), pw_w_ref[...].astype(jnp.float32),
                 preferred_element_type=jnp.float32) + pw_b_ref[...]

    p2_ref[0] = p2.reshape(H, W, cout).astype(p2_ref.dtype)
    s2_ref[...] = jnp.sum(p2, axis=0).reshape(1, 1, cout)
    q2_ref[...] = jnp.sum(p2 * p2, axis=0).reshape(1, 1, cout)


def _stage_b(p1, bn1, p):
    N, H, W, Cout = p1.shape
    img = pl.BlockSpec((1, H, W, Cout), lambda n: (n, 0, 0, 0))
    stat = pl.BlockSpec((1, 1, Cout), lambda n: (n, 0, 0))

    def full(shape):
        return pl.BlockSpec(shape, lambda n: (0,) * len(shape))

    return pl.pallas_call(
        _stage_b_kernel,
        out_shape=(
            jax.ShapeDtypeStruct((N, H, W, Cout), jnp.float32),
            jax.ShapeDtypeStruct((N, 1, Cout), jnp.float32),
            jax.ShapeDtypeStruct((N, 1, Cout), jnp.float32),
        ),
        grid=(N,),
        in_specs=[
            img,
            full((4, Cout)),
            full((3, 3, Cout)), full((1, 1, Cout)),
            full((Cout, Cout)), full((1, Cout)),
        ],
        out_specs=(img, stat, stat),
        scratch_shapes=[pltpu.VMEM((H + 2, W, Cout), jnp.float32)],
        compiler_params=pltpu.CompilerParams(
            dimension_semantics=("parallel",),
            vmem_limit_bytes=_vmem_limit_bytes()),
    )(p1, bn1,
      p["dw2_w"], p["dw2_b"].reshape(1, 1, Cout),
      p["pw2_w"], p["pw2_b"].reshape(1, Cout))


# ----------------------------------------------------------------------------
# Stage C: recompute ds (MXU) + bn2/bn_d affines + residual + relu + attention
# ----------------------------------------------------------------------------
def _stage_c_kernel(p2_ref, x_ref, bn2_ref, bnd_ref, dsw_ref, dsb_ref,
                    w1_ref, b1_ref, w2_ref, b2_ref, o_ref):
    scale2, shift2 = _bn_scale_shift(bn2_ref[...].astype(jnp.float32))
    scaled, shiftd = _bn_scale_shift(bnd_ref[...].astype(jnp.float32))

    p2 = p2_ref[...].astype(jnp.float32)
    x = x_ref[...].astype(jnp.float32)

    # downsample 1x1 conv recomputed on the MXU (cheaper than an HBM round trip)
    ds = jnp.dot(x, dsw_ref[...].astype(jnp.float32),
                 preferred_element_type=jnp.float32) + dsb_ref[...]

    y = jnp.maximum(p2 * scale2 + shift2 + ds * scaled + shiftd, 0.0)

    # channel-attention MLP kept entirely in VMEM/registers
    h = jnp.maximum(jnp.dot(y, w1_ref[...].astype(jnp.float32),
                            preferred_element_type=jnp.float32) + b1_ref[...], 0.0)
    a = jax.nn.sigmoid(jnp.dot(h, w2_ref[...].astype(jnp.float32),
                               preferred_element_type=jnp.float32) + b2_ref[...])
    o_ref[...] = (y * a).astype(o_ref.dtype)


def _row_tile(m, target=2048):
    tm = min(target, m)
    tm = max(8, (tm // 8) * 8)      # sublane multiple
    return tm


def _stage_c(p2_2d, x2d, bn2, bnd, p):
    M, Cout = p2_2d.shape
    Cin = x2d.shape[1]
    Ca = p["att1_w"].shape[1]
    tm = _row_tile(M)
    row_o = pl.BlockSpec((tm, Cout), lambda i: (i, 0))
    row_x = pl.BlockSpec((tm, Cin), lambda i: (i, 0))

    def full(shape):
        return pl.BlockSpec(shape, lambda i: (0,) * len(shape))

    return pl.pallas_call(
        _stage_c_kernel,
        out_shape=jax.ShapeDtypeStruct((M, Cout), jnp.float32),
        grid=(pl.cdiv(M, tm),),
        in_specs=[
            row_o, row_x,
            full((4, Cout)), full((4, Cout)),
            full((Cin, Cout)), full((1, Cout)),
            full((Cout, Ca)), full((1, Ca)),
            full((Ca, Cout)), full((1, Cout)),
        ],
        out_specs=row_o,
        compiler_params=pltpu.CompilerParams(
            dimension_semantics=("parallel",),
            vmem_limit_bytes=_vmem_limit_bytes()),
    )(p2_2d, x2d, bn2, bnd,
      p["ds_w"], p["ds_b"].reshape(1, Cout),
      p["att1_w"], p["att1_b"].reshape(1, Ca),
      p["att2_w"], p["att2_b"].reshape(1, Cout))


# ----------------------------------------------------------------------------
# ResNetBlock forward (stride=1, downsample=True, attention=True), NCHW in/out
# ----------------------------------------------------------------------------
def resnet_block_forward(x_nchw, p):
    x = jnp.transpose(x_nchw, (0, 2, 3, 1))          # NCHW -> NHWC
    N, H, W, Cin = x.shape
    Cout = p["pw1_w"].shape[1]
    M = N * H * W

    p1, s1, q1, sd, qd = _stage_a(x, p)

    def bn_pack(s, q, g, b):
        mean = jnp.sum(s, axis=0) / M                           # (1, C)
        var = jnp.maximum(jnp.sum(q, axis=0) / M - mean * mean, 0.0)   # biased, clamped
        return jnp.concatenate(
            [mean, var, g.reshape(1, -1), b.reshape(1, -1)], axis=0)   # (4, C)

    bn1 = bn_pack(s1, q1, p["bn1_g"], p["bn1_b"])
    p2, s2, q2 = _stage_b(p1, bn1, p)

    bn2 = bn_pack(s2, q2, p["bn2_g"], p["bn2_b"])
    bnd = bn_pack(sd, qd, p["bnd_g"], p["bnd_b"])

    out2d = _stage_c(p2.reshape(M, Cout), x.reshape(M, Cin), bn2, bnd, p)
    out = out2d.reshape(N, H, W, Cout)
    return jnp.transpose(out, (0, 3, 1, 2))          # NHWC -> NCHW


# ----------------------------------------------------------------------------
# Deterministic parameter init (matches shapes of the PyTorch module)
# ----------------------------------------------------------------------------
def init_params(key, cin, cout):
    ks = jax.random.split(key, 8)

    def xavier(k, shape, fan_in, fan_out):
        bound = (6.0 / (fan_in + fan_out)) ** 0.5
        return jax.random.uniform(k, shape, jnp.float32, -bound, bound)

    ca = cout // 8
    bd = (1.0 / cin) ** 0.5

    return {
        # SeparableConv2D #1
        "dw1_w": xavier(ks[0], (3, 3, cin), 9, cin * 9),
        "dw1_b": jnp.full((cin,), 0.2, jnp.float32),
        "pw1_w": xavier(ks[1], (cin, cout), cin, cout),
        "pw1_b": jnp.full((cout,), 0.2, jnp.float32),
        "bn1_g": jnp.ones((cout,), jnp.float32),
        "bn1_b": jnp.zeros((cout,), jnp.float32),
        # SeparableConv2D #2
        "dw2_w": xavier(ks[2], (3, 3, cout), 9, cout * 9),
        "dw2_b": jnp.full((cout,), 0.2, jnp.float32),
        "pw2_w": xavier(ks[3], (cout, cout), cout, cout),
        "pw2_b": jnp.full((cout,), 0.2, jnp.float32),
        "bn2_g": jnp.ones((cout,), jnp.float32),
        "bn2_b": jnp.zeros((cout,), jnp.float32),
        # downsample 1x1 conv + bn
        "ds_w": jax.random.uniform(ks[4], (cin, cout), jnp.float32, -bd, bd),
        "ds_b": jax.random.uniform(ks[5], (cout,), jnp.float32, -bd, bd),
        "bnd_g": jnp.ones((cout,), jnp.float32),
        "bnd_b": jnp.zeros((cout,), jnp.float32),
        # attention 1x1 convs
        "att1_w": jax.random.uniform(ks[6], (cout, ca), jnp.float32,
                                     -(1.0 / cout) ** 0.5, (1.0 / cout) ** 0.5),
        "att1_b": jnp.full((ca,), 0.01, jnp.float32),
        "att2_w": jax.random.uniform(ks[7], (ca, cout), jnp.float32,
                                     -(1.0 / max(ca, 1)) ** 0.5, (1.0 / max(ca, 1)) ** 0.5),
        "att2_b": jnp.full((cout,), 0.01, jnp.float32),
    }


# ----------------------------------------------------------------------------
# Pure-JAX reference for correctness
# ----------------------------------------------------------------------------
def reference_forward(x_nchw, p):
    x = jnp.transpose(x_nchw, (0, 2, 3, 1))

    def dw(x, w, b):
        C = x.shape[-1]
        y = jax.lax.conv_general_dilated(
            x, w.reshape(3, 3, 1, C), window_strides=(1, 1),
            padding=((1, 1), (1, 1)),
            dimension_numbers=("NHWC", "HWIO", "NHWC"),
            feature_group_count=C)
        return y + b

    def pw(x, w, b):
        return jnp.einsum("nhwc,cd->nhwd", x, w) + b

    def bn(x, g, beta):
        m = jnp.mean(x, axis=(0, 1, 2))
        v = jnp.var(x, axis=(0, 1, 2))
        return (x - m) / jnp.sqrt(v + _EPS) * g + beta

    out = pw(dw(x, p["dw1_w"], p["dw1_b"]), p["pw1_w"], p["pw1_b"])
    out = jax.nn.relu(bn(out, p["bn1_g"], p["bn1_b"]))
    out = pw(dw(out, p["dw2_w"], p["dw2_b"]), p["pw2_w"], p["pw2_b"])
    out = bn(out, p["bn2_g"], p["bn2_b"])
    identity = bn(pw(x, p["ds_w"], p["ds_b"]), p["bnd_g"], p["bnd_b"])
    out = jax.nn.relu(out + identity)
    att = jax.nn.sigmoid(
        pw(jax.nn.relu(pw(out, p["att1_w"], p["att1_b"])), p["att2_w"], p["att2_b"]))
    out = out * att
    return jnp.transpose(out, (0, 3, 1, 2))


if __name__ == "__main__":
    key = jax.random.PRNGKey(0)
    kx, kp = jax.random.split(key)

    N, Cin, H, W, Cout = 2, 8, 16, 16, 16   # attention needs Cout // 8 >= 1
    x = jax.random.normal(kx, (N, Cin, H, W), jnp.float32)
    params = init_params(kp, Cin, Cout)

    out = jax.jit(resnet_block_forward)(x, params)
    out = jax.block_until_ready(out)

    assert out.shape == (N, Cout, H, W), out.shape
    ref = reference_forward(x, params)
    if not jnp.allclose(out, ref, rtol=1e-3, atol=1e-3):
        raise AssertionError("Pallas kernel output does not match JAX reference")

    print("KERNEL_OK")
</pallas_src>

<mosaic_0001>
module attributes {stable_mosaic.version = 11 : i64} {
  func.func @_stage_a_kernel(%arg0: i32, %arg1: memref<1x16x16x8xf32, #tpu.memory_space<vmem>>, %arg2: memref<3x3x8xf32, #tpu.memory_space<vmem>>, %arg3: memref<1x1x8xf32, #tpu.memory_space<vmem>>, %arg4: memref<8x16xf32, #tpu.memory_space<vmem>>, %arg5: memref<1x16xf32, #tpu.memory_space<vmem>>, %arg6: memref<8x16xf32, #tpu.memory_space<vmem>>, %arg7: memref<1x16xf32, #tpu.memory_space<vmem>>, %arg8: memref<1x16x16x16xf32, #tpu.memory_space<vmem>>, %arg9: memref<1x1x16xf32, #tpu.memory_space<vmem>>, %arg10: memref<1x1x16xf32, #tpu.memory_space<vmem>>, %arg11: memref<1x1x16xf32, #tpu.memory_space<vmem>>, %arg12: memref<1x1x16xf32, #tpu.memory_space<vmem>>, %arg13: memref<18x16x8xf32, #tpu.memory_space<vmem>>) attributes {dimension_semantics = [#tpu.dimension_semantics<parallel>], iteration_bounds = array<i64: 2>, scalar_prefetch = 0 : i64, scratch_operands = 1 : i64, tpu.core_type = #tpu.core_type<tc>, window_params = [{transform_indices = @transform_0, window_bounds = array<i64: 1, 16, 16, 8>}, {pipeline_mode = #tpu.pipeline_mode<synchronous>, transform_indices = @transform_1, window_bounds = array<i64: 3, 3, 8>}, {pipeline_mode = #tpu.pipeline_mode<synchronous>, transform_indices = @transform_2, window_bounds = array<i64: 1, 1, 8>}, {pipeline_mode = #tpu.pipeline_mode<synchronous>, transform_indices = @transform_3, window_bounds = array<i64: 8, 16>}, {pipeline_mode = #tpu.pipeline_mode<synchronous>, transform_indices = @transform_4, window_bounds = array<i64: 1, 16>}, {pipeline_mode = #tpu.pipeline_mode<synchronous>, transform_indices = @transform_5, window_bounds = array<i64: 8, 16>}, {pipeline_mode = #tpu.pipeline_mode<synchronous>, transform_indices = @transform_6, window_bounds = array<i64: 1, 16>}, {transform_indices = @transform_7, window_bounds = array<i64: 1, 16, 16, 16>}, {transform_indices = @transform_8, window_bounds = array<i64: 1, 1, 16>}, {transform_indices = @transform_9, window_bounds = array<i64: 1, 1, 16>}, {transform_indices = @transform_10, window_bounds = array<i64: 1, 1, 16>}, {transform_indices = @transform_11, window_bounds = array<i64: 1, 1, 16>}]} {
    %c0 = arith.constant 0 : index
    %c0_0 = arith.constant 0 : index
    %c0_1 = arith.constant 0 : index
    %c0_2 = arith.constant 0 : index
    %0 = vector.load %arg1[%c0, %c0_0, %c0_1, %c0_2] : memref<1x16x16x8xf32, #tpu.memory_space<vmem>>, vector<1x16x16x8xf32>
    %1 = vector.shape_cast %0 : vector<1x16x16x8xf32> to vector<16x16x8xf32>
    %cst = arith.constant 0.000000e+00 : f32
    %2 = vector.broadcast %cst : f32 to vector<1x16x8xf32>
    %c0_3 = arith.constant 0 : index
    %c0_4 = arith.constant 0 : index
    %c0_5 = arith.constant 0 : index
    %3 = vector.load %arg13[%c0_3, %c0_4, %c0_5] : memref<18x16x8xf32, #tpu.memory_space<vmem>>, vector<1x16x8xf32>
    tpu.vector_store %arg13[%c0_3, %c0_4, %c0_5], %2 {strides = array<i32>} : memref<18x16x8xf32, #tpu.memory_space<vmem>>, vector<1x16x8xf32>,
    %c17 = arith.constant 17 : index
    %c0_6 = arith.constant 0 : index
    %c0_7 = arith.constant 0 : index
    %4 = vector.load %arg13[%c17, %c0_6, %c0_7] : memref<18x16x8xf32, #tpu.memory_space<vmem>>, vector<1x16x8xf32>
    tpu.vector_store %arg13[%c17, %c0_6, %c0_7], %2 {strides = array<i32>} : memref<18x16x8xf32, #tpu.memory_space<vmem>>, vector<1x16x8xf32>,
    %c1 = arith.constant 1 : index
    %c0_8 = arith.constant 0 : index
    %c0_9 = arith.constant 0 : index
    %5 = vector.load %arg13[%c1, %c0_8, %c0_9] : memref<18x16x8xf32, #tpu.memory_space<vmem>>, vector<16x16x8xf32>
    tpu.vector_store %arg13[%c1, %c0_8, %c0_9], %1 {strides = array<i32>} : memref<18x16x8xf32, #tpu.memory_space<vmem>>, vector<16x16x8xf32>,
    %c0_10 = arith.constant 0 : index
    %c0_11 = arith.constant 0 : index
    %c0_12 = arith.constant 0 : index
    %6 = vector.load %arg2[%c0_10, %c0_11, %c0_12] : memref<3x3x8xf32, #tpu.memory_space<vmem>>, vector<3x3x8xf32>
    %c0_13 = arith.constant 0 : index
    %c0_14 = arith.constant 0 : index
    %c0_15 = arith.constant 0 : index
    %7 = vector.load %arg3[%c0_13, %c0_14, %c0_15] : memref<1x1x8xf32, #tpu.memory_space<vmem>>, vector<1x1x8xf32>
    %8 = tpu.iota {dimensions = array<i32: 1>} : vector<16x16x8xi32>
    %c1_i32 = arith.constant 1 : i32
    %9 = vector.broadcast %c1_i32 : i32 to vector<16x16x8xi32>
    %10 = arith.cmpi sge, %8, %9 : vector<16x16x8xi32>
    %c15_i32 = arith.constant 15 : i32
    %11 = vector.broadcast %c15_i32 : i32 to vector<16x16x8xi32>
    %12 = arith.cmpi slt, %8, %11 : vector<16x16x8xi32>
    %cst_16 = arith.constant 0.000000e+00 : f32
    %13 = vector.broadcast %cst_16 : f32 to vector<16x16x8xf32>
    %14 = vector.broadcast %7 : vector<1x1x8xf32> to vector<16x16x8xf32>
    %15 = arith.addf %13, %14 : vector<16x16x8xf32>
    %c0_17 = arith.constant 0 : index
    %c0_18 = arith.constant 0 : index
    %c0_19 = arith.constant 0 : index
    %16 = vector.load %arg13[%c0_17, %c0_18, %c0_19] : memref<18x16x8xf32, #tpu.memory_space<vmem>>, vector<16x16x8xf32>
    %c1_i32_20 = arith.constant 1 : i32
    %17 = tpu.dynamic_rotate %16 by %c1_i32_20 dim 1 : vector<16x16x8xf32>, i32 -> vector<16x16x8xf32>
    %cst_21 = arith.constant 0.000000e+00 : f32
    %18 = vector.broadcast %cst_21 : f32 to vector<16x16x8xf32>
    %19 = arith.select %10, %17, %18 : vector<16x16x8xi1>, vector<16x16x8xf32>
    %20 = vector.extract_strided_slice %6 {offsets = [0, 0, 0], sizes = [1, 1, 8], strides = [1, 1, 1]} : vector<3x3x8xf32> to vector<1x1x8xf32>
    %21 = vector.shape_cast %20 : vector<1x1x8xf32> to vector<8xf32>
    %22 = vector.shape_cast %21 : vector<8xf32> to vector<1x1x8xf32>
    %23 = vector.broadcast %22 : vector<1x1x8xf32> to vector<16x16x8xf32>
    %24 = arith.mulf %19, %23 : vector<16x16x8xf32>
    %25 = arith.addf %15, %24 : vector<16x16x8xf32>
    %26 = vector.extract_strided_slice %6 {offsets = [0, 1, 0], sizes = [1, 1, 8], strides = [1, 1, 1]} : vector<3x3x8xf32> to vector<1x1x8xf32>
    %27 = vector.shape_cast %26 : vector<1x1x8xf32> to vector<8xf32>
    %28 = vector.shape_cast %27 : vector<8xf32> to vector<1x1x8xf32>
    %29 = vector.broadcast %28 : vector<1x1x8xf32> to vector<16x16x8xf32>
    %30 = arith.mulf %16, %29 : vector<16x16x8xf32>
    %31 = arith.addf %25, %30 : vector<16x16x8xf32>
    %c15_i32_22 = arith.constant 15 : i32
    %32 = tpu.dynamic_rotate %16 by %c15_i32_22 dim 1 : vector<16x16x8xf32>, i32 -> vector<16x16x8xf32>
    %cst_23 = arith.constant 0.000000e+00 : f32
    %33 = vector.broadcast %cst_23 : f32 to vector<16x16x8xf32>
    %34 = arith.select %12, %32, %33 : vector<16x16x8xi1>, vector<16x16x8xf32>
    %35 = vector.extract_strided_slice %6 {offsets = [0, 2, 0], sizes = [1, 1, 8], strides = [1, 1, 1]} : vector<3x3x8xf32> to vector<1x1x8xf32>
    %36 = vector.shape_cast %35 : vector<1x1x8xf32> to vector<8xf32>
    %37 = vector.shape_cast %36 : vector<8xf32> to vector<1x1x8xf32>
    %38 = vector.broadcast %37 : vector<1x1x8xf32> to vector<16x16x8xf32>
    %39 = arith.mulf %34, %38 : vector<16x16x8xf32>
    %40 = arith.addf %31, %39 : vector<16x16x8xf32>
    %c1_24 = arith.constant 1 : index
    %c0_25 = arith.constant 0 : index
    %c0_26 = arith.constant 0 : index
    %41 = vector.load %arg13[%c1_24, %c0_25, %c0_26] : memref<18x16x8xf32, #tpu.memory_space<vmem>>, vector<16x16x8xf32>
    %c1_i32_27 = arith.constant 1 : i32
    %42 = tpu.dynamic_rotate %41 by %c1_i32_27 dim 1 : vector<16x16x8xf32>, i32 -> vector<16x16x8xf32>
    %cst_28 = arith.constant 0.000000e+00 : f32
    %43 = vector.broadcast %cst_28 : f32 to vector<16x16x8xf32>
    %44 = arith.select %10, %42, %43 : vector<16x16x8xi1>, vector<16x16x8xf32>
    %45 = vector.extract_strided_slice %6 {offsets = [1, 0, 0], sizes = [1, 1, 8], strides = [1, 1, 1]} : vector<3x3x8xf32> to vector<1x1x8xf32>
    %46 = vector.shape_cast %45 : vector<1x1x8xf32> to vector<8xf32>
    %47 = vector.shape_cast %46 : vector<8xf32> to vector<1x1x8xf32>
    %48 = vector.broadcast %47 : vector<1x1x8xf32> to vector<16x16x8xf32>
    %49 = arith.mulf %44, %48 : vector<16x16x8xf32>
    %50 = arith.addf %40, %49 : vector<16x16x8xf32>
    %51 = vector.extract_strided_slice %6 {offsets = [1, 1, 0], sizes = [1, 1, 8], strides = [1, 1, 1]} : vector<3x3x8xf32> to vector<1x1x8xf32>
    %52 = vector.shape_cast %51 : vector<1x1x8xf32> to vector<8xf32>
    %53 = vector.shape_cast %52 : vector<8xf32> to vector<1x1x8xf32>
    %54 = vector.broadcast %53 : vector<1x1x8xf32> to vector<16x16x8xf32>
    %55 = arith.mulf %41, %54 : vector<16x16x8xf32>
    %56 = arith.addf %50, %55 : vector<16x16x8xf32>
    %c15_i32_29 = arith.constant 15 : i32
    %57 = tpu.dynamic_rotate %41 by %c15_i32_29 dim 1 : vector<16x16x8xf32>, i32 -> vector<16x16x8xf32>
    %cst_30 = arith.constant 0.000000e+00 : f32
    %58 = vector.broadcast %cst_30 : f32 to vector<16x16x8xf32>
    %59 = arith.select %12, %57, %58 : vector<16x16x8xi1>, vector<16x16x8xf32>
    %60 = vector.extract_strided_slice %6 {offsets = [1, 2, 0], sizes = [1, 1, 8], strides = [1, 1, 1]} : vector<3x3x8xf32> to vector<1x1x8xf32>
    %61 = vector.shape_cast %60 : vector<1x1x8xf32> to vector<8xf32>
    %62 = vector.shape_cast %61 : vector<8xf32> to vector<1x1x8xf32>
    %63 = vector.broadcast %62 : vector<1x1x8xf32> to vector<16x16x8xf32>
    %64 = arith.mulf %59, %63 : vector<16x16x8xf32>
    %65 = arith.addf %56, %64 : vector<16x16x8xf32>
    %c2 = arith.constant 2 : index
    %c0_31 = arith.constant 0 : index
    %c0_32 = arith.constant 0 : index
    %66 = vector.load %arg13[%c2, %c0_31, %c0_32] : memref<18x16x8xf32, #tpu.memory_space<vmem>>, vector<16x16x8xf32>
    %c1_i32_33 = arith.constant 1 : i32
    %67 = tpu.dynamic_rotate %66 by %c1_i32_33 dim 1 : vector<16x16x8xf32>, i32 -> vector<16x16x8xf32>
    %cst_34 = arith.constant 0.000000e+00 : f32
    %68 = vector.broadcast %cst_34 : f32 to vector<16x16x8xf32>
    %69 = arith.select %10, %67, %68 : vector<16x16x8xi1>, vector<16x16x8xf32>
    %70 = vector.extract_strided_slice %6 {offsets = [2, 0, 0], sizes = [1, 1, 8], strides = [1, 1, 1]} : vector<3x3x8xf32> to vector<1x1x8xf32>
    %71 = vector.shape_cast %70 : vector<1x1x8xf32> to vector<8xf32>
    %72 = vector.shape_cast %71 : vector<8xf32> to vector<1x1x8xf32>
    %73 = vector.broadcast %72 : vector<1x1x8xf32> to vector<16x16x8xf32>
    %74 = arith.mulf %69, %73 : vector<16x16x8xf32>
    %75 = arith.addf %65, %74 : vector<16x16x8xf32>
    %76 = vector.extract_strided_slice %6 {offsets = [2, 1, 0], sizes = [1, 1, 8], strides = [1, 1, 1]} : vector<3x3x8xf32> to vector<1x1x8xf32>
    %77 = vector.shape_cast %76 : vector<1x1x8xf32> to vector<8xf32>
    %78 = vector.shape_cast %77 : vector<8xf32> to vector<1x1x8xf32>
    %79 = vector.broadcast %78 : vector<1x1x8xf32> to vector<16x16x8xf32>
    %80 = arith.mulf %66, %79 : vector<16x16x8xf32>
    %81 = arith.addf %75, %80 : vector<16x16x8xf32>
    %c15_i32_35 = arith.constant 15 : i32
    %82 = tpu.dynamic_rotate %66 by %c15_i32_35 dim 1 : vector<16x16x8xf32>, i32 -> vector<16x16x8xf32>
    %cst_36 = arith.constant 0.000000e+00 : f32
    %83 = vector.broadcast %cst_36 : f32 to vector<16x16x8xf32>
    %84 = arith.select %12, %82, %83 : vector<16x16x8xi1>, vector<16x16x8xf32>
    %85 = vector.extract_strided_slice %6 {offsets = [2, 2, 0], sizes = [1, 1, 8], strides = [1, 1, 1]} : vector<3x3x8xf32> to vector<1x1x8xf32>
    %86 = vector.shape_cast %85 : vector<1x1x8xf32> to vector<8xf32>
    %87 = vector.shape_cast %86 : vector<8xf32> to vector<1x1x8xf32>
    %88 = vector.broadcast %87 : vector<1x1x8xf32> to vector<16x16x8xf32>
    %89 = arith.mulf %84, %88 : vector<16x16x8xf32>
    %90 = arith.addf %81, %89 : vector<16x16x8xf32>
    %91 = vector.shape_cast %1 : vector<16x16x8xf32> to vector<256x8xf32>
    %92 = vector.shape_cast %90 : vector<16x16x8xf32> to vector<256x8xf32>
    %c0_37 = arith.constant 0 : index
    %c0_38 = arith.constant 0 : index
    %93 = vector.load %arg4[%c0_37, %c0_38] : memref<8x16xf32, #tpu.memory_space<vmem>>, vector<8x16xf32>
    %cst_39 = arith.constant dense<0.000000e+00> : vector<256x16xf32>
    %94 = tpu.matmul %92, %93, %cst_39 {dimension_numbers = #tpu.dot_dimension_numbers<[1], [0], [0], [1], [0, 0, 1, 1], [], []>} : vector<256x8xf32>, vector<8x16xf32>, vector<256x16xf32> -> vector<256x16xf32>
    %c0_40 = arith.constant 0 : index
    %c0_41 = arith.constant 0 : index
    %95 = vector.load %arg5[%c0_40, %c0_41] : memref<1x16xf32, #tpu.memory_space<vmem>>, vector<1x16xf32>
    %96 = vector.broadcast %95 : vector<1x16xf32> to vector<256x16xf32>
    %97 = arith.addf %94, %96 : vector<256x16xf32>
    %c0_42 = arith.constant 0 : index
    %c0_43 = arith.constant 0 : index
    %98 = vector.load %arg6[%c0_42, %c0_43] : memref<8x16xf32, #tpu.memory_space<vmem>>, vector<8x16xf32>
    %cst_44 = arith.constant dense<0.000000e+00> : vector<256x16xf32>
    %99 = tpu.matmul %91, %98, %cst_44 {dimension_numbers = #tpu.dot_dimension_numbers<[1], [0], [0], [1], [0, 0, 1, 1], [], []>} : vector<256x8xf32>, vector<8x16xf32>, vector<256x16xf32> -> vector<256x16xf32>
    %c0_45 = arith.constant 0 : index
    %c0_46 = arith.constant 0 : index
    %100 = vector.load %arg7[%c0_45, %c0_46] : memref<1x16xf32, #tpu.memory_space<vmem>>, vector<1x16xf32>
    %101 = vector.broadcast %100 : vector<1x16xf32> to vector<256x16xf32>
    %102 = arith.addf %99, %101 : vector<256x16xf32>
    %103 = vector.shape_cast %97 : vector<256x16xf32> to vector<16x16x16xf32>
    %c0_47 = arith.constant 0 : index
    %c0_48 = arith.constant 0 : index
    %c0_49 = arith.constant 0 : index
    %c0_50 = arith.constant 0 : index
    %104 = vector.load %arg8[%c0_47, %c0_48, %c0_49, %c0_50] : memref<1x16x16x16xf32, #tpu.memory_space<vmem>>, vector<1x16x16x16xf32>
    %105 = vector.shape_cast %104 : vector<1x16x16x16xf32> to vector<16x16x16xf32>
    %106 = vector.shape_cast %103 : vector<16x16x16xf32> to vector<1x16x16x16xf32>
    tpu.vector_store %arg8[%c0_47, %c0_48, %c0_49, %c0_50], %106 {strides = array<i32>} : memref<1x16x16x16xf32, #tpu.memory_space<vmem>>, vector<1x16x16x16xf32>,
    %cst_51 = arith.constant dense<0.000000e+00> : vector<16xf32>
    %107 = vector.multi_reduction <add>, %97, %cst_51 [0] : vector<256x16xf32> to vector<16xf32>
    %108 = vector.shape_cast %107 : vector<16xf32> to vector<1x1x16xf32>
    %c0_52 = arith.constant 0 : index
    %c0_53 = arith.constant 0 : index
    %c0_54 = arith.constant 0 : index
    %109 = vector.load %arg9[%c0_52, %c0_53, %c0_54] : memref<1x1x16xf32, #tpu.memory_space<vmem>>, vector<1x1x16xf32>
    tpu.vector_store %arg9[%c0_52, %c0_53, %c0_54], %108 {strides = array<i32>} : memref<1x1x16xf32, #tpu.memory_space<vmem>>, vector<1x1x16xf32>,
    %110 = arith.mulf %97, %97 : vector<256x16xf32>
    %cst_55 = arith.constant dense<0.000000e+00> : vector<16xf32>
    %111 = vector.multi_reduction <add>, %110, %cst_55 [0] : vector<256x16xf32> to vector<16xf32>
    %112 = vector.shape_cast %111 : vector<16xf32> to vector<1x1x16xf32>
    %c0_56 = arith.constant 0 : index
    %c0_57 = arith.constant 0 : index
    %c0_58 = arith.constant 0 : index
    %113 = vector.load %arg10[%c0_56, %c0_57, %c0_58] : memref<1x1x16xf32, #tpu.memory_space<vmem>>, vector<1x1x16xf32>
    tpu.vector_store %arg10[%c0_56, %c0_57, %c0_58], %112 {strides = array<i32>} : memref<1x1x16xf32, #tpu.memory_space<vmem>>, vector<1x1x16xf32>,
    %cst_59 = arith.constant dense<0.000000e+00> : vector<16xf32>
    %114 = vector.multi_reduction <add>, %102, %cst_59 [0] : vector<256x16xf32> to vector<16xf32>
    %115 = vector.shape_cast %114 : vector<16xf32> to vector<1x1x16xf32>
    %c0_60 = arith.constant 0 : index
    %c0_61 = arith.constant 0 : index
    %c0_62 = arith.constant 0 : index
    %116 = vector.load %arg11[%c0_60, %c0_61, %c0_62] : memref<1x1x16xf32, #tpu.memory_space<vmem>>, vector<1x1x16xf32>
    tpu.vector_store %arg11[%c0_60, %c0_61, %c0_62], %115 {strides = array<i32>} : memref<1x1x16xf32, #tpu.memory_space<vmem>>, vector<1x1x16xf32>,
    %117 = arith.mulf %102, %102 : vector<256x16xf32>
    %cst_63 = arith.constant dense<0.000000e+00> : vector<16xf32>
    %118 = vector.multi_reduction <add>, %117, %cst_63 [0] : vector<256x16xf32> to vector<16xf32>
    %119 = vector.shape_cast %118 : vector<16xf32> to vector<1x1x16xf32>
    %c0_64 = arith.constant 0 : index
    %c0_65 = arith.constant 0 : index
    %c0_66 = arith.constant 0 : index
    %120 = vector.load %arg12[%c0_64, %c0_65, %c0_66] : memref<1x1x16xf32, #tpu.memory_space<vmem>>, vector<1x1x16xf32>
    tpu.vector_store %arg12[%c0_64, %c0_65, %c0_66], %119 {strides = array<i32>} : memref<1x1x16xf32, #tpu.memory_space<vmem>>, vector<1x1x16xf32>,
    return
  }
  func.func @transform_0(%arg0: i32) -> (i32, i32, i32, i32) {
    %c0_i32 = arith.constant 0 : i32
    %c0_i32_0 = arith.constant 0 : i32
    %c0_i32_1 = arith.constant 0 : i32
    %c0_i32_2 = arith.constant 0 : i32
    return %arg0, %c0_i32, %c0_i32_0, %c0_i32_1 : i32, i32, i32, i32
  }
  func.func @transform_1(%arg0: i32) -> (i32, i32, i32) {
    %c0_i32 = arith.constant 0 : i32
    %c0_i32_0 = arith.constant 0 : i32
    %c0_i32_1 = arith.constant 0 : i32
    %c0_i32_2 = arith.constant 0 : i32
    return %c0_i32, %c0_i32_0, %c0_i32_1 : i32, i32, i32
  }
  func.func @transform_2(%arg0: i32) -> (i32, i32, i32) {
    %c0_i32 = arith.constant 0 : i32
    %c0_i32_0 = arith.constant 0 : i32
    %c0_i32_1 = arith.constant 0 : i32
    %c0_i32_2 = arith.constant 0 : i32
    return %c0_i32, %c0_i32_0, %c0_i32_1 : i32, i32, i32
  }
  func.func @transform_3(%arg0: i32) -> (i32, i32) {
    %c0_i32 = arith.constant 0 : i32
    %c0_i32_0 = arith.constant 0 : i32
    %c0_i32_1 = arith.constant 0 : i32
    return %c0_i32, %c0_i32_0 : i32, i32
  }
  func.func @transform_4(%arg0: i32) -> (i32, i32) {
    %c0_i32 = arith.constant 0 : i32
    %c0_i32_0 = arith.constant 0 : i32
    %c0_i32_1 = arith.constant 0 : i32
    return %c0_i32, %c0_i32_0 : i32, i32
  }
  func.func @transform_5(%arg0: i32) -> (i32, i32) {
    %c0_i32 = arith.constant 0 : i32
    %c0_i32_0 = arith.constant 0 : i32
    %c0_i32_1 = arith.constant 0 : i32
    return %c0_i32, %c0_i32_0 : i32, i32
  }
  func.func @transform_6(%arg0: i32) -> (i32, i32) {
    %c0_i32 = arith.constant 0 : i32
    %c0_i32_0 = arith.constant 0 : i32
    %c0_i32_1 = arith.constant 0 : i32
    return %c0_i32, %c0_i32_0 : i32, i32
  }
  func.func @transform_7(%arg0: i32) -> (i32, i32, i32, i32) {
    %c0_i32 = arith.constant 0 : i32
    %c0_i32_0 = arith.constant 0 : i32
    %c0_i32_1 = arith.constant 0 : i32
    %c0_i32_2 = arith.constant 0 : i32
    return %arg0, %c0_i32, %c0_i32_0, %c0_i32_1 : i32, i32, i32, i32
  }
  func.func @transform_8(%arg0: i32) -> (i32, i32, i32) {
    %c0_i32 = arith.constant 0 : i32
    %c0_i32_0 = arith.constant 0 : i32
    %c0_i32_1 = arith.constant 0 : i32
    return %arg0, %c0_i32, %c0_i32_0 : i32, i32, i32
  }
  func.func @transform_9(%arg0: i32) -> (i32, i32, i32) {
    %c0_i32 = arith.constant 0 : i32
    %c0_i32_0 = arith.constant 0 : i32
    %c0_i32_1 = arith.constant 0 : i32
    return %arg0, %c0_i32, %c0_i32_0 : i32, i32, i32
  }
  func.func @transform_10(%arg0: i32) -> (i32, i32, i32) {
    %c0_i32 = arith.constant 0 : i32
    %c0_i32_0 = arith.constant 0 : i32
    %c0_i32_1 = arith.constant 0 : i32
    return %arg0, %c0_i32, %c0_i32_0 : i32, i32, i32
  }
  func.func @transform_11(%arg0: i32) -> (i32, i32, i32) {
    %c0_i32 = arith.constant 0 : i32
    %c0_i32_0 = arith.constant 0 : i32
    %c0_i32_1 = arith.constant 0 : i32
    return %arg0, %c0_i32, %c0_i32_0 : i32, i32, i32
  }
}

module attributes {stable_mosaic.version = 11 : i64} {
  func.func @_stage_c_kernel(%arg0: i32, %arg1: memref<512x16xf32, #tpu.memory_space<vmem>>, %arg2: memref<512x8xf32, #tpu.memory_space<vmem>>, %arg3: memref<4x16xf32, #tpu.memory_space<vmem>>, %arg4: memref<4x16xf32, #tpu.memory_space<vmem>>, %arg5: memref<8x16xf32, #tpu.memory_space<vmem>>, %arg6: memref<1x16xf32, #tpu.memory_space<vmem>>, %arg7: memref<16x2xf32, #tpu.memory_space<vmem>>, %arg8: memref<1x2xf32, #tpu.memory_space<vmem>>, %arg9: memref<2x16xf32, #tpu.memory_space<vmem>>, %arg10: memref<1x16xf32, #tpu.memory_space<vmem>>, %arg11: memref<512x16xf32, #tpu.memory_space<vmem>>) attributes {dimension_semantics = [#tpu.dimension_semantics<parallel>], iteration_bounds = array<i64: 1>, scalar_prefetch = 0 : i64, scratch_operands = 0 : i64, tpu.core_type = #tpu.core_type<tc>, window_params = [{transform_indices = @transform_0, window_bounds = array<i64: 512, 16>}, {transform_indices = @transform_1, window_bounds = array<i64: 512, 8>}, {pipeline_mode = #tpu.pipeline_mode<synchronous>, transform_indices = @transform_2, window_bounds = array<i64: 4, 16>}, {pipeline_mode = #tpu.pipeline_mode<synchronous>, transform_indices = @transform_3, window_bounds = array<i64: 4, 16>}, {pipeline_mode = #tpu.pipeline_mode<synchronous>, transform_indices = @transform_4, window_bounds = array<i64: 8, 16>}, {pipeline_mode = #tpu.pipeline_mode<synchronous>, transform_indices = @transform_5, window_bounds = array<i64: 1, 16>}, {pipeline_mode = #tpu.pipeline_mode<synchronous>, transform_indices = @transform_6, window_bounds = array<i64: 16, 2>}, {pipeline_mode = #tpu.pipeline_mode<synchronous>, transform_indices = @transform_7, window_bounds = array<i64: 1, 2>}, {pipeline_mode = #tpu.pipeline_mode<synchronous>, transform_indices = @transform_8, window_bounds = array<i64: 2, 16>}, {pipeline_mode = #tpu.pipeline_mode<synchronous>, transform_indices = @transform_9, window_bounds = array<i64: 1, 16>}, {transform_indices = @transform_10, window_bounds = array<i64: 512, 16>}]} {
    %c0 = arith.constant 0 : index
    %c0_0 = arith.constant 0 : index
    %0 = vector.load %arg3[%c0, %c0_0] : memref<4x16xf32, #tpu.memory_space<vmem>>, vector<4x16xf32>
    %1 = vector.extract_strided_slice %0 {offsets = [2, 0], sizes = [1, 16], strides = [1, 1]} : vector<4x16xf32> to vector<1x16xf32>
    %2 = vector.extract_strided_slice %0 {offsets = [1, 0], sizes = [1, 16], strides = [1, 1]} : vector<4x16xf32> to vector<1x16xf32>
    %cst = arith.constant 9.99999974E-6 : f32
    %3 = vector.broadcast %cst : f32 to vector<1x16xf32>
    %4 = arith.addf %2, %3 : vector<1x16xf32>
    %5 = math.rsqrt %4 : vector<1x16xf32>
    %6 = arith.mulf %1, %5 : vector<1x16xf32>
    %7 = vector.extract_strided_slice %0 {offsets = [3, 0], sizes = [1, 16], strides = [1, 1]} : vector<4x16xf32> to vector<1x16xf32>
    %8 = vector.extract_strided_slice %0 {offsets = [0, 0], sizes = [1, 16], strides = [1, 1]} : vector<4x16xf32> to vector<1x16xf32>
    %9 = arith.mulf %8, %6 : vector<1x16xf32>
    %10 = arith.subf %7, %9 : vector<1x16xf32>
    %c0_1 = arith.constant 0 : index
    %c0_2 = arith.constant 0 : index
    %11 = vector.load %arg4[%c0_1, %c0_2] : memref<4x16xf32, #tpu.memory_space<vmem>>, vector<4x16xf32>
    %12 = vector.extract_strided_slice %11 {offsets = [2, 0], sizes = [1, 16], strides = [1, 1]} : vector<4x16xf32> to vector<1x16xf32>
    %13 = vector.extract_strided_slice %11 {offsets = [1, 0], sizes = [1, 16], strides = [1, 1]} : vector<4x16xf32> to vector<1x16xf32>
    %cst_3 = arith.constant 9.99999974E-6 : f32
    %14 = vector.broadcast %cst_3 : f32 to vector<1x16xf32>
    %15 = arith.addf %13, %14 : vector<1x16xf32>
    %16 = math.rsqrt %15 : vector<1x16xf32>
    %17 = arith.mulf %12, %16 : vector<1x16xf32>
    %18 = vector.extract_strided_slice %11 {offsets = [3, 0], sizes = [1, 16], strides = [1, 1]} : vector<4x16xf32> to vector<1x16xf32>
    %19 = vector.extract_strided_slice %11 {offsets = [0, 0], sizes = [1, 16], strides = [1, 1]} : vector<4x16xf32> to vector<1x16xf32>
    %20 = arith.mulf %19, %17 : vector<1x16xf32>
    %21 = arith.subf %18, %20 : vector<1x16xf32>
    %c0_4 = arith.constant 0 : index
    %c0_5 = arith.constant 0 : index
    %22 = vector.load %arg1[%c0_4, %c0_5] : memref<512x16xf32, #tpu.memory_space<vmem>>, vector<512x16xf32>
    %c0_6 = arith.constant 0 : index
    %c0_7 = arith.constant 0 : index
    %23 = vector.load %arg2[%c0_6, %c0_7] : memref<512x8xf32, #tpu.memory_space<vmem>>, vector<512x8xf32>
    %c0_8 = arith.constant 0 : index
    %c0_9 = arith.constant 0 : index
    %24 = vector.load %arg5[%c0_8, %c0_9] : memref<8x16xf32, #tpu.memory_space<vmem>>, vector<8x16xf32>
    %cst_10 = arith.constant dense<0.000000e+00> : vector<512x16xf32>
    %25 = tpu.matmul %23, %24, %cst_10 {dimension_numbers = #tpu.dot_dimension_numbers<[1], [0], [0], [1], [0, 0, 1, 1], [], []>} : vector<512x8xf32>, vector<8x16xf32>, vector<512x16xf32> -> vector<512x16xf32>
    %c0_11 = arith.constant 0 : index
    %c0_12 = arith.constant 0 : index
    %26 = vector.load %arg6[%c0_11, %c0_12] : memref<1x16xf32, #tpu.memory_space<vmem>>, vector<1x16xf32>
    %27 = vector.broadcast %26 : vector<1x16xf32> to vector<512x16xf32>
    %28 = arith.addf %25, %27 : vector<512x16xf32>
    %29 = vector.broadcast %6 : vector<1x16xf32> to vector<512x16xf32>
    %30 = arith.mulf %22, %29 : vector<512x16xf32>
    %31 = vector.broadcast %10 : vector<1x16xf32> to vector<512x16xf32>
    %32 = arith.addf %30, %31 : vector<512x16xf32>
    %33 = vector.broadcast %17 : vector<1x16xf32> to vector<512x16xf32>
    %34 = arith.mulf %28, %33 : vector<512x16xf32>
    %35 = arith.addf %32, %34 : vector<512x16xf32>
    %36 = vector.broadcast %21 : vector<1x16xf32> to vector<512x16xf32>
    %37 = arith.addf %35, %36 : vector<512x16xf32>
    %cst_13 = arith.constant 0.000000e+00 : f32
    %38 = vector.broadcast %cst_13 : f32 to vector<512x16xf32>
    %39 = arith.maximumf %37, %38 : vector<512x16xf32>
    %c0_14 = arith.constant 0 : index
    %c0_15 = arith.constant 0 : index
    %40 = vector.load %arg7[%c0_14, %c0_15] : memref<16x2xf32, #tpu.memory_space<vmem>>, vector<16x2xf32>
    %cst_16 = arith.constant dense<0.000000e+00> : vector<512x2xf32>
    %41 = tpu.matmul %39, %40, %cst_16 {dimension_numbers = #tpu.dot_dimension_numbers<[1], [0], [0], [1], [0, 0, 1, 1], [], []>} : vector<512x16xf32>, vector<16x2xf32>, vector<512x2xf32> -> vector<512x2xf32>
    %c0_17 = arith.constant 0 : index
    %c0_18 = arith.constant 0 : index
    %42 = vector.load %arg8[%c0_17, %c0_18] : memref<1x2xf32, #tpu.memory_space<vmem>>, vector<1x2xf32>
    %43 = vector.broadcast %42 : vector<1x2xf32> to vector<512x2xf32>
    %44 = arith.addf %41, %43 : vector<512x2xf32>
    %cst_19 = arith.constant 0.000000e+00 : f32
    %45 = vector.broadcast %cst_19 : f32 to vector<512x2xf32>
    %46 = arith.maximumf %44, %45 : vector<512x2xf32>
    %c0_20 = arith.constant 0 : index
    %c0_21 = arith.constant 0 : index
    %47 = vector.load %arg9[%c0_20, %c0_21] : memref<2x16xf32, #tpu.memory_space<vmem>>, vector<2x16xf32>
    %cst_22 = arith.constant dense<0.000000e+00> : vector<512x16xf32>
    %48 = tpu.matmul %46, %47, %cst_22 {dimension_numbers = #tpu.dot_dimension_numbers<[1], [0], [0], [1], [0, 0, 1, 1], [], []>} : vector<512x2xf32>, vector<2x16xf32>, vector<512x16xf32> -> vector<512x16xf32>
    %c0_23 = arith.constant 0 : index
    %c0_24 = arith.constant 0 : index
    %49 = vector.load %arg10[%c0_23, %c0_24] : memref<1x16xf32, #tpu.memory_space<vmem>>, vector<1x16xf32>
    %50 = vector.broadcast %49 : vector<1x16xf32> to vector<512x16xf32>
    %51 = arith.addf %48, %50 : vector<512x16xf32>
    %52 = arith.negf %51 : vector<512x16xf32>
    %53 = math.exp %52 : vector<512x16xf32>
    %cst_25 = arith.constant 1.000000e+00 : f32
    %54 = vector.broadcast %cst_25 : f32 to vector<512x16xf32>
    %55 = arith.addf %54, %53 : vector<512x16xf32>
    %56 = arith.divf %54, %55 : vector<512x16xf32>
    %57 = arith.mulf %39, %56 : vector<512x16xf32>
    %c0_26 = arith.constant 0 : index
    %c0_27 = arith.constant 0 : index
    %58 = vector.load %arg11[%c0_26, %c0_27] : memref<512x16xf32, #tpu.memory_space<vmem>>, vector<512x16xf32>
    tpu.vector_store %arg11[%c0_26, %c0_27], %57 {strides = array<i32>} : memref<512x16xf32, #tpu.memory_space<vmem>>, vector<512x16xf32>,
    return
  }
  func.func @transform_0(%arg0: i32) -> (i32, i32) {
    %c0_i32 = arith.constant 0 : i32
    %c0_i32_0 = arith.constant 0 : i32
    return %arg0, %c0_i32 : i32, i32
  }
  func.func @transform_1(%arg0: i32) -> (i32, i32) {
    %c0_i32 = arith.constant 0 : i32
    %c0_i32_0 = arith.constant 0 : i32
    return %arg0, %c0_i32 : i32, i32
  }
  func.func @transform_2(%arg0: i32) -> (i32, i32) {
    %c0_i32 = arith.constant 0 : i32
    %c0_i32_0 = arith.constant 0 : i32
    %c0_i32_1 = arith.constant 0 : i32
    return %c0_i32, %c0_i32_0 : i32, i32
  }
  func.func @transform_3(%arg0: i32) -> (i32, i32) {
    %c0_i32 = arith.constant 0 : i32
    %c0_i32_0 = arith.constant 0 : i32
    %c0_i32_1 = arith.constant 0 : i32
    return %c0_i32, %c0_i32_0 : i32, i32
  }
  func.func @transform_4(%arg0: i32) -> (i32, i32) {
    %c0_i32 = arith.constant 0 : i32
    %c0_i32_0 = arith.constant 0 : i32
    %c0_i32_1 = arith.constant 0 : i32
    return %c0_i32, %c0_i32_0 : i32, i32
  }
  func.func @transform_5(%arg0: i32) -> (i32, i32) {
    %c0_i32 = arith.constant 0 : i32
    %c0_i32_0 = arith.constant 0 : i32
    %c0_i32_1 = arith.constant 0 : i32
    return %c0_i32, %c0_i32_0 : i32, i32
  }
  func.func @transform_6(%arg0: i32) -> (i32, i32) {
    %c0_i32 = arith.constant 0 : i32
    %c0_i32_0 = arith.constant 0 : i32
    %c0_i32_1 = arith.constant 0 : i32
    return %c0_i32, %c0_i32_0 : i32, i32
  }
  func.func @transform_7(%arg0: i32) -> (i32, i32) {
    %c0_i32 = arith.constant 0 : i32
    %c0_i32_0 = arith.constant 0 : i32
    %c0_i32_1 = arith.constant 0 : i32
    return %c0_i32, %c0_i32_0 : i32, i32
  }
  func.func @transform_8(%arg0: i32) -> (i32, i32) {
    %c0_i32 = arith.constant 0 : i32
    %c0_i32_0 = arith.constant 0 : i32
    %c0_i32_1 = arith.constant 0 : i32
    return %c0_i32, %c0_i32_0 : i32, i32
  }
  func.func @transform_9(%arg0: i32) -> (i32, i32) {
    %c0_i32 = arith.constant 0 : i32
    %c0_i32_0 = arith.constant 0 : i32
    %c0_i32_1 = arith.constant 0 : i32
    return %c0_i32, %c0_i32_0 : i32, i32
  }
  func.func @transform_10(%arg0: i32) -> (i32, i32) {
    %c0_i32 = arith.constant 0 : i32
    %c0_i32_0 = arith.constant 0 : i32
    return %arg0, %c0_i32 : i32, i32
  }
}

module attributes {stable_mosaic.version = 11 : i64} {
  func.func @_stage_b_kernel(%arg0: i32, %arg1: memref<1x16x16x16xf32, #tpu.memory_space<vmem>>, %arg2: memref<4x16xf32, #tpu.memory_space<vmem>>, %arg3: memref<3x3x16xf32, #tpu.memory_space<vmem>>, %arg4: memref<1x1x16xf32, #tpu.memory_space<vmem>>, %arg5: memref<16x16xf32, #tpu.memory_space<vmem>>, %arg6: memref<1x16xf32, #tpu.memory_space<vmem>>, %arg7: memref<1x16x16x16xf32, #tpu.memory_space<vmem>>, %arg8: memref<1x1x16xf32, #tpu.memory_space<vmem>>, %arg9: memref<1x1x16xf32, #tpu.memory_space<vmem>>, %arg10: memref<18x16x16xf32, #tpu.memory_space<vmem>>) attributes {dimension_semantics = [#tpu.dimension_semantics<parallel>], iteration_bounds = array<i64: 2>, scalar_prefetch = 0 : i64, scratch_operands = 1 : i64, tpu.core_type = #tpu.core_type<tc>, window_params = [{transform_indices = @transform_0, window_bounds = array<i64: 1, 16, 16, 16>}, {pipeline_mode = #tpu.pipeline_mode<synchronous>, transform_indices = @transform_1, window_bounds = array<i64: 4, 16>}, {pipeline_mode = #tpu.pipeline_mode<synchronous>, transform_indices = @transform_2, window_bounds = array<i64: 3, 3, 16>}, {pipeline_mode = #tpu.pipeline_mode<synchronous>, transform_indices = @transform_3, window_bounds = array<i64: 1, 1, 16>}, {pipeline_mode = #tpu.pipeline_mode<synchronous>, transform_indices = @transform_4, window_bounds = array<i64: 16, 16>}, {pipeline_mode = #tpu.pipeline_mode<synchronous>, transform_indices = @transform_5, window_bounds = array<i64: 1, 16>}, {transform_indices = @transform_6, window_bounds = array<i64: 1, 16, 16, 16>}, {transform_indices = @transform_7, window_bounds = array<i64: 1, 1, 16>}, {transform_indices = @transform_8, window_bounds = array<i64: 1, 1, 16>}]} {
    %c0 = arith.constant 0 : index
    %c0_0 = arith.constant 0 : index
    %0 = vector.load %arg2[%c0, %c0_0] : memref<4x16xf32, #tpu.memory_space<vmem>>, vector<4x16xf32>
    %1 = vector.extract_strided_slice %0 {offsets = [2, 0], sizes = [1, 16], strides = [1, 1]} : vector<4x16xf32> to vector<1x16xf32>
    %2 = vector.extract_strided_slice %0 {offsets = [1, 0], sizes = [1, 16], strides = [1, 1]} : vector<4x16xf32> to vector<1x16xf32>
    %cst = arith.constant 9.99999974E-6 : f32
    %3 = vector.broadcast %cst : f32 to vector<1x16xf32>
    %4 = arith.addf %2, %3 : vector<1x16xf32>
    %5 = math.rsqrt %4 : vector<1x16xf32>
    %6 = arith.mulf %1, %5 : vector<1x16xf32>
    %7 = vector.extract_strided_slice %0 {offsets = [3, 0], sizes = [1, 16], strides = [1, 1]} : vector<4x16xf32> to vector<1x16xf32>
    %8 = vector.extract_strided_slice %0 {offsets = [0, 0], sizes = [1, 16], strides = [1, 1]} : vector<4x16xf32> to vector<1x16xf32>
    %9 = arith.mulf %8, %6 : vector<1x16xf32>
    %10 = arith.subf %7, %9 : vector<1x16xf32>
    %c0_1 = arith.constant 0 : index
    %c0_2 = arith.constant 0 : index
    %c0_3 = arith.constant 0 : index
    %c0_4 = arith.constant 0 : index
    %11 = vector.load %arg1[%c0_1, %c0_2, %c0_3, %c0_4] : memref<1x16x16x16xf32, #tpu.memory_space<vmem>>, vector<1x16x16x16xf32>
    %12 = vector.shape_cast %11 : vector<1x16x16x16xf32> to vector<16x16x16xf32>
    %13 = vector.shape_cast %6 : vector<1x16xf32> to vector<1x1x16xf32>
    %14 = vector.broadcast %13 : vector<1x1x16xf32> to vector<16x16x16xf32>
    %15 = arith.mulf %12, %14 : vector<16x16x16xf32>
    %16 = vector.shape_cast %10 : vector<1x16xf32> to vector<1x1x16xf32>
    %17 = vector.broadcast %16 : vector<1x1x16xf32> to vector<16x16x16xf32>
    %18 = arith.addf %15, %17 : vector<16x16x16xf32>
    %cst_5 = arith.constant 0.000000e+00 : f32
    %19 = vector.broadcast %cst_5 : f32 to vector<16x16x16xf32>
    %20 = arith.maximumf %18, %19 : vector<16x16x16xf32>
    %cst_6 = arith.constant 0.000000e+00 : f32
    %21 = vector.broadcast %cst_6 : f32 to vector<1x16x16xf32>
    %c0_7 = arith.constant 0 : index
    %c0_8 = arith.constant 0 : index
    %c0_9 = arith.constant 0 : index
    %22 = vector.load %arg10[%c0_7, %c0_8, %c0_9] : memref<18x16x16xf32, #tpu.memory_space<vmem>>, vector<1x16x16xf32>
    tpu.vector_store %arg10[%c0_7, %c0_8, %c0_9], %21 {strides = array<i32>} : memref<18x16x16xf32, #tpu.memory_space<vmem>>, vector<1x16x16xf32>,
    %c17 = arith.constant 17 : index
    %c0_10 = arith.constant 0 : index
    %c0_11 = arith.constant 0 : index
    %23 = vector.load %arg10[%c17, %c0_10, %c0_11] : memref<18x16x16xf32, #tpu.memory_space<vmem>>, vector<1x16x16xf32>
    tpu.vector_store %arg10[%c17, %c0_10, %c0_11], %21 {strides = array<i32>} : memref<18x16x16xf32, #tpu.memory_space<vmem>>, vector<1x16x16xf32>,
    %c1 = arith.constant 1 : index
    %c0_12 = arith.constant 0 : index
    %c0_13 = arith.constant 0 : index
    %24 = vector.load %arg10[%c1, %c0_12, %c0_13] : memref<18x16x16xf32, #tpu.memory_space<vmem>>, vector<16x16x16xf32>
    tpu.vector_store %arg10[%c1, %c0_12, %c0_13], %20 {strides = array<i32>} : memref<18x16x16xf32, #tpu.memory_space<vmem>>, vector<16x16x16xf32>,
    %c0_14 = arith.constant 0 : index
    %c0_15 = arith.constant 0 : index
    %c0_16 = arith.constant 0 : index
    %25 = vector.load %arg3[%c0_14, %c0_15, %c0_16] : memref<3x3x16xf32, #tpu.memory_space<vmem>>, vector<3x3x16xf32>
    %c0_17 = arith.constant 0 : index
    %c0_18 = arith.constant 0 : index
    %c0_19 = arith.constant 0 : index
    %26 = vector.load %arg4[%c0_17, %c0_18, %c0_19] : memref<1x1x16xf32, #tpu.memory_space<vmem>>, vector<1x1x16xf32>
    %27 = tpu.iota {dimensions = array<i32: 1>} : vector<16x16x16xi32>
    %c1_i32 = arith.constant 1 : i32
    %28 = vector.broadcast %c1_i32 : i32 to vector<16x16x16xi32>
    %29 = arith.cmpi sge, %27, %28 : vector<16x16x16xi32>
    %c15_i32 = arith.constant 15 : i32
    %30 = vector.broadcast %c15_i32 : i32 to vector<16x16x16xi32>
    %31 = arith.cmpi slt, %27, %30 : vector<16x16x16xi32>
    %cst_20 = arith.constant 0.000000e+00 : f32
    %32 = vector.broadcast %cst_20 : f32 to vector<16x16x16xf32>
    %33 = vector.broadcast %26 : vector<1x1x16xf32> to vector<16x16x16xf32>
    %34 = arith.addf %32, %33 : vector<16x16x16xf32>
    %c0_21 = arith.constant 0 : index
    %c0_22 = arith.constant 0 : index
    %c0_23 = arith.constant 0 : index
    %35 = vector.load %arg10[%c0_21, %c0_22, %c0_23] : memref<18x16x16xf32, #tpu.memory_space<vmem>>, vector<16x16x16xf32>
    %c1_i32_24 = arith.constant 1 : i32
    %36 = tpu.dynamic_rotate %35 by %c1_i32_24 dim 1 : vector<16x16x16xf32>, i32 -> vector<16x16x16xf32>
    %cst_25 = arith.constant 0.000000e+00 : f32
    %37 = vector.broadcast %cst_25 : f32 to vector<16x16x16xf32>
    %38 = arith.select %29, %36, %37 : vector<16x16x16xi1>, vector<16x16x16xf32>
    %39 = vector.extract_strided_slice %25 {offsets = [0, 0, 0], sizes = [1, 1, 16], strides = [1, 1, 1]} : vector<3x3x16xf32> to vector<1x1x16xf32>
    %40 = vector.shape_cast %39 : vector<1x1x16xf32> to vector<16xf32>
    %41 = vector.shape_cast %40 : vector<16xf32> to vector<1x1x16xf32>
    %42 = vector.broadcast %41 : vector<1x1x16xf32> to vector<16x16x16xf32>
    %43 = arith.mulf %38, %42 : vector<16x16x16xf32>
    %44 = arith.addf %34, %43 : vector<16x16x16xf32>
    %45 = vector.extract_strided_slice %25 {offsets = [0, 1, 0], sizes = [1, 1, 16], strides = [1, 1, 1]} : vector<3x3x16xf32> to vector<1x1x16xf32>
    %46 = vector.shape_cast %45 : vector<1x1x16xf32> to vector<16xf32>
    %47 = vector.shape_cast %46 : vector<16xf32> to vector<1x1x16xf32>
    %48 = vector.broadcast %47 : vector<1x1x16xf32> to vector<16x16x16xf32>
    %49 = arith.mulf %35, %48 : vector<16x16x16xf32>
    %50 = arith.addf %44, %49 : vector<16x16x16xf32>
    %c15_i32_26 = arith.constant 15 : i32
    %51 = tpu.dynamic_rotate %35 by %c15_i32_26 dim 1 : vector<16x16x16xf32>, i32 -> vector<16x16x16xf32>
    %cst_27 = arith.constant 0.000000e+00 : f32
    %52 = vector.broadcast %cst_27 : f32 to vector<16x16x16xf32>
    %53 = arith.select %31, %51, %52 : vector<16x16x16xi1>, vector<16x16x16xf32>
    %54 = vector.extract_strided_slice %25 {offsets = [0, 2, 0], sizes = [1, 1, 16], strides = [1, 1, 1]} : vector<3x3x16xf32> to vector<1x1x16xf32>
    %55 = vector.shape_cast %54 : vector<1x1x16xf32> to vector<16xf32>
    %56 = vector.shape_cast %55 : vector<16xf32> to vector<1x1x16xf32>
    %57 = vector.broadcast %56 : vector<1x1x16xf32> to vector<16x16x16xf32>
    %58 = arith.mulf %53, %57 : vector<16x16x16xf32>
    %59 = arith.addf %50, %58 : vector<16x16x16xf32>
    %c1_28 = arith.constant 1 : index
    %c0_29 = arith.constant 0 : index
    %c0_30 = arith.constant 0 : index
    %60 = vector.load %arg10[%c1_28, %c0_29, %c0_30] : memref<18x16x16xf32, #tpu.memory_space<vmem>>, vector<16x16x16xf32>
    %c1_i32_31 = arith.constant 1 : i32
    %61 = tpu.dynamic_rotate %60 by %c1_i32_31 dim 1 : vector<16x16x16xf32>, i32 -> vector<16x16x16xf32>
    %cst_32 = arith.constant 0.000000e+00 : f32
    %62 = vector.broadcast %cst_32 : f32 to vector<16x16x16xf32>
    %63 = arith.select %29, %61, %62 : vector<16x16x16xi1>, vector<16x16x16xf32>
    %64 = vector.extract_strided_slice %25 {offsets = [1, 0, 0], sizes = [1, 1, 16], strides = [1, 1, 1]} : vector<3x3x16xf32> to vector<1x1x16xf32>
    %65 = vector.shape_cast %64 : vector<1x1x16xf32> to vector<16xf32>
    %66 = vector.shape_cast %65 : vector<16xf32> to vector<1x1x16xf32>
    %67 = vector.broadcast %66 : vector<1x1x16xf32> to vector<16x16x16xf32>
    %68 = arith.mulf %63, %67 : vector<16x16x16xf32>
    %69 = arith.addf %59, %68 : vector<16x16x16xf32>
    %70 = vector.extract_strided_slice %25 {offsets = [1, 1, 0], sizes = [1, 1, 16], strides = [1, 1, 1]} : vector<3x3x16xf32> to vector<1x1x16xf32>
    %71 = vector.shape_cast %70 : vector<1x1x16xf32> to vector<16xf32>
    %72 = vector.shape_cast %71 : vector<16xf32> to vector<1x1x16xf32>
    %73 = vector.broadcast %72 : vector<1x1x16xf32> to vector<16x16x16xf32>
    %74 = arith.mulf %60, %73 : vector<16x16x16xf32>
    %75 = arith.addf %69, %74 : vector<16x16x16xf32>
    %c15_i32_33 = arith.constant 15 : i32
    %76 = tpu.dynamic_rotate %60 by %c15_i32_33 dim 1 : vector<16x16x16xf32>, i32 -> vector<16x16x16xf32>
    %cst_34 = arith.constant 0.000000e+00 : f32
    %77 = vector.broadcast %cst_34 : f32 to vector<16x16x16xf32>
    %78 = arith.select %31, %76, %77 : vector<16x16x16xi1>, vector<16x16x16xf32>
    %79 = vector.extract_strided_slice %25 {offsets = [1, 2, 0], sizes = [1, 1, 16], strides = [1, 1, 1]} : vector<3x3x16xf32> to vector<1x1x16xf32>
    %80 = vector.shape_cast %79 : vector<1x1x16xf32> to vector<16xf32>
    %81 = vector.shape_cast %80 : vector<16xf32> to vector<1x1x16xf32>
    %82 = vector.broadcast %81 : vector<1x1x16xf32> to vector<16x16x16xf32>
    %83 = arith.mulf %78, %82 : vector<16x16x16xf32>
    %84 = arith.addf %75, %83 : vector<16x16x16xf32>
    %c2 = arith.constant 2 : index
    %c0_35 = arith.constant 0 : index
    %c0_36 = arith.constant 0 : index
    %85 = vector.load %arg10[%c2, %c0_35, %c0_36] : memref<18x16x16xf32, #tpu.memory_space<vmem>>, vector<16x16x16xf32>
    %c1_i32_37 = arith.constant 1 : i32
    %86 = tpu.dynamic_rotate %85 by %c1_i32_37 dim 1 : vector<16x16x16xf32>, i32 -> vector<16x16x16xf32>
    %cst_38 = arith.constant 0.000000e+00 : f32
    %87 = vector.broadcast %cst_38 : f32 to vector<16x16x16xf32>
    %88 = arith.select %29, %86, %87 : vector<16x16x16xi1>, vector<16x16x16xf32>
    %89 = vector.extract_strided_slice %25 {offsets = [2, 0, 0], sizes = [1, 1, 16], strides = [1, 1, 1]} : vector<3x3x16xf32> to vector<1x1x16xf32>
    %90 = vector.shape_cast %89 : vector<1x1x16xf32> to vector<16xf32>
    %91 = vector.shape_cast %90 : vector<16xf32> to vector<1x1x16xf32>
    %92 = vector.broadcast %91 : vector<1x1x16xf32> to vector<16x16x16xf32>
    %93 = arith.mulf %88, %92 : vector<16x16x16xf32>
    %94 = arith.addf %84, %93 : vector<16x16x16xf32>
    %95 = vector.extract_strided_slice %25 {offsets = [2, 1, 0], sizes = [1, 1, 16], strides = [1, 1, 1]} : vector<3x3x16xf32> to vector<1x1x16xf32>
    %96 = vector.shape_cast %95 : vector<1x1x16xf32> to vector<16xf32>
    %97 = vector.shape_cast %96 : vector<16xf32> to vector<1x1x16xf32>
    %98 = vector.broadcast %97 : vector<1x1x16xf32> to vector<16x16x16xf32>
    %99 = arith.mulf %85, %98 : vector<16x16x16xf32>
    %100 = arith.addf %94, %99 : vector<16x16x16xf32>
    %c15_i32_39 = arith.constant 15 : i32
    %101 = tpu.dynamic_rotate %85 by %c15_i32_39 dim 1 : vector<16x16x16xf32>, i32 -> vector<16x16x16xf32>
    %cst_40 = arith.constant 0.000000e+00 : f32
    %102 = vector.broadcast %cst_40 : f32 to vector<16x16x16xf32>
    %103 = arith.select %31, %101, %102 : vector<16x16x16xi1>, vector<16x16x16xf32>
    %104 = vector.extract_strided_slice %25 {offsets = [2, 2, 0], sizes = [1, 1, 16], strides = [1, 1, 1]} : vector<3x3x16xf32> to vector<1x1x16xf32>
    %105 = vector.shape_cast %104 : vector<1x1x16xf32> to vector<16xf32>
    %106 = vector.shape_cast %105 : vector<16xf32> to vector<1x1x16xf32>
    %107 = vector.broadcast %106 : vector<1x1x16xf32> to vector<16x16x16xf32>
    %108 = arith.mulf %103, %107 : vector<16x16x16xf32>
    %109 = arith.addf %100, %108 : vector<16x16x16xf32>
    %110 = vector.shape_cast %109 : vector<16x16x16xf32> to vector<256x16xf32>
    %c0_41 = arith.constant 0 : index
    %c0_42 = arith.constant 0 : index
    %111 = vector.load %arg5[%c0_41, %c0_42] : memref<16x16xf32, #tpu.memory_space<vmem>>, vector<16x16xf32>
    %cst_43 = arith.constant dense<0.000000e+00> : vector<256x16xf32>
    %112 = tpu.matmul %110, %111, %cst_43 {dimension_numbers = #tpu.dot_dimension_numbers<[1], [0], [0], [1], [0, 0, 1, 1], [], []>} : vector<256x16xf32>, vector<16x16xf32>, vector<256x16xf32> -> vector<256x16xf32>
    %c0_44 = arith.constant 0 : index
    %c0_45 = arith.constant 0 : index
    %113 = vector.load %arg6[%c0_44, %c0_45] : memref<1x16xf32, #tpu.memory_space<vmem>>, vector<1x16xf32>
    %114 = vector.broadcast %113 : vector<1x16xf32> to vector<256x16xf32>
    %115 = arith.addf %112, %114 : vector<256x16xf32>
    %116 = vector.shape_cast %115 : vector<256x16xf32> to vector<16x16x16xf32>
    %c0_46 = arith.constant 0 : index
    %c0_47 = arith.constant 0 : index
    %c0_48 = arith.constant 0 : index
    %c0_49 = arith.constant 0 : index
    %117 = vector.load %arg7[%c0_46, %c0_47, %c0_48, %c0_49] : memref<1x16x16x16xf32, #tpu.memory_space<vmem>>, vector<1x16x16x16xf32>
    %118 = vector.shape_cast %117 : vector<1x16x16x16xf32> to vector<16x16x16xf32>
    %119 = vector.shape_cast %116 : vector<16x16x16xf32> to vector<1x16x16x16xf32>
    tpu.vector_store %arg7[%c0_46, %c0_47, %c0_48, %c0_49], %119 {strides = array<i32>} : memref<1x16x16x16xf32, #tpu.memory_space<vmem>>, vector<1x16x16x16xf32>,
    %cst_50 = arith.constant dense<0.000000e+00> : vector<16xf32>
    %120 = vector.multi_reduction <add>, %115, %cst_50 [0] : vector<256x16xf32> to vector<16xf32>
    %121 = vector.shape_cast %120 : vector<16xf32> to vector<1x1x16xf32>
    %c0_51 = arith.constant 0 : index
    %c0_52 = arith.constant 0 : index
    %c0_53 = arith.constant 0 : index
    %122 = vector.load %arg8[%c0_51, %c0_52, %c0_53] : memref<1x1x16xf32, #tpu.memory_space<vmem>>, vector<1x1x16xf32>
    tpu.vector_store %arg8[%c0_51, %c0_52, %c0_53], %121 {strides = array<i32>} : memref<1x1x16xf32, #tpu.memory_space<vmem>>, vector<1x1x16xf32>,
    %123 = arith.mulf %115, %115 : vector<256x16xf32>
    %cst_54 = arith.constant dense<0.000000e+00> : vector<16xf32>
    %124 = vector.multi_reduction <add>, %123, %cst_54 [0] : vector<256x16xf32> to vector<16xf32>
    %125 = vector.shape_cast %124 : vector<16xf32> to vector<1x1x16xf32>
    %c0_55 = arith.constant 0 : index
    %c0_56 = arith.constant 0 : index
    %c0_57 = arith.constant 0 : index
    %126 = vector.load %arg9[%c0_55, %c0_56, %c0_57] : memref<1x1x16xf32, #tpu.memory_space<vmem>>, vector<1x1x16xf32>
    tpu.vector_store %arg9[%c0_55, %c0_56, %c0_57], %125 {strides = array<i32>} : memref<1x1x16xf32, #tpu.memory_space<vmem>>, vector<1x1x16xf32>,
    return
  }
  func.func @transform_0(%arg0: i32) -> (i32, i32, i32, i32) {
    %c0_i32 = arith.constant 0 : i32
    %c0_i32_0 = arith.constant 0 : i32
    %c0_i32_1 = arith.constant 0 : i32
    %c0_i32_2 = arith.constant 0 : i32
    return %arg0, %c0_i32, %c0_i32_0, %c0_i32_1 : i32, i32, i32, i32
  }
  func.func @transform_1(%arg0: i32) -> (i32, i32) {
    %c0_i32 = arith.constant 0 : i32
    %c0_i32_0 = arith.constant 0 : i32
    %c0_i32_1 = arith.constant 0 : i32
    return %c0_i32, %c0_i32_0 : i32, i32
  }
  func.func @transform_2(%arg0: i32) -> (i32, i32, i32) {
    %c0_i32 = arith.constant 0 : i32
    %c0_i32_0 = arith.constant 0 : i32
    %c0_i32_1 = arith.constant 0 : i32
    %c0_i32_2 = arith.constant 0 : i32
    return %c0_i32, %c0_i32_0, %c0_i32_1 : i32, i32, i32
  }
  func.func @transform_3(%arg0: i32) -> (i32, i32, i32) {
    %c0_i32 = arith.constant 0 : i32
    %c0_i32_0 = arith.constant 0 : i32
    %c0_i32_1 = arith.constant 0 : i32
    %c0_i32_2 = arith.constant 0 : i32
    return %c0_i32, %c0_i32_0, %c0_i32_1 : i32, i32, i32
  }
  func.func @transform_4(%arg0: i32) -> (i32, i32) {
    %c0_i32 = arith.constant 0 : i32
    %c0_i32_0 = arith.constant 0 : i32
    %c0_i32_1 = arith.constant 0 : i32
    return %c0_i32, %c0_i32_0 : i32, i32
  }
  func.func @transform_5(%arg0: i32) -> (i32, i32) {
    %c0_i32 = arith.constant 0 : i32
    %c0_i32_0 = arith.constant 0 : i32
    %c0_i32_1 = arith.constant 0 : i32
    return %c0_i32, %c0_i32_0 : i32, i32
  }
  func.func @transform_6(%arg0: i32) -> (i32, i32, i32, i32) {
    %c0_i32 = arith.constant 0 : i32
    %c0_i32_0 = arith.constant 0 : i32
    %c0_i32_1 = arith.constant 0 : i32
    %c0_i32_2 = arith.constant 0 : i32
    return %arg0, %c0_i32, %c0_i32_0, %c0_i32_1 : i32, i32, i32, i32
  }
  func.func @transform_7(%arg0: i32) -> (i32, i32, i32) {
    %c0_i32 = arith.constant 0 : i32
    %c0_i32_0 = arith.constant 0 : i32
    %c0_i32_1 = arith.constant 0 : i32
    return %arg0, %c0_i32, %c0_i32_0 : i32, i32, i32
  }
  func.func @transform_8(%arg0: i32) -> (i32, i32, i32) {
    %c0_i32 = arith.constant 0 : i32
    %c0_i32_0 = arith.constant 0 : i32
    %c0_i32_1 = arith.constant 0 : i32
    return %arg0, %c0_i32, %c0_i32_0 : i32, i32, i32
  }
}

</mosaic_0001>

<bundles_post_ra>
// kernel: resnet_block_forward.4
= control target key start
LH: loop header
LB: loop body
LE: loop exit
PB: predicated region body
PF: predicated region fallthrough
CT: control target
= control target key end

     0   :  { %s2661_s27 = smov 0   ;;  %s4082_s0 = inlined_call_operand.vmem [shape: f32[2,16,16,16], index: 0, kind: input, shape index: {}]   ;;  %s4083_s1 = inlined_call_operand.vmem [shape: f32[4,16], index: 1, kind: input, shape index: {}]   ;;  %s4084_s2 = inlined_call_operand.vmem [shape: f32[3,3,16], index: 2, kind: input, shape index: {}]   ;;  %s4085_s3 = inlined_call_operand.vmem [shape: f32[1,1,16], index: 3, kind: input, shape index: {}]   ;;  %s4086_s4 = inlined_call_operand.vmem [shape: f32[16,16], index: 4, kind: input, shape index: {}]   ;;  %s4087_s5 = inlined_call_operand.vmem [shape: f32[1,16], index: 5, kind: input, shape index: {}]   ;;  %s4088_s6 = inlined_call_operand.vmem [shape: f32[2,16,16,16], index: 6, kind: output, shape index: {0}]   ;;  %s4089_s7 = inlined_call_operand.vmem [shape: f32[2,1,16], index: 7, kind: output, shape index: {1}]   ;;  %s4090_s8 = inlined_call_operand.vmem [shape: f32[2,1,16], index: 8, kind: output, shape index: {2}]  }
   0x1 LB: > { %s2458_s28 = sadd.s32 4294967295, %s2613_s27   ;;  %p2462_p0 = scmp.ge.s32.totalorder %s2613_s27, 1  ;;  %s2613_s27 = sphi %s2661_s27, %s19_s27  }
   0x2   : > { %p267_p1 = scmp.lt.s32.totalorder %s2613_s27, 3 }
   0x4   : > { %p268_p2 = pnand %p2462_p0, %p267_p1 }
   0x5   : > { %p307_p3 = scmp.lt.s32.totalorder (!%p268_p2), %s2458_s28, 1 }
   0x6   : > { %271 = sbr.rel (%p268_p2) target bundleno = 470 (0x1d6), region = 44 }
   0xb   : > { %v1819_v0 = vld [vmem:[%s4086_s4 + $0x8] sm:$0xff]  ;;  %v1818_v1 = vld [vmem:[%s4086_s4] sm:$0xff]  ;;  %v370_v3 = vlaneseq  ;;  %vm474_vm0 = vcmask 130048   ;;  %v2615_v5 = vmov 0.0   ;;  %s4092_s28 = smov (!%p307_p3, %s2458_s28), 1  ;;  %vm2249_vm5 = vcmask 122880  }
   0xc   : > { %v2678_v2 = vld [vmem:[%s4083_s1] sm:$0xf]  ;;  %2539 = vmatprep.subr.mxu0 %v1819_v0  ;;  %2591 = vmatprep.subr.mxu1 %v1819_v0  ;;  %475 = vst.msk [vmem:[#allocation2] sm:$0xff] %vm474_vm0, %v2615_v5  ;;  %476 = vst.msk [vmem:[#allocation2 + $0x8] sm:$0xff] %vm474_vm0, %v2615_v5  ;;  %s2503_s17 = sshll.u32 %s4092_s28, 8  ;;  %s319_s14 = scalar_lea.vmem %s4089_s7, %s4092_s28 }
   0xd   : > { %v324_v4 = vadd.f32 1e-05, %v2678_v2  ;;  %2540 = vmatpush3.msra.mxu0 %v1819_v0  ;;  %478 = vst.msk [vmem:[#allocation2 + $0x110] sm:$0xff] %vm474_vm0, %v2615_v5  ;;  %479 = vst.msk [vmem:[#allocation2 + $0x118] sm:$0xff] %vm474_vm0, %v2615_v5  ;;  %2593 = vmatpush3.msra.mxu1 %v1819_v0  ;;  %v2685_v6 = vshrl.u32 %v370_v3, 7  ;;  %s2738_s20 = scalar_lea.vmem %s4082_s0, %s2503_s17  ;;  %s3909_s11 = scalar_lea.vmem %s4088_s6, %s2503_s17 }
   0xe   : > { %2541 = vmatprep.subr.mxu0 %v1818_v1  ;;  %2592 = vmatprep.subr.mxu1 %v1818_v1  ;;  %v513_v8 = vld [vmem:[%s4084_s2] sm:$0x7]  ;;  %v514_v36 = vld [vmem:[%s4084_s2 + $0x4] sm:$0x7]  ;;  %v339_v40 = vld [vmem:[%s2738_s20 + $0x8] sm:$0xff]  ;;  %s322_s17 = scalar_lea.vmem %s4090_s8, %s4092_s28 }
   0xf   : > { %2604 = vrsqrt.f32 %v324_v4  ;;  %2542 = vmatpush3.msra.mxu0 %v1818_v1  ;;  %2594 = vmatpush3.msra.mxu1 %v1818_v1  ;;  %v662_v7 = vsub.s32 0, %v2685_v6  ;;  %v730_v9 = vsub.s32 1, %v2685_v6  ;;  %v2699_v10 = vadd.s32 8, %v2685_v6  ;;  %v2712_v20 = vld [vmem:[%s4085_s3] ss:$0 sm:$0xff]  ;;  %v340_v45 = vld [vmem:[%s2738_s20 + $0x10] sm:$0xff] }
  0x10   : > { %vm520_vm1 = vcmp.ge.s32.totalorder %v2685_v6, 1  ;;  %vm595_vm2 = vcmp.lt.s32.totalorder %v2685_v6, 1  ;;  %vm828_vm3 = vcmp.lt.s32.totalorder %v2685_v6, 7  ;;  %v372_v19 = vsub.s32 2, %v2685_v6  ;;  %v338_v39 = vld [vmem:[%s2738_s20] sm:$0xff]  ;;  %v341_v46 = vld [vmem:[%s2738_s20 + $0x18] sm:$0xff] }
  0x11   : > { %v2703_v13 = vrot.slane %v513_v8, %v662_v7  ;;  %v2706_v17 = vrot.slane %v513_v8, %v730_v9  ;;  %vm523_vm4 = vcmp.lt.s32.totalorder %v2699_v10, 15  ;;  %v515_v41 = vld [vmem:[%s4084_s2 + $0x8] sm:$0x7]  ;;  %v408_v47 = vsub.s32 3, %v2685_v6  ;;  %v342_v48 = vld [vmem:[%s2738_s20 + $0x20] sm:$0xff]  ;;  %v344_v54 = vld [vmem:[%s2738_s20 + $0x30] sm:$0xff] }
  0x12   : > { %v2726_v27 = vrot.slane %v513_v8, %v372_v19  ;;  %v2760_v51 = vrot.slane %v514_v36, %v372_v19  ;;  %v2762_v52 = vrot.slane %v515_v41, %v372_v19  ;;  %v343_v53 = vld [vmem:[%s2738_s20 + $0x28] sm:$0xff]  ;;  %v345_v55 = vld [vmem:[%s2738_s20 + $0x38] sm:$0xff]  ;;  %v2767_v56 = vrot.slane %v514_v36, %v662_v7  ;;  %v346_v60 = vld [vmem:[%s2738_s20 + $0x40] sm:$0xff] }
  0x13   : > { %v531_v11 = vld [vmem:[#allocation2] sm:$0xff]  ;;  %v532_v12 = vld [vmem:[#allocation2 + $0x8] sm:$0xff]  ;;  %v2769_v57 = vrot.slane %v514_v36, %v730_v9  ;;  %v2771_v58 = vrot.slane %v515_v41, %v662_v7  ;;  %v2773_v59 = vrot.slane %v515_v41, %v730_v9  ;;  %v348_v62 = vld [vmem:[%s2738_s20 + $0x50] sm:$0xff] }
  0x14   : > { %v563_v14 = vrot.slane %v531_v11, 7  ;;  %v579_v15 = vrot.slane %v532_v12, 7  ;;  %v796_v16 = vrot.slane %v531_v11, 1  ;;  %v812_v18 = vrot.slane %v532_v12, 1  ;;  %v347_v61 = vld [vmem:[%s2738_s20 + $0x48] sm:$0xff]  ;;  %v349_v4 = vld [vmem:[%s2738_s20 + $0x58] sm:$0xff] }
  0x15   : > { %v732_v28 = vmul.f32 %v2706_v17, %v531_v11  ;;  %v733_v31 = vmul.f32 %v2706_v17, %v532_v12  ;;  %v350_v5 = vld [vmem:[%s2738_s20 + $0x60] sm:$0xff]  ;;  %v351_v7 = vld [vmem:[%s2738_s20 + $0x68] sm:$0xff] }
  0x16   : > { %v612_v21 = vsel %vm595_vm2, %v579_v15, %v563_v14  ;;  %v596_v22 = vsel %vm595_vm2, %v563_v14, %v579_v15  ;;  %v845_v25 = vsel %vm828_vm3, %v812_v18, %v796_v16  ;;  %v829_v29 = vsel %vm828_vm3, %v796_v16, %v812_v18  ;;  %v352_v14 = vld [vmem:[%s2738_s20 + $0x70] sm:$0xff]  ;;  %v353_v15 = vld [vmem:[%s2738_s20 + $0x78] sm:$0xff]  ;;  %v354_v16 = vld [vmem:[%s2738_s20 + $0x80] sm:$0xff] }
  0x17   : > { %v628_v23 = vsel %vm520_vm1, %v612_v21, 0.0  ;;  %v665_v24 = vmul.f32 %v2703_v13, %v596_v22  ;;  %v862_v34 = vsel %vm523_vm4, %v845_v25, 0.0  ;;  %v897_v37 = vmul.f32 %v2726_v27, %v829_v29  ;;  %v357_v25 = vld [vmem:[%s2738_s20 + $0x98] sm:$0xff]  ;;  %v3902_v10 = vld [vmem:[%s4087_s5] ss:$0 sm:$0xff] }
  0x18   : > { %v664_v26 = vmul.f32 %v2703_v13, %v628_v23  ;;  %v898_v44 = vmul.f32 %v2726_v27, %v862_v34  ;;  %v355_v23 = vld [vmem:[%s2738_s20 + $0x88] sm:$0xff] }
  0x19   : > { %v697_v30 = vadd.f32 %v2712_v20, %v665_v24  ;;  %v356_v24 = vld [vmem:[%s2738_s20 + $0x90] sm:$0xff] }
  0x1a   : > { %v696_v33 = vadd.f32 %v2712_v20, %v664_v26 }
  0x1b   : > { %v765_v43 = vadd.f32 %v733_v31, %v697_v30  ;;  %v358_v31 = vld [vmem:[%s2738_s20 + $0xa0] sm:$0xff] }
  0x1c   : > { %v2605_v32 = vpop.eup %2604  ;;  %v764_v42 = vadd.f32 %v732_v28, %v696_v33  ;;  %v360_v33 = vld [vmem:[%s2738_s20 + $0xb0] sm:$0xff] }
  0x1d   : > { %v327_v35 = vrot.slane %v2605_v32, 7  ;;  %v2782_v3 = vadd.f32 %v898_v44, %v765_v43  ;;  %v359_v32 = vld [vmem:[%s2738_s20 + $0xa8] sm:$0xff] }
  0x1e   : > { %v2780_v1 = vadd.f32 %v897_v37, %v764_v42 }
  0x1f   : > { %v329_v38 = vmul.f32 %v327_v35, %v2678_v2 }
  0x21   : > { %v331_v49 = vrot.slane %v329_v38, 2  ;;  %v2758_v50 = vrot.slane %v329_v38, %v372_v19  ;;  %v361_v38 = vld [vmem:[%s2738_s20 + $0xb8] sm:$0xff] }
  0x23   : > { %v333_v63 = vmul.f32 %v331_v49, %v2678_v2  ;;  %v374_v0 = vmul.f32 %v2758_v50, %v338_v39  ;;  %v375_v8 = vmul.f32 %v2758_v50, %v339_v40  ;;  %v376_v9 = vmul.f32 %v2758_v50, %v340_v45  ;;  %v362_v39 = vld [vmem:[%s2738_s20 + $0xc0] sm:$0xff]  ;;  %v363_v40 = vld [vmem:[%s2738_s20 + $0xc8] sm:$0xff] }
  0x24   : > { %v377_v11 = vmul.f32 %v2758_v50, %v341_v46  ;;  %v378_v12 = vmul.f32 %v2758_v50, %v342_v48  ;;  %v379_v19 = vmul.f32 %v2758_v50, %v343_v53  ;;  %v380_v21 = vmul.f32 %v2758_v50, %v344_v54 }
  0x25   : > { %v335_v18 = vrot.slane %v333_v63, 5  ;;  %v381_v22 = vmul.f32 %v2758_v50, %v345_v55  ;;  %v382_v26 = vmul.f32 %v2758_v50, %v346_v60  ;;  %v383_v28 = vmul.f32 %v2758_v50, %v347_v61 }
  0x26   : > { %v384_v29 = vmul.f32 %v2758_v50, %v348_v62  ;;  %v385_v30 = vmul.f32 %v2758_v50, %v349_v4  ;;  %v386_v35 = vmul.f32 %v2758_v50, %v350_v5  ;;  %v387_v36 = vmul.f32 %v2758_v50, %v351_v7 }
  0x27   : > { %v337_v34 = vsub.f32 %v2678_v2, %v335_v18  ;;  %v388_v37 = vmul.f32 %v2758_v50, %v352_v14  ;;  %v389_v41 = vmul.f32 %v2758_v50, %v353_v15  ;;  %v390_v42 = vmul.f32 %v2758_v50, %v354_v16 }
  0x28   : > { %v391_v43 = vmul.f32 %v2758_v50, %v355_v23  ;;  %v392_v44 = vmul.f32 %v2758_v50, %v356_v24  ;;  %v393_v2 = vmul.f32 %v2758_v50, %v357_v25  ;;  %v394_v46 = vmul.f32 %v2758_v50, %v358_v31 }
  0x29   : > { %v2818_v45 = vrot.slane %v337_v34, %v408_v47  ;;  %v395_v48 = vmul.f32 %v2758_v50, %v359_v32  ;;  %v396_v49 = vmul.f32 %v2758_v50, %v360_v33  ;;  %v397_v53 = vmul.f32 %v2758_v50, %v361_v38 }
  0x2a   : > { %v2826_v54 = vmul.f32 %v2758_v50, %v362_v39  ;;  %v2829_v55 = vmul.f32 %v2758_v50, %v363_v40 }
  0x2b   : > { %v410_v60 = vadd.f32 %v2818_v45, %v374_v0  ;;  %v411_v47 = vadd.f32 %v2818_v45, %v375_v8  ;;  %v412_v61 = vadd.f32 %v2818_v45, %v376_v9  ;;  %v413_v62 = vadd.f32 %v2818_v45, %v377_v11 }
  0x2c   : > { %v414_v63 = vadd.f32 %v2818_v45, %v378_v12  ;;  %v415_v4 = vadd.f32 %v2818_v45, %v379_v19  ;;  %v416_v5 = vadd.f32 %v2818_v45, %v380_v21  ;;  %v417_v7 = vadd.f32 %v2818_v45, %v381_v22 }
  0x2d   : > { %v442_v14 = vmax.f32 %v410_v60, 0.0  ;;  %v443_v15 = vmax.f32 %v411_v47, 0.0  ;;  %v444_v16 = vmax.f32 %v412_v61, 0.0  ;;  %v445_v18 = vmax.f32 %v413_v62, 0.0 }
  0x2e   : > { %v446_v23 = vmax.f32 %v414_v63, 0.0  ;;  %v447_v0 = vmax.f32 %v415_v4, 0.0  ;;  %v448_v24 = vmax.f32 %v416_v5, 0.0  ;;  %v449_v8 = vmax.f32 %v417_v7, 0.0 }
  0x2f   : > { %481 = vst.msk [vmem:[#allocation2 + $0x10] sm:$0xff] %vm474_vm0, %v442_v14  ;;  %482 = vst.msk [vmem:[#allocation2 + $0x18] sm:$0xff] %vm474_vm0, %v443_v15  ;;  %v418_v9 = vadd.f32 %v2818_v45, %v382_v26  ;;  %v419_v11 = vadd.f32 %v2818_v45, %v383_v28  ;;  %v420_v12 = vadd.f32 %v2818_v45, %v384_v29 }
  0x30   : > { %483 = vst.msk [vmem:[#allocation2 + $0x20] sm:$0xff] %vm474_vm0, %v444_v16  ;;  %484 = vst.msk [vmem:[#allocation2 + $0x28] sm:$0xff] %vm474_vm0, %v445_v18  ;;  %v421_v19 = vadd.f32 %v2818_v45, %v385_v30  ;;  %v422_v21 = vadd.f32 %v2818_v45, %v386_v35  ;;  %v423_v22 = vadd.f32 %v2818_v45, %v387_v36 }
  0x31   : > { %485 = vst.msk [vmem:[#allocation2 + $0x30] sm:$0xff] %vm474_vm0, %v446_v23  ;;  %486 = vst.msk [vmem:[#allocation2 + $0x38] sm:$0xff] %vm474_vm0, %v447_v0  ;;  %v424_v25 = vadd.f32 %v2818_v45, %v388_v37  ;;  %v425_v26 = vadd.f32 %v2818_v45, %v389_v41  ;;  %v450_v28 = vmax.f32 %v418_v9, 0.0  ;;  %v451_v29 = vmax.f32 %v419_v11, 0.0 }
  0x32   : > { %487 = vst.msk [vmem:[#allocation2 + $0x40] sm:$0xff] %vm474_vm0, %v448_v24  ;;  %488 = vst.msk [vmem:[#allocation2 + $0x48] sm:$0xff] %vm474_vm0, %v449_v8  ;;  %v452_v31 = vmax.f32 %v420_v12, 0.0  ;;  %v453_v30 = vmax.f32 %v421_v19, 0.0  ;;  %v454_v32 = vmax.f32 %v422_v21, 0.0  ;;  %v455_v33 = vmax.f32 %v423_v22, 0.0 }
  0x33   : > { %v456_v34 = vmax.f32 %v424_v25, 0.0  ;;  %v457_v38 = vmax.f32 %v425_v26, 0.0  ;;  %489 = vst.msk [vmem:[#allocation2 + $0x50] sm:$0xff] %vm474_vm0, %v450_v28  ;;  %490 = vst.msk [vmem:[#allocation2 + $0x58] sm:$0xff] %vm474_vm0, %v451_v29  ;;  %v426_v35 = vadd.f32 %v2818_v45, %v390_v42  ;;  %v427_v36 = vadd.f32 %v2818_v45, %v391_v43 }
  0x34   : > { %491 = vst.msk [vmem:[#allocation2 + $0x60] sm:$0xff] %vm474_vm0, %v452_v31  ;;  %492 = vst.msk [vmem:[#allocation2 + $0x68] sm:$0xff] %vm474_vm0, %v453_v30  ;;  %v428_v37 = vadd.f32 %v2818_v45, %v392_v44  ;;  %v429_v39 = vadd.f32 %v2818_v45, %v393_v2  ;;  %v430_v40 = vadd.f32 %v2818_v45, %v394_v46 }
  0x35   : > { %493 = vst.msk [vmem:[#allocation2 + $0x70] sm:$0xff] %vm474_vm0, %v454_v32  ;;  %494 = vst.msk [vmem:[#allocation2 + $0x78] sm:$0xff] %vm474_vm0, %v455_v33  ;;  %v431_v41 = vadd.f32 %v2818_v45, %v395_v48  ;;  %v432_v42 = vadd.f32 %v2818_v45, %v396_v49  ;;  %v2871_v43 = vadd.f32 %v2818_v45, %v397_v53  ;;  %v458_v44 = vmax.f32 %v426_v35, 0.0 }
  0x36   : > { %495 = vst.msk [vmem:[#allocation2 + $0x80] sm:$0xff] %vm474_vm0, %v456_v34  ;;  %496 = vst.msk [vmem:[#allocation2 + $0x88] sm:$0xff] %vm474_vm0, %v457_v38  ;;  %v459_v60 = vmax.f32 %v427_v36, 0.0  ;;  %v460_v2 = vmax.f32 %v428_v37, 0.0  ;;  %v461_v47 = vmax.f32 %v429_v39, 0.0  ;;  %v961_v61 = vld [vmem:[#allocation2 + $0x10] sm:$0xff]  ;;  %v2879_v46 = vadd.f32 %v2818_v45, %v2826_v54 }
  0x37   : > { %v2873_v62 = vld [vmem:[#allocation2 + $0x18] sm:$0xff]  ;;  %v2875_v63 = vld [vmem:[#allocation2 + $0x20] sm:$0xff]  ;;  %v462_v4 = vmax.f32 %v430_v40, 0.0  ;;  %v463_v5 = vmax.f32 %v431_v41, 0.0  ;;  %v464_v7 = vmax.f32 %v432_v42, 0.0  ;;  %v993_v48 = vrot.slane %v961_v61, 7 }
  0x38   : > { %v1009_v49 = vrot.slane %v2873_v62, 7  ;;  %v1161_v53 = vmul.f32 %v2769_v57, %v961_v61  ;;  %v1225_v14 = vrot.slane %v961_v61, 1  ;;  %v2883_v15 = vld [vmem:[#allocation2 + $0x28] sm:$0xff]  ;;  %497 = vst.msk [vmem:[#allocation2 + $0x90] sm:$0xff] %vm474_vm0, %v458_v44  ;;  %498 = vst.msk [vmem:[#allocation2 + $0x98] sm:$0xff] %vm474_vm0, %v459_v60  ;;  %v1241_v16 = vrot.slane %v2873_v62, 1 }
  0x39   : > { %499 = vst.msk [vmem:[#allocation2 + $0xa0] sm:$0xff] %vm474_vm0, %v460_v2  ;;  %500 = vst.msk [vmem:[#allocation2 + $0xa8] sm:$0xff] %vm474_vm0, %v461_v47  ;;  %v1422_v54 = vrot.slane %v2875_v63, 7  ;;  %v1438_v18 = vrot.slane %v2883_v15, 7  ;;  %v1590_v23 = vmul.f32 %v2773_v59, %v2875_v63  ;;  %v1654_v24 = vrot.slane %v2875_v63, 1  ;;  %v2948_v44 = vld [vmem:[#allocation2 + $0x30] sm:$0xff] }
  0x3a   : > { %501 = vst.msk [vmem:[#allocation2 + $0xb0] sm:$0xff] %vm474_vm0, %v462_v4  ;;  %502 = vst.msk [vmem:[#allocation2 + $0xb8] sm:$0xff] %vm474_vm0, %v463_v5  ;;  %v1041_v0 = vsel %vm595_vm2, %v1009_v49, %v993_v48  ;;  %v1670_v8 = vrot.slane %v2883_v15, 1  ;;  %v1025_v9 = vsel %vm595_vm2, %v993_v48, %v1009_v49  ;;  %v1257_v12 = vsel %vm828_vm3, %v1225_v14, %v1241_v16  ;;  %v2950_v60 = vld [vmem:[#allocation2 + $0x38] sm:$0xff] }
  0x3b   : > { %503 = vst.msk [vmem:[#allocation2 + $0xc0] sm:$0xff] %vm474_vm0, %v464_v7  ;;  %v1057_v11 = vsel %vm520_vm1, %v1041_v0, 0.0  ;;  %v1470_v19 = vsel %vm595_vm2, %v1438_v18, %v1422_v54  ;;  %v1094_v21 = vmul.f32 %v2767_v56, %v1025_v9  ;;  %v1325_v25 = vmul.f32 %v2760_v51, %v1257_v12 }
  0x3c   : > { %v1093_v22 = vmul.f32 %v2767_v56, %v1057_v11  ;;  %v2914_v26 = vsel %vm520_vm1, %v1470_v19, 0.0  ;;  %v2918_v28 = vsel %vm828_vm3, %v1654_v24, %v1670_v8  ;;  %v1162_v32 = vmul.f32 %v2769_v57, %v2873_v62 }
  0x3d   : > { %v1522_v29 = vmul.f32 %v2771_v58, %v2914_v26  ;;  %v1754_v31 = vmul.f32 %v2762_v52, %v2918_v28  ;;  %v1126_v30 = vadd.f32 %v1094_v21, %v2782_v3  ;;  %v1273_v34 = vsel %vm828_vm3, %v1241_v16, %v1225_v14 }
  0x3e   : > { %v1125_v33 = vadd.f32 %v1093_v22, %v2780_v1  ;;  %v2932_v38 = vsel %vm595_vm2, %v1422_v54, %v1438_v18  ;;  %v1591_v35 = vmul.f32 %v2773_v59, %v2883_v15  ;;  %v1290_v37 = vsel %vm523_vm4, %v1273_v34, 0.0 }
  0x3f   : > { %v1194_v36 = vadd.f32 %v1162_v32, %v1126_v30  ;;  %v1523_v3 = vmul.f32 %v2771_v58, %v2932_v38  ;;  %v1702_v1 = vsel %vm828_vm3, %v1670_v8, %v1654_v24  ;;  %v1326_v40 = vmul.f32 %v2760_v51, %v1290_v37 }
  0x40   : > { %v1193_v39 = vadd.f32 %v1161_v53, %v1125_v33  ;;  %v2945_v41 = vsel %vm523_vm4, %v1702_v1, 0.0  ;;  %v666_v42 = vmul.f32 %v1057_v11, %v2703_v13  ;;  %v734_v47 = vmul.f32 %v961_v61, %v2706_v17 }
  0x41   : > { %v1755_v2 = vmul.f32 %v2762_v52, %v2945_v41  ;;  %v899_v4 = vmul.f32 %v1257_v12, %v2726_v27  ;;  %v1095_v5 = vmul.f32 %v2914_v26, %v2767_v56  ;;  %v1358_v48 = vadd.f32 %v1326_v40, %v1194_v36 }
  0x42   : > { %v1357_v7 = vadd.f32 %v1325_v25, %v1193_v39  ;;  %v698_v49 = vadd.f32 %v2712_v20, %v666_v42  ;;  %v1163_v53 = vmul.f32 %v2875_v63, %v2769_v57  ;;  %v1327_v14 = vmul.f32 %v2918_v28, %v2760_v51 }
  0x43   : > { %v1423_v16 = vrot.slane %v2948_v44, 7  ;;  %v1439_v54 = vrot.slane %v2950_v60, 7  ;;  %v1592_v61 = vmul.f32 %v2773_v59, %v2948_v44  ;;  %v1555_v0 = vadd.f32 %v1523_v3, %v1358_v48  ;;  %v3012_v48 = vld [vmem:[#allocation2 + $0x40] sm:$0xff] }
  0x44   : > { %v1554_v18 = vadd.f32 %v1522_v29, %v1357_v7  ;;  %v766_v24 = vadd.f32 %v734_v47, %v698_v49  ;;  %v1655_v8 = vrot.slane %v2948_v44, 1  ;;  %v1671_v12 = vrot.slane %v2950_v60, 1  ;;  %v3014_v49 = vld [vmem:[#allocation2 + $0x48] sm:$0xff] }
  0x45   : > { %v1471_v11 = vsel %vm595_vm2, %v1439_v54, %v1423_v16  ;;  %v667_v19 = vmul.f32 %v1025_v9, %v2703_v13  ;;  %v735_v21 = vmul.f32 %v2873_v62, %v2706_v17  ;;  %v1623_v25 = vadd.f32 %v1591_v35, %v1555_v0 }
  0x46   : > { %v1622_v22 = vadd.f32 %v1590_v23, %v1554_v18  ;;  %v931_v30 = vadd.f32 %v899_v4, %v766_v24  ;;  %v2976_v29 = vsel %vm520_vm1, %v1471_v11, 0.0  ;;  %v2982_v33 = vsel %vm828_vm3, %v1655_v8, %v1671_v12 }
  0x47   : > { %v1524_v32 = vmul.f32 %v2771_v58, %v2976_v29  ;;  %v699_v34 = vadd.f32 %v2712_v20, %v667_v19  ;;  %v900_v9 = vmul.f32 %v1290_v37, %v2726_v27  ;;  %v1787_v62 = vadd.f32 %v1755_v2, %v1623_v25 }
  0x48   : > { %v1786_v36 = vadd.f32 %v1754_v31, %v1622_v22  ;;  %v1127_v23 = vadd.f32 %v1095_v5, %v931_v30  ;;  %v1756_v35 = vmul.f32 %v2762_v52, %v2982_v33  ;;  %v1096_v1 = vmul.f32 %v2932_v38, %v2767_v56 }
  0x49   : > { %v767_v3 = vadd.f32 %v735_v21, %v699_v34  ;;  %v1164_v39 = vmul.f32 %v2883_v15, %v2769_v57  ;;  %v1328_v40 = vmul.f32 %v2945_v41, %v2760_v51  ;;  %v2997_v31 = vsel %vm595_vm2, %v1423_v16, %v1439_v54 }
  0x4a   : > { %2543 = vmatprep.mubr.msk.f32.mxu0 %vm474_vm0, %v1786_v36  ;;  %v1195_v42 = vadd.f32 %v1163_v53, %v1127_v23  ;;  %v1593_v37 = vmul.f32 %v2773_v59, %v2950_v60  ;;  %v1703_v2 = vsel %vm828_vm3, %v1671_v12, %v1655_v8  ;;  %v1525_v4 = vmul.f32 %v2771_v58, %v2997_v31 }
  0x4b   : > { %2544 = vmatmul.mubr.msk.f32.vlgmr.msra.gmra.mxu0 %vm474_vm0, %v1787_v62  ;;  %v932_v47 = vadd.f32 %v900_v9, %v767_v3  ;;  %v3008_v5 = vsel %vm523_vm4, %v1703_v2, 0.0  ;;  %v668_v7 = vmul.f32 %v2914_v26, %v2703_v13  ;;  %v736_v54 = vmul.f32 %v2875_v63, %v2706_v17 }
  0x4c   : > { %v1359_v53 = vadd.f32 %v1327_v14, %v1195_v42  ;;  %v1757_v16 = vmul.f32 %v2762_v52, %v3008_v5  ;;  %v901_v18 = vmul.f32 %v2918_v28, %v2726_v27  ;;  %v1097_v26 = vmul.f32 %v2976_v29, %v2767_v56 }
  0x4d   : > { %v1128_v0 = vadd.f32 %v1096_v1, %v932_v47  ;;  %v700_v24 = vadd.f32 %v2712_v20, %v668_v7  ;;  %v1165_v8 = vmul.f32 %v2948_v44, %v2769_v57  ;;  %v1329_v14 = vmul.f32 %v2982_v33, %v2760_v51 }
  0x4e   : > { %v1556_v11 = vadd.f32 %v1524_v32, %v1359_v53  ;;  %v1424_v12 = vrot.slane %v3012_v48, 7  ;;  %v1440_v63 = vrot.slane %v3014_v49, 7  ;;  %v1594_v28 = vmul.f32 %v2773_v59, %v3012_v48 }
  0x4f   : > { %v1196_v19 = vadd.f32 %v1164_v39, %v1128_v0  ;;  %v768_v21 = vadd.f32 %v736_v54, %v700_v24  ;;  %v1656_v22 = vrot.slane %v3012_v48, 1  ;;  %v1672_v32 = vrot.slane %v3014_v49, 1 }
  0x50   : > { %v1624_v25 = vadd.f32 %v1592_v61, %v1556_v11  ;;  %v1472_v30 = vsel %vm595_vm2, %v1440_v63, %v1424_v12  ;;  %v669_v34 = vmul.f32 %v2932_v38, %v2703_v13  ;;  %v737_v23 = vmul.f32 %v2883_v15, %v2706_v17 }
  0x51   : > { %v1360_v9 = vadd.f32 %v1328_v40, %v1196_v19  ;;  %v933_v36 = vadd.f32 %v901_v18, %v768_v21  ;;  %v3041_v62 = vsel %vm520_vm1, %v1472_v30, 0.0  ;;  %v3049_v1 = vsel %vm828_vm3, %v1656_v22, %v1672_v32  ;;  %v3083_v19 = vld [vmem:[#allocation2 + $0x58] sm:$0xff] }
  0x52   : > { %v1788_v3 = vadd.f32 %v1756_v35, %v1624_v25  ;;  %v1526_v61 = vmul.f32 %v2771_v58, %v3041_v62  ;;  %v701_v39 = vadd.f32 %v2712_v20, %v669_v34  ;;  %v1758_v42 = vmul.f32 %v2762_v52, %v3049_v1 }
  0x53   : > { %v1557_v38 = vadd.f32 %v1525_v4, %v1360_v9  ;;  %v1129_v40 = vadd.f32 %v1097_v26, %v933_v36  ;;  %v902_v2 = vmul.f32 %v2945_v41, %v2726_v27  ;;  %v1098_v35 = vmul.f32 %v2997_v31, %v2767_v56 }
  0x54   : > { %2546 = vmatprep.mubr.msk.f32.mxu0 %vm474_vm0, %v1788_v3  ;;  %v769_v15 = vadd.f32 %v737_v23, %v701_v39  ;;  %v1166_v47 = vmul.f32 %v2950_v60, %v2769_v57  ;;  %v1330_v7 = vmul.f32 %v3008_v5, %v2760_v51  ;;  %v3065_v54 = vsel %vm595_vm2, %v1424_v12, %v1440_v63  ;;  %v3081_v63 = vld [vmem:[#allocation2 + $0x50] sm:$0xff] }
  0x55   : > { %v1625_v4 = vadd.f32 %v1593_v37, %v1557_v38  ;;  %v1197_v53 = vadd.f32 %v1165_v8, %v1129_v40  ;;  %v1595_v41 = vmul.f32 %v2773_v59, %v3014_v49  ;;  %v1527_v0 = vmul.f32 %v2771_v58, %v3065_v54 }
  0x56   : > { %v934_v18 = vadd.f32 %v902_v2, %v769_v15  ;;  %v1704_v24 = vsel %vm828_vm3, %v1672_v32, %v1656_v22  ;;  %v670_v26 = vmul.f32 %v2976_v29, %v2703_v13  ;;  %v738_v12 = vmul.f32 %v2948_v44, %v2706_v17 }
  0x57   : > { %v1789_v11 = vadd.f32 %v1757_v16, %v1625_v4  ;;  %v1361_v37 = vadd.f32 %v1329_v14, %v1197_v53  ;;  %v3077_v8 = vsel %vm523_vm4, %v1704_v24, 0.0  ;;  %v903_v29 = vmul.f32 %v2982_v33, %v2726_v27 }
  0x58   : > { %v1130_v21 = vadd.f32 %v1098_v35, %v934_v18  ;;  %v1759_v22 = vmul.f32 %v2762_v52, %v3077_v8  ;;  %v702_v25 = vadd.f32 %v2712_v20, %v670_v26  ;;  %v1099_v14 = vmul.f32 %v3041_v62, %v2767_v56 }
  0x59   : > { %2547 = vmatmul.mubr.msk.f32.gmra.mxu0 %vm474_vm0, %v1789_v11  ;;  %v1558_v16 = vadd.f32 %v1526_v61, %v1361_v37  ;;  %v1167_v44 = vmul.f32 %v3012_v48, %v2769_v57  ;;  %v1331_v30 = vmul.f32 %v3049_v1, %v2760_v51  ;;  %v1425_v9 = vrot.slane %v3081_v63, 7 }
  0x5a   : > { %v1198_v32 = vadd.f32 %v1166_v47, %v1130_v21  ;;  %v770_v34 = vadd.f32 %v738_v12, %v702_v25  ;;  %v1441_v36 = vrot.slane %v3083_v19, 7  ;;  %v1596_v33 = vmul.f32 %v2773_v59, %v3081_v63 }
  0x5b   : > { %v1626_v23 = vadd.f32 %v1594_v28, %v1558_v16  ;;  %v1657_v3 = vrot.slane %v3081_v63, 1  ;;  %v1673_v61 = vrot.slane %v3083_v19, 1  ;;  %v671_v2 = vmul.f32 %v2997_v31, %v2703_v13 }
  0x5c   : > { %v1362_v39 = vadd.f32 %v1330_v7, %v1198_v32  ;;  %v935_v38 = vadd.f32 %v903_v29, %v770_v34  ;;  %v1473_v40 = vsel %vm595_vm2, %v1441_v36, %v1425_v9  ;;  %v739_v47 = vmul.f32 %v2950_v60, %v2706_v17  ;;  %v3149_v32 = vld [vmem:[#allocation2 + $0x68] sm:$0xff] }
  0x5d   : > { %v1790_v15 = vadd.f32 %v1758_v42, %v1626_v23  ;;  %v3109_v35 = vsel %vm520_vm1, %v1473_v40, 0.0  ;;  %v3113_v28 = vsel %vm828_vm3, %v1657_v3, %v1673_v61  ;;  %v703_v42 = vadd.f32 %v2712_v20, %v671_v2 }
  0x5e   : > { %v1559_v7 = vadd.f32 %v1527_v0, %v1362_v39  ;;  %v1131_v4 = vadd.f32 %v1099_v14, %v935_v38  ;;  %v1528_v53 = vmul.f32 %v2771_v58, %v3109_v35  ;;  %v1760_v31 = vmul.f32 %v2762_v52, %v3113_v28 }
  0x5f   : > { %2549 = vmatprep.mubr.msk.f32.mxu0 %vm474_vm0, %v1790_v15  ;;  %v904_v18 = vmul.f32 %v3008_v5, %v2726_v27  ;;  %v1100_v24 = vmul.f32 %v3065_v54, %v2767_v56  ;;  %v1168_v60 = vmul.f32 %v3014_v49, %v2769_v57  ;;  %v1332_v11 = vmul.f32 %v3077_v8, %v2760_v51 }
  0x60   : > { %v1627_v0 = vadd.f32 %v1595_v41, %v1559_v7  ;;  %v1199_v26 = vadd.f32 %v1167_v44, %v1131_v4  ;;  %v3133_v37 = vsel %vm595_vm2, %v1425_v9, %v1441_v36  ;;  %v771_v12 = vadd.f32 %v739_v47, %v703_v42  ;;  %v3147_v44 = vld [vmem:[#allocation2 + $0x60] sm:$0xff] }
  0x61   : > { %v1529_v21 = vmul.f32 %v2771_v58, %v3133_v37  ;;  %v1597_v5 = vmul.f32 %v2773_v59, %v3083_v19  ;;  %v1705_v25 = vsel %vm828_vm3, %v1673_v61, %v1657_v3  ;;  %v672_v14 = vmul.f32 %v3041_v62, %v2703_v13 }
  0x62   : > { %v1791_v29 = vadd.f32 %v1759_v22, %v1627_v0  ;;  %v1363_v41 = vadd.f32 %v1331_v30, %v1199_v26  ;;  %v3143_v16 = vsel %vm523_vm4, %v1705_v25, 0.0  ;;  %v936_v34 = vadd.f32 %v904_v18, %v771_v12 }
  0x63   : > { %v1761_v9 = vmul.f32 %v2762_v52, %v3143_v16  ;;  %v740_v36 = vmul.f32 %v3012_v48, %v2706_v17  ;;  %v905_v22 = vmul.f32 %v3049_v1, %v2726_v27  ;;  %v704_v23 = vadd.f32 %v2712_v20, %v672_v14 }
  0x64   : > { %2550 = vmatmul.mubr.msk.f32.gmra.mxu0 %vm474_vm0, %v1791_v29  ;;  %v1560_v30 = vadd.f32 %v1528_v53, %v1363_v41  ;;  %v1101_v62 = vmul.f32 %v3109_v35, %v2767_v56  ;;  %v1169_v3 = vmul.f32 %v3081_v63, %v2769_v57  ;;  %v1132_v61 = vadd.f32 %v1100_v24, %v936_v34 }
  0x65   : > { %v1333_v39 = vmul.f32 %v3113_v28, %v2760_v51  ;;  %v1426_v48 = vrot.slane %v3147_v44, 7  ;;  %v1442_v38 = vrot.slane %v3149_v32, 7  ;;  %v772_v40 = vadd.f32 %v740_v36, %v704_v23 }
  0x66   : > { %v1628_v1 = vadd.f32 %v1596_v33, %v1560_v30  ;;  %v1598_v2 = vmul.f32 %v2773_v59, %v3147_v44  ;;  %v1658_v15 = vrot.slane %v3147_v44, 1  ;;  %v1200_v47 = vadd.f32 %v1168_v60, %v1132_v61 }
  0x67   : > { %v1474_v7 = vsel %vm595_vm2, %v1442_v38, %v1426_v48  ;;  %v1674_v4 = vrot.slane %v3149_v32, 1  ;;  %v673_v53 = vmul.f32 %v3065_v54, %v2703_v13  ;;  %v937_v18 = vadd.f32 %v905_v22, %v772_v40 }
  0x68   : > { %v1792_v42 = vadd.f32 %v1760_v31, %v1628_v1  ;;  %v3177_v33 = vsel %vm520_vm1, %v1474_v7, 0.0  ;;  %v741_v24 = vmul.f32 %v3014_v49, %v2706_v17  ;;  %v1364_v0 = vadd.f32 %v1332_v11, %v1200_v47  ;;  %v3219_v1 = vld [vmem:[#allocation2 + $0x70] sm:$0xff] }
  0x69   : > { %v1530_v60 = vmul.f32 %v2771_v58, %v3177_v33  ;;  %v3185_v26 = vsel %vm828_vm3, %v1658_v15, %v1674_v4  ;;  %v705_v12 = vadd.f32 %v2712_v20, %v673_v53  ;;  %v1133_v54 = vadd.f32 %v1101_v62, %v937_v18 }
  0x6a   : > { %2552 = vmatprep.mubr.msk.f32.mxu0 %vm474_vm0, %v1792_v42  ;;  %v1762_v31 = vmul.f32 %v2762_v52, %v3185_v26  ;;  %v906_v25 = vmul.f32 %v3077_v8, %v2726_v27  ;;  %v1102_v49 = vmul.f32 %v3133_v37, %v2767_v56  ;;  %v1561_v11 = vadd.f32 %v1529_v21, %v1364_v0 }
  0x6b   : > { %v773_v29 = vadd.f32 %v741_v24, %v705_v12  ;;  %v1170_v41 = vmul.f32 %v3083_v19, %v2769_v57  ;;  %v1334_v14 = vmul.f32 %v3143_v16, %v2760_v51  ;;  %v1201_v34 = vadd.f32 %v1169_v3, %v1133_v54 }
  0x6c   : > { %v3201_v36 = vsel %vm595_vm2, %v1426_v48, %v1442_v38  ;;  %v1599_v22 = vmul.f32 %v2773_v59, %v3149_v32  ;;  %v1706_v8 = vsel %vm828_vm3, %v1674_v4, %v1658_v15  ;;  %v1629_v30 = vadd.f32 %v1597_v5, %v1561_v11  ;;  %v3221_v5 = vld [vmem:[#allocation2 + $0x78] sm:$0xff] }
  0x6d   : > { %v938_v21 = vadd.f32 %v906_v25, %v773_v29  ;;  %v1531_v23 = vmul.f32 %v2771_v58, %v3201_v36  ;;  %v3211_v62 = vsel %vm523_vm4, %v1706_v8, 0.0  ;;  %v1365_v3 = vadd.f32 %v1333_v39, %v1201_v34 }
  0x6e   : > { %v1763_v61 = vmul.f32 %v2762_v52, %v3211_v62  ;;  %v674_v48 = vmul.f32 %v3109_v35, %v2703_v13  ;;  %v742_v38 = vmul.f32 %v3081_v63, %v2706_v17  ;;  %v1793_v40 = vadd.f32 %v1761_v9, %v1629_v30 }
  0x6f   : > { %v1134_v15 = vadd.f32 %v1102_v49, %v938_v21  ;;  %v907_v47 = vmul.f32 %v3113_v28, %v2726_v27  ;;  %v1103_v39 = vmul.f32 %v3177_v33, %v2767_v56  ;;  %v1562_v7 = vadd.f32 %v1530_v60, %v1365_v3 }
  0x70   : > { %v706_v4 = vadd.f32 %v2712_v20, %v674_v48  ;;  %v1171_v35 = vmul.f32 %v3147_v44, %v2769_v57  ;;  %v1335_v63 = vmul.f32 %v3185_v26, %v2760_v51  ;;  %2553 = vmatmul.mubr.msk.f32.gmra.mxu0 %vm474_vm0, %v1793_v40  ;;  %v1427_v9 = vrot.slane %v3219_v1, 7 }
  0x71   : > { %v1202_v53 = vadd.f32 %v1170_v41, %v1134_v15  ;;  %v1443_v42 = vrot.slane %v3221_v5, 7  ;;  %v1600_v28 = vmul.f32 %v2773_v59, %v3219_v1  ;;  %v1630_v18 = vadd.f32 %v1598_v2, %v1562_v7 }
  0x72   : > { %v774_v24 = vadd.f32 %v742_v38, %v706_v4  ;;  %v1659_v0 = vrot.slane %v3219_v1, 1  ;;  %v1675_v60 = vrot.slane %v3221_v5, 1  ;;  %v675_v25 = vmul.f32 %v3133_v37, %v2703_v13 }
  0x73   : > { %v1366_v12 = vadd.f32 %v1334_v14, %v1202_v53  ;;  %v1475_v54 = vsel %vm595_vm2, %v1443_v42, %v1427_v9  ;;  %v743_v49 = vmul.f32 %v3083_v19, %v2706_v17  ;;  %v1794_v11 = vadd.f32 %v1762_v31, %v1630_v18  ;;  %v3283_v53 = vld [vmem:[#allocation2 + $0x80] sm:$0xff] }
  0x74   : > { %v939_v29 = vadd.f32 %v907_v47, %v774_v24  ;;  %v3247_v2 = vsel %vm520_vm1, %v1475_v54, 0.0  ;;  %v3251_v41 = vsel %vm828_vm3, %v1659_v0, %v1675_v60  ;;  %v707_v8 = vadd.f32 %v2712_v20, %v675_v25 }
  0x75   : > { %v1563_v14 = vadd.f32 %v1531_v23, %v1366_v12  ;;  %v1532_v34 = vmul.f32 %v2771_v58, %v3247_v2  ;;  %v1764_v37 = vmul.f32 %v2762_v52, %v3251_v41  ;;  %2555 = vmatprep.mubr.msk.f32.mxu0 %vm474_vm0, %v1794_v11  ;;  %v908_v31 = vmul.f32 %v3143_v16, %v2726_v27 }
  0x76   : > { %v1135_v19 = vadd.f32 %v1103_v39, %v939_v29  ;;  %v1104_v30 = vmul.f32 %v3201_v36, %v2767_v56  ;;  %v1172_v21 = vmul.f32 %v3149_v32, %v2769_v57  ;;  %v775_v3 = vadd.f32 %v743_v49, %v707_v8 }
  0x77   : > { %v1631_v23 = vadd.f32 %v1599_v22, %v1563_v14  ;;  %v1336_v48 = vmul.f32 %v3211_v62, %v2760_v51  ;;  %v3269_v38 = vsel %vm595_vm2, %v1427_v9, %v1443_v42  ;;  %v1601_v16 = vmul.f32 %v2773_v59, %v3221_v5 }
  0x78   : > { %v1203_v40 = vadd.f32 %v1171_v35, %v1135_v19  ;;  %v1533_v15 = vmul.f32 %v2771_v58, %v3269_v38  ;;  %v1707_v47 = vsel %vm828_vm3, %v1675_v60, %v1659_v0  ;;  %v940_v22 = vadd.f32 %v908_v31, %v775_v3  ;;  %v3285_v35 = vld [vmem:[#allocation2 + $0x88] sm:$0xff] }
  0x79   : > { %v1795_v39 = vadd.f32 %v1763_v61, %v1631_v23  ;;  %v3279_v7 = vsel %vm523_vm4, %v1707_v47, 0.0  ;;  %v676_v4 = vmul.f32 %v3177_v33, %v2703_v13  ;;  %v744_v18 = vmul.f32 %v3147_v44, %v2706_v17 }
  0x7a   : > { %v1367_v9 = vadd.f32 %v1335_v63, %v1203_v40  ;;  %v1765_v42 = vmul.f32 %v2762_v52, %v3279_v7  ;;  %v909_v61 = vmul.f32 %v3185_v26, %v2726_v27  ;;  %v1136_v24 = vadd.f32 %v1104_v30, %v940_v22 }
  0x7b   : > { %2556 = vmatmul.mubr.msk.f32.gmra.mxu0 %vm474_vm0, %v1795_v39  ;;  %v708_v0 = vadd.f32 %v2712_v20, %v676_v4  ;;  %v1105_v33 = vmul.f32 %v3247_v2, %v2767_v56  ;;  %v1173_v63 = vmul.f32 %v3219_v1, %v2769_v57  ;;  %v1337_v12 = vmul.f32 %v3251_v41, %v2760_v51 }
  0x7c   : > { %v1564_v60 = vadd.f32 %v1532_v34, %v1367_v9  ;;  %v1428_v44 = vrot.slane %v3283_v53, 7  ;;  %v1444_v54 = vrot.slane %v3285_v35, 7  ;;  %v1204_v26 = vadd.f32 %v1172_v21, %v1136_v24 }
  0x7d   : > { %v776_v25 = vadd.f32 %v744_v18, %v708_v0  ;;  %v1602_v49 = vmul.f32 %v2773_v59, %v3283_v53  ;;  %v1660_v11 = vrot.slane %v3283_v53, 1  ;;  %v1676_v34 = vrot.slane %v3285_v35, 1 }
  0x7e   : > { %v1632_v29 = vadd.f32 %v1600_v28, %v1564_v60  ;;  %v1476_v14 = vsel %vm595_vm2, %v1444_v54, %v1428_v44  ;;  %v677_v8 = vmul.f32 %v3201_v36, %v2703_v13  ;;  %v1368_v19 = vadd.f32 %v1336_v48, %v1204_v26  ;;  %v3355_v26 = vld [vmem:[#allocation2 + $0x98] sm:$0xff] }
  0x7f   : > { %v941_v31 = vadd.f32 %v909_v61, %v776_v25  ;;  %v3313_v30 = vsel %vm520_vm1, %v1476_v14, 0.0  ;;  %v745_v21 = vmul.f32 %v3149_v32, %v2706_v17  ;;  %v3321_v3 = vsel %vm828_vm3, %v1660_v11, %v1676_v34 }
  0x80   : > { %v1796_v23 = vadd.f32 %v1764_v37, %v1632_v29  ;;  %v1534_v28 = vmul.f32 %v2771_v58, %v3313_v30  ;;  %v709_v40 = vadd.f32 %v2712_v20, %v677_v8  ;;  %v1565_v36 = vadd.f32 %v1533_v15, %v1368_v19 }
  0x81   : > { %v1137_v48 = vadd.f32 %v1105_v33, %v941_v31  ;;  %v1766_v47 = vmul.f32 %v2762_v52, %v3321_v3  ;;  %v910_v39 = vmul.f32 %v3211_v62, %v2726_v27  ;;  %v1106_v37 = vmul.f32 %v3269_v38, %v2767_v56 }
  0x82   : > { %2558 = vmatprep.mubr.msk.f32.mxu0 %vm474_vm0, %v1796_v23  ;;  %v777_v32 = vadd.f32 %v745_v21, %v709_v40  ;;  %v1174_v22 = vmul.f32 %v3221_v5, %v2769_v57  ;;  %v1338_v4 = vmul.f32 %v3279_v7, %v2760_v51  ;;  %v1633_v15 = vadd.f32 %v1601_v16, %v1565_v36 }
  0x83   : > { %v1205_v9 = vadd.f32 %v1173_v63, %v1137_v48  ;;  %v3337_v18 = vsel %vm595_vm2, %v1428_v44, %v1444_v54  ;;  %v1603_v62 = vmul.f32 %v2773_v59, %v3285_v35  ;;  %v1708_v0 = vsel %vm828_vm3, %v1676_v34, %v1660_v11  ;;  %v3353_v54 = vld [vmem:[#allocation2 + $0x90] sm:$0xff] }
  0x84   : > { %v942_v61 = vadd.f32 %v910_v39, %v777_v32  ;;  %v1535_v24 = vmul.f32 %v2771_v58, %v3337_v18  ;;  %v678_v33 = vmul.f32 %v3247_v2, %v2703_v13  ;;  %v1797_v60 = vadd.f32 %v1765_v42, %v1633_v15 }
  0x85   : > { %v1369_v16 = vadd.f32 %v1337_v12, %v1205_v9  ;;  %v3349_v63 = vsel %vm523_vm4, %v1708_v0, 0.0  ;;  %v746_v44 = vmul.f32 %v3219_v1, %v2706_v17  ;;  %v911_v2 = vmul.f32 %v3251_v41, %v2726_v27 }
  0x86   : > { %v1138_v25 = vadd.f32 %v1106_v37, %v942_v61  ;;  %v1767_v11 = vmul.f32 %v2762_v52, %v3349_v63  ;;  %v710_v29 = vadd.f32 %v2712_v20, %v678_v33  ;;  %2559 = vmatmul.mubr.msk.f32.gmra.mxu0 %vm474_vm0, %v1797_v60  ;;  %v1107_v12 = vmul.f32 %v3313_v30, %v2767_v56 }
  0x87   : > { %v1566_v42 = vadd.f32 %v1534_v28, %v1369_v16  ;;  %v1175_v1 = vmul.f32 %v3283_v53, %v2769_v57  ;;  %v1339_v14 = vmul.f32 %v3321_v3, %v2760_v51  ;;  %v1429_v19 = vrot.slane %v3353_v54, 7 }
  0x88   : > { %v1206_v34 = vadd.f32 %v1174_v22, %v1138_v25  ;;  %v778_v8 = vadd.f32 %v746_v44, %v710_v29  ;;  %v1445_v20 = vrot.slane %v3355_v26, 7  ;;  %v1604_v41 = vmul.f32 %v2773_v59, %v3353_v54 }
  0x89   : > { %v1634_v31 = vadd.f32 %v1602_v49, %v1566_v42  ;;  %v1661_v21 = vrot.slane %v3353_v54, 1  ;;  %v1677_v23 = vrot.slane %v3355_v26, 1  ;;  %v679_v48 = vmul.f32 %v3269_v38, %v2703_v13 }
  0x8a   : > { %v1370_v28 = vadd.f32 %v1338_v4, %v1206_v34  ;;  %v943_v40 = vadd.f32 %v911_v2, %v778_v8  ;;  %v1477_v36 = vsel %vm595_vm2, %v1445_v20, %v1429_v19  ;;  %v747_v37 = vmul.f32 %v3221_v5, %v2706_v17  ;;  %v3426_v34 = vld [vmem:[#allocation2 + $0xa8] sm:$0xff] }
  0x8b   : > { %v1798_v39 = vadd.f32 %v1766_v47, %v1634_v31  ;;  %v3381_v32 = vsel %vm520_vm1, %v1477_v36, 0.0  ;;  %v3385_v49 = vsel %vm828_vm3, %v1661_v21, %v1677_v23  ;;  %v3397_v47 = vld [vmem:[%s4085_s3] ss:$0 sm:$0xff]  ;;  %v912_v5 = vmul.f32 %v3279_v7, %v2726_v27 }
  0x8c   : > { %v1567_v22 = vadd.f32 %v1535_v24, %v1370_v28  ;;  %v1139_v4 = vadd.f32 %v1107_v12, %v943_v40  ;;  %v1536_v15 = vmul.f32 %v2771_v58, %v3381_v32  ;;  %v1768_v38 = vmul.f32 %v2762_v52, %v3385_v49 }
  0x8d   : > { %2561 = vmatprep.mubr.msk.f32.mxu0 %vm474_vm0, %v1798_v39  ;;  %v711_v9 = vadd.f32 %v3397_v47, %v679_v48  ;;  %v1108_v61 = vmul.f32 %v3337_v18, %v2767_v56  ;;  %v1176_v24 = vmul.f32 %v3285_v35, %v2769_v57  ;;  %v1340_v60 = vmul.f32 %v3349_v63, %v2760_v51 }
  0x8e   : > { %v1635_v0 = vadd.f32 %v1603_v62, %v1567_v22  ;;  %v1207_v33 = vadd.f32 %v1175_v1, %v1139_v4  ;;  %v3410_v16 = vsel %vm595_vm2, %v1429_v19, %v1445_v20  ;;  %v1605_v7 = vmul.f32 %v2773_v59, %v3355_v26  ;;  %v3424_v1 = vld [vmem:[#allocation2 + $0xa0] sm:$0xff] }
  0x8f   : > { %v779_v44 = vadd.f32 %v747_v37, %v711_v9  ;;  %v1537_v25 = vmul.f32 %v2771_v58, %v3410_v16  ;;  %v1709_v29 = vsel %vm828_vm3, %v1677_v23, %v1661_v21  ;;  %v680_v12 = vmul.f32 %v3313_v30, %v2703_v13 }
  0x90   : > { %v1799_v2 = vadd.f32 %v1767_v11, %v1635_v0  ;;  %v1371_v62 = vadd.f32 %v1339_v14, %v1207_v33  ;;  %v3420_v42 = vsel %vm523_vm4, %v1709_v29, 0.0  ;;  %v748_v20 = vmul.f32 %v3283_v53, %v2706_v17 }
  0x91   : > { %v944_v8 = vadd.f32 %v912_v5, %v779_v44  ;;  %v1769_v19 = vmul.f32 %v2762_v52, %v3420_v42  ;;  %v913_v11 = vmul.f32 %v3321_v3, %v2726_v27  ;;  %v712_v31 = vadd.f32 %v3397_v47, %v680_v12 }
  0x92   : > { %2562 = vmatmul.mubr.msk.f32.gmra.mxu0 %vm474_vm0, %v1799_v2  ;;  %v1568_v14 = vadd.f32 %v1536_v15, %v1371_v62  ;;  %v1109_v30 = vmul.f32 %v3381_v32, %v2767_v56  ;;  %v1177_v21 = vmul.f32 %v3353_v54, %v2769_v57  ;;  %v1341_v28 = vmul.f32 %v3385_v49, %v2760_v51 }
  0x93   : > { %v1140_v23 = vadd.f32 %v1108_v61, %v944_v8  ;;  %v1430_v53 = vrot.slane %v3424_v1, 7  ;;  %v1446_v40 = vrot.slane %v3426_v34, 7  ;;  %v780_v36 = vadd.f32 %v748_v20, %v712_v31 }
  0x94   : > { %v1636_v3 = vadd.f32 %v1604_v41, %v1568_v14  ;;  %v1606_v48 = vmul.f32 %v2773_v59, %v3424_v1  ;;  %v1662_v39 = vrot.slane %v3424_v1, 1  ;;  %v1678_v4 = vrot.slane %v3426_v34, 1 }
  0x95   : > { %v1208_v37 = vadd.f32 %v1176_v24, %v1140_v23  ;;  %v1478_v22 = vsel %vm595_vm2, %v1446_v40, %v1430_v53  ;;  %v681_v15 = vmul.f32 %v3337_v18, %v2703_v13  ;;  %v945_v5 = vadd.f32 %v913_v11, %v780_v36 }
  0x96   : > { %v1800_v9 = vadd.f32 %v1768_v38, %v1636_v3  ;;  %v3454_v41 = vsel %vm520_vm1, %v1478_v22, 0.0  ;;  %v749_v61 = vmul.f32 %v3285_v35, %v2706_v17  ;;  %v3462_v33 = vsel %vm828_vm3, %v1662_v39, %v1678_v4  ;;  %v3496_v3 = vld [vmem:[#allocation2 + $0xb0] sm:$0xff] }
  0x97   : > { %v1372_v0 = vadd.f32 %v1340_v60, %v1208_v37  ;;  %v1538_v24 = vmul.f32 %v2771_v58, %v3454_v41  ;;  %v713_v44 = vadd.f32 %v3397_v47, %v681_v15  ;;  %v1141_v18 = vadd.f32 %v1109_v30, %v945_v5 }
  0x98   : > { %2564 = vmatprep.mubr.msk.f32.mxu0 %vm474_vm0, %v1800_v9  ;;  %v1770_v38 = vmul.f32 %v2762_v52, %v3462_v33  ;;  %v914_v29 = vmul.f32 %v3349_v63, %v2726_v27  ;;  %v1110_v35 = vmul.f32 %v3410_v16, %v2767_v56  ;;  %v1178_v62 = vmul.f32 %v3355_v26, %v2769_v57 }
  0x99   : > { %v1569_v60 = vadd.f32 %v1537_v25, %v1372_v0  ;;  %v781_v2 = vadd.f32 %v749_v61, %v713_v44  ;;  %v1342_v12 = vmul.f32 %v3420_v42, %v2760_v51  ;;  %v1209_v8 = vadd.f32 %v1177_v21, %v1141_v18 }
  0x9a   : > { %v3478_v20 = vsel %vm595_vm2, %v1430_v53, %v1446_v40  ;;  %v1607_v11 = vmul.f32 %v2773_v59, %v3426_v34  ;;  %v1710_v63 = vsel %vm828_vm3, %v1678_v4, %v1662_v39  ;;  %v682_v53 = vmul.f32 %v3381_v32, %v2703_v13 }
  0x9b   : > { %v1637_v14 = vadd.f32 %v1605_v7, %v1569_v60  ;;  %v946_v25 = vadd.f32 %v914_v29, %v781_v2  ;;  %v1539_v31 = vmul.f32 %v2771_v58, %v3478_v20  ;;  %v3488_v30 = vsel %vm523_vm4, %v1710_v63, 0.0  ;;  %v3498_v7 = vld [vmem:[#allocation2 + $0xb8] sm:$0xff] }
  0x9c   : > { %v1373_v21 = vadd.f32 %v1341_v28, %v1209_v8  ;;  %v1771_v23 = vmul.f32 %v2762_v52, %v3488_v30  ;;  %v750_v40 = vmul.f32 %v3353_v54, %v2706_v17  ;;  %v915_v37 = vmul.f32 %v3385_v49, %v2726_v27 }
  0x9d   : > { %v1801_v36 = vadd.f32 %v1769_v19, %v1637_v14  ;;  %v1142_v39 = vadd.f32 %v1110_v35, %v946_v25  ;;  %v1111_v28 = vmul.f32 %v3454_v41, %v2767_v56  ;;  %v714_v4 = vadd.f32 %v3397_v47, %v682_v53 }
  0x9e   : > { %v1570_v22 = vadd.f32 %v1538_v24, %v1373_v21  ;;  %v1179_v32 = vmul.f32 %v3424_v1, %v2769_v57  ;;  %v1343_v54 = vmul.f32 %v3462_v33, %v2760_v51  ;;  %v1431_v19 = vrot.slane %v3496_v3, 7 }
  0x9f   : > { %2565 = vmatmul.mubr.msk.f32.gmra.mxu0 %vm474_vm0, %v1801_v36  ;;  %v1210_v15 = vadd.f32 %v1178_v62, %v1142_v39  ;;  %v1447_v9 = vrot.slane %v3498_v7, 7  ;;  %v1608_v49 = vmul.f32 %v2773_v59, %v3496_v3  ;;  %v782_v61 = vadd.f32 %v750_v40, %v714_v4 }
  0xa0   : > { %v1638_v5 = vadd.f32 %v1606_v48, %v1570_v22  ;;  %v1663_v0 = vrot.slane %v3496_v3, 1  ;;  %v1679_v24 = vrot.slane %v3498_v7, 1  ;;  %v683_v29 = vmul.f32 %v3410_v16, %v2703_v13 }
  0xa1   : > { %v1374_v44 = vadd.f32 %v1342_v12, %v1210_v15  ;;  %v1479_v18 = vsel %vm595_vm2, %v1447_v9, %v1431_v19  ;;  %v751_v35 = vmul.f32 %v3355_v26, %v2706_v17  ;;  %v947_v2 = vadd.f32 %v915_v37, %v782_v61  ;;  %v3553_v15 = vld [vmem:[#allocation2 + $0xc0] sm:$0xff] }
  0xa2   : > { %v1802_v60 = vadd.f32 %v1770_v38, %v1638_v5  ;;  %v1504_v48 = vsel %vm520_vm1, %v1479_v18, 0.0  ;;  %v1695_v62 = vsel %vm828_vm3, %v1663_v0, %v1679_v24  ;;  %v715_v14 = vadd.f32 %v3397_v47, %v683_v29 }
  0xa3   : > { %v1571_v8 = vadd.f32 %v1539_v31, %v1374_v44  ;;  %v1540_v12 = vmul.f32 %v2771_v58, %v1504_v48  ;;  %v1772_v63 = vmul.f32 %v2762_v52, %v1695_v62  ;;  %v1143_v16 = vadd.f32 %v1111_v28, %v947_v2 }
  0xa4   : > { %2567 = vmatprep.mubr.msk.f32.mxu1 %vm474_vm0, %v1802_v60  ;;  %v916_v26 = vmul.f32 %v3420_v42, %v2726_v27  ;;  %v1112_v38 = vmul.f32 %v3478_v20, %v2767_v56  ;;  %v1180_v25 = vmul.f32 %v3426_v34, %v2769_v57  ;;  %v783_v31 = vadd.f32 %v751_v35, %v715_v14 }
  0xa5   : > { %v1639_v21 = vadd.f32 %v1607_v11, %v1571_v8  ;;  %v1344_v53 = vmul.f32 %v3488_v30, %v2760_v51  ;;  %v3540_v40 = vsel %vm595_vm2, %v1431_v19, %v1447_v9  ;;  %v1211_v36 = vadd.f32 %v1179_v32, %v1143_v16 }
  0xa6   : > { %v1541_v39 = vmul.f32 %v2771_v58, %v3540_v40  ;;  %v1609_v42 = vmul.f32 %v2773_v59, %v3498_v7  ;;  %v1711_v37 = vsel %vm828_vm3, %v1679_v24, %v1663_v0  ;;  %v948_v11 = vadd.f32 %v916_v26, %v783_v31 }
  0xa7   : > { %v1803_v28 = vadd.f32 %v1771_v23, %v1639_v21  ;;  %v3550_v22 = vsel %vm523_vm4, %v1711_v37, 0.0  ;;  %v465_v4 = vmax.f32 %v2871_v43, 0.0  ;;  %v1375_v32 = vadd.f32 %v1343_v54, %v1211_v36 }
  0xa8   : > { %v1773_v19 = vmul.f32 %v2762_v52, %v3550_v22  ;;  %v684_v9 = vmul.f32 %v3454_v41, %v2703_v13  ;;  %v752_v5 = vmul.f32 %v3424_v1, %v2706_v17  ;;  %v1144_v23 = vadd.f32 %v1112_v38, %v948_v11 }
  0xa9   : > { %2568 = vmatmul.mubr.msk.f32.vlgmr.msra.gmra.mxu1 %vm474_vm0, %v1803_v28  ;;  %504 = vst.msk [vmem:[#allocation2 + $0xc8] sm:$0xff] %vm474_vm0, %v465_v4  ;;  %v917_v43 = vmul.f32 %v3462_v33, %v2726_v27  ;;  %v1113_v61 = vmul.f32 %v1504_v48, %v2767_v56  ;;  %v1181_v54 = vmul.f32 %v3496_v3, %v2769_v57  ;;  %v1432_v1 = vrot.slane %v3553_v15, 7 }
  0xaa   : > { %v1572_v0 = vadd.f32 %v1540_v12, %v1375_v32  ;;  %v716_v24 = vadd.f32 %v3397_v47, %v684_v9  ;;  %v1345_v41 = vmul.f32 %v1695_v62, %v2760_v51  ;;  %v1212_v44 = vadd.f32 %v1180_v25, %v1144_v23 }
  0xab   : > { %v1610_v18 = vmul.f32 %v2773_v59, %v3553_v15  ;;  %v1664_v29 = vrot.slane %v3553_v15, 1  ;;  %v685_v33 = vmul.f32 %v3478_v20, %v2703_v13  ;;  %v753_v2 = vmul.f32 %v3426_v34, %v2706_v17 }
  0xac   : > { %v1640_v35 = vadd.f32 %v1608_v49, %v1572_v0  ;;  %v784_v60 = vadd.f32 %v752_v5, %v716_v24  ;;  %v918_v8 = vmul.f32 %v3488_v30, %v2726_v27  ;;  %v1376_v12 = vadd.f32 %v1344_v53, %v1212_v44 }
  0xad   : > { %v717_v14 = vadd.f32 %v3397_v47, %v685_v33  ;;  %v1114_v16 = vmul.f32 %v3540_v40, %v2767_v56  ;;  %v1182_v26 = vmul.f32 %v3498_v7, %v2769_v57  ;;  %v1346_v20 = vmul.f32 %v3550_v22, %v2760_v51 }
  0xae   : > { %v1804_v38 = vadd.f32 %v1772_v63, %v1640_v35  ;;  %v949_v25 = vadd.f32 %v917_v43, %v784_v60  ;;  %v435_v34 = vadd.f32 %v2818_v45, %v2829_v55  ;;  %v1573_v49 = vadd.f32 %v1541_v39, %v1376_v12 }
  0xaf   : > { %v785_v21 = vadd.f32 %v753_v2, %v717_v14  ;;  %v466_v30 = vmax.f32 %v2879_v46, 0.0  ;;  %v686_v31 = vmul.f32 %v1504_v48, %v2703_v13  ;;  %v754_v63 = vmul.f32 %v3496_v3, %v2706_v17 }
  0xb0   : > { %2570 = vmatprep.mubr.msk.f32.mxu1 %vm474_vm0, %v1804_v38  ;;  %v1145_v53 = vadd.f32 %v1113_v61, %v949_v25  ;;  %v3592_v36 = vld [vmem:[#allocation2 + $0xc8] sm:$0xff]  ;;  %v467_v37 = vmax.f32 %v435_v34, 0.0  ;;  %v919_v28 = vmul.f32 %v1695_v62, %v2726_v27  ;;  %v1641_v11 = vadd.f32 %v1609_v42, %v1573_v49 }
  0xb1   : > { %v1448_v55 = vrot.slane %v3592_v36, 7  ;;  %v1680_v39 = vrot.slane %v3592_v36, 1  ;;  %v950_v4 = vadd.f32 %v918_v8, %v785_v21  ;;  %505 = vst.msk [vmem:[#allocation2 + $0xd0] sm:$0xff] %vm474_vm0, %v466_v30  ;;  %v1611_v48 = vmul.f32 %v2773_v59, %v3592_v36 }
  0xb2   : > { %v1213_v46 = vadd.f32 %v1181_v54, %v1145_v53  ;;  %506 = vst.msk [vmem:[#allocation2 + $0xd8] sm:$0xff] %vm474_vm0, %v467_v37  ;;  %v718_v32 = vadd.f32 %v3397_v47, %v686_v31  ;;  %v1183_v3 = vmul.f32 %v3553_v15, %v2769_v57  ;;  %v1805_v62 = vadd.f32 %v1773_v19, %v1641_v11 }
  0xb3   : > { %v1480_v42 = vsel %vm595_vm2, %v1448_v55, %v1432_v1  ;;  %v3610_v9 = vsel %vm828_vm3, %v1664_v29, %v1680_v39  ;;  %v1146_v5 = vadd.f32 %v1114_v16, %v950_v4  ;;  %v3618_v54 = vsel %vm595_vm2, %v1432_v1, %v1448_v55 }
  0xb4   : > { %v1377_v23 = vadd.f32 %v1345_v41, %v1213_v46  ;;  %v1506_v43 = vsel %vm520_vm1, %v1480_v42, 0.0  ;;  %v1774_v61 = vmul.f32 %v2762_v52, %v3610_v9  ;;  %2571 = vmatmul.mubr.msk.f32.gmra.mxu1 %vm474_vm0, %v1805_v62  ;;  %v1543_v24 = vmul.f32 %v2771_v58, %v3618_v54 }
  0xb5   : > { %v1542_v19 = vmul.f32 %v2771_v58, %v1506_v43  ;;  %v1214_v0 = vadd.f32 %v1182_v26, %v1146_v5  ;;  %v1712_v41 = vsel %vm828_vm3, %v1680_v39, %v1664_v29  ;;  %v786_v33 = vadd.f32 %v754_v63, %v718_v32  ;;  %v364_v39 = vld [vmem:[%s2738_s20 + $0xd0] sm:$0xff] }
  0xb6   : > { %v3628_v44 = vsel %vm523_vm4, %v1712_v41, 0.0  ;;  %v1115_v35 = vmul.f32 %v1506_v43, %v2767_v56  ;;  %v1347_v1 = vmul.f32 %v3610_v9, %v2760_v51  ;;  %v687_v12 = vmul.f32 %v3540_v40, %v2703_v13 }
  0xb7   : > { %v1574_v60 = vadd.f32 %v1542_v19, %v1377_v23  ;;  %v1378_v2 = vadd.f32 %v1346_v20, %v1214_v0  ;;  %v1775_v8 = vmul.f32 %v2762_v52, %v3628_v44  ;;  %v951_v14 = vadd.f32 %v919_v28, %v786_v33 }
  0xb8   : > { %v3637_v29 = vld [vmem:[#allocation2 + $0xd0] sm:$0xff]  ;;  %v755_v16 = vmul.f32 %v3498_v7, %v2706_v17  ;;  %v920_v26 = vmul.f32 %v3550_v22, %v2726_v27  ;;  %v1116_v38 = vmul.f32 %v3618_v54, %v2767_v56  ;;  %v1184_v37 = vmul.f32 %v3592_v36, %v2769_v57 }
  0xb9   : > { %v1642_v25 = vadd.f32 %v1610_v18, %v1574_v60  ;;  %v1575_v20 = vadd.f32 %v1543_v24, %v1378_v2  ;;  %v3645_v34 = vld [vmem:[#allocation2 + $0xd8] sm:$0xff]  ;;  %v1433_v49 = vrot.slane %v3637_v29, 7  ;;  %v1612_v40 = vmul.f32 %v2773_v59, %v3637_v29 }
  0xba   : > { %v1147_v21 = vadd.f32 %v1115_v35, %v951_v14  ;;  %v1449_v30 = vrot.slane %v3645_v34, 7  ;;  %v1665_v7 = vrot.slane %v3637_v29, 1  ;;  %v1681_v22 = vrot.slane %v3645_v34, 1 }
  0xbb   : > { %v1806_v31 = vadd.f32 %v1774_v61, %v1642_v25  ;;  %v1643_v53 = vadd.f32 %v1611_v48, %v1575_v20  ;;  %v719_v18 = vadd.f32 %v3397_v47, %v687_v12  ;;  %v1348_v55 = vmul.f32 %v3628_v44, %v2760_v51 }
  0xbc   : > { %v1215_v63 = vadd.f32 %v1183_v3, %v1147_v21  ;;  %v1481_v28 = vsel %vm595_vm2, %v1449_v30, %v1433_v49  ;;  %v1697_v11 = vsel %vm828_vm3, %v1665_v7, %v1681_v22  ;;  %v365_v3 = vld [vmem:[%s2738_s20 + $0xd8] sm:$0xff]  ;;  %v1465_v5 = vsel %vm595_vm2, %v1433_v49, %v1449_v30 }
  0xbd   : > { %2573 = vmatprep.mubr.msk.f32.mxu1 %vm474_vm0, %v1806_v31  ;;  %v1807_v4 = vadd.f32 %v1775_v8, %v1643_v53  ;;  %v1508_v46 = vsel %vm520_vm1, %v1481_v28, 0.0  ;;  %v1776_v48 = vmul.f32 %v2762_v52, %v1697_v11  ;;  %v787_v32 = vadd.f32 %v755_v16, %v719_v18 }
  0xbe   : > { %v1379_v62 = vadd.f32 %v1347_v1, %v1215_v63  ;;  %v1544_v42 = vmul.f32 %v2771_v58, %v1508_v46  ;;  %v1613_v23 = vmul.f32 %v2773_v59, %v3645_v34  ;;  %v1545_v19 = vmul.f32 %v2771_v58, %v1465_v5 }
  0xbf   : > { %2574 = vmatmul.mubr.msk.f32.gmra.mxu1 %vm474_vm0, %v1807_v4  ;;  %v952_v61 = vadd.f32 %v920_v26, %v787_v32  ;;  %v1713_v0 = vsel %vm828_vm3, %v1681_v22, %v1665_v7  ;;  %v400_v24 = vmul.f32 %v2758_v50, %v364_v39  ;;  %v401_v35 = vmul.f32 %v2758_v50, %v365_v3  ;;  %v367_v22 = vld [vmem:[%s2738_s20 + $0xe8] sm:$0xff] }
  0xc0   : > { %v1576_v41 = vadd.f32 %v1544_v42, %v1379_v62  ;;  %v1741_v33 = vsel %vm523_vm4, %v1713_v0, 0.0  ;;  %v688_v1 = vmul.f32 %v1506_v43, %v2703_v13  ;;  %v756_v12 = vmul.f32 %v3553_v15, %v2706_v17 }
  0xc1   : > { %v1148_v60 = vadd.f32 %v1116_v38, %v952_v61  ;;  %v1777_v2 = vmul.f32 %v2762_v52, %v1741_v33  ;;  %v436_v8 = vadd.f32 %v2818_v45, %v400_v24  ;;  %v437_v16 = vadd.f32 %v2818_v45, %v401_v35 }
  0xc2   : > { %v1644_v14 = vadd.f32 %v1612_v40, %v1576_v41  ;;  %v720_v26 = vadd.f32 %v3397_v47, %v688_v1  ;;  %v921_v25 = vmul.f32 %v3610_v9, %v2726_v27  ;;  %v1117_v38 = vmul.f32 %v1508_v46, %v2767_v56  ;;  %v366_v40 = vld [vmem:[%s2738_s20 + $0xe0] sm:$0xff] }
  0xc3   : > { %v1216_v20 = vadd.f32 %v1184_v37, %v1148_v60  ;;  %v468_v43 = vmax.f32 %v436_v8, 0.0  ;;  %v1185_v49 = vmul.f32 %v3637_v29, %v2769_v57  ;;  %v469_v30 = vmax.f32 %v437_v16, 0.0 }
  0xc4   : > { %v1808_v21 = vadd.f32 %v1776_v48, %v1644_v14  ;;  %v788_v7 = vadd.f32 %v756_v12, %v720_v26  ;;  %v1349_v15 = vmul.f32 %v1697_v11, %v2760_v51  ;;  %v689_v9 = vmul.f32 %v3618_v54, %v2703_v13 }
  0xc5   : > { %v1380_v31 = vadd.f32 %v1348_v55, %v1216_v20  ;;  %507 = vst.msk [vmem:[#allocation2 + $0xe0] sm:$0xff] %vm474_vm0, %v468_v43  ;;  %v757_v53 = vmul.f32 %v3592_v36, %v2706_v17  ;;  %v922_v18 = vmul.f32 %v3628_v44, %v2726_v27  ;;  %508 = vst.msk [vmem:[#allocation2 + $0xe8] sm:$0xff] %vm474_vm0, %v469_v30 }
  0xc6   : > { %2576 = vmatprep.mubr.msk.f32.mxu1 %vm474_vm0, %v1808_v21  ;;  %v953_v37 = vadd.f32 %v921_v25, %v788_v7  ;;  %v1118_v63 = vmul.f32 %v1465_v5, %v2767_v56  ;;  %v1186_v28 = vmul.f32 %v3645_v34, %v2769_v57  ;;  %v1350_v55 = vmul.f32 %v1741_v33, %v2760_v51 }
  0xc7   : > { %v1577_v39 = vadd.f32 %v1545_v19, %v1380_v31  ;;  %v721_v54 = vadd.f32 %v3397_v47, %v689_v9  ;;  %v402_v36 = vmul.f32 %v2758_v50, %v366_v40  ;;  %v403_v4 = vmul.f32 %v2758_v50, %v367_v22 }
  0xc8   : > { %v1149_v44 = vadd.f32 %v1117_v38, %v953_v37  ;;  %v690_v48 = vmul.f32 %v1508_v46, %v2703_v13  ;;  %v758_v32 = vmul.f32 %v3637_v29, %v2706_v17  ;;  %v923_v3 = vmul.f32 %v1697_v11, %v2726_v27  ;;  %v368_v37 = vld [vmem:[%s2738_s20 + $0xf0] sm:$0xff] }
  0xc9   : > { %v1645_v62 = vadd.f32 %v1613_v23, %v1577_v39  ;;  %v789_v42 = vadd.f32 %v757_v53, %v721_v54  ;;  %v438_v61 = vadd.f32 %v2818_v45, %v402_v36  ;;  %v439_v19 = vadd.f32 %v2818_v45, %v403_v4 }
  0xca   : > { %v1217_v0 = vadd.f32 %v1185_v49, %v1149_v44  ;;  %v722_v24 = vadd.f32 %v3397_v47, %v690_v48  ;;  %v691_v41 = vmul.f32 %v1465_v5, %v2703_v13  ;;  %v759_v35 = vmul.f32 %v3645_v34, %v2706_v17 }
  0xcb   : > { %v1809_v46 = vadd.f32 %v1777_v2, %v1645_v62  ;;  %v954_v1 = vadd.f32 %v922_v18, %v789_v42  ;;  %v470_v60 = vmax.f32 %v438_v61, 0.0  ;;  %v471_v29 = vmax.f32 %v439_v19, 0.0 }
  0xcc   : > { %v1381_v8 = vadd.f32 %v1349_v15, %v1217_v0  ;;  %v3722_v11 = vld [vmem:[#allocation2 + $0xe0] sm:$0xff]  ;;  %v790_v23 = vadd.f32 %v758_v32, %v722_v24  ;;  %v723_v12 = vadd.f32 %v3397_v47, %v691_v41  ;;  %v924_v14 = vmul.f32 %v1741_v33, %v2726_v27  ;;  %v3727_v16 = vld [vmem:[#allocation2 + $0xe8] sm:$0xff] }
  0xcd   : > { %2577 = vmatmul.mubr.msk.f32.gmra.mxu1 %vm474_vm0, %v1809_v46  ;;  %v1434_v5 = vrot.slane %v3722_v11, 7  ;;  %v1614_v34 = vmul.f32 %v2773_v59, %v3722_v11  ;;  %v1666_v2 = vrot.slane %v3722_v11, 1  ;;  %v1150_v26 = vadd.f32 %v1118_v63, %v954_v1  ;;  %509 = vst.msk [vmem:[#allocation2 + $0xf0] sm:$0xff] %vm474_vm0, %v470_v60  ;;  %510 = vst.msk [vmem:[#allocation2 + $0xf8] sm:$0xff] %vm474_vm0, %v471_v29 }
  0xce   : > { %v1450_v25 = vrot.slane %v3727_v16, 7  ;;  %v1682_v33 = vrot.slane %v3727_v16, 1  ;;  %v1615_v20 = vmul.f32 %v2773_v59, %v3727_v16  ;;  %v955_v43 = vadd.f32 %v923_v3, %v790_v23 }
  0xcf   : > { %v1218_v38 = vadd.f32 %v1186_v28, %v1150_v26  ;;  %v1187_v49 = vmul.f32 %v3722_v11, %v2769_v57  ;;  %v791_v21 = vadd.f32 %v759_v35, %v723_v12  ;;  %v1188_v30 = vmul.f32 %v3727_v16, %v2769_v57 }
  0xd0   : > { %v1482_v7 = vsel %vm595_vm2, %v1450_v25, %v1434_v5  ;;  %v1698_v15 = vsel %vm828_vm3, %v1666_v2, %v1682_v33  ;;  %v3749_v40 = vsel %vm595_vm2, %v1434_v5, %v1450_v25  ;;  %v1714_v22 = vsel %vm828_vm3, %v1682_v33, %v1666_v2 }
  0xd1   : > { %v1510_v31 = vsel %vm520_vm1, %v1482_v7, 0.0  ;;  %v1778_v9 = vmul.f32 %v2762_v52, %v1698_v15  ;;  %v1382_v53 = vadd.f32 %v1350_v55, %v1218_v38  ;;  %v1547_v18 = vmul.f32 %v2771_v58, %v3749_v40 }
  0xd2   : > { %v1546_v63 = vmul.f32 %v2771_v58, %v1510_v31  ;;  %v3762_v28 = vsel %vm523_vm4, %v1714_v22, 0.0  ;;  %v1119_v39 = vmul.f32 %v1510_v31, %v2767_v56  ;;  %v1351_v54 = vmul.f32 %v1698_v15, %v2760_v51 }
  0xd3   : > { %v1579_v36 = vadd.f32 %v1547_v18, %v1382_v53  ;;  %v1779_v4 = vmul.f32 %v2762_v52, %v3762_v28  ;;  %v956_v44 = vadd.f32 %v924_v14, %v791_v21  ;;  %v1120_v55 = vmul.f32 %v3749_v40, %v2767_v56  ;;  %v369_v14 = vld [vmem:[%s2738_s20 + $0xf8] sm:$0xff] }
  0xd4   : > { %v1578_v48 = vadd.f32 %v1546_v63, %v1381_v8  ;;  %v1151_v32 = vadd.f32 %v1119_v39, %v955_v43  ;;  %v1416_v3 = vld [vmem:[#allocation2 + $0xf0] sm:$0xff]  ;;  %v3770_v62 = vld [vmem:[#allocation2 + $0xf8] sm:$0xff]  ;;  %v1352_v42 = vmul.f32 %v3762_v28, %v2760_v51  ;;  %v404_v61 = vmul.f32 %v2758_v50, %v368_v37 }
  0xd5   : > { %v1647_v19 = vadd.f32 %v1615_v20, %v1579_v36  ;;  %v1435_v0 = vrot.slane %v1416_v3, 7  ;;  %v1451_v24 = vrot.slane %v3770_v62, 7  ;;  %v1616_v41 = vmul.f32 %v2773_v59, %v1416_v3 }
  0xd6   : > { %v1646_v35 = vadd.f32 %v1614_v34, %v1578_v48  ;;  %v1219_v46 = vadd.f32 %v1187_v49, %v1151_v32  ;;  %v1667_v1 = vrot.slane %v1416_v3, 1  ;;  %v1683_v60 = vrot.slane %v3770_v62, 1 }
  0xd7   : > { %v1811_v29 = vadd.f32 %v1779_v4, %v1647_v19  ;;  %v1483_v8 = vsel %vm595_vm2, %v1451_v24, %v1435_v0  ;;  %v1152_v23 = vadd.f32 %v1120_v55, %v956_v44  ;;  %v1467_v12 = vsel %vm595_vm2, %v1435_v0, %v1451_v24 }
  0xd8   : > { %v1810_v5 = vadd.f32 %v1778_v9, %v1646_v35  ;;  %v1383_v2 = vadd.f32 %v1351_v54, %v1219_v46  ;;  %v1512_v26 = vsel %vm520_vm1, %v1483_v8, 0.0  ;;  %v1699_v34 = vsel %vm828_vm3, %v1667_v1, %v1683_v60 }
  0xd9   : > { %v1548_v25 = vmul.f32 %v2771_v58, %v1512_v26  ;;  %v1780_v33 = vmul.f32 %v2762_v52, %v1699_v34  ;;  %v1220_v20 = vadd.f32 %v1188_v30, %v1152_v23  ;;  %v1549_v43 = vmul.f32 %v2771_v58, %v1467_v12 }
  0xda   : > { %2579 = vmatprep.mubr.msk.f32.mxu1 %vm474_vm0, %v1810_v5  ;;  %v1617_v38 = vmul.f32 %v2773_v59, %v3770_v62  ;;  %v1715_v49 = vsel %vm828_vm3, %v1683_v60, %v1667_v1  ;;  %v405_v21 = vmul.f32 %v2758_v50, %v369_v14  ;;  %v440_v7 = vadd.f32 %v2818_v45, %v404_v61  ;;  %v3820_v61 = vld [vmem:[#allocation2 + $0x118] sm:$0xff] }
  0xdb   : > { %2580 = vmatmul.mubr.msk.f32.gmra.mxu1 %vm474_vm0, %v1811_v29  ;;  %v1580_v22 = vadd.f32 %v1548_v25, %v1383_v2  ;;  %v1384_v9 = vadd.f32 %v1352_v42, %v1220_v20  ;;  %v3800_v30 = vsel %vm523_vm4, %v1715_v49, 0.0  ;;  %v692_v53 = vmul.f32 %v1510_v31, %v2703_v13  ;;  %v3814_v42 = vld [vmem:[#allocation2 + $0x110] sm:$0xff] }
  0xdc   : > { %v1781_v18 = vmul.f32 %v2762_v52, %v3800_v30  ;;  %v441_v37 = vadd.f32 %v2818_v45, %v405_v21  ;;  %v472_v63 = vmax.f32 %v440_v7, 0.0  ;;  %v760_v50 = vmul.f32 %v3722_v11, %v2706_v17 }
  0xdd   : > { %v1648_v39 = vadd.f32 %v1616_v41, %v1580_v22  ;;  %v1581_v54 = vadd.f32 %v1549_v43, %v1384_v9  ;;  %v724_v36 = vadd.f32 %v3397_v47, %v692_v53  ;;  %v925_v4 = vmul.f32 %v1698_v15, %v2726_v27 }
  0xde   : > { %v473_v44 = vmax.f32 %v441_v37, 0.0  ;;  %511 = vst.msk [vmem:[#allocation2 + $0x100] sm:$0xff] %vm474_vm0, %v472_v63  ;;  %v1121_v31 = vmul.f32 %v1512_v26, %v2767_v56  ;;  %v693_v45 = vmul.f32 %v3749_v40, %v2703_v13  ;;  %v1189_v11 = vmul.f32 %v1416_v3, %v2769_v57 }
  0xdf   : > { %v1812_v55 = vadd.f32 %v1780_v33, %v1648_v39  ;;  %v1649_v48 = vadd.f32 %v1617_v38, %v1581_v54  ;;  %v792_v32 = vadd.f32 %v760_v50, %v724_v36  ;;  %v761_v15 = vmul.f32 %v3727_v16, %v2706_v17 }
  0xe0   : > { %512 = vst.msk [vmem:[#allocation2 + $0x108] sm:$0xff] %vm474_vm0, %v473_v44  ;;  %v725_v24 = vadd.f32 %v3397_v47, %v693_v45  ;;  %v926_v40 = vmul.f32 %v3762_v28, %v2726_v27  ;;  %v1353_v41 = vmul.f32 %v1699_v34, %v2760_v51  ;;  %v694_v35 = vmul.f32 %v1512_v26, %v2703_v13 }
  0xe1   : > { %2582 = vmatprep.mubr.msk.f32.mxu1 %vm474_vm0, %v1812_v55  ;;  %v1813_v19 = vadd.f32 %v1781_v18, %v1649_v48  ;;  %v957_v0 = vadd.f32 %v925_v4, %v792_v32  ;;  %v762_v46 = vmul.f32 %v1416_v3, %v2706_v17  ;;  %v1437_v1 = vrot.slane %v3814_v42, 7 }
  0xe2   : > { %v793_v60 = vadd.f32 %v761_v15, %v725_v24  ;;  %v1122_v29 = vmul.f32 %v1467_v12, %v2767_v56  ;;  %v1453_v8 = vrot.slane %v3820_v61, 7  ;;  %v1190_v23 = vmul.f32 %v3770_v62, %v2769_v57 }
  0xe3   : > { %2583 = vmatmul.mubr.msk.f32.gmra.mxu1 %vm474_vm0, %v1813_v19  ;;  %v1153_v16 = vadd.f32 %v1121_v31, %v957_v0  ;;  %v1354_v28 = vmul.f32 %v3800_v30, %v2760_v51  ;;  %v726_v14 = vadd.f32 %v3397_v47, %v694_v35  ;;  %v927_v3 = vmul.f32 %v1699_v34, %v2726_v27 }
  0xe4   : > { %v958_v26 = vadd.f32 %v926_v40, %v793_v60  ;;  %v1669_v25 = vrot.slane %v3814_v42, 1  ;;  %v695_v33 = vmul.f32 %v1467_v12, %v2703_v13  ;;  %v1485_v49 = vsel %vm595_vm2, %v1453_v8, %v1437_v1 }
  0xe5   : > { %v1221_v5 = vadd.f32 %v1189_v11, %v1153_v16  ;;  %v1418_v2 = vld [vmem:[#allocation2 + $0x100] sm:$0xff]  ;;  %v794_v38 = vadd.f32 %v762_v46, %v726_v14  ;;  %v1685_v34 = vrot.slane %v3820_v61, 1  ;;  %v763_v9 = vmul.f32 %v3770_v62, %v2706_v17 }
  0xe6   : > { %v1436_v20 = vrot.slane %v1418_v2, 7  ;;  %v1668_v43 = vrot.slane %v1418_v2, 1  ;;  %v1618_v7 = vmul.f32 %v2773_v59, %v1418_v2  ;;  %v1154_v22 = vadd.f32 %v1122_v29, %v958_v26 }
  0xe7   : > { %v1419_v21 = vld [vmem:[#allocation2 + $0x108] sm:$0xff]  ;;  %v1385_v53 = vadd.f32 %v1353_v41, %v1221_v5  ;;  %v1191_v12 = vmul.f32 %v1418_v2, %v2769_v57  ;;  %v959_v63 = vadd.f32 %v927_v3, %v794_v38  ;;  %v1516_v50 = vsel %vm520_vm1, %v1485_v49, 0.0 }
  0xe8   : > { %v1452_v18 = vrot.slane %v1419_v21, 7  ;;  %v1684_v13 = vrot.slane %v1419_v21, 1  ;;  %v1222_v37 = vadd.f32 %v1190_v23, %v1154_v22  ;;  %v727_v39 = vadd.f32 %v3397_v47, %v695_v33 }
  0xe9   : > { %v1619_v47 = vmul.f32 %v2773_v59, %v1419_v21  ;;  %v928_v41 = vmul.f32 %v3800_v30, %v2726_v27  ;;  %v1552_v16 = vmul.f32 %v2771_v58, %v1516_v50  ;;  %v1620_v60 = vmul.f32 %v2773_v59, %v3814_v42 }
  0xea   : > { %v1484_v54 = vsel %vm595_vm2, %v1452_v18, %v1436_v20  ;;  %v1700_v36 = vsel %vm828_vm3, %v1668_v43, %v1684_v13  ;;  %v1468_v17 = vsel %vm595_vm2, %v1436_v20, %v1452_v18  ;;  %v1716_v62 = vsel %vm828_vm3, %v1684_v13, %v1668_v43 }
  0xeb   : > { %v1514_v4 = vsel %vm520_vm1, %v1484_v54, 0.0  ;;  %v1386_v44 = vadd.f32 %v1354_v28, %v1222_v37  ;;  %v1551_v31 = vmul.f32 %v2771_v58, %v1468_v17  ;;  %v1782_v48 = vmul.f32 %v2762_v52, %v1700_v36 }
  0xec   : > { %v1550_v55 = vmul.f32 %v2771_v58, %v1514_v4  ;;  %v1747_v32 = vsel %vm523_vm4, %v1716_v62, 0.0  ;;  %v1123_v45 = vmul.f32 %v1514_v4, %v2767_v56  ;;  %v1355_v19 = vmul.f32 %v1700_v36, %v2760_v51 }
  0xed   : > { %v1583_v11 = vadd.f32 %v1551_v31, %v1386_v44  ;;  %v1783_v15 = vmul.f32 %v2762_v52, %v1747_v32  ;;  %v795_v0 = vadd.f32 %v763_v9, %v727_v39  ;;  %v1124_v35 = vmul.f32 %v1468_v17, %v2767_v56 }
  0xee   : > { %v1582_v24 = vadd.f32 %v1550_v55, %v1385_v53  ;;  %v1155_v40 = vadd.f32 %v1123_v45, %v959_v63  ;;  %v1192_v14 = vmul.f32 %v1419_v21, %v2769_v57  ;;  %v1701_v5 = vsel %vm828_vm3, %v1669_v25, %v1685_v34 }
  0xef   : > { %v1651_v46 = vadd.f32 %v1619_v47, %v1583_v11  ;;  %v960_v28 = vadd.f32 %v928_v41, %v795_v0  ;;  %v1356_v2 = vmul.f32 %v1747_v32, %v2760_v51  ;;  %v1469_v27 = vsel %vm595_vm2, %v1437_v1, %v1453_v8 }
  0xf0   : > { %v1650_v29 = vadd.f32 %v1618_v7, %v1582_v24  ;;  %v1223_v23 = vadd.f32 %v1191_v12, %v1155_v40  ;;  %v1717_v33 = vsel %vm828_vm3, %v1685_v34, %v1669_v25  ;;  %v1784_v20 = vmul.f32 %v2762_v52, %v1701_v5 }
  0xf1   : > { %v1815_v3 = vadd.f32 %v1783_v15, %v1651_v46  ;;  %v1156_v26 = vadd.f32 %v1124_v35, %v960_v28  ;;  %v1553_v51 = vmul.f32 %v2771_v58, %v1469_v27  ;;  %v1749_v42 = vsel %vm523_vm4, %v1717_v33, 0.0 }
  0xf2   : > { %v1814_v56 = vadd.f32 %v1782_v48, %v1650_v29  ;;  %v1387_v30 = vadd.f32 %v1355_v19, %v1223_v23  ;;  %v1621_v6 = vmul.f32 %v2773_v59, %v3820_v61  ;;  %v1785_v49 = vmul.f32 %v2762_v52, %v1749_v42 }
  0xf3   : > { %v1224_v43 = vadd.f32 %v1192_v14, %v1156_v26 }
  0xf4   : > { %2585 = vmatprep.mubr.msk.f32.mxu1 %vm474_vm0, %v1814_v56  ;;  %v1584_v57 = vadd.f32 %v1552_v16, %v1387_v30 }
  0xf5   : > { %2586 = vmatmul.mubr.msk.f32.gmra.mxu1 %vm474_vm0, %v1815_v3  ;;  %v1388_v8 = vadd.f32 %v1356_v2, %v1224_v43 }
  0xf6   : > { %v1652_v1 = vadd.f32 %v1620_v60, %v1584_v57 }
  0xf7   : > { %v1585_v38 = vadd.f32 %v1553_v51, %v1388_v8 }
  0xf8   : > { %v1816_v25 = vadd.f32 %v1784_v20, %v1652_v1 }
  0xf9   : > { %v1653_v21 = vadd.f32 %v1621_v6, %v1585_v38 }
  0xfa   : > { %2588 = vmatprep.mubr.msk.f32.mxu1 %vm474_vm0, %v1816_v25 }
  0xfb   : > { %v1817_v7 = vadd.f32 %v1785_v49, %v1653_v21 }
  0xfd   : > { %2589 = vmatmul.mubr.msk.f32.gmra.mxu1 %vm474_vm0, %v1817_v7 }
 0x10b   : > { %v2545_v52 = vpop.f32.mrf.mxu0 }
 0x10c   : > { %v1995_v58 = vadd.f32 %v2545_v52, %v3902_v10 }
 0x10d   : > { %v1989_v59 = vpop.f32.mrf.mxu0 }
 0x10e   : > { %2149 = vst.msk [vmem:[%s3909_s11 + $0x8] sm:$0xff] %vm474_vm0, %v1995_v58  ;;  %v2181_v61 = vsel %vm474_vm0, %v1995_v58, 0.0  ;;  %v2252_v22 = vmul.f32 %v1995_v58, %v1995_v58  ;;  %v1990_v34 = vadd.f32 %v3902_v10, %v1989_v59 }
 0x110   : > { %v2284_v9 = vsel %vm474_vm0, %v2252_v22, 0.0  ;;  %2148 = vst.msk [vmem:[%s3909_s11] sm:$0xff] %vm474_vm0, %v1990_v34  ;;  %v2180_v53 = vsel %vm474_vm0, %v1990_v34, 0.0  ;;  %v2251_v18 = vmul.f32 %v1990_v34, %v1990_v34 }
 0x111   : > { %v2182_v13 = vadd.f32 %v2181_v61, %v2180_v53 }
 0x112   : > { %v2283_v12 = vsel %vm474_vm0, %v2251_v18, 0.0 }
 0x113   : > { %v2285_v37 = vadd.f32 %v2284_v9, %v2283_v12 }
 0x119   : > { %v2548_v63 = vpop.f32.mrf.mxu0 }
 0x11a   : > { %v2005_v50 = vadd.f32 %v2548_v63, %v3902_v10 }
 0x11b   : > { %v1999_v39 = vpop.f32.mrf.mxu0 }
 0x11c   : > { %2151 = vst.msk [vmem:[%s3909_s11 + $0x18] sm:$0xff] %vm474_vm0, %v2005_v50  ;;  %v2000_v54 = vadd.f32 %v3902_v10, %v1999_v39  ;;  %v2254_v36 = vmul.f32 %v2005_v50, %v2005_v50  ;;  %v2185_v44 = vsel %vm474_vm0, %v2005_v50, 0.0 }
 0x11e   : > { %2150 = vst.msk [vmem:[%s3909_s11 + $0x10] sm:$0xff] %vm474_vm0, %v2000_v54  ;;  %v2183_v17 = vsel %vm474_vm0, %v2000_v54, 0.0  ;;  %v2253_v62 = vmul.f32 %v2000_v54, %v2000_v54  ;;  %v2288_v48 = vsel %vm474_vm0, %v2254_v36, 0.0 }
 0x11f   : > { %v2184_v4 = vadd.f32 %v2183_v17, %v2182_v13 }
 0x120   : > { %v2286_v31 = vsel %vm474_vm0, %v2253_v62, 0.0 }
 0x121   : > { %v2287_v47 = vadd.f32 %v2286_v31, %v2285_v37  ;;  %v2186_v55 = vadd.f32 %v2185_v44, %v2184_v4 }
 0x123   : > { %v2289_v32 = vadd.f32 %v2288_v48, %v2287_v47 }
 0x124   : > { %v2551_v45 = vpop.f32.mrf.mxu0 }
 0x125   : > { %v2015_v11 = vadd.f32 %v2551_v45, %v3902_v10 }
 0x126   : > { %v2009_v15 = vpop.f32.mrf.mxu0 }
 0x127   : > { %2153 = vst.msk [vmem:[%s3909_s11 + $0x28] sm:$0xff] %vm474_vm0, %v2015_v11  ;;  %v2010_v19 = vadd.f32 %v3902_v10, %v2009_v15  ;;  %v2256_v0 = vmul.f32 %v2015_v11, %v2015_v11  ;;  %v2189_v35 = vsel %vm474_vm0, %v2015_v11, 0.0 }
 0x129   : > { %2152 = vst.msk [vmem:[%s3909_s11 + $0x20] sm:$0xff] %vm474_vm0, %v2010_v19  ;;  %v2187_v24 = vsel %vm474_vm0, %v2010_v19, 0.0  ;;  %v2255_v40 = vmul.f32 %v2010_v19, %v2010_v19  ;;  %v2292_v29 = vsel %vm474_vm0, %v2256_v0, 0.0 }
 0x12a   : > { %v2188_v41 = vadd.f32 %v2187_v24, %v2186_v55 }
 0x12b   : > { %v2290_v46 = vsel %vm474_vm0, %v2255_v40, 0.0 }
 0x12c   : > { %v2291_v16 = vadd.f32 %v2290_v46, %v2289_v32  ;;  %v2190_v60 = vadd.f32 %v2189_v35, %v2188_v41 }
 0x12e   : > { %v2293_v23 = vadd.f32 %v2292_v29, %v2291_v16 }
 0x130   : > { %v2554_v28 = vpop.f32.mrf.mxu0 }
 0x131   : > { %v2025_v14 = vadd.f32 %v2554_v28, %v3902_v10 }
 0x132   : > { %v2019_v3 = vpop.f32.mrf.mxu0 }
 0x133   : > { %2155 = vst.msk [vmem:[%s3909_s11 + $0x38] sm:$0xff] %vm474_vm0, %v2025_v14  ;;  %v2020_v5 = vadd.f32 %v3902_v10, %v2019_v3  ;;  %v2258_v2 = vmul.f32 %v2025_v14, %v2025_v14  ;;  %v2193_v26 = vsel %vm474_vm0, %v2025_v14, 0.0 }
 0x135   : > { %2154 = vst.msk [vmem:[%s3909_s11 + $0x30] sm:$0xff] %vm474_vm0, %v2020_v5  ;;  %v2191_v27 = vsel %vm474_vm0, %v2020_v5, 0.0  ;;  %v2257_v56 = vmul.f32 %v2020_v5, %v2020_v5  ;;  %v2296_v43 = vsel %vm474_vm0, %v2258_v2, 0.0 }
 0x136   : > { %v2192_v30 = vadd.f32 %v2191_v27, %v2190_v60 }
 0x137   : > { %v2294_v33 = vsel %vm474_vm0, %v2257_v56, 0.0 }
 0x138   : > { %v2295_v57 = vadd.f32 %v2294_v33, %v2293_v23  ;;  %v2194_v20 = vadd.f32 %v2193_v26, %v2192_v30 }
 0x13a   : > { %v2297_v42 = vadd.f32 %v2296_v43, %v2295_v57 }
 0x13b   : > { %v2557_v51 = vpop.f32.mrf.mxu0 }
 0x13c   : > { %v2035_v1 = vadd.f32 %v2557_v51, %v3902_v10 }
 0x13d   : > { %v2029_v8 = vpop.f32.mrf.mxu0 }
 0x13e   : > { %2157 = vst.msk [vmem:[%s3909_s11 + $0x48] sm:$0xff] %vm474_vm0, %v2035_v1  ;;  %v2030_v6 = vadd.f32 %v3902_v10, %v2029_v8  ;;  %v2260_v25 = vmul.f32 %v2035_v1, %v2035_v1  ;;  %v2197_v7 = vsel %vm474_vm0, %v2035_v1, 0.0 }
 0x140   : > { %2156 = vst.msk [vmem:[%s3909_s11 + $0x40] sm:$0xff] %vm474_vm0, %v2030_v6  ;;  %v2195_v38 = vsel %vm474_vm0, %v2030_v6, 0.0  ;;  %v2259_v49 = vmul.f32 %v2030_v6, %v2030_v6  ;;  %v2300_v61 = vsel %vm474_vm0, %v2260_v25, 0.0 }
 0x141   : > { %v2196_v21 = vadd.f32 %v2195_v38, %v2194_v20 }
 0x142   : > { %v2298_v52 = vsel %vm474_vm0, %v2259_v49, 0.0 }
 0x143   : > { %v2299_v58 = vadd.f32 %v2298_v52, %v2297_v42  ;;  %v2198_v59 = vadd.f32 %v2197_v7, %v2196_v21 }
 0x145   : > { %v2301_v22 = vadd.f32 %v2300_v61, %v2299_v58 }
 0x146   : > { %v2560_v34 = vpop.f32.mrf.mxu0 }
 0x147   : > { %v2045_v9 = vadd.f32 %v2560_v34, %v3902_v10 }
 0x148   : > { %v2039_v53 = vpop.f32.mrf.mxu0 }
 0x149   : > { %2159 = vst.msk [vmem:[%s3909_s11 + $0x58] sm:$0xff] %vm474_vm0, %v2045_v9  ;;  %v2040_v18 = vadd.f32 %v3902_v10, %v2039_v53  ;;  %v2262_v13 = vmul.f32 %v2045_v9, %v2045_v9  ;;  %v2201_v50 = vsel %vm474_vm0, %v2045_v9, 0.0 }
 0x14b   : > { %2158 = vst.msk [vmem:[%s3909_s11 + $0x50] sm:$0xff] %vm474_vm0, %v2040_v18  ;;  %v2199_v12 = vsel %vm474_vm0, %v2040_v18, 0.0  ;;  %v2261_v37 = vmul.f32 %v2040_v18, %v2040_v18  ;;  %v2304_v17 = vsel %vm474_vm0, %v2262_v13, 0.0 }
 0x14c   : > { %v2200_v63 = vadd.f32 %v2199_v12, %v2198_v59 }
 0x14d   : > { %v2302_v39 = vsel %vm474_vm0, %v2261_v37, 0.0 }
 0x14e   : > { %v2303_v54 = vadd.f32 %v2302_v39, %v2301_v22  ;;  %v2202_v36 = vadd.f32 %v2201_v50, %v2200_v63 }
 0x150   : > { %v2305_v62 = vadd.f32 %v2304_v17, %v2303_v54 }
 0x152   : > { %v2563_v4 = vpop.f32.mrf.mxu0 }
 0x153   : > { %v2055_v44 = vadd.f32 %v2563_v4, %v3902_v10 }
 0x154   : > { %v2049_v31 = vpop.f32.mrf.mxu0 }
 0x155   : > { %2161 = vst.msk [vmem:[%s3909_s11 + $0x68] sm:$0xff] %vm474_vm0, %v2055_v44  ;;  %v2050_v47 = vadd.f32 %v3902_v10, %v2049_v31  ;;  %v2264_v55 = vmul.f32 %v2055_v44, %v2055_v44  ;;  %v2205_v11 = vsel %vm474_vm0, %v2055_v44, 0.0 }
 0x157   : > { %2160 = vst.msk [vmem:[%s3909_s11 + $0x60] sm:$0xff] %vm474_vm0, %v2050_v47  ;;  %v2203_v48 = vsel %vm474_vm0, %v2050_v47, 0.0  ;;  %v2263_v32 = vmul.f32 %v2050_v47, %v2050_v47  ;;  %v2308_v24 = vsel %vm474_vm0, %v2264_v55, 0.0 }
 0x158   : > { %v2204_v45 = vadd.f32 %v2203_v48, %v2202_v36 }
 0x159   : > { %v2306_v15 = vsel %vm474_vm0, %v2263_v32, 0.0 }
 0x15a   : > { %v2307_v19 = vadd.f32 %v2306_v15, %v2305_v62  ;;  %v2206_v0 = vadd.f32 %v2205_v11, %v2204_v45 }
 0x15c   : > { %v2309_v40 = vadd.f32 %v2308_v24, %v2307_v19 }
 0x15f   : > { %v2566_v41 = vpop.f32.mrf.mxu0 }
 0x160   : > { %v2065_v35 = vadd.f32 %v2566_v41, %v3902_v10 }
 0x161   : > { %v2059_v46 = vpop.f32.mrf.mxu0 }
 0x162   : > { %2163 = vst.msk [vmem:[%s3909_s11 + $0x78] sm:$0xff] %vm474_vm0, %v2065_v35  ;;  %v2060_v16 = vadd.f32 %v3902_v10, %v2059_v46  ;;  %v2266_v60 = vmul.f32 %v2065_v35, %v2065_v35  ;;  %v2209_v14 = vsel %vm474_vm0, %v2065_v35, 0.0 }
 0x164   : > { %2162 = vst.msk [vmem:[%s3909_s11 + $0x70] sm:$0xff] %vm474_vm0, %v2060_v16  ;;  %v2207_v29 = vsel %vm474_vm0, %v2060_v16, 0.0  ;;  %v2265_v23 = vmul.f32 %v2060_v16, %v2060_v16  ;;  %v2312_v27 = vsel %vm474_vm0, %v2266_v60, 0.0 }
 0x165   : > { %v2208_v28 = vadd.f32 %v2207_v29, %v2206_v0 }
 0x166   : > { %v2310_v3 = vsel %vm474_vm0, %v2265_v23, 0.0 }
 0x167   : > { %v2311_v5 = vadd.f32 %v2310_v3, %v2309_v40  ;;  %v2210_v2 = vadd.f32 %v2209_v14, %v2208_v28 }
 0x169   : > { %v2569_v56 = vpop.f32.mrf.mxu1  ;;  %v2313_v30 = vadd.f32 %v2312_v27, %v2311_v5 }
 0x16a   : > { %v2075_v26 = vadd.f32 %v2569_v56, %v3902_v10 }
 0x16b   : > { %v2069_v33 = vpop.f32.mrf.mxu1 }
 0x16c   : > { %2165 = vst.msk [vmem:[%s3909_s11 + $0x88] sm:$0xff] %vm474_vm0, %v2075_v26  ;;  %v2070_v57 = vadd.f32 %v3902_v10, %v2069_v33  ;;  %v2268_v7 = vmul.f32 %v2075_v26, %v2075_v26  ;;  %v2213_v22 = vsel %vm474_vm0, %v2075_v26, 0.0 }
 0x16e   : > { %2164 = vst.msk [vmem:[%s3909_s11 + $0x80] sm:$0xff] %vm474_vm0, %v2070_v57  ;;  %v2267_v38 = vmul.f32 %v2070_v57, %v2070_v57  ;;  %v2211_v49 = vsel %vm474_vm0, %v2070_v57, 0.0  ;;  %v2316_v18 = vsel %vm474_vm0, %v2268_v7, 0.0 }
 0x16f   : > { %v2212_v21 = vadd.f32 %v2211_v49, %v2210_v2 }
 0x170   : > { %v2314_v52 = vsel %vm474_vm0, %v2267_v38, 0.0 }
 0x171   : > { %v2315_v59 = vadd.f32 %v2314_v52, %v2313_v30  ;;  %v2214_v9 = vadd.f32 %v2213_v22, %v2212_v21 }
 0x173   : > { %v2317_v12 = vadd.f32 %v2316_v18, %v2315_v59 }
 0x174   : > { %v2572_v20 = vpop.f32.mrf.mxu1 }
 0x175   : > { %v2085_v43 = vadd.f32 %v2572_v20, %v3902_v10 }
 0x176   : > { %v2079_v51 = vpop.f32.mrf.mxu1 }
 0x177   : > { %2167 = vst.msk [vmem:[%s3909_s11 + $0x98] sm:$0xff] %vm474_vm0, %v2085_v43  ;;  %v2080_v42 = vadd.f32 %v3902_v10, %v2079_v51  ;;  %v2270_v50 = vmul.f32 %v2085_v43, %v2085_v43  ;;  %v2217_v36 = vsel %vm474_vm0, %v2085_v43, 0.0 }
 0x179   : > { %2166 = vst.msk [vmem:[%s3909_s11 + $0x90] sm:$0xff] %vm474_vm0, %v2080_v42  ;;  %v2269_v13 = vmul.f32 %v2080_v42, %v2080_v42  ;;  %v2215_v37 = vsel %vm474_vm0, %v2080_v42, 0.0  ;;  %v2320_v62 = vsel %vm474_vm0, %v2270_v50, 0.0 }
 0x17a   : > { %v2216_v63 = vadd.f32 %v2215_v37, %v2214_v9 }
 0x17b   : > { %v2318_v39 = vsel %vm474_vm0, %v2269_v13, 0.0 }
 0x17c   : > { %v2319_v54 = vadd.f32 %v2318_v39, %v2317_v12  ;;  %v2218_v17 = vadd.f32 %v2217_v36, %v2216_v63 }
 0x17e   : > { %v2321_v44 = vadd.f32 %v2320_v62, %v2319_v54 }
 0x17f   : > { %v2575_v1 = vpop.f32.mrf.mxu1 }
 0x180   : > { %v2095_v8 = vadd.f32 %v2575_v1, %v3902_v10 }
 0x181   : > { %v2089_v6 = vpop.f32.mrf.mxu1 }
 0x182   : > { %2169 = vst.msk [vmem:[%s3909_s11 + $0xa8] sm:$0xff] %vm474_vm0, %v2095_v8  ;;  %v2090_v25 = vadd.f32 %v3902_v10, %v2089_v6  ;;  %v2272_v32 = vmul.f32 %v2095_v8, %v2095_v8  ;;  %v2221_v0 = vsel %vm474_vm0, %v2095_v8, 0.0 }
 0x184   : > { %2168 = vst.msk [vmem:[%s3909_s11 + $0xa0] sm:$0xff] %vm474_vm0, %v2090_v25  ;;  %v2271_v4 = vmul.f32 %v2090_v25, %v2090_v25  ;;  %v2219_v31 = vsel %vm474_vm0, %v2090_v25, 0.0  ;;  %v2324_v40 = vsel %vm474_vm0, %v2272_v32, 0.0 }
 0x185   : > { %v2220_v55 = vadd.f32 %v2219_v31, %v2218_v17 }
 0x186   : > { %v2322_v45 = vsel %vm474_vm0, %v2271_v4, 0.0 }
 0x187   : > { %v2323_v15 = vadd.f32 %v2322_v45, %v2321_v44  ;;  %v2222_v24 = vadd.f32 %v2221_v0, %v2220_v55 }
 0x189   : > { %v2325_v35 = vadd.f32 %v2324_v40, %v2323_v15 }
 0x18d   : > { %v2578_v58 = vpop.f32.mrf.mxu1 }
 0x18e   : > { %v2105_v61 = vadd.f32 %v2578_v58, %v3902_v10 }
 0x18f   : > { %v2099_v34 = vpop.f32.mrf.mxu1 }
 0x190   : > { %2171 = vst.msk [vmem:[%s3909_s11 + $0xb8] sm:$0xff] %vm474_vm0, %v2105_v61  ;;  %v2100_v53 = vadd.f32 %v3902_v10, %v2099_v34  ;;  %v2274_v23 = vmul.f32 %v2105_v61, %v2105_v61  ;;  %v2225_v2 = vsel %vm474_vm0, %v2105_v61, 0.0 }
 0x192   : > { %2170 = vst.msk [vmem:[%s3909_s11 + $0xb0] sm:$0xff] %vm474_vm0, %v2100_v53  ;;  %v2273_v41 = vmul.f32 %v2100_v53, %v2100_v53  ;;  %v2223_v46 = vsel %vm474_vm0, %v2100_v53, 0.0  ;;  %v2328_v56 = vsel %vm474_vm0, %v2274_v23, 0.0 }
 0x193   : > { %v2224_v60 = vadd.f32 %v2223_v46, %v2222_v24 }
 0x194   : > { %v2326_v28 = vsel %vm474_vm0, %v2273_v41, 0.0 }
 0x195   : > { %v2327_v3 = vadd.f32 %v2326_v28, %v2325_v35  ;;  %v2226_v27 = vadd.f32 %v2225_v2, %v2224_v60 }
 0x197   : > { %v2329_v26 = vadd.f32 %v2328_v56, %v2327_v3 }
 0x19b   : > { %v2581_v47 = vpop.f32.mrf.mxu1 }
 0x19c   : > { %v2115_v48 = vadd.f32 %v2581_v47, %v3902_v10 }
 0x19d   : > { %v2109_v11 = vpop.f32.mrf.mxu1 }
 0x19e   : > { %2173 = vst.msk [vmem:[%s3909_s11 + $0xc8] sm:$0xff] %vm474_vm0, %v2115_v48  ;;  %v2110_v19 = vadd.f32 %v3902_v10, %v2109_v11  ;;  %v2276_v20 = vmul.f32 %v2115_v48, %v2115_v48  ;;  %v2229_v42 = vsel %vm474_vm0, %v2115_v48, 0.0 }
 0x1a0   : > { %2172 = vst.msk [vmem:[%s3909_s11 + $0xc0] sm:$0xff] %vm474_vm0, %v2110_v19  ;;  %v2275_v30 = vmul.f32 %v2110_v19, %v2110_v19  ;;  %v2227_v33 = vsel %vm474_vm0, %v2110_v19, 0.0  ;;  %v2332_v8 = vsel %vm474_vm0, %v2276_v20, 0.0 }
 0x1a1   : > { %v2228_v57 = vadd.f32 %v2227_v33, %v2226_v27 }
 0x1a2   : > { %v2330_v43 = vsel %vm474_vm0, %v2275_v30, 0.0 }
 0x1a3   : > { %v2584_v16 = vpop.f32.mrf.mxu1  ;;  %v2331_v51 = vadd.f32 %v2330_v43, %v2329_v26  ;;  %v2230_v1 = vadd.f32 %v2229_v42, %v2228_v57 }
 0x1a4   : > { %v2125_v29 = vadd.f32 %v2584_v16, %v3902_v10 }
 0x1a5   : > { %v2119_v14 = vpop.f32.mrf.mxu1  ;;  %v2333_v25 = vadd.f32 %v2332_v8, %v2331_v51 }
 0x1a6   : > { %2175 = vst.msk [vmem:[%s3909_s11 + $0xd8] sm:$0xff] %vm474_vm0, %v2125_v29  ;;  %v2120_v5 = vadd.f32 %v3902_v10, %v2119_v14  ;;  %v2278_v21 = vmul.f32 %v2125_v29, %v2125_v29  ;;  %v2233_v61 = vsel %vm474_vm0, %v2125_v29, 0.0 }
 0x1a8   : > { %2174 = vst.msk [vmem:[%s3909_s11 + $0xd0] sm:$0xff] %vm474_vm0, %v2120_v5  ;;  %v2277_v6 = vmul.f32 %v2120_v5, %v2120_v5  ;;  %v2231_v38 = vsel %vm474_vm0, %v2120_v5, 0.0  ;;  %v2336_v53 = vsel %vm474_vm0, %v2278_v21, 0.0 }
 0x1a9   : > { %v2232_v49 = vadd.f32 %v2231_v38, %v2230_v1 }
 0x1aa   : > { %v2334_v7 = vsel %vm474_vm0, %v2277_v6, 0.0 }
 0x1ab   : > { %v2335_v58 = vadd.f32 %v2334_v7, %v2333_v25  ;;  %v2234_v9 = vadd.f32 %v2233_v61, %v2232_v49 }
 0x1ad   : > { %v2337_v13 = vadd.f32 %v2336_v53, %v2335_v58 }
 0x1b5   : > { %v2587_v52 = vpop.f32.mrf.mxu1 }
 0x1b6   : > { %v2135_v59 = vadd.f32 %v2587_v52, %v3902_v10 }
 0x1b7   : > { %v2129_v22 = vpop.f32.mrf.mxu1 }
 0x1b8   : > { %2177 = vst.msk [vmem:[%s3909_s11 + $0xe8] sm:$0xff] %vm474_vm0, %v2135_v59  ;;  %v2130_v34 = vadd.f32 %v3902_v10, %v2129_v22  ;;  %v2280_v63 = vmul.f32 %v2135_v59, %v2135_v59  ;;  %v2237_v36 = vsel %vm474_vm0, %v2135_v59, 0.0 }
 0x1ba   : > { %2176 = vst.msk [vmem:[%s3909_s11 + $0xe0] sm:$0xff] %vm474_vm0, %v2130_v34  ;;  %v2279_v18 = vmul.f32 %v2130_v34, %v2130_v34  ;;  %v2235_v12 = vsel %vm474_vm0, %v2130_v34, 0.0  ;;  %v2340_v44 = vsel %vm474_vm0, %v2280_v63, 0.0 }
 0x1bb   : > { %v2236_v37 = vadd.f32 %v2235_v12, %v2234_v9 }
 0x1bc   : > { %v2338_v50 = vsel %vm474_vm0, %v2279_v18, 0.0 }
 0x1bd   : > { %v2339_v39 = vadd.f32 %v2338_v50, %v2337_v13  ;;  %v2590_v54 = vpop.f32.mrf.mxu1  ;;  %v2238_v4 = vadd.f32 %v2237_v36, %v2236_v37 }
 0x1be   : > { %v2145_v17 = vadd.f32 %v2590_v54, %v3902_v10 }
 0x1bf   : > { %v2139_v62 = vpop.f32.mrf.mxu1  ;;  %v2341_v47 = vadd.f32 %v2340_v44, %v2339_v39 }
 0x1c0   : > { %2179 = vst.msk [vmem:[%s3909_s11 + $0xf8] sm:$0xff] %vm474_vm0, %v2145_v17  ;;  %v2140_v31 = vadd.f32 %v3902_v10, %v2139_v62  ;;  %v2282_v55 = vmul.f32 %v2145_v17, %v2145_v17  ;;  %v2241_v11 = vsel %vm474_vm0, %v2145_v17, 0.0 }
 0x1c2   : > { %2178 = vst.msk [vmem:[%s3909_s11 + $0xf0] sm:$0xff] %vm474_vm0, %v2140_v31  ;;  %v2239_v48 = vsel %vm474_vm0, %v2140_v31, 0.0  ;;  %v2281_v32 = vmul.f32 %v2140_v31, %v2140_v31  ;;  %v2344_v24 = vsel %vm474_vm0, %v2282_v55, 0.0 }
 0x1c3   : > { %v2240_v45 = vadd.f32 %v2239_v48, %v2238_v4 }
 0x1c4   : > { %v2342_v15 = vsel %vm474_vm0, %v2281_v32, 0.0 }
 0x1c5   : > { %v2242_v19 = vadd.f32 %v2241_v11, %v2240_v45  ;;  %v2343_v0 = vadd.f32 %v2342_v15, %v2341_v47 }
 0x1c7   : > { %v2243_v40 = vrot.slane %v2242_v19, 4  ;;  %v2345_v10 = vadd.f32 %v2344_v24, %v2343_v0 }
 0x1c9   : > { %v2244_v41 = vadd.f32 %v2243_v40, %v2242_v19  ;;  %v2346_v35 = vrot.slane %v2345_v10, 4 }
 0x1cb   : > { %v2245_v46 = vrot.slane %v2244_v41, 2  ;;  %v2347_v16 = vadd.f32 %v2346_v35, %v2345_v10 }
 0x1cd   : > { %v2246_v60 = vadd.f32 %v2245_v46, %v2244_v41  ;;  %v2348_v29 = vrot.slane %v2347_v16, 2 }
 0x1cf   : > { %v2247_v23 = vrot.slane %v2246_v60, 1  ;;  %v2349_v28 = vadd.f32 %v2348_v29, %v2347_v16 }
 0x1d1   : > { %v2248_v14 = vadd.f32 %v2247_v23, %v2246_v60  ;;  %v2350_v3 = vrot.slane %v2349_v28, 1 }
 0x1d3   : > { %2250 = vst.msk [vmem:[%s319_s14] sm:$0x1] %vm2249_vm5, %v2248_v14  ;;  %v2351_v5 = vadd.f32 %v2350_v3, %v2349_v28 }
 0x1d5   : > { %2352 = vst.msk [vmem:[%s322_s17] sm:$0x1] %vm2249_vm5, %v2351_v5 }
 0x1d6 PF: > { %s19_s27 = sadd.s32 1, %s2613_s27  }
 0x1d7   : > { %p16_p4 = scmp.ge.s32.totalorder %s19_s27, 4  }
 0x1d9   :  { %18 = sbr.rel (!%p16_p4) target bundleno = 1 (0x1), region = 101 }

// kernel: resnet_block_forward.5
= control target key start
LH: loop header
LB: loop body
LE: loop exit
PB: predicated region body
PF: predicated region fallthrough
CT: control target
= control target key end

     0   :  { %vm201_vm0 = vcmask 64512   ;;  %vm1188_vm1 = vcmask 130048   ;;  %vm2031_vm2 = vcmask 1041408   ;;  %vm1838_vm3 = vcmask 15360   ;;  %s5872_s4 = inlined_call_operand.vmem [shape: f32[8,16], index: 4, kind: input, shape index: {}]   ;;  %s5873_s1 = inlined_call_operand.vmem [shape: f32[512,8], index: 1, kind: input, shape index: {}]   ;;  %s5874_s6 = inlined_call_operand.vmem [shape: f32[16,2], index: 6, kind: input, shape index: {}]   ;;  %s5875_s2 = inlined_call_operand.vmem [shape: f32[4,16], index: 2, kind: input, shape index: {}]   ;;  %s5876_s3 = inlined_call_operand.vmem [shape: f32[4,16], index: 3, kind: input, shape index: {}]   ;;  %s5877_s0 = inlined_call_operand.vmem [shape: f32[512,16], index: 0, kind: input, shape index: {}]   ;;  %s5878_s5 = inlined_call_operand.vmem [shape: f32[1,16], index: 5, kind: input, shape index: {}]   ;;  %s5879_s8 = inlined_call_operand.vmem [shape: f32[2,16], index: 8, kind: input, shape index: {}]   ;;  %s5880_s7 = inlined_call_operand.vmem [shape: f32[1,2], index: 7, kind: input, shape index: {}]   ;;  %s5881_s9 = inlined_call_operand.vmem [shape: f32[1,16], index: 9, kind: input, shape index: {}]   ;;  %s5882_s10 = inlined_call_operand.vmem [shape: f32[512,16], index: 10, kind: output, shape index: {}]  }
   0x1   :  { %v193_v0 = vld [vmem:[%s5872_s4] sm:$0xff]  ;;  %v130_v2 = vld [vmem:[%s5873_s1 + $0x8] sm:$0xff]  ;;  %v131_v3 = vld [vmem:[%s5873_s1 + $0x10] sm:$0xff] }
   0x2   :  { %v129_v1 = vld [vmem:[%s5873_s1] sm:$0xff]  ;;  %3392 = vmatprep.subr.mxu0 %v193_v0  ;;  %3688 = vmatprep.subr.mxu1 %v193_v0  ;;  %v132_v4 = vld [vmem:[%s5873_s1 + $0x18] sm:$0xff]  ;;  %v134_v6 = vld [vmem:[%s5873_s1 + $0x28] sm:$0xff] }
   0x3   :  { %3394 = vmatprep.mubr.msk.f32.mxu0 %vm201_vm0, %v129_v1  ;;  %3393 = vmatpush3.msra.mxu0 %v193_v0  ;;  %v133_v5 = vld [vmem:[%s5873_s1 + $0x20] sm:$0xff]  ;;  %v135_v7 = vld [vmem:[%s5873_s1 + $0x30] sm:$0xff]  ;;  %v162_v9 = vld [vmem:[%s5873_s1 + $0x108] sm:$0xff] }
   0x4   :  { %3395 = vmatmul.mubr.msk.f32.vlgmr.msra.gmra.mxu0 %vm201_vm0, %v130_v2  ;;  %3689 = vmatpush3.msra.mxu1 %v193_v0  ;;  %v161_v8 = vld [vmem:[%s5873_s1 + $0x100] sm:$0xff]  ;;  %v163_v10 = vld [vmem:[%s5873_s1 + $0x110] sm:$0xff]  ;;  %v136_v11 = vld [vmem:[%s5873_s1 + $0x38] sm:$0xff] }
   0x5   :  { %3397 = vmatprep.mubr.msk.f32.mxu0 %vm201_vm0, %v131_v3  ;;  %3442 = vmatprep.mubr.msk.f32.mxu1 %vm201_vm0, %v161_v8  ;;  %v137_v12 = vld [vmem:[%s5873_s1 + $0x40] sm:$0xff]  ;;  %v164_v13 = vld [vmem:[%s5873_s1 + $0x118] sm:$0xff]  ;;  %v138_v15 = vld [vmem:[%s5873_s1 + $0x48] sm:$0xff] }
   0x6   :  { %3443 = vmatmul.mubr.msk.f32.vlgmr.msra.gmra.mxu1 %vm201_vm0, %v162_v9  ;;  %v165_v14 = vld [vmem:[%s5873_s1 + $0x120] sm:$0xff]  ;;  %v139_v16 = vld [vmem:[%s5873_s1 + $0x50] sm:$0xff]  ;;  %v166_v17 = vld [vmem:[%s5873_s1 + $0x128] sm:$0xff] }
   0x7   :  { %3445 = vmatprep.mubr.msk.f32.mxu1 %vm201_vm0, %v163_v10  ;;  %v167_v18 = vld [vmem:[%s5873_s1 + $0x130] sm:$0xff]  ;;  %v140_v19 = vld [vmem:[%s5873_s1 + $0x58] sm:$0xff]  ;;  %v141_v20 = vld [vmem:[%s5873_s1 + $0x60] sm:$0xff] }
   0x8   :  { %3398 = vmatmul.mubr.msk.f32.gmra.mxu0 %vm201_vm0, %v132_v4  ;;  %v1180_v21 = vld [vmem:[%s5874_s6 + $0x8] sm:$0xff]  ;;  %v168_v22 = vld [vmem:[%s5873_s1 + $0x138] sm:$0xff]  ;;  %v1179_v23 = vld [vmem:[%s5874_s6] sm:$0xff] }
   0x9   :  { %3400 = vmatprep.mubr.msk.f32.mxu0 %vm201_vm0, %v133_v5  ;;  %3490 = vmatprep.subr.mxu1 %v1180_v21  ;;  %v169_v24 = vld [vmem:[%s5873_s1 + $0x140] sm:$0xff]  ;;  %v142_v25 = vld [vmem:[%s5873_s1 + $0x68] sm:$0xff]  ;;  %v143_v26 = vld [vmem:[%s5873_s1 + $0x70] sm:$0xff] }
   0xa   :  { %3446 = vmatmul.mubr.msk.f32.gmra.mxu1 %vm201_vm0, %v164_v13  ;;  %v170_v27 = vld [vmem:[%s5873_s1 + $0x148] sm:$0xff]  ;;  %v171_v28 = vld [vmem:[%s5873_s1 + $0x150] sm:$0xff]  ;;  %v144_v29 = vld [vmem:[%s5873_s1 + $0x78] sm:$0xff]  ;;  %v779_v13 = vlaneseq }
   0xb   :  { %3448 = vmatprep.mubr.msk.f32.mxu1 %vm201_vm0, %v165_v14  ;;  %3491 = vmatpush3.msra.mxu1 %v1180_v21  ;;  %v145_v30 = vld [vmem:[%s5873_s1 + $0x80] sm:$0xff]  ;;  %v172_v31 = vld [vmem:[%s5873_s1 + $0x158] sm:$0xff]  ;;  %v146_v33 = vld [vmem:[%s5873_s1 + $0x88] sm:$0xff] }
   0xc   :  { %3401 = vmatmul.mubr.msk.f32.gmra.mxu0 %vm201_vm0, %v134_v6  ;;  %3492 = vmatprep.subr.mxu1 %v1179_v23  ;;  %v173_v32 = vld [vmem:[%s5873_s1 + $0x160] sm:$0xff]  ;;  %v147_v34 = vld [vmem:[%s5873_s1 + $0x90] sm:$0xff]  ;;  %v174_v35 = vld [vmem:[%s5873_s1 + $0x168] sm:$0xff] }
   0xd   :  { %3403 = vmatprep.mubr.msk.f32.mxu0 %vm201_vm0, %v135_v7  ;;  %3493 = vmatpush3.msra.mxu1 %v1179_v23  ;;  %v175_v36 = vld [vmem:[%s5873_s1 + $0x170] sm:$0xff]  ;;  %v148_v37 = vld [vmem:[%s5873_s1 + $0x98] sm:$0xff]  ;;  %v149_v38 = vld [vmem:[%s5873_s1 + $0xa0] sm:$0xff] }
   0xe   :  { %3449 = vmatmul.mubr.msk.f32.gmra.mxu1 %vm201_vm0, %v166_v17  ;;  %v176_v39 = vld [vmem:[%s5873_s1 + $0x178] sm:$0xff]  ;;  %v177_v40 = vld [vmem:[%s5873_s1 + $0x180] sm:$0xff]  ;;  %v150_v41 = vld [vmem:[%s5873_s1 + $0xa8] sm:$0xff] }
   0xf   :  { %3451 = vmatprep.mubr.msk.f32.mxu1 %vm201_vm0, %v167_v18  ;;  %v151_v42 = vld [vmem:[%s5873_s1 + $0xb0] sm:$0xff]  ;;  %v178_v43 = vld [vmem:[%s5873_s1 + $0x188] sm:$0xff]  ;;  %v152_v45 = vld [vmem:[%s5873_s1 + $0xb8] sm:$0xff] }
  0x10   :  { %3404 = vmatmul.mubr.msk.f32.gmra.mxu0 %vm201_vm0, %v136_v11  ;;  %v179_v44 = vld [vmem:[%s5873_s1 + $0x190] sm:$0xff]  ;;  %v153_v46 = vld [vmem:[%s5873_s1 + $0xc0] sm:$0xff]  ;;  %v180_v47 = vld [vmem:[%s5873_s1 + $0x198] sm:$0xff] }
  0x11   :  { %3406 = vmatprep.mubr.msk.f32.mxu0 %vm201_vm0, %v137_v12  ;;  %v181_v48 = vld [vmem:[%s5873_s1 + $0x1a0] sm:$0xff]  ;;  %v154_v49 = vld [vmem:[%s5873_s1 + $0xc8] sm:$0xff]  ;;  %v155_v50 = vld [vmem:[%s5873_s1 + $0xd0] sm:$0xff] }
  0x12   :  { %3452 = vmatmul.mubr.msk.f32.gmra.mxu1 %vm201_vm0, %v168_v22  ;;  %v182_v51 = vld [vmem:[%s5873_s1 + $0x1a8] sm:$0xff]  ;;  %v183_v52 = vld [vmem:[%s5873_s1 + $0x1b0] sm:$0xff]  ;;  %v156_v53 = vld [vmem:[%s5873_s1 + $0xd8] sm:$0xff] }
  0x13   :  { %3454 = vmatprep.mubr.msk.f32.mxu1 %vm201_vm0, %v169_v24  ;;  %v157_v54 = vld [vmem:[%s5873_s1 + $0xe0] sm:$0xff]  ;;  %v184_v55 = vld [vmem:[%s5873_s1 + $0x1b8] sm:$0xff]  ;;  %v158_v57 = vld [vmem:[%s5873_s1 + $0xe8] sm:$0xff] }
  0x14   :  { %3407 = vmatmul.mubr.msk.f32.gmra.mxu0 %vm201_vm0, %v138_v15  ;;  %v185_v56 = vld [vmem:[%s5873_s1 + $0x1c0] sm:$0xff]  ;;  %v159_v58 = vld [vmem:[%s5873_s1 + $0xf0] sm:$0xff]  ;;  %v186_v59 = vld [vmem:[%s5873_s1 + $0x1c8] sm:$0xff] }
  0x15   :  { %3409 = vmatprep.mubr.msk.f32.mxu0 %vm201_vm0, %v139_v16  ;;  %v187_v60 = vld [vmem:[%s5873_s1 + $0x1d0] sm:$0xff]  ;;  %v160_v61 = vld [vmem:[%s5873_s1 + $0xf8] sm:$0xff]  ;;  %v189_v63 = vld [vmem:[%s5873_s1 + $0x1e0] sm:$0xff]  ;;  %v780_v16 = vshrl.u32 %v779_v13, 7 }
  0x16   :  { %3455 = vmatmul.mubr.msk.f32.gmra.mxu1 %vm201_vm0, %v170_v27  ;;  %v188_v62 = vld [vmem:[%s5873_s1 + $0x1d8] sm:$0xff]  ;;  %v190_v0 = vld [vmem:[%s5873_s1 + $0x1e8] sm:$0xff]  ;;  %v191_v1 = vld [vmem:[%s5873_s1 + $0x1f0] sm:$0xff] }
  0x17   :  { %3457 = vmatprep.mubr.msk.f32.mxu1 %vm201_vm0, %v171_v28  ;;  %v192_v2 = vld [vmem:[%s5873_s1 + $0x1f8] sm:$0xff]  ;;  %v35_v3 = vld [vmem:[%s5875_s2] sm:$0xf]  ;;  %v849_v23 = vsub.s32 3, %v780_v16  ;;  %v66_v24 = vld [vmem:[%s5877_s0 + $0x8] sm:$0xff] }
  0x18   :  { %3410 = vmatmul.mubr.msk.f32.gmra.mxu0 %vm201_vm0, %v140_v19  ;;  %v36_v4 = vadd.f32 1e-05, %v35_v3  ;;  %v50_v5 = vld [vmem:[%s5876_s3] sm:$0xf]  ;;  %v781_v19 = vsub.s32 2, %v780_v16 }
  0x19   :  { %3412 = vmatprep.mubr.msk.f32.mxu0 %vm201_vm0, %v141_v20  ;;  %v51_v6 = vadd.f32 1e-05, %v50_v5 }
  0x1a   :  { %3458 = vmatmul.mubr.msk.f32.gmra.mxu1 %vm201_vm0, %v172_v31  ;;  %3690 = vrsqrt.f32 %v36_v4 }
  0x1b   :  { %3460 = vmatprep.mubr.msk.f32.mxu1 %vm201_vm0, %v173_v32  ;;  %3692 = vrsqrt.f32 %v51_v6 }
  0x1c   :  { %3413 = vmatmul.mubr.msk.f32.gmra.mxu0 %vm201_vm0, %v142_v25 }
  0x1d   :  { %3415 = vmatprep.mubr.msk.f32.mxu0 %vm201_vm0, %v143_v26  ;;  %v65_v26 = vld [vmem:[%s5877_s0] sm:$0xff] }
  0x1e   :  { %3461 = vmatmul.mubr.msk.f32.gmra.mxu1 %vm201_vm0, %v174_v35  ;;  %v67_v35 = vld [vmem:[%s5877_s0 + $0x10] sm:$0xff] }
  0x1f   :  { %3463 = vmatprep.mubr.msk.f32.mxu1 %vm201_vm0, %v175_v36 }
  0x20   :  { %3416 = vmatmul.mubr.msk.f32.gmra.mxu0 %vm201_vm0, %v144_v29  ;;  %v4292_v29 = vld [vmem:[%s5878_s5] ss:$0 sm:$0xff] }
  0x21   :  { %3418 = vmatprep.mubr.msk.f32.mxu0 %vm201_vm0, %v145_v30  ;;  %v68_v30 = vld [vmem:[%s5877_s0 + $0x18] sm:$0xff] }
  0x22   :  { %3464 = vmatmul.mubr.msk.f32.gmra.mxu1 %vm201_vm0, %v176_v39  ;;  %v70_v39 = vld [vmem:[%s5877_s0 + $0x28] sm:$0xff] }
  0x23   :  { %3466 = vmatprep.mubr.msk.f32.mxu1 %vm201_vm0, %v177_v40 }
  0x24   :  { %3419 = vmatmul.mubr.msk.f32.gmra.mxu0 %vm201_vm0, %v146_v33 }
  0x25   :  { %3421 = vmatprep.mubr.msk.f32.mxu0 %vm201_vm0, %v147_v34 }
  0x26   :  { %3467 = vmatmul.mubr.msk.f32.gmra.mxu1 %vm201_vm0, %v178_v43 }
  0x27   :  { %3469 = vmatprep.mubr.msk.f32.mxu1 %vm201_vm0, %v179_v44  ;;  %v3691_v7 = vpop.eup %3690 }
  0x28   :  { %3422 = vmatmul.mubr.msk.f32.gmra.mxu0 %vm201_vm0, %v148_v37  ;;  %v39_v8 = vrot.slane %v3691_v7, 7  ;;  %v3693_v9 = vpop.eup %3692 }
  0x29   :  { %3424 = vmatprep.mubr.msk.f32.mxu0 %vm201_vm0, %v149_v38  ;;  %v54_v11 = vrot.slane %v3693_v9, 7 }
  0x2a   :  { %3470 = vmatmul.mubr.msk.f32.gmra.mxu1 %vm201_vm0, %v180_v47  ;;  %v41_v10 = vmul.f32 %v39_v8, %v35_v3 }
  0x2b   :  { %3472 = vmatprep.mubr.msk.f32.mxu1 %vm201_vm0, %v181_v48  ;;  %v56_v14 = vmul.f32 %v54_v11, %v50_v5 }
  0x2c   :  { %3425 = vmatmul.mubr.msk.f32.gmra.mxu0 %vm201_vm0, %v150_v41  ;;  %v43_v12 = vrot.slane %v41_v10, 2  ;;  %v4278_v22 = vrot.slane %v41_v10, %v781_v19 }
  0x2d   :  { %3427 = vmatprep.mubr.msk.f32.mxu0 %vm201_vm0, %v151_v42  ;;  %v58_v17 = vrot.slane %v56_v14, 2  ;;  %v4297_v31 = vrot.slane %v56_v14, %v781_v19 }
  0x2e   :  { %3473 = vmatmul.mubr.msk.f32.gmra.mxu1 %vm201_vm0, %v182_v51  ;;  %v45_v15 = vmul.f32 %v43_v12, %v35_v3  ;;  %v784_v27 = vmul.f32 %v4278_v22, %v66_v24  ;;  %v783_v32 = vmul.f32 %v4278_v22, %v65_v26  ;;  %v786_v38 = vmul.f32 %v4278_v22, %v68_v30  ;;  %v76_v26 = vld [vmem:[%s5877_s0 + $0x58] sm:$0xff] }
  0x2f   :  { %3475 = vmatprep.mubr.msk.f32.mxu1 %vm201_vm0, %v183_v52  ;;  %v60_v20 = vmul.f32 %v58_v17, %v50_v5  ;;  %v785_v44 = vmul.f32 %v4278_v22, %v67_v35 }
  0x30   :  { %3428 = vmatmul.mubr.msk.f32.gmra.mxu0 %vm201_vm0, %v152_v45  ;;  %v47_v18 = vrot.slane %v45_v15, 5  ;;  %v69_v45 = vld [vmem:[%s5877_s0 + $0x20] sm:$0xff] }
  0x31   :  { %3430 = vmatprep.mubr.msk.f32.mxu0 %vm201_vm0, %v153_v46  ;;  %v62_v25 = vrot.slane %v60_v20, 5  ;;  %v72_v46 = vld [vmem:[%s5877_s0 + $0x38] sm:$0xff]  ;;  %v73_v15 = vld [vmem:[%s5877_s0 + $0x40] sm:$0xff] }
  0x32   :  { %3476 = vmatmul.mubr.msk.f32.gmra.mxu1 %vm201_vm0, %v184_v55  ;;  %v49_v21 = vsub.f32 %v35_v3, %v47_v18  ;;  %v787_v55 = vmul.f32 %v4278_v22, %v69_v45 }
  0x33   :  { %3478 = vmatprep.mubr.msk.f32.mxu1 %vm201_vm0, %v185_v56  ;;  %v64_v33 = vsub.f32 %v50_v5, %v62_v25  ;;  %v790_v56 = vmul.f32 %v4278_v22, %v72_v46 }
  0x34   :  { %3431 = vmatmul.mubr.msk.f32.gmra.mxu0 %vm201_vm0, %v154_v49  ;;  %v4287_v28 = vrot.slane %v49_v21, %v849_v23  ;;  %v788_v49 = vmul.f32 %v4278_v22, %v70_v39  ;;  %v1830_v21 = vld [vmem:[%s5879_s8] sm:$0x3] }
  0x35   :  { %3433 = vmatprep.mubr.msk.f32.mxu0 %vm201_vm0, %v155_v50  ;;  %v4319_v47 = vrot.slane %v64_v33, %v849_v23  ;;  %3590 = vmatprep.subr.msk.mxu0 %vm2031_vm2, %v1830_v21  ;;  %v791_v33 = vmul.f32 %v4278_v22, %v73_v15 }
  0x36   :  { %3479 = vmatmul.mubr.msk.f32.gmra.mxu1 %vm201_vm0, %v186_v59  ;;  %v852_v37 = vadd.f32 %v4287_v28, %v784_v27  ;;  %v851_v43 = vadd.f32 %v4287_v28, %v783_v32  ;;  %v855_v7 = vadd.f32 %v4287_v28, %v787_v55  ;;  %v858_v8 = vadd.f32 %v4287_v28, %v790_v56 }
  0x37   :  { %3481 = vmatprep.mubr.msk.f32.mxu1 %vm201_vm0, %v187_v60  ;;  %v853_v60 = vadd.f32 %v4287_v28, %v785_v44  ;;  %3591 = vmatpush3.msk.msra.mxu0 %vm2031_vm2, %v1830_v21  ;;  %v75_v44 = vld [vmem:[%s5877_s0 + $0x50] sm:$0xff]  ;;  %v80_v21 = vld [vmem:[%s5877_s0 + $0x78] sm:$0xff] }
  0x38   :  { %3434 = vmatmul.mubr.msk.f32.gmra.mxu0 %vm201_vm0, %v156_v53  ;;  %v854_v53 = vadd.f32 %v4287_v28, %v786_v38 }
  0x39   :  { %3436 = vmatprep.mubr.msk.f32.mxu0 %vm201_vm0, %v157_v54 }
  0x3a   :  { %3482 = vmatmul.mubr.msk.f32.gmra.mxu1 %vm201_vm0, %v188_v62 }
  0x3b   :  { %3484 = vmatprep.mubr.msk.f32.mxu1 %vm201_vm0, %v189_v63 }
  0x3c   :  { %3437 = vmatmul.mubr.msk.f32.gmra.mxu0 %vm201_vm0, %v158_v57 }
  0x3d   :  { %3439 = vmatprep.mubr.msk.f32.mxu0 %vm201_vm0, %v159_v58 }
  0x3e   :  { %3485 = vmatmul.mubr.msk.f32.gmra.mxu1 %vm201_vm0, %v190_v0  ;;  %v856_v0 = vadd.f32 %v4287_v28, %v788_v49 }
  0x3f   :  { %3487 = vmatprep.mubr.msk.f32.mxu1 %vm201_vm0, %v191_v1  ;;  %v74_v1 = vld [vmem:[%s5877_s0 + $0x48] sm:$0xff] }
  0x40   :  { %3440 = vmatmul.mubr.msk.f32.gmra.mxu0 %vm201_vm0, %v160_v61  ;;  %v71_v61 = vld [vmem:[%s5877_s0 + $0x30] sm:$0xff]  ;;  %v792_v14 = vmul.f32 %v4278_v22, %v74_v1 }
  0x41   :  { %v789_v9 = vmul.f32 %v4278_v22, %v71_v61 }
  0x42   :  { %3488 = vmatmul.mubr.msk.f32.gmra.mxu1 %vm201_vm0, %v192_v2 }
  0x43   :  { %v857_v32 = vadd.f32 %v4287_v28, %v789_v9 }
  0xc4   :  { %v3396_v34 = vpop.f32.mrf.mxu0 }
  0xc5   :  { %v466_v36 = vadd.f32 %v3396_v34, %v4292_v29 }
  0xc6   :  { %v460_v40 = vpop.f32.mrf.mxu0  ;;  %v4348_v10 = vpop.f32.mrf.mxu1 }
  0xc7   :  { %v920_v41 = vmul.f32 %v4297_v31, %v466_v36  ;;  %v461_v42 = vadd.f32 %v4292_v29, %v460_v40 }
  0xc8   :  { %v3399_v48 = vpop.f32.mrf.mxu0  ;;  %v4361_v20 = vpop.f32.mrf.mxu1 }
  0xc9   :  { %v984_v50 = vadd.f32 %v920_v41, %v852_v37  ;;  %v919_v51 = vmul.f32 %v4297_v31, %v461_v42  ;;  %v476_v52 = vadd.f32 %v3399_v48, %v4292_v29  ;;  %v860_v42 = vadd.f32 %v4287_v28, %v792_v14 }
  0xca   :  { %v470_v54 = vpop.f32.mrf.mxu0  ;;  %v4382_v34 = vpop.f32.mrf.mxu1 }
  0xcb   :  { %v983_v57 = vadd.f32 %v919_v51, %v851_v43  ;;  %v922_v58 = vmul.f32 %v4297_v31, %v476_v52  ;;  %v471_v59 = vadd.f32 %v4292_v29, %v470_v54  ;;  %v4334_v62 = vadd.f32 %v4319_v47, %v984_v50 }
  0xcc   :  { %v3402_v63 = vpop.f32.mrf.mxu0  ;;  %v794_v43 = vmul.f32 %v4278_v22, %v76_v26  ;;  %v4396_v45 = vpop.f32.mrf.mxu1  ;;  %v859_v52 = vadd.f32 %v4287_v28, %v791_v33 }
  0xcd   :  { %v4341_v2 = vadd.f32 %v4319_v47, %v983_v57  ;;  %v986_v3 = vadd.f32 %v922_v58, %v854_v53  ;;  %v921_v4 = vmul.f32 %v4297_v31, %v471_v59  ;;  %v486_v5 = vadd.f32 %v3402_v63, %v4292_v29  ;;  %v78_v53 = vld [vmem:[%s5877_s0 + $0x68] sm:$0xff]  ;;  %v77_v59 = vld [vmem:[%s5877_s0 + $0x60] sm:$0xff] }
  0xce   :  { %v480_v6 = vpop.f32.mrf.mxu0  ;;  %v5900_v16 = vmax.f32 %v4334_v62, 0.0  ;;  %v4413_v54 = vpop.f32.mrf.mxu1  ;;  %v793_v58 = vmul.f32 %v4278_v22, %v75_v44  ;;  %v862_v1 = vadd.f32 %v4287_v28, %v794_v43 }
  0xcf   :  { %v5898_v11 = vmax.f32 %v4341_v2, 0.0  ;;  %v985_v12 = vadd.f32 %v921_v4, %v853_v60  ;;  %v481_v13 = vadd.f32 %v4292_v29, %v480_v6  ;;  %v4358_v17 = vadd.f32 %v4319_v47, %v986_v3 }
  0xd0   :  { %v924_v18 = vmul.f32 %v4297_v31, %v486_v5  ;;  %v3405_v19 = vpop.f32.mrf.mxu0  ;;  %v4427_v3 = vpop.f32.mrf.mxu1 }
  0xd1   :  { %v4367_v23 = vadd.f32 %v4319_v47, %v985_v12  ;;  %v923_v24 = vmul.f32 %v4297_v31, %v481_v13  ;;  %v496_v25 = vadd.f32 %v3405_v19, %v4292_v29  ;;  %3494 = vmatprep.mubr.msk.f32.mxu1 %vm1188_vm1, %v5898_v11  ;;  %v5897_v39 = vmax.f32 %v4358_v17, 0.0 }
  0xd2   :  { %v988_v27 = vadd.f32 %v924_v18, %v856_v0  ;;  %v490_v30 = vpop.f32.mrf.mxu0  ;;  %3495 = vmatmul.mubr.msk.f32.vlgmr.msra.gmra.mxu1 %vm1188_vm1, %v5900_v16  ;;  %v795_v12 = vmul.f32 %v4278_v22, %v77_v59  ;;  %v4442_v13 = vpop.f32.mrf.mxu1  ;;  %v861_v19 = vadd.f32 %v4287_v28, %v793_v58 }
  0xd3   :  { %v5895_v35 = vmax.f32 %v4367_v23, 0.0  ;;  %v987_v36 = vadd.f32 %v923_v24, %v855_v7  ;;  %v926_v37 = vmul.f32 %v4297_v31, %v496_v25  ;;  %v491_v38 = vadd.f32 %v4292_v29, %v490_v30  ;;  %v79_v30 = vld [vmem:[%s5877_s0 + $0x70] sm:$0xff] }
  0xd4   :  { %v4389_v40 = vadd.f32 %v4319_v47, %v988_v27  ;;  %v3408_v41 = vpop.f32.mrf.mxu0  ;;  %v796_v7 = vmul.f32 %v4278_v22, %v78_v53  ;;  %v863_v44 = vadd.f32 %v4287_v28, %v795_v12  ;;  %v797_v53 = vmul.f32 %v4278_v22, %v79_v30 }
  0xd5   :  { %v4399_v46 = vadd.f32 %v4319_v47, %v987_v36  ;;  %v990_v48 = vadd.f32 %v926_v37, %v858_v8  ;;  %v925_v49 = vmul.f32 %v4297_v31, %v491_v38  ;;  %v506_v50 = vadd.f32 %v3408_v41, %v4292_v29  ;;  %3497 = vmatprep.mubr.msk.f32.mxu1 %vm1188_vm1, %v5895_v35  ;;  %v82_v41 = vld [vmem:[%s5877_s0 + $0x88] sm:$0xff] }
  0xd6   :  { %v500_v51 = vpop.f32.mrf.mxu0  ;;  %3498 = vmatmul.mubr.msk.f32.gmra.mxu1 %vm1188_vm1, %v5897_v39  ;;  %v5894_v60 = vmax.f32 %v4389_v40, 0.0  ;;  %v864_v38 = vadd.f32 %v4287_v28, %v796_v7  ;;  %v865_v30 = vadd.f32 %v4287_v28, %v797_v53 }
  0xd7   :  { %v5893_v55 = vmax.f32 %v4399_v46, 0.0  ;;  %v989_v56 = vadd.f32 %v925_v49, %v857_v32  ;;  %v928_v57 = vmul.f32 %v4297_v31, %v506_v50  ;;  %v4423_v61 = vadd.f32 %v4319_v47, %v990_v48  ;;  %v4458_v32 = vpop.f32.mrf.mxu1 }
  0xd8   :  { %v501_v63 = vadd.f32 %v4292_v29, %v500_v51  ;;  %v3411_v0 = vpop.f32.mrf.mxu0  ;;  %v798_v48 = vmul.f32 %v4278_v22, %v80_v21 }
  0xd9   :  { %v4430_v4 = vadd.f32 %v4319_v47, %v989_v56  ;;  %v992_v5 = vadd.f32 %v928_v57, %v860_v42  ;;  %v516_v6 = vadd.f32 %v3411_v0, %v4292_v29  ;;  %3500 = vmatprep.mubr.msk.f32.mxu1 %vm1188_vm1, %v5893_v55  ;;  %v5890_v24 = vmax.f32 %v4423_v61, 0.0  ;;  %v4477_v49 = vpop.f32.mrf.mxu1  ;;  %v81_v56 = vld [vmem:[%s5877_s0 + $0x80] sm:$0xff] }
  0xda   :  { %v927_v8 = vmul.f32 %v4297_v31, %v501_v63  ;;  %v510_v9 = vpop.f32.mrf.mxu0  ;;  %3501 = vmatmul.mubr.msk.f32.gmra.mxu1 %vm1188_vm1, %v5894_v60  ;;  %v800_v63 = vmul.f32 %v4278_v22, %v82_v41  ;;  %v866_v12 = vadd.f32 %v4287_v28, %v798_v48 }
  0xdb   :  { %v5889_v14 = vmax.f32 %v4430_v4, 0.0  ;;  %v930_v15 = vmul.f32 %v4297_v31, %v516_v6  ;;  %v511_v18 = vadd.f32 %v4292_v29, %v510_v9  ;;  %v4453_v25 = vadd.f32 %v4319_v47, %v992_v5  ;;  %v4488_v0 = vpop.f32.mrf.mxu1 }
  0xdc   :  { %v991_v26 = vadd.f32 %v927_v8, %v859_v52  ;;  %v3414_v27 = vpop.f32.mrf.mxu0  ;;  %v84_v8 = vld [vmem:[%s5877_s0 + $0x98] sm:$0xff] }
  0xdd   :  { %v994_v33 = vadd.f32 %v930_v15, %v862_v1  ;;  %v929_v36 = vmul.f32 %v4297_v31, %v511_v18  ;;  %v526_v37 = vadd.f32 %v3414_v27, %v4292_v29  ;;  %3503 = vmatprep.mubr.msk.f32.mxu1 %vm1188_vm1, %v5889_v14  ;;  %v5887_v57 = vmax.f32 %v4453_v25, 0.0 }
  0xde   :  { %v4470_v42 = vadd.f32 %v4319_v47, %v991_v26  ;;  %v520_v43 = vpop.f32.mrf.mxu0  ;;  %3504 = vmatmul.mubr.msk.f32.gmra.mxu1 %vm1188_vm1, %v5890_v24  ;;  %v799_v18 = vmul.f32 %v4278_v22, %v81_v56 }
  0xdf   :  { %v993_v50 = vadd.f32 %v929_v36, %v861_v19  ;;  %v932_v51 = vmul.f32 %v4297_v31, %v526_v37  ;;  %v521_v52 = vadd.f32 %v4292_v29, %v520_v43  ;;  %v4491_v1 = vadd.f32 %v4319_v47, %v994_v33  ;;  %v4506_v19 = vpop.f32.mrf.mxu1  ;;  %v83_v33 = vld [vmem:[%s5877_s0 + $0x90] sm:$0xff]  ;;  %v86_v36 = vld [vmem:[%s5877_s0 + $0xa8] sm:$0xff] }
  0xe0   :  { %v5886_v58 = vmax.f32 %v4470_v42, 0.0  ;;  %v3417_v59 = vpop.f32.mrf.mxu0  ;;  %v868_v43 = vadd.f32 %v4287_v28, %v800_v63  ;;  %v867_v63 = vadd.f32 %v4287_v28, %v799_v18 }
  0xe1   :  { %v4494_v5 = vadd.f32 %v4319_v47, %v993_v50  ;;  %v996_v6 = vadd.f32 %v932_v51, %v864_v38  ;;  %v931_v7 = vmul.f32 %v4297_v31, %v521_v52  ;;  %v536_v9 = vadd.f32 %v3417_v59, %v4292_v29  ;;  %v4535_v53 = vpop.f32.mrf.mxu1 }
  0xe2   :  { %3506 = vmatprep.mubr.msk.f32.mxu1 %vm1188_vm1, %v5886_v58  ;;  %v530_v15 = vpop.f32.mrf.mxu0  ;;  %v5885_v48 = vmax.f32 %v4491_v1, 0.0  ;;  %v89_v58 = vld [vmem:[%s5877_s0 + $0xc0] sm:$0xff] }
  0xe3   :  { %v5884_v21 = vmax.f32 %v4494_v5, 0.0  ;;  %v995_v26 = vadd.f32 %v931_v7, %v863_v44  ;;  %v531_v27 = vadd.f32 %v4292_v29, %v530_v15  ;;  %3507 = vmatmul.mubr.msk.f32.gmra.mxu1 %vm1188_vm1, %v5887_v57  ;;  %v4521_v37 = vadd.f32 %v4319_v47, %v996_v6 }
  0xe4   :  { %v934_v38 = vmul.f32 %v4297_v31, %v536_v9  ;;  %v3420_v41 = vpop.f32.mrf.mxu0  ;;  %v802_v44 = vmul.f32 %v4278_v22, %v84_v8  ;;  %v801_v6 = vmul.f32 %v4278_v22, %v83_v33  ;;  %v804_v7 = vmul.f32 %v4278_v22, %v86_v36  ;;  %v88_v36 = vld [vmem:[%s5877_s0 + $0xb8] sm:$0xff] }
  0xe5   :  { %v4528_v50 = vadd.f32 %v4319_v47, %v995_v26  ;;  %v933_v51 = vmul.f32 %v4297_v31, %v531_v27  ;;  %v546_v52 = vadd.f32 %v3420_v41, %v4292_v29  ;;  %3509 = vmatprep.mubr.msk.f32.mxu1 %vm1188_vm1, %v5884_v21  ;;  %v5888_v18 = vmax.f32 %v4521_v37, 0.0 }
  0xe6   :  { %v998_v56 = vadd.f32 %v934_v38, %v866_v12  ;;  %v540_v59 = vpop.f32.mrf.mxu0  ;;  %v85_v12 = vld [vmem:[%s5877_s0 + $0xa0] sm:$0xff] }
  0xe7   :  { %v5883_v8 = vmax.f32 %v4528_v50, 0.0  ;;  %v997_v9 = vadd.f32 %v933_v51, %v865_v30  ;;  %v936_v15 = vmul.f32 %v4297_v31, %v546_v52  ;;  %v541_v26 = vadd.f32 %v4292_v29, %v540_v59  ;;  %3510 = vmatmul.mubr.msk.f32.gmra.mxu1 %vm1188_vm1, %v5885_v48  ;;  %v4571_v59 = vpop.f32.mrf.mxu1 }
  0xe8   :  { %v4551_v27 = vadd.f32 %v4319_v47, %v998_v56  ;;  %v3423_v33 = vpop.f32.mrf.mxu0  ;;  %v870_v30 = vadd.f32 %v4287_v28, %v802_v44  ;;  %v87_v44 = vld [vmem:[%s5877_s0 + $0xb0] sm:$0xff]  ;;  %v90_v56 = vld [vmem:[%s5877_s0 + $0xc8] sm:$0xff]  ;;  %v806_v48 = vmul.f32 %v4278_v22, %v88_v36 }
  0xe9   :  { %v4558_v38 = vadd.f32 %v4319_v47, %v997_v9  ;;  %v1000_v41 = vadd.f32 %v936_v15, %v868_v43  ;;  %v935_v51 = vmul.f32 %v4297_v31, %v541_v26  ;;  %v556_v52 = vadd.f32 %v3423_v33, %v4292_v29  ;;  %3512 = vmatprep.mubr.msk.f32.mxu1 %vm1188_vm1, %v5883_v8  ;;  %v4599_v14 = vpop.f32.mrf.mxu1 }
  0xea   :  { %v550_v9 = vpop.f32.mrf.mxu0  ;;  %v869_v43 = vadd.f32 %v4287_v28, %v801_v6  ;;  %v872_v15 = vadd.f32 %v4287_v28, %v804_v7  ;;  %v803_v26 = vmul.f32 %v4278_v22, %v85_v12  ;;  %v5892_v6 = vmax.f32 %v4551_v27, 0.0 }
  0xeb   :  { %5946 = vst [vmem:[#allocation2_spill] sm:$0xff] %v4558_v38  ;;  %v5891_v33 = vmax.f32 %v4558_v38, 0.0  ;;  %v999_v8 = vadd.f32 %v935_v51, %v867_v63  ;;  %v938_v21 = vmul.f32 %v4297_v31, %v556_v52  ;;  %3513 = vmatmul.mubr.msk.f32.gmra.mxu1 %vm1188_vm1, %v5888_v18  ;;  %v551_v7 = vadd.f32 %v4292_v29, %v550_v9 }
  0xec   :  { %v3426_v12 = vpop.f32.mrf.mxu0  ;;  %v805_v57 = vmul.f32 %v4278_v22, %v87_v44  ;;  %v808_v63 = vmul.f32 %v4278_v22, %v90_v56  ;;  %v4590_v51 = vadd.f32 %v4319_v47, %v1000_v41  ;;  %v871_v56 = vadd.f32 %v4287_v28, %v803_v26 }
  0xed   :  { %v4593_v52 = vadd.f32 %v4319_v47, %v999_v8  ;;  %v1002_v36 = vadd.f32 %v938_v21, %v870_v30  ;;  %v566_v18 = vadd.f32 %v3426_v12, %v4292_v29  ;;  %3515 = vmatprep.mubr.msk.f32.mxu1 %vm1188_vm1, %v5891_v33  ;;  %v937_v9 = vmul.f32 %v4297_v31, %v551_v7  ;;  %v92_v7 = vld [vmem:[%s5877_s0 + $0xd8] sm:$0xff] }
  0xee   :  { %5947 = vst [vmem:[#allocation3_spill] sm:$0xff] %v4590_v51  ;;  %v560_v44 = vpop.f32.mrf.mxu0  ;;  %v807_v41 = vmul.f32 %v4278_v22, %v89_v58  ;;  %v874_v30 = vadd.f32 %v4287_v28, %v806_v48  ;;  %v91_v58 = vld [vmem:[%s5877_s0 + $0xd0] sm:$0xff]  ;;  %v876_v33 = vadd.f32 %v4287_v28, %v808_v63  ;;  %v94_v48 = vld [vmem:[%s5877_s0 + $0xe8] sm:$0xff]  ;;  %v4637_v63 = vpop.f32.mrf.mxu1 }
  0xef   :  { %5948 = vst [vmem:[#allocation4_spill] sm:$0xff] %v4593_v52  ;;  %v5896_v24 = vmax.f32 %v4593_v52, 0.0  ;;  %v940_v8 = vmul.f32 %v4297_v31, %v566_v18  ;;  %v561_v21 = vadd.f32 %v4292_v29, %v560_v44  ;;  %3516 = vmatmul.mubr.msk.f32.gmra.mxu1 %vm1188_vm1, %v5892_v6  ;;  %v4618_v26 = vadd.f32 %v4319_v47, %v1002_v36 }
  0xf0   :  { %v1001_v18 = vadd.f32 %v937_v9, %v869_v43  ;;  %v3429_v12 = vpop.f32.mrf.mxu0  ;;  %v873_v44 = vadd.f32 %v4287_v28, %v805_v57  ;;  %v5899_v6 = vmax.f32 %v4590_v51, 0.0  ;;  %v93_v57 = vld [vmem:[%s5877_s0 + $0xe0] sm:$0xff]  ;;  %v96_v43 = vld [vmem:[%s5877_s0 + $0xf8] sm:$0xff]  ;;  %v875_v9 = vadd.f32 %v4287_v28, %v807_v41  ;;  %v4665_v16 = vpop.f32.mrf.mxu1 }
  0xf1   :  { %5949 = vst [vmem:[#allocation5_spill] sm:$0xff] %v4618_v26  ;;  %v1004_v55 = vadd.f32 %v940_v8, %v872_v15  ;;  %v939_v60 = vmul.f32 %v4297_v31, %v561_v21  ;;  %v576_v35 = vadd.f32 %v3429_v12, %v4292_v29  ;;  %3518 = vmatprep.mubr.msk.f32.mxu1 %vm1188_vm1, %v5896_v24 }
  0xf2   :  { %v4640_v15 = vadd.f32 %v4319_v47, %v1001_v18  ;;  %v570_v36 = vpop.f32.mrf.mxu0  ;;  %v810_v8 = vmul.f32 %v4278_v22, %v92_v7  ;;  %v809_v21 = vmul.f32 %v4278_v22, %v91_v58  ;;  %v812_v11 = vmul.f32 %v4278_v22, %v94_v48  ;;  %v95_v18 = vld [vmem:[%s5877_s0 + $0xf0] sm:$0xff] }
  0xf3   :  { %v1003_v12 = vadd.f32 %v939_v60, %v871_v56  ;;  %v942_v24 = vmul.f32 %v4297_v31, %v576_v35  ;;  %v571_v39 = vadd.f32 %v4292_v29, %v570_v36  ;;  %3519 = vmatmul.mubr.msk.f32.gmra.mxu1 %vm1188_vm1, %v5899_v6  ;;  %v811_v60 = vmul.f32 %v4278_v22, %v93_v57 }
  0xf4   :  { %5950 = vst [vmem:[#allocation6_spill] sm:$0xff] %v4640_v15  ;;  %v5902_v7 = vmax.f32 %v4640_v15, 0.0  ;;  %v3432_v58 = vpop.f32.mrf.mxu0  ;;  %v814_v35 = vmul.f32 %v4278_v22, %v96_v43  ;;  %v4659_v56 = vadd.f32 %v4319_v47, %v1004_v55  ;;  %v878_v43 = vadd.f32 %v4287_v28, %v810_v8  ;;  %v97_v8 = vld [vmem:[%s5877_s0 + $0x100] sm:$0xff] }
  0xf5   :  { %v4662_v36 = vadd.f32 %v4319_v47, %v1003_v12  ;;  %v1006_v48 = vadd.f32 %v942_v24, %v874_v30  ;;  %v941_v6 = vmul.f32 %v4297_v31, %v571_v39  ;;  %v586_v41 = vadd.f32 %v3432_v58, %v4292_v29 }
  0xf6   :  { %5951 = vst [vmem:[#allocation7_spill] sm:$0xff] %v4659_v56  ;;  %3521 = vmatprep.mubr.msk.f32.mxu1 %vm1188_vm1, %v5902_v7  ;;  %v580_v57 = vpop.f32.mrf.mxu0  ;;  %v877_v55 = vadd.f32 %v4287_v28, %v809_v21  ;;  %v813_v52 = vmul.f32 %v4278_v22, %v95_v18  ;;  %v5953_v30 = vmax.f32 %v4618_v26, 0.0  ;;  %v880_v58 = vadd.f32 %v4287_v28, %v812_v11  ;;  %v98_v7 = vld [vmem:[%s5877_s0 + $0x108] sm:$0xff] }
  0xf7   :  { %5952 = vst [vmem:[#allocation8_spill] sm:$0xff] %v4662_v36  ;;  %v1005_v24 = vadd.f32 %v941_v6, %v873_v44  ;;  %v581_v39 = vadd.f32 %v4292_v29, %v580_v57  ;;  %v4687_v21 = vadd.f32 %v4319_v47, %v1006_v48  ;;  %v944_v6 = vmul.f32 %v4297_v31, %v586_v41  ;;  %v99_v41 = vld [vmem:[%s5877_s0 + $0x110] sm:$0xff] }
  0xf8   :  { %3522 = vmatmul.mubr.msk.f32.gmra.mxu1 %vm1188_vm1, %v5953_v30  ;;  %v3435_v44 = vpop.f32.mrf.mxu0  ;;  %v4691_v18 = vadd.f32 %v4287_v28, %v811_v60  ;;  %v4694_v57 = vadd.f32 %v4287_v28, %v814_v35  ;;  %v5956_v48 = vmax.f32 %v4662_v36, 0.0  ;;  %v4708_v60 = vpop.f32.mrf.mxu1  ;;  %v4711_v11 = vadd.f32 %v4287_v28, %v813_v52 }
  0xf9   :  { %5954 = vst [vmem:[#allocation9_spill] sm:$0xff] %v4687_v21  ;;  %v4698_v30 = vadd.f32 %v4319_v47, %v1005_v24  ;;  %v943_v12 = vmul.f32 %v4297_v31, %v581_v39  ;;  %v596_v15 = vadd.f32 %v3435_v44, %v4292_v29  ;;  %v1008_v35 = vadd.f32 %v944_v6, %v876_v33  ;;  %v100_v33 = vld [vmem:[%s5877_s0 + $0x118] sm:$0xff] }
  0xfa   :  { %3524 = vmatprep.mubr.msk.f32.mxu1 %vm1188_vm1, %v5956_v48  ;;  %v590_v26 = vpop.f32.mrf.mxu0  ;;  %v816_v24 = vmul.f32 %v4278_v22, %v98_v7  ;;  %v815_v39 = vmul.f32 %v4278_v22, %v97_v8  ;;  %v5957_v38 = vmax.f32 %v4659_v56, 0.0 }
  0xfb   :  { %5955 = vst [vmem:[#allocation10_spill] sm:$0xff] %v4698_v30  ;;  %v5909_v44 = vmax.f32 %v4698_v30, 0.0  ;;  %v1007_v36 = vadd.f32 %v943_v12, %v875_v9  ;;  %v946_v48 = vmul.f32 %v4297_v31, %v596_v15  ;;  %v591_v51 = vadd.f32 %v4292_v29, %v590_v26 }
  0xfc   :  { %3525 = vmatmul.mubr.msk.f32.gmra.mxu1 %vm1188_vm1, %v5957_v38  ;;  %v4726_v7 = vadd.f32 %v4319_v47, %v1008_v35  ;;  %v3438_v8 = vpop.f32.mrf.mxu0  ;;  %v621_v9 = vadd.f32 %v4292_v29, %v4361_v20  ;;  %v817_v15 = vmul.f32 %v4278_v22, %v99_v41  ;;  %v4739_v35 = vpop.f32.mrf.mxu1  ;;  %v626_v20 = vadd.f32 %v4348_v10, %v4292_v29  ;;  %v101_v10 = vld [vmem:[%s5877_s0 + $0x120] sm:$0xff] }
  0xfd   :  { %v4732_v26 = vadd.f32 %v4319_v47, %v1007_v36  ;;  %v1010_v12 = vadd.f32 %v946_v48, %v878_v43  ;;  %v945_v38 = vmul.f32 %v4297_v31, %v591_v51  ;;  %v606_v6 = vadd.f32 %v3438_v8, %v4292_v29  ;;  %3527 = vmatprep.mubr.msk.f32.mxu1 %vm1188_vm1, %v5909_v44 }
  0xfe   :  { %5958 = vst [vmem:[#allocation11_spill] sm:$0xff] %v4726_v7  ;;  %v600_v52 = vpop.f32.mrf.mxu0  ;;  %v884_v41 = vadd.f32 %v4287_v28, %v816_v24  ;;  %v883_v36 = vadd.f32 %v4287_v28, %v815_v39  ;;  %v818_v43 = vmul.f32 %v4278_v22, %v100_v33  ;;  %v5960_v30 = vmax.f32 %v4687_v21, 0.0  ;;  %v4770_v24 = vpop.f32.mrf.mxu1 }
  0xff   :  { %5959 = vst [vmem:[#allocation12_spill] sm:$0xff] %v4732_v26  ;;  %v1009_v48 = vadd.f32 %v945_v38, %v877_v55  ;;  %v948_v8 = vmul.f32 %v4297_v31, %v606_v6  ;;  %v631_v44 = vadd.f32 %v4292_v29, %v4396_v45  ;;  %v601_v39 = vadd.f32 %v4292_v29, %v600_v52 }
 0x100   :  { %3528 = vmatmul.mubr.msk.f32.gmra.mxu1 %vm1188_vm1, %v5960_v30  ;;  %v3441_v33 = vpop.f32.mrf.mxu0  ;;  %v951_v55 = vmul.f32 %v4297_v31, %v621_v9  ;;  %v885_v38 = vadd.f32 %v4287_v28, %v817_v15  ;;  %v4761_v6 = vadd.f32 %v4319_v47, %v1010_v12  ;;  %v5961_v21 = vmax.f32 %v4732_v26, 0.0 }
 0x101   :  { %v4764_v30 = vadd.f32 %v4319_v47, %v1009_v48  ;;  %v1012_v45 = vadd.f32 %v948_v8, %v880_v58  ;;  %v616_v51 = vadd.f32 %v3441_v33, %v4292_v29  ;;  %v947_v52 = vmul.f32 %v4297_v31, %v601_v39 }
 0x102   :  { %3530 = vmatprep.mubr.msk.f32.mxu1 %vm1188_vm1, %v5961_v21  ;;  %v610_v9 = vpop.f32.mrf.mxu0  ;;  %v952_v15 = vmul.f32 %v4297_v31, %v626_v20  ;;  %v636_v12 = vadd.f32 %v4382_v34, %v4292_v29  ;;  %v819_v48 = vmul.f32 %v4278_v22, %v101_v10  ;;  %v5962_v21 = vmax.f32 %v4726_v7, 0.0  ;;  %v102_v20 = vld [vmem:[%s5877_s0 + $0x128] sm:$0xff]  ;;  %v103_v34 = vld [vmem:[%s5877_s0 + $0x130] sm:$0xff] }
 0x103   :  { %v950_v8 = vmul.f32 %v4297_v31, %v616_v51  ;;  %v611_v33 = vadd.f32 %v4292_v29, %v610_v9  ;;  %v953_v39 = vmul.f32 %v4297_v31, %v631_v44  ;;  %v1011_v10 = vadd.f32 %v947_v52, %v4691_v18  ;;  %v4803_v18 = vpop.f32.mrf.mxu1 }
 0x104   :  { %3531 = vmatmul.mubr.msk.f32.gmra.mxu1 %vm1188_vm1, %v5962_v21  ;;  %v1015_v58 = vadd.f32 %v951_v55, %v883_v36  ;;  %v886_v51 = vadd.f32 %v4287_v28, %v818_v43  ;;  %v641_v9 = vadd.f32 %v4292_v29, %v4427_v3  ;;  %v5918_v21 = vmax.f32 %v4761_v6, 0.0 }
 0x105   :  { %v4796_v44 = vadd.f32 %v4319_v47, %v1012_v45  ;;  %v1014_v26 = vadd.f32 %v950_v8, %v4694_v57  ;;  %v949_v7 = vmul.f32 %v4297_v31, %v611_v33  ;;  %v5963_v56 = vmax.f32 %v4764_v30, 0.0  ;;  %v104_v8 = vld [vmem:[%s5877_s0 + $0x138] sm:$0xff] }
 0x106   :  { %v4806_v36 = vadd.f32 %v4319_v47, %v1011_v10  ;;  %v820_v3 = vmul.f32 %v4278_v22, %v102_v20  ;;  %v887_v43 = vadd.f32 %v4287_v28, %v819_v48  ;;  %v821_v55 = vmul.f32 %v4278_v22, %v103_v34 }
 0x107   :  { %3533 = vmatprep.mubr.msk.f32.mxu1 %vm1188_vm1, %v5963_v56  ;;  %v1013_v45 = vadd.f32 %v949_v7, %v4711_v11  ;;  %v1016_v57 = vadd.f32 %v952_v15, %v884_v41  ;;  %v954_v52 = vmul.f32 %v4297_v31, %v636_v12  ;;  %v1017_v56 = vadd.f32 %v953_v39, %v885_v38  ;;  %v105_v7 = vld [vmem:[%s5877_s0 + $0x140] sm:$0xff] }
 0x108   :  { %3534 = vmatmul.mubr.msk.f32.gmra.mxu1 %vm1188_vm1, %v5918_v21  ;;  %v5914_v33 = vmax.f32 %v4806_v36, 0.0  ;;  %v4821_v48 = vadd.f32 %v4319_v47, %v1015_v58  ;;  %v955_v20 = vmul.f32 %v4297_v31, %v641_v9  ;;  %v651_v11 = vadd.f32 %v4292_v29, %v4458_v32  ;;  %v4838_v58 = vpop.f32.mrf.mxu1 }
 0x109   :  { %v5915_v41 = vmax.f32 %v4796_v44, 0.0  ;;  %v4831_v38 = vadd.f32 %v4319_v47, %v1014_v26  ;;  %v4834_v15 = vadd.f32 %v4319_v47, %v1013_v45  ;;  %v646_v12 = vadd.f32 %v4413_v54, %v4292_v29  ;;  %v106_v54 = vld [vmem:[%s5877_s0 + $0x148] sm:$0xff] }
 0x10a   :  { %5964 = vst [vmem:[#allocation13_spill] sm:$0xff] %v4821_v48  ;;  %3536 = vmatprep.mubr.msk.f32.mxu1 %vm1188_vm1, %v5914_v33  ;;  %v888_v32 = vadd.f32 %v4287_v28, %v820_v3  ;;  %v822_v39 = vmul.f32 %v4278_v22, %v104_v8  ;;  %v889_v34 = vadd.f32 %v4287_v28, %v821_v55  ;;  %v5920_v45 = vmax.f32 %v4821_v48, 0.0 }
 0x10b   :  { %v5916_v26 = vmax.f32 %v4834_v15, 0.0  ;;  %v1018_v10 = vadd.f32 %v954_v52, %v886_v51  ;;  %v4848_v9 = vadd.f32 %v4319_v47, %v1017_v56  ;;  %v823_v3 = vmul.f32 %v4278_v22, %v105_v7  ;;  %v107_v52 = vld [vmem:[%s5877_s0 + $0x150] sm:$0xff] }
 0x10c   :  { %3537 = vmatmul.mubr.msk.f32.gmra.mxu1 %vm1188_vm1, %v5915_v41  ;;  %v1019_v8 = vadd.f32 %v955_v20, %v887_v43  ;;  %v957_v55 = vmul.f32 %v4297_v31, %v651_v11  ;;  %v661_v51 = vadd.f32 %v4292_v29, %v4488_v0  ;;  %v5917_v56 = vmax.f32 %v4831_v38, 0.0  ;;  %v4874_v20 = vpop.f32.mrf.mxu1 }
 0x10d   :  { %5965 = vst [vmem:[#allocation14_spill] sm:$0xff] %v4848_v9  ;;  %v4866_v33 = vadd.f32 %v4319_v47, %v1016_v57  ;;  %v956_v41 = vmul.f32 %v4297_v31, %v646_v12  ;;  %3539 = vmatprep.mubr.msk.f32.mxu1 %vm1188_vm1, %v5916_v26  ;;  %v656_v43 = vadd.f32 %v4442_v13, %v4292_v29  ;;  %v108_v13 = vld [vmem:[%s5877_s0 + $0x158] sm:$0xff] }
 0x10e   :  { %v890_v0 = vadd.f32 %v4287_v28, %v822_v39  ;;  %v824_v11 = vmul.f32 %v4278_v22, %v106_v54  ;;  %v4879_v7 = vadd.f32 %v4319_v47, %v1018_v10  ;;  %v891_v12 = vadd.f32 %v4287_v28, %v823_v3  ;;  %v109_v3 = vld [vmem:[%s5877_s0 + $0x160] sm:$0xff]  ;;  %v4906_v48 = vpop.f32.mrf.mxu1 }
 0x10f   :  { %v825_v26 = vmul.f32 %v4278_v22, %v107_v52  ;;  %v4891_v39 = vadd.f32 %v4319_v47, %v1019_v8  ;;  %v1021_v10 = vadd.f32 %v957_v55, %v889_v34  ;;  %v959_v54 = vmul.f32 %v4297_v31, %v661_v51 }
 0x110   :  { %3540 = vmatmul.mubr.msk.f32.gmra.mxu1 %vm1188_vm1, %v5917_v56  ;;  %v671_v56 = vadd.f32 %v4292_v29, %v4535_v53  ;;  %v5921_v21 = vmax.f32 %v4866_v33, 0.0  ;;  %v1020_v52 = vadd.f32 %v956_v41, %v888_v32  ;;  %v958_v8 = vmul.f32 %v4297_v31, %v656_v43  ;;  %v110_v41 = vld [vmem:[%s5877_s0 + $0x168] sm:$0xff]  ;;  %v4938_v53 = vpop.f32.mrf.mxu1 }
 0x111   :  { %5966 = vst [vmem:[#allocation15_spill] sm:$0xff] %v4891_v39  ;;  %3542 = vmatprep.mubr.msk.f32.mxu1 %vm1188_vm1, %v5920_v45  ;;  %v666_v57 = vadd.f32 %v4477_v49, %v4292_v29  ;;  %v892_v34 = vadd.f32 %v4287_v28, %v824_v11  ;;  %v826_v55 = vmul.f32 %v4278_v22, %v108_v13  ;;  %v5967_v13 = vmax.f32 %v4848_v9, 0.0 }
 0x112   :  { %v893_v51 = vadd.f32 %v4287_v28, %v825_v26  ;;  %v681_v49 = vadd.f32 %v4292_v29, %v4599_v14  ;;  %v827_v32 = vmul.f32 %v4278_v22, %v109_v3  ;;  %v4923_v11 = vadd.f32 %v4319_v47, %v1021_v10  ;;  %v4970_v9 = vpop.f32.mrf.mxu1 }
 0x113   :  { %v1023_v45 = vadd.f32 %v959_v54, %v891_v12  ;;  %v961_v26 = vmul.f32 %v4297_v31, %v671_v56  ;;  %v4933_v14 = vadd.f32 %v4319_v47, %v1020_v52  ;;  %v1022_v3 = vadd.f32 %v958_v8, %v890_v0 }
 0x114   :  { %3543 = vmatmul.mubr.msk.f32.gmra.mxu1 %vm1188_vm1, %v5921_v21  ;;  %v111_v21 = vld [vmem:[%s5877_s0 + $0x170] sm:$0xff]  ;;  %v960_v43 = vmul.f32 %v4297_v31, %v666_v57  ;;  %v676_v10 = vadd.f32 %v4506_v19, %v4292_v29  ;;  %v828_v12 = vmul.f32 %v4278_v22, %v110_v41  ;;  %v5968_v56 = vmax.f32 %v4879_v7, 0.0  ;;  %v112_v19 = vld [vmem:[%s5877_s0 + $0x178] sm:$0xff] }
 0x115   :  { %3545 = vmatprep.mubr.msk.f32.mxu1 %vm1188_vm1, %v5967_v13  ;;  %v894_v13 = vadd.f32 %v4287_v28, %v826_v55  ;;  %v686_v54 = vadd.f32 %v4571_v59, %v4292_v29  ;;  %v895_v0 = vadd.f32 %v4287_v28, %v827_v32  ;;  %v963_v57 = vmul.f32 %v4297_v31, %v681_v49  ;;  %v113_v49 = vld [vmem:[%s5877_s0 + $0x180] sm:$0xff] }
 0x116   :  { %v829_v52 = vmul.f32 %v4278_v22, %v111_v21  ;;  %v4955_v55 = vadd.f32 %v4319_v47, %v1023_v45  ;;  %v5970_v41 = vmax.f32 %v4891_v39, 0.0  ;;  %v1025_v59 = vadd.f32 %v961_v26, %v893_v51 }
 0x117   :  { %v691_v32 = vadd.f32 %v4292_v29, %v4665_v16  ;;  %v4967_v21 = vadd.f32 %v4319_v47, %v1022_v3  ;;  %v1024_v8 = vadd.f32 %v960_v43, %v892_v34  ;;  %v962_v45 = vmul.f32 %v4297_v31, %v676_v10  ;;  %v114_v34 = vld [vmem:[%s5877_s0 + $0x188] sm:$0xff] }
 0x118   :  { %3546 = vmatmul.mubr.msk.f32.gmra.mxu1 %vm1188_vm1, %v5968_v56  ;;  %5969 = vst [vmem:[#allocation16_spill] sm:$0xff] %v4955_v55  ;;  %v5924_v56 = vmax.f32 %v4933_v14, 0.0  ;;  %v830_v51 = vmul.f32 %v4278_v22, %v112_v19  ;;  %v964_v16 = vmul.f32 %v4297_v31, %v686_v54  ;;  %v1027_v26 = vadd.f32 %v963_v57, %v895_v0  ;;  %v115_v57 = vld [vmem:[%s5877_s0 + $0x190] sm:$0xff] }
 0x119   :  { %3548 = vmatprep.mubr.msk.f32.mxu1 %vm1188_vm1, %v5970_v41  ;;  %v896_v41 = vadd.f32 %v4287_v28, %v828_v12  ;;  %v897_v39 = vadd.f32 %v4287_v28, %v829_v52  ;;  %v831_v43 = vmul.f32 %v4278_v22, %v113_v49  ;;  %v4985_v10 = vadd.f32 %v4319_v47, %v1025_v59 }
 0x11a   :  { %v5972_v12 = vmax.f32 %v4923_v11, 0.0  ;;  %v965_v54 = vmul.f32 %v4297_v31, %v691_v32  ;;  %v701_v0 = vadd.f32 %v4292_v29, %v4739_v35  ;;  %v5925_v19 = vmax.f32 %v4967_v21, 0.0 }
 0x11b   :  { %5971 = vst [vmem:[#allocation17_spill] sm:$0xff] %v4985_v10  ;;  %v4998_v52 = vadd.f32 %v4319_v47, %v1024_v8  ;;  %v1026_v59 = vadd.f32 %v962_v45, %v894_v13  ;;  %v696_v49 = vadd.f32 %v4637_v63, %v4292_v29  ;;  %v898_v32 = vadd.f32 %v4287_v28, %v830_v51  ;;  %v116_v63 = vld [vmem:[%s5877_s0 + $0x198] sm:$0xff] }
 0x11c   :  { %3549 = vmatmul.mubr.msk.f32.gmra.mxu1 %vm1188_vm1, %v5924_v56  ;;  %v5002_v56 = vpop.f32.mrf.mxu1  ;;  %v1028_v35 = vadd.f32 %v964_v16, %v896_v41  ;;  %v5007_v3 = vadd.f32 %v4319_v47, %v1027_v26  ;;  %v899_v8 = vadd.f32 %v4287_v28, %v831_v43  ;;  %v833_v13 = vmul.f32 %v4278_v22, %v115_v57 }
 0x11d   :  { %3551 = vmatprep.mubr.msk.f32.mxu1 %vm1188_vm1, %v5972_v12  ;;  %v832_v12 = vmul.f32 %v4278_v22, %v114_v34  ;;  %v5974_v51 = vmax.f32 %v4955_v55, 0.0  ;;  %v1029_v41 = vadd.f32 %v965_v54, %v897_v39  ;;  %v967_v16 = vmul.f32 %v4297_v31, %v701_v0  ;;  %v117_v34 = vld [vmem:[%s5877_s0 + $0x1a0] sm:$0xff] }
 0x11e   :  { %5973 = vst [vmem:[#allocation18_spill] sm:$0xff] %v5007_v3  ;;  %v711_v26 = vadd.f32 %v4292_v29, %v4803_v18  ;;  %v5926_v43 = vmax.f32 %v4998_v52, 0.0  ;;  %v5029_v57 = vadd.f32 %v4319_v47, %v1026_v59  ;;  %v5034_v39 = vpop.f32.mrf.mxu1  ;;  %v834_v18 = vmul.f32 %v4278_v22, %v116_v63 }
 0x11f   :  { %v900_v54 = vadd.f32 %v4287_v28, %v832_v12  ;;  %v5039_v0 = vadd.f32 %v4319_v47, %v1028_v35  ;;  %v901_v59 = vadd.f32 %v4287_v28, %v833_v13  ;;  %v5051_v12 = vadd.f32 %v4319_v47, %v1029_v41  ;;  %v119_v13 = vld [vmem:[%s5877_s0 + $0x1b0] sm:$0xff] }
 0x120   :  { %3552 = vmatmul.mubr.msk.f32.gmra.mxu1 %vm1188_vm1, %v5925_v19  ;;  %5975 = vst [vmem:[#allocation19_spill] sm:$0xff] %v5029_v57  ;;  %v966_v19 = vmul.f32 %v4297_v31, %v696_v49  ;;  %v835_v49 = vmul.f32 %v4278_v22, %v117_v34  ;;  %v5977_v35 = vmax.f32 %v4985_v10, 0.0  ;;  %v1031_v63 = vadd.f32 %v967_v16, %v899_v8  ;;  %v5067_v10 = vld [vmem:[%s5878_s5] ss:$0 sm:$0xff]  ;;  %v750_v16 = vpop.f32.mrf.mxu1 }
 0x121   :  { %3554 = vmatprep.mubr.msk.f32.mxu1 %vm1188_vm1, %v5974_v51  ;;  %v706_v51 = vadd.f32 %v4708_v60, %v4292_v29  ;;  %v118_v60 = vld [vmem:[%s5877_s0 + $0x1a8] sm:$0xff]  ;;  %5976 = vst [vmem:[#allocation20_spill] sm:$0xff] %v5051_v12  ;;  %v969_v45 = vmul.f32 %v4297_v31, %v711_v26  ;;  %v5929_v55 = vmax.f32 %v5029_v57, 0.0  ;;  %v716_v8 = vadd.f32 %v5067_v10, %v4770_v24  ;;  %v121_v26 = vld [vmem:[%s5877_s0 + $0x1c0] sm:$0xff] }
 0x122   :  { %v1030_v34 = vadd.f32 %v966_v19, %v898_v32  ;;  %v903_v19 = vadd.f32 %v4287_v28, %v835_v49  ;;  %v120_v32 = vld [vmem:[%s5877_s0 + $0x1b8] sm:$0xff]  ;;  %v731_v24 = vadd.f32 %v5067_v10, %v4938_v53  ;;  %v5101_v57 = vpop.f32.mrf.mxu1 }
 0x123   :  { %v968_v41 = vmul.f32 %v4297_v31, %v706_v51  ;;  %v837_v51 = vmul.f32 %v4278_v22, %v119_v13 }
 0x124   :  { %3555 = vmatmul.mubr.msk.f32.gmra.mxu1 %vm1188_vm1, %v5926_v43  ;;  %v721_v43 = vadd.f32 %v4292_v29, %v4874_v20  ;;  %v902_v29 = vadd.f32 %v4287_v28, %v834_v18  ;;  %v836_v20 = vmul.f32 %v4278_v22, %v118_v60  ;;  %v5086_v60 = vadd.f32 %v4319_v47, %v1031_v63 }
 0x125   :  { %3557 = vmatprep.mubr.msk.f32.mxu1 %vm1188_vm1, %v5977_v35  ;;  %v5978_v35 = vmax.f32 %v5007_v3, 0.0  ;;  %v5096_v53 = vadd.f32 %v4319_v47, %v1030_v34  ;;  %v1032_v13 = vadd.f32 %v968_v41, %v900_v54  ;;  %v970_v18 = vmul.f32 %v4297_v31, %v716_v8  ;;  %v760_v3 = vpop.f32.mrf.mxu1 }
 0x126   :  { %v971_v49 = vmul.f32 %v4297_v31, %v721_v43  ;;  %v726_v63 = vadd.f32 %v5067_v10, %v4838_v58  ;;  %v5979_v43 = vmax.f32 %v5039_v0, 0.0  ;;  %v905_v54 = vadd.f32 %v4287_v28, %v837_v51  ;;  %v122_v58 = vld [vmem:[%s5877_s0 + $0x1c8] sm:$0xff] }
 0x127   :  { %v973_v34 = vmul.f32 %v4297_v31, %v731_v24  ;;  %v839_v41 = vmul.f32 %v4278_v22, %v121_v26  ;;  %v741_v51 = vadd.f32 %v5067_v10, %v5002_v56  ;;  %v123_v24 = vld [vmem:[%s5877_s0 + $0x1d0] sm:$0xff]  ;;  %v5130_v26 = vadd.f32 %v4319_v47, %v1032_v13 }
 0x128   :  { %3558 = vmatmul.mubr.msk.f32.gmra.mxu1 %vm1188_vm1, %v5929_v55  ;;  %v1033_v55 = vadd.f32 %v969_v45, %v901_v59  ;;  %v838_v45 = vmul.f32 %v4278_v22, %v120_v32  ;;  %v736_v59 = vadd.f32 %v5067_v10, %v4906_v48  ;;  %v5981_v32 = vmax.f32 %v5051_v12, 0.0 }
 0x129   :  { %3560 = vmatprep.mubr.msk.f32.mxu1 %vm1188_vm1, %v5978_v35  ;;  %v904_v35 = vadd.f32 %v4287_v28, %v836_v20  ;;  %v1035_v48 = vadd.f32 %v971_v49, %v903_v19  ;;  %v1034_v8 = vadd.f32 %v970_v18, %v902_v29  ;;  %v840_v19 = vmul.f32 %v4278_v22, %v122_v58  ;;  %v124_v29 = vld [vmem:[%s5877_s0 + $0x1d8] sm:$0xff] }
 0x12a   :  { %v5118_v20 = vadd.f32 %v4319_v47, %v1033_v55  ;;  %v972_v55 = vmul.f32 %v4297_v31, %v726_v63  ;;  %v906_v12 = vadd.f32 %v4287_v28, %v838_v45  ;;  %v974_v49 = vmul.f32 %v4297_v31, %v736_v59 }
 0x12b   :  { %v1037_v56 = vadd.f32 %v973_v34, %v905_v54  ;;  %v841_v18 = vmul.f32 %v4278_v22, %v123_v24  ;;  %v5146_v63 = vadd.f32 %v4319_v47, %v1035_v48  ;;  %v5983_v45 = vmax.f32 %v5086_v60, 0.0  ;;  %v125_v34 = vld [vmem:[%s5877_s0 + $0x1e0] sm:$0xff] }
 0x12c   :  { %3561 = vmatmul.mubr.msk.f32.gmra.mxu1 %vm1188_vm1, %v5979_v43  ;;  %5980 = vst [vmem:[#allocation21_spill] sm:$0xff] %v5118_v20  ;;  %v5933_v43 = vmax.f32 %v5096_v53, 0.0  ;;  %v975_v59 = vmul.f32 %v4297_v31, %v741_v51  ;;  %v751_v54 = vadd.f32 %v5067_v10, %v750_v16  ;;  %v5934_v58 = vmax.f32 %v5130_v26, 0.0 }
 0x12d   :  { %3563 = vmatprep.mubr.msk.f32.mxu1 %vm1188_vm1, %v5981_v32  ;;  %v907_v32 = vadd.f32 %v4287_v28, %v839_v41  ;;  %5982 = vst [vmem:[#allocation22_spill] sm:$0xff] %v5146_v63  ;;  %v5158_v41 = vadd.f32 %v4319_v47, %v1034_v8  ;;  %v1036_v24 = vadd.f32 %v972_v55, %v904_v35  ;;  %v126_v35 = vld [vmem:[%s5877_s0 + $0x1e8] sm:$0xff] }
 0x12e   :  { %v746_v48 = vadd.f32 %v5067_v10, %v4970_v9  ;;  %v842_v51 = vmul.f32 %v4278_v22, %v124_v29  ;;  %v1038_v13 = vadd.f32 %v974_v49, %v906_v12  ;;  %v5165_v16 = vadd.f32 %v4319_v47, %v1037_v56  ;;  %v127_v29 = vld [vmem:[%s5877_s0 + $0x1f0] sm:$0xff] }
 0x12f   :  { %v909_v8 = vadd.f32 %v4287_v28, %v841_v18  ;;  %v843_v9 = vmul.f32 %v4278_v22, %v125_v34  ;;  %v1039_v12 = vadd.f32 %v975_v59, %v907_v32  ;;  %v977_v49 = vmul.f32 %v4297_v31, %v751_v54  ;;  %v128_v54 = vld [vmem:[%s5877_s0 + $0x1f8] sm:$0xff] }
 0x130   :  { %3564 = vmatmul.mubr.msk.f32.gmra.mxu1 %vm1188_vm1, %v5933_v43  ;;  %v3489_v43 = vpop.f32.mrf.mxu1  ;;  %v761_v56 = vadd.f32 %v5067_v10, %v760_v3  ;;  %v5935_v18 = vmax.f32 %v5158_v41, 0.0  ;;  %v976_v34 = vmul.f32 %v4297_v31, %v746_v48  ;;  %v756_v55 = vadd.f32 %v5067_v10, %v5034_v39 }
 0x131   :  { %3566 = vmatprep.mubr.msk.f32.mxu1 %vm1188_vm1, %v5983_v45  ;;  %v908_v45 = vadd.f32 %v4287_v28, %v840_v19  ;;  %v5984_v19 = vmax.f32 %v5118_v20, 0.0  ;;  %v910_v32 = vadd.f32 %v4287_v28, %v842_v51  ;;  %v844_v59 = vmul.f32 %v4278_v22, %v126_v35 }
 0x132   :  { %v5194_v3 = vadd.f32 %v4319_v47, %v1038_v13  ;;  %v845_v48 = vmul.f32 %v4278_v22, %v127_v29  ;;  %v5203_v39 = vadd.f32 %v4319_v47, %v1039_v12  ;;  %v5985_v51 = vmax.f32 %v5146_v63, 0.0 }
 0x133   :  { %v1041_v35 = vadd.f32 %v977_v49, %v909_v8  ;;  %v979_v13 = vmul.f32 %v4297_v31, %v761_v56  ;;  %v1040_v20 = vadd.f32 %v976_v34, %v908_v45  ;;  %v978_v29 = vmul.f32 %v4297_v31, %v756_v55 }
 0x134   :  { %3567 = vmatmul.mubr.msk.f32.gmra.mxu1 %vm1188_vm1, %v5934_v58  ;;  %v5186_v58 = vadd.f32 %v4319_v47, %v1036_v24  ;;  %v911_v24 = vadd.f32 %v4287_v28, %v843_v9  ;;  %v766_v12 = vadd.f32 %v5067_v10, %v5101_v57  ;;  %v1170_v63 = vmax.f32 %v5194_v3, 0.0 }
 0x135   :  { %3569 = vmatprep.mubr.msk.f32.mxu1 %vm1188_vm1, %v5984_v19  ;;  %v770_v19 = vpop.f32.mrf.mxu1  ;;  %v912_v8 = vadd.f32 %v4287_v28, %v844_v59  ;;  %v846_v49 = vmul.f32 %v4278_v22, %v128_v54  ;;  %v913_v56 = vadd.f32 %v4287_v28, %v845_v48  ;;  %v5226_v45 = vadd.f32 %v4319_v47, %v1041_v35 }
 0x136   :  { %v1168_v9 = vmax.f32 %v5186_v58, 0.0  ;;  %v5986_v55 = vmax.f32 %v5165_v16, 0.0  ;;  %v1043_v57 = vadd.f32 %v979_v13, %v911_v24  ;;  %v5233_v59 = vadd.f32 %v4319_v47, %v1040_v20 }
 0x137   :  { %v980_v22 = vmul.f32 %v4297_v31, %v766_v12  ;;  %v776_v54 = vadd.f32 %v5067_v10, %v3489_v43  ;;  %v5942_v48 = vmax.f32 %v5226_v45, 0.0  ;;  %v914_v24 = vadd.f32 %v4287_v28, %v846_v49 }
 0x138   :  { %3570 = vmatmul.mubr.msk.f32.gmra.mxu1 %vm1188_vm1, %v5935_v18  ;;  %v771_v18 = vadd.f32 %v5067_v10, %v770_v19  ;;  %v5944_v19 = vmax.f32 %v5203_v39, 0.0  ;;  %v5242_v35 = vadd.f32 %v4319_v47, %v1043_v57  ;;  %v5291_v57 = vld [vmem:[%s5880_s7] ss:$0 sm:$0xff] }
 0x139   :  { %3572 = vmatprep.mubr.msk.f32.mxu1 %vm1188_vm1, %v5985_v51  ;;  %v1042_v51 = vadd.f32 %v978_v29, %v910_v32  ;;  %v1044_v43 = vadd.f32 %v980_v22, %v912_v8  ;;  %v982_v32 = vmul.f32 %v4297_v31, %v776_v54 }
 0x13a   :  { %v981_v34 = vmul.f32 %v4297_v31, %v771_v18  ;;  %v5945_v18 = vmax.f32 %v5233_v59, 0.0  ;;  %v5940_v13 = vmax.f32 %v5242_v35, 0.0 }
 0x13b   :  { %v5250_v10 = vadd.f32 %v4319_v47, %v1042_v51  ;;  %v5265_v12 = vadd.f32 %v4319_v47, %v1044_v43  ;;  %v1046_v8 = vadd.f32 %v982_v32, %v914_v24 }
 0x13c   :  { %3573 = vmatmul.mubr.msk.f32.gmra.mxu1 %vm1188_vm1, %v1168_v9  ;;  %v1045_v20 = vadd.f32 %v981_v34, %v913_v56 }
 0x13d   :  { %3575 = vmatprep.mubr.msk.f32.mxu1 %vm1188_vm1, %v5986_v55  ;;  %v5943_v29 = vmax.f32 %v5250_v10, 0.0  ;;  %v5941_v49 = vmax.f32 %v5265_v12, 0.0  ;;  %v5276_v56 = vadd.f32 %v4319_v47, %v1046_v8 }
 0x13e   :  { %v5258_v28 = vadd.f32 %v4319_v47, %v1045_v20 }
 0x13f   :  { %v5939_v55 = vmax.f32 %v5276_v56, 0.0 }
 0x140   :  { %3576 = vmatmul.mubr.msk.f32.gmra.mxu1 %vm1188_vm1, %v1170_v63  ;;  %v5938_v31 = vmax.f32 %v5258_v28, 0.0 }
 0x141   :  { %3578 = vmatprep.mubr.msk.f32.mxu1 %vm1188_vm1, %v5944_v19 }
 0x144   :  { %3579 = vmatmul.mubr.msk.f32.gmra.mxu1 %vm1188_vm1, %v5945_v18 }
 0x145   :  { %3581 = vmatprep.mubr.msk.f32.mxu1 %vm1188_vm1, %v5942_v48 }
 0x148   :  { %3582 = vmatmul.mubr.msk.f32.gmra.mxu1 %vm1188_vm1, %v5943_v29 }
 0x149   :  { %3584 = vmatprep.mubr.msk.f32.mxu1 %vm1188_vm1, %v5940_v13 }
 0x14c   :  { %3585 = vmatmul.mubr.msk.f32.gmra.mxu1 %vm1188_vm1, %v5941_v49 }
 0x14d   :  { %3587 = vmatprep.mubr.msk.f32.mxu1 %vm1188_vm1, %v5938_v31 }
 0x150   :  { %3588 = vmatmul.mubr.msk.f32.gmra.mxu1 %vm1188_vm1, %v5939_v55 }
 0x192   :  { %v3496_v47 = vpop.f32.mrf.mxu1 }
 0x193   :  { %v1453_v34 = vadd.f32 %v3496_v47, %v5291_v57 }
 0x194   :  { %v1447_v51 = vpop.f32.mrf.mxu1 }
 0x195   :  { %v1448_v22 = vadd.f32 %v5291_v57, %v1447_v51  ;;  %v1767_v20 = vmax.f32 %v1453_v34, 0.0 }
 0x196   :  { %v3499_v54 = vpop.f32.mrf.mxu1 }
 0x197   :  { %v1766_v24 = vmax.f32 %v1448_v22, 0.0  ;;  %v1463_v43 = vadd.f32 %v3499_v54, %v5291_v57 }
 0x198   :  { %v1457_v32 = vpop.f32.mrf.mxu1 }
 0x199   :  { %v1458_v8 = vadd.f32 %v5291_v57, %v1457_v32  ;;  %3592 = vmatprep.mubr.msk.f32.mxu0 %vm1838_vm3, %v1766_v24  ;;  %v1769_v13 = vmax.f32 %v1463_v43, 0.0 }
 0x19a   :  { %v3502_v31 = vpop.f32.mrf.mxu1  ;;  %3593 = vmatmul.mubr.msk.f32.vlgmr.msra.gmra.mxu0 %vm1838_vm3, %v1767_v20 }
 0x19b   :  { %v1768_v55 = vmax.f32 %v1458_v8, 0.0  ;;  %v1473_v47 = vadd.f32 %v3502_v31, %v5291_v57 }
 0x19c   :  { %v1467_v49 = vpop.f32.mrf.mxu1 }
 0x19d   :  { %v1468_v51 = vadd.f32 %v5291_v57, %v1467_v49  ;;  %3595 = vmatprep.mubr.msk.f32.mxu0 %vm1838_vm3, %v1768_v55  ;;  %v1771_v54 = vmax.f32 %v1473_v47, 0.0 }
 0x19e   :  { %v3505_v34 = vpop.f32.mrf.mxu1  ;;  %3596 = vmatmul.mubr.msk.f32.gmra.mxu0 %vm1838_vm3, %v1769_v13 }
 0x19f   :  { %v1770_v22 = vmax.f32 %v1468_v51, 0.0  ;;  %v1483_v32 = vadd.f32 %v3505_v34, %v5291_v57 }
 0x1a0   :  { %v1477_v24 = vpop.f32.mrf.mxu1 }
 0x1a1   :  { %v1478_v48 = vadd.f32 %v5291_v57, %v1477_v24  ;;  %3598 = vmatprep.mubr.msk.f32.mxu0 %vm1838_vm3, %v1770_v22  ;;  %v1773_v43 = vmax.f32 %v1483_v32, 0.0 }
 0x1a2   :  { %3599 = vmatmul.mubr.msk.f32.gmra.mxu0 %vm1838_vm3, %v1771_v54 }
 0x1a3   :  { %v1772_v31 = vmax.f32 %v1478_v48, 0.0  ;;  %v3508_v20 = vpop.f32.mrf.mxu1 }
 0x1a4   :  { %v1493_v49 = vadd.f32 %v3508_v20, %v5291_v57 }
 0x1a5   :  { %v1487_v55 = vpop.f32.mrf.mxu1  ;;  %3601 = vmatprep.mubr.msk.f32.mxu0 %vm1838_vm3, %v1772_v31 }
 0x1a6   :  { %v1488_v13 = vadd.f32 %v5291_v57, %v1487_v55  ;;  %3602 = vmatmul.mubr.msk.f32.gmra.mxu0 %vm1838_vm3, %v1773_v43  ;;  %v1775_v51 = vmax.f32 %v1493_v49, 0.0 }
 0x1a7   :  { %v3511_v8 = vpop.f32.mrf.mxu1 }
 0x1a8   :  { %v1774_v47 = vmax.f32 %v1488_v13, 0.0  ;;  %v1503_v34 = vadd.f32 %v3511_v8, %v5291_v57 }
 0x1a9   :  { %v1497_v22 = vpop.f32.mrf.mxu1 }
 0x1aa   :  { %v1498_v54 = vadd.f32 %v5291_v57, %v1497_v22  ;;  %3604 = vmatprep.mubr.msk.f32.mxu0 %vm1838_vm3, %v1774_v47  ;;  %v1777_v24 = vmax.f32 %v1503_v34, 0.0 }
 0x1ab   :  { %v3514_v48 = vpop.f32.mrf.mxu1  ;;  %3605 = vmatmul.mubr.msk.f32.gmra.mxu0 %vm1838_vm3, %v1775_v51 }
 0x1ac   :  { %v1776_v32 = vmax.f32 %v1498_v54, 0.0  ;;  %v1513_v31 = vadd.f32 %v3514_v48, %v5291_v57 }
 0x1ad   :  { %v1507_v20 = vpop.f32.mrf.mxu1 }
 0x1ae   :  { %v1508_v43 = vadd.f32 %v5291_v57, %v1507_v20  ;;  %3607 = vmatprep.mubr.msk.f32.mxu0 %vm1838_vm3, %v1776_v32  ;;  %v1779_v13 = vmax.f32 %v1513_v31, 0.0 }
 0x1af   :  { %v3517_v49 = vpop.f32.mrf.mxu1  ;;  %3608 = vmatmul.mubr.msk.f32.gmra.mxu0 %vm1838_vm3, %v1777_v24 }
 0x1b0   :  { %v1778_v55 = vmax.f32 %v1508_v43, 0.0  ;;  %v1523_v8 = vadd.f32 %v3517_v49, %v5291_v57 }
 0x1b1   :  { %v1517_v47 = vpop.f32.mrf.mxu1 }
 0x1b2   :  { %v1518_v22 = vadd.f32 %v5291_v57, %v1517_v47  ;;  %3610 = vmatprep.mubr.msk.f32.mxu0 %vm1838_vm3, %v1778_v55  ;;  %v1781_v54 = vmax.f32 %v1523_v8, 0.0 }
 0x1b3   :  { %v3520_v51 = vpop.f32.mrf.mxu1  ;;  %3611 = vmatmul.mubr.msk.f32.gmra.mxu0 %vm1838_vm3, %v1779_v13 }
 0x1b4   :  { %v1780_v34 = vmax.f32 %v1518_v22, 0.0  ;;  %v1533_v48 = vadd.f32 %v3520_v51, %v5291_v57 }
 0x1b5   :  { %v1527_v32 = vpop.f32.mrf.mxu1 }
 0x1b6   :  { %v1528_v20 = vadd.f32 %v5291_v57, %v1527_v32  ;;  %3613 = vmatprep.mubr.msk.f32.mxu0 %vm1838_vm3, %v1780_v34  ;;  %v1783_v43 = vmax.f32 %v1533_v48, 0.0 }
 0x1b7   :  { %3614 = vmatmul.mubr.msk.f32.gmra.mxu0 %vm1838_vm3, %v1781_v54 }
 0x1b8   :  { %v3523_v24 = vpop.f32.mrf.mxu1  ;;  %v1782_v31 = vmax.f32 %v1528_v20, 0.0 }
 0x1b9   :  { %v1543_v49 = vadd.f32 %v3523_v24, %v5291_v57 }
 0x1ba   :  { %v1537_v55 = vpop.f32.mrf.mxu1  ;;  %3616 = vmatprep.mubr.msk.f32.mxu0 %vm1838_vm3, %v1782_v31 }
 0x1bb   :  { %v1538_v47 = vadd.f32 %v5291_v57, %v1537_v55  ;;  %3617 = vmatmul.mubr.msk.f32.gmra.mxu0 %vm1838_vm3, %v1783_v43  ;;  %v1785_v22 = vmax.f32 %v1543_v49, 0.0 }
 0x1bc   :  { %v3526_v13 = vpop.f32.mrf.mxu1 }
 0x1bd   :  { %v1784_v8 = vmax.f32 %v1538_v47, 0.0  ;;  %v1553_v51 = vadd.f32 %v3526_v13, %v5291_v57 }
 0x1be   :  { %v1547_v34 = vpop.f32.mrf.mxu1 }
 0x1bf   :  { %v1548_v32 = vadd.f32 %v5291_v57, %v1547_v34  ;;  %3619 = vmatprep.mubr.msk.f32.mxu0 %vm1838_vm3, %v1784_v8  ;;  %v1787_v20 = vmax.f32 %v1553_v51, 0.0 }
 0x1c0   :  { %v3529_v54 = vpop.f32.mrf.mxu1  ;;  %3620 = vmatmul.mubr.msk.f32.gmra.mxu0 %vm1838_vm3, %v1785_v22 }
 0x1c1   :  { %v1786_v48 = vmax.f32 %v1548_v32, 0.0  ;;  %v1563_v24 = vadd.f32 %v3529_v54, %v5291_v57 }
 0x1c2   :  { %v1557_v31 = vpop.f32.mrf.mxu1 }
 0x1c3   :  { %v1558_v55 = vadd.f32 %v5291_v57, %v1557_v31  ;;  %3622 = vmatprep.mubr.msk.f32.mxu0 %vm1838_vm3, %v1786_v48  ;;  %v1789_v47 = vmax.f32 %v1563_v24, 0.0 }
 0x1c4   :  { %v3532_v43 = vpop.f32.mrf.mxu1  ;;  %3623 = vmatmul.mubr.msk.f32.gmra.mxu0 %vm1838_vm3, %v1787_v20 }
 0x1c5   :  { %v1788_v49 = vmax.f32 %v1558_v55, 0.0  ;;  %v1573_v13 = vadd.f32 %v3532_v43, %v5291_v57 }
 0x1c6   :  { %v1567_v8 = vpop.f32.mrf.mxu1 }
 0x1c7   :  { %v1568_v34 = vadd.f32 %v5291_v57, %v1567_v8  ;;  %3625 = vmatprep.mubr.msk.f32.mxu0 %vm1838_vm3, %v1788_v49  ;;  %v1791_v32 = vmax.f32 %v1573_v13, 0.0 }
 0x1c8   :  { %v3535_v22 = vpop.f32.mrf.mxu1  ;;  %3626 = vmatmul.mubr.msk.f32.gmra.mxu0 %vm1838_vm3, %v1789_v47 }
 0x1c9   :  { %v1790_v51 = vmax.f32 %v1568_v34, 0.0  ;;  %v1583_v54 = vadd.f32 %v3535_v22, %v5291_v57 }
 0x1ca   :  { %v1577_v48 = vpop.f32.mrf.mxu1 }
 0x1cb   :  { %v1578_v31 = vadd.f32 %v5291_v57, %v1577_v48  ;;  %3628 = vmatprep.mubr.msk.f32.mxu0 %vm1838_vm3, %v1790_v51  ;;  %v1793_v55 = vmax.f32 %v1583_v54, 0.0 }
 0x1cc   :  { %v3538_v20 = vpop.f32.mrf.mxu1  ;;  %3629 = vmatmul.mubr.msk.f32.gmra.mxu0 %vm1838_vm3, %v1791_v32 }
 0x1cd   :  { %v1792_v24 = vmax.f32 %v1578_v31, 0.0  ;;  %v1593_v43 = vadd.f32 %v3538_v20, %v5291_v57 }
 0x1ce   :  { %v1587_v49 = vpop.f32.mrf.mxu1 }
 0x1cf   :  { %v1588_v8 = vadd.f32 %v5291_v57, %v1587_v49  ;;  %3631 = vmatprep.mubr.msk.f32.mxu0 %vm1838_vm3, %v1792_v24  ;;  %v1795_v34 = vmax.f32 %v1593_v43, 0.0 }
 0x1d0   :  { %v3541_v47 = vpop.f32.mrf.mxu1  ;;  %3632 = vmatmul.mubr.msk.f32.gmra.mxu0 %vm1838_vm3, %v1793_v55 }
 0x1d1   :  { %v1794_v13 = vmax.f32 %v1588_v8, 0.0  ;;  %v1603_v22 = vadd.f32 %v3541_v47, %v5291_v57 }
 0x1d2   :  { %v1597_v51 = vpop.f32.mrf.mxu1 }
 0x1d3   :  { %v1598_v48 = vadd.f32 %v5291_v57, %v1597_v51  ;;  %3634 = vmatprep.mubr.msk.f32.mxu0 %vm1838_vm3, %v1794_v13  ;;  %v1797_v31 = vmax.f32 %v1603_v22, 0.0 }
 0x1d4   :  { %v3544_v32 = vpop.f32.mrf.mxu1  ;;  %3635 = vmatmul.mubr.msk.f32.gmra.mxu0 %vm1838_vm3, %v1795_v34 }
 0x1d5   :  { %v1796_v54 = vmax.f32 %v1598_v48, 0.0  ;;  %v1613_v20 = vadd.f32 %v3544_v32, %v5291_v57 }
 0x1d6   :  { %v1607_v24 = vpop.f32.mrf.mxu1 }
 0x1d7   :  { %v1608_v49 = vadd.f32 %v5291_v57, %v1607_v24  ;;  %3637 = vmatprep.mubr.msk.f32.mxu0 %vm1838_vm3, %v1796_v54  ;;  %v1799_v8 = vmax.f32 %v1613_v20, 0.0 }
 0x1d8   :  { %v3547_v55 = vpop.f32.mrf.mxu1  ;;  %3638 = vmatmul.mubr.msk.f32.gmra.mxu0 %vm1838_vm3, %v1797_v31 }
 0x1d9   :  { %v1798_v43 = vmax.f32 %v1608_v49, 0.0  ;;  %v1623_v47 = vadd.f32 %v3547_v55, %v5291_v57 }
 0x1da   :  { %v1617_v13 = vpop.f32.mrf.mxu1 }
 0x1db   :  { %v1618_v51 = vadd.f32 %v5291_v57, %v1617_v13  ;;  %3640 = vmatprep.mubr.msk.f32.mxu0 %vm1838_vm3, %v1798_v43  ;;  %v1801_v48 = vmax.f32 %v1623_v47, 0.0 }
 0x1dc   :  { %v3550_v34 = vpop.f32.mrf.mxu1  ;;  %3641 = vmatmul.mubr.msk.f32.gmra.mxu0 %vm1838_vm3, %v1799_v8 }
 0x1dd   :  { %v1800_v22 = vmax.f32 %v1618_v51, 0.0  ;;  %v1633_v32 = vadd.f32 %v3550_v34, %v5291_v57 }
 0x1de   :  { %v1627_v54 = vpop.f32.mrf.mxu1 }
 0x1df   :  { %v1628_v24 = vadd.f32 %v5291_v57, %v1627_v54  ;;  %3643 = vmatprep.mubr.msk.f32.mxu0 %vm1838_vm3, %v1800_v22  ;;  %v1803_v49 = vmax.f32 %v1633_v32, 0.0 }
 0x1e0   :  { %v3553_v31 = vpop.f32.mrf.mxu1  ;;  %3644 = vmatmul.mubr.msk.f32.gmra.mxu0 %vm1838_vm3, %v1801_v48 }
 0x1e1   :  { %v1802_v20 = vmax.f32 %v1628_v24, 0.0  ;;  %v1643_v55 = vadd.f32 %v3553_v31, %v5291_v57 }
 0x1e2   :  { %v1637_v43 = vpop.f32.mrf.mxu1 }
 0x1e3   :  { %v1638_v13 = vadd.f32 %v5291_v57, %v1637_v43  ;;  %3646 = vmatprep.mubr.msk.f32.mxu0 %vm1838_vm3, %v1802_v20  ;;  %v1805_v51 = vmax.f32 %v1643_v55, 0.0 }
 0x1e4   :  { %v3556_v8 = vpop.f32.mrf.mxu1  ;;  %3647 = vmatmul.mubr.msk.f32.gmra.mxu0 %vm1838_vm3, %v1803_v49 }
 0x1e5   :  { %v1804_v47 = vmax.f32 %v1638_v13, 0.0  ;;  %v1653_v34 = vadd.f32 %v3556_v8, %v5291_v57 }
 0x1e6   :  { %v1647_v22 = vpop.f32.mrf.mxu1 }
 0x1e7   :  { %v1648_v54 = vadd.f32 %v5291_v57, %v1647_v22  ;;  %3649 = vmatprep.mubr.msk.f32.mxu0 %vm1838_vm3, %v1804_v47  ;;  %v1807_v24 = vmax.f32 %v1653_v34, 0.0 }
 0x1e8   :  { %v3559_v48 = vpop.f32.mrf.mxu1  ;;  %3650 = vmatmul.mubr.msk.f32.gmra.mxu0 %vm1838_vm3, %v1805_v51 }
 0x1e9   :  { %v1806_v32 = vmax.f32 %v1648_v54, 0.0  ;;  %v1663_v31 = vadd.f32 %v3559_v48, %v5291_v57 }
 0x1ea   :  { %v1657_v20 = vpop.f32.mrf.mxu1 }
 0x1eb   :  { %v1658_v43 = vadd.f32 %v5291_v57, %v1657_v20  ;;  %3652 = vmatprep.mubr.msk.f32.mxu0 %vm1838_vm3, %v1806_v32  ;;  %v1809_v13 = vmax.f32 %v1663_v31, 0.0 }
 0x1ec   :  { %v3562_v49 = vpop.f32.mrf.mxu1  ;;  %3653 = vmatmul.mubr.msk.f32.gmra.mxu0 %vm1838_vm3, %v1807_v24 }
 0x1ed   :  { %v1808_v55 = vmax.f32 %v1658_v43, 0.0  ;;  %v1673_v8 = vadd.f32 %v3562_v49, %v5291_v57 }
 0x1ee   :  { %v1667_v47 = vpop.f32.mrf.mxu1 }
 0x1ef   :  { %v1668_v22 = vadd.f32 %v5291_v57, %v1667_v47  ;;  %3655 = vmatprep.mubr.msk.f32.mxu0 %vm1838_vm3, %v1808_v55  ;;  %v1811_v54 = vmax.f32 %v1673_v8, 0.0 }
 0x1f0   :  { %v3565_v51 = vpop.f32.mrf.mxu1  ;;  %3656 = vmatmul.mubr.msk.f32.gmra.mxu0 %vm1838_vm3, %v1809_v13 }
 0x1f1   :  { %v1810_v34 = vmax.f32 %v1668_v22, 0.0  ;;  %v1683_v48 = vadd.f32 %v3565_v51, %v5291_v57 }
 0x1f2   :  { %v1677_v32 = vpop.f32.mrf.mxu1 }
 0x1f3   :  { %v1678_v20 = vadd.f32 %v5291_v57, %v1677_v32  ;;  %3658 = vmatprep.mubr.msk.f32.mxu0 %vm1838_vm3, %v1810_v34  ;;  %v1813_v43 = vmax.f32 %v1683_v48, 0.0 }
 0x1f4   :  { %v3568_v24 = vpop.f32.mrf.mxu1  ;;  %3659 = vmatmul.mubr.msk.f32.gmra.mxu0 %vm1838_vm3, %v1811_v54 }
 0x1f5   :  { %v1812_v31 = vmax.f32 %v1678_v20, 0.0  ;;  %v1693_v49 = vadd.f32 %v3568_v24, %v5291_v57 }
 0x1f6   :  { %v1687_v55 = vpop.f32.mrf.mxu1 }
 0x1f7   :  { %v1688_v47 = vadd.f32 %v5291_v57, %v1687_v55  ;;  %3661 = vmatprep.mubr.msk.f32.mxu0 %vm1838_vm3, %v1812_v31  ;;  %v1815_v22 = vmax.f32 %v1693_v49, 0.0 }
 0x1f8   :  { %v3571_v13 = vpop.f32.mrf.mxu1  ;;  %3662 = vmatmul.mubr.msk.f32.gmra.mxu0 %vm1838_vm3, %v1813_v43 }
 0x1f9   :  { %v1814_v8 = vmax.f32 %v1688_v47, 0.0  ;;  %v1703_v51 = vadd.f32 %v3571_v13, %v5291_v57 }
 0x1fa   :  { %v1697_v34 = vpop.f32.mrf.mxu1 }
 0x1fb   :  { %v1698_v32 = vadd.f32 %v5291_v57, %v1697_v34  ;;  %3664 = vmatprep.mubr.msk.f32.mxu0 %vm1838_vm3, %v1814_v8  ;;  %v1817_v20 = vmax.f32 %v1703_v51, 0.0 }
 0x1fc   :  { %v3574_v54 = vpop.f32.mrf.mxu1  ;;  %3665 = vmatmul.mubr.msk.f32.gmra.mxu0 %vm1838_vm3, %v1815_v22 }
 0x1fd   :  { %v1816_v48 = vmax.f32 %v1698_v32, 0.0  ;;  %v1713_v24 = vadd.f32 %v3574_v54, %v5291_v57 }
 0x1fe   :  { %v1707_v31 = vpop.f32.mrf.mxu1 }
 0x1ff   :  { %v1708_v55 = vadd.f32 %v5291_v57, %v1707_v31  ;;  %3667 = vmatprep.mubr.msk.f32.mxu0 %vm1838_vm3, %v1816_v48  ;;  %v1819_v47 = vmax.f32 %v1713_v24, 0.0 }
 0x200   :  { %v3577_v43 = vpop.f32.mrf.mxu1  ;;  %3668 = vmatmul.mubr.msk.f32.gmra.mxu0 %vm1838_vm3, %v1817_v20 }
 0x201   :  { %v1818_v49 = vmax.f32 %v1708_v55, 0.0  ;;  %v1723_v13 = vadd.f32 %v3577_v43, %v5291_v57 }
 0x202   :  { %v1717_v8 = vpop.f32.mrf.mxu1 }
 0x203   :  { %v1718_v34 = vadd.f32 %v5291_v57, %v1717_v8  ;;  %3670 = vmatprep.mubr.msk.f32.mxu0 %vm1838_vm3, %v1818_v49  ;;  %v1821_v32 = vmax.f32 %v1723_v13, 0.0 }
 0x204   :  { %v3580_v22 = vpop.f32.mrf.mxu1  ;;  %3671 = vmatmul.mubr.msk.f32.gmra.mxu0 %vm1838_vm3, %v1819_v47 }
 0x205   :  { %v1820_v51 = vmax.f32 %v1718_v34, 0.0  ;;  %v1733_v54 = vadd.f32 %v3580_v22, %v5291_v57 }
 0x206   :  { %v1727_v48 = vpop.f32.mrf.mxu1 }
 0x207   :  { %v1728_v31 = vadd.f32 %v5291_v57, %v1727_v48  ;;  %3673 = vmatprep.mubr.msk.f32.mxu0 %vm1838_vm3, %v1820_v51  ;;  %v1823_v55 = vmax.f32 %v1733_v54, 0.0 }
 0x208   :  { %v3583_v20 = vpop.f32.mrf.mxu1  ;;  %3674 = vmatmul.mubr.msk.f32.gmra.mxu0 %vm1838_vm3, %v1821_v32 }
 0x209   :  { %v1822_v24 = vmax.f32 %v1728_v31, 0.0  ;;  %v1743_v43 = vadd.f32 %v3583_v20, %v5291_v57 }
 0x20a   :  { %v1737_v49 = vpop.f32.mrf.mxu1 }
 0x20b   :  { %v1738_v8 = vadd.f32 %v5291_v57, %v1737_v49  ;;  %3676 = vmatprep.mubr.msk.f32.mxu0 %vm1838_vm3, %v1822_v24  ;;  %v1825_v34 = vmax.f32 %v1743_v43, 0.0 }
 0x20c   :  { %v3586_v47 = vpop.f32.mrf.mxu1  ;;  %3677 = vmatmul.mubr.msk.f32.gmra.mxu0 %vm1838_vm3, %v1823_v55 }
 0x20d   :  { %v1824_v13 = vmax.f32 %v1738_v8, 0.0  ;;  %v1753_v22 = vadd.f32 %v3586_v47, %v5291_v57  ;;  %v5424_v8 = vld [vmem:[%s5881_s9] ss:$0 sm:$0xff] }
 0x20e   :  { %v1747_v51 = vpop.f32.mrf.mxu1 }
 0x20f   :  { %v1748_v48 = vadd.f32 %v5291_v57, %v1747_v51  ;;  %3679 = vmatprep.mubr.msk.f32.mxu0 %vm1838_vm3, %v1824_v13  ;;  %v1827_v31 = vmax.f32 %v1753_v22, 0.0 }
 0x210   :  { %v3589_v32 = vpop.f32.mrf.mxu1  ;;  %3680 = vmatmul.mubr.msk.f32.gmra.mxu0 %vm1838_vm3, %v1825_v34 }
 0x211   :  { %v1826_v54 = vmax.f32 %v1748_v48, 0.0  ;;  %v1763_v20 = vadd.f32 %v3589_v32, %v5291_v57 }
 0x212   :  { %v1757_v24 = vpop.f32.mrf.mxu1 }
 0x213   :  { %v1758_v49 = vadd.f32 %v5291_v57, %v1757_v24  ;;  %3682 = vmatprep.mubr.msk.f32.mxu0 %vm1838_vm3, %v1826_v54  ;;  %v1829_v43 = vmax.f32 %v1763_v20, 0.0 }
 0x214   :  { %3683 = vmatmul.mubr.msk.f32.gmra.mxu0 %vm1838_vm3, %v1827_v31 }
 0x215   :  { %v1828_v55 = vmax.f32 %v1758_v49, 0.0 }
 0x217   :  { %3685 = vmatprep.mubr.msk.f32.mxu0 %vm1838_vm3, %v1828_v55 }
 0x218   :  { %3686 = vmatmul.mubr.msk.f32.gmra.mxu0 %vm1838_vm3, %v1829_v43 }
 0x25a   :  { %v3594_v47 = vpop.f32.mrf.mxu0 }
 0x25b   :  { %v2107_v13 = vadd.f32 %v3594_v47, %v5424_v8 }
 0x25c   :  { %v2101_v34 = vpop.f32.mrf.mxu0 }
 0x25d   :  { %v3133_v57 = vmul.f32 -1.442695, %v2107_v13  ;;  %v2102_v22 = vadd.f32 %v5424_v8, %v2101_v34 }
 0x25e   :  { %v3597_v51 = vpop.f32.mrf.mxu0 }
 0x25f   :  { %3694 = vpow2.f32 %v3133_v57  ;;  %v3132_v48 = vmul.f32 -1.442695, %v2102_v22  ;;  %v2117_v32 = vadd.f32 %v3597_v51, %v5424_v8 }
 0x260   :  { %v2111_v54 = vpop.f32.mrf.mxu0 }
 0x261   :  { %3696 = vpow2.f32 %v3132_v48  ;;  %v3135_v31 = vmul.f32 -1.442695, %v2117_v32  ;;  %v2112_v20 = vadd.f32 %v5424_v8, %v2111_v54 }
 0x262   :  { %v3600_v24 = vpop.f32.mrf.mxu0 }
 0x263   :  { %3698 = vpow2.f32 %v3135_v31  ;;  %v3134_v49 = vmul.f32 -1.442695, %v2112_v20  ;;  %v2127_v55 = vadd.f32 %v3600_v24, %v5424_v8 }
 0x264   :  { %v2121_v43 = vpop.f32.mrf.mxu0 }
 0x265   :  { %3700 = vpow2.f32 %v3134_v49  ;;  %v3137_v47 = vmul.f32 -1.442695, %v2127_v55  ;;  %v2122_v13 = vadd.f32 %v5424_v8, %v2121_v43 }
 0x266   :  { %v3603_v34 = vpop.f32.mrf.mxu0 }
 0x267   :  { %3702 = vpow2.f32 %v3137_v47  ;;  %v3136_v57 = vmul.f32 -1.442695, %v2122_v13  ;;  %v2137_v22 = vadd.f32 %v3603_v34, %v5424_v8 }
 0x268   :  { %v2131_v51 = vpop.f32.mrf.mxu0 }
 0x269   :  { %3704 = vpow2.f32 %v3136_v57  ;;  %v3139_v48 = vmul.f32 -1.442695, %v2137_v22  ;;  %v2132_v32 = vadd.f32 %v5424_v8, %v2131_v51 }
 0x26b   :  { %3706 = vpow2.f32 %v3139_v48  ;;  %v3138_v54 = vmul.f32 -1.442695, %v2132_v32  ;;  %v3606_v31 = vpop.f32.mrf.mxu0 }
 0x26c   :  { %v3695_v20 = vpop.eup %3694  ;;  %v2147_v24 = vadd.f32 %v3606_v31, %v5424_v8 }
 0x26d   :  { %v2613_v49 = vadd.f32 1.0, %v3695_v20  ;;  %3708 = vpow2.f32 %v3138_v54  ;;  %v2141_v55 = vpop.f32.mrf.mxu0 }
 0x26e   :  { %v3697_v43 = vpop.eup %3696  ;;  %v3141_v29 = vmul.f32 -1.442695, %v2147_v24  ;;  %v2142_v47 = vadd.f32 %v5424_v8, %v2141_v55 }
 0x26f   :  { %3710 = vrcp.f32 %v2613_v49  ;;  %v2612_v13 = vadd.f32 1.0, %v3697_v43  ;;  %v3609_v34 = vpop.f32.mrf.mxu0 }
 0x270   :  { %v3699_v57 = vpop.eup %3698  ;;  %3712 = vpow2.f32 %v3141_v29  ;;  %v3140_v22 = vmul.f32 -1.442695, %v2142_v47  ;;  %v2157_v51 = vadd.f32 %v3609_v34, %v5424_v8 }
 0x271   :  { %3714 = vrcp.f32 %v2612_v13  ;;  %v2615_v48 = vadd.f32 1.0, %v3699_v57  ;;  %v2151_v32 = vpop.f32.mrf.mxu0 }
 0x272   :  { %v3701_v19 = vpop.eup %3700  ;;  %3716 = vpow2.f32 %v3140_v22  ;;  %v3143_v31 = vmul.f32 -1.442695, %v2157_v51  ;;  %v2152_v54 = vadd.f32 %v5424_v8, %v2151_v32 }
 0x273   :  { %3718 = vrcp.f32 %v2615_v48  ;;  %v2614_v20 = vadd.f32 1.0, %v3701_v19  ;;  %v3612_v24 = vpop.f32.mrf.mxu0 }
 0x274   :  { %v3703_v55 = vpop.eup %3702  ;;  %3720 = vpow2.f32 %v3143_v31  ;;  %v3142_v49 = vmul.f32 -1.442695, %v2152_v54  ;;  %v2167_v43 = vadd.f32 %v3612_v24, %v5424_v8 }
 0x275   :  { %3722 = vrcp.f32 %v2614_v20  ;;  %v2617_v29 = vadd.f32 1.0, %v3703_v55  ;;  %v2161_v47 = vpop.f32.mrf.mxu0 }
 0x276   :  { %v3705_v34 = vpop.eup %3704  ;;  %3724 = vpow2.f32 %v3142_v49  ;;  %v3145_v13 = vmul.f32 -1.442695, %v2167_v43  ;;  %v2162_v57 = vadd.f32 %v5424_v8, %v2161_v47 }
 0x277   :  { %3726 = vrcp.f32 %v2617_v29  ;;  %v2616_v22 = vadd.f32 1.0, %v3705_v34  ;;  %v3615_v51 = vpop.f32.mrf.mxu0 }
 0x278   :  { %v3707_v32 = vpop.eup %3706  ;;  %3728 = vpow2.f32 %v3145_v13  ;;  %v3144_v19 = vmul.f32 -1.442695, %v2162_v57  ;;  %v2177_v48 = vadd.f32 %v3615_v51, %v5424_v8  ;;  %v5987_v57 = vmax.f32 %v4334_v62, 0.0 }
 0x279   :  { %3730 = vrcp.f32 %v2616_v22  ;;  %v2619_v31 = vadd.f32 1.0, %v3707_v32  ;;  %v2171_v54 = vpop.f32.mrf.mxu0 }
 0x27a   :  { %v3709_v24 = vpop.eup %3708  ;;  %3732 = vpow2.f32 %v3144_v19  ;;  %v3147_v20 = vmul.f32 -1.442695, %v2177_v48  ;;  %v2172_v55 = vadd.f32 %v5424_v8, %v2171_v54  ;;  %v5988_v54 = vmax.f32 %v4341_v2, 0.0 }
 0x27b   :  { %3734 = vrcp.f32 %v2619_v31  ;;  %v2618_v49 = vadd.f32 1.0, %v3709_v24  ;;  %v3618_v43 = vpop.f32.mrf.mxu0 }
 0x27c   :  { %v3711_v47 = vpop.eup %3710  ;;  %3736 = vpow2.f32 %v3147_v20  ;;  %v3146_v29 = vmul.f32 -1.442695, %v2172_v55  ;;  %v2187_v34 = vadd.f32 %v3618_v43, %v5424_v8 }
 0x27d   :  { %v3713_v13 = vpop.eup %3712  ;;  %v2805_v51 = vmul.f32 %v3711_v47, %v5987_v57  ;;  %3738 = vrcp.f32 %v2618_v49  ;;  %v2181_v22 = vpop.f32.mrf.mxu0 }
 0x27e   :  { %v3715_v32 = vpop.eup %3714  ;;  %v2621_v18 = vadd.f32 1.0, %v3713_v13  ;;  %3740 = vpow2.f32 %v3146_v29  ;;  %v3149_v19 = vmul.f32 -1.442695, %v2187_v34  ;;  %v2182_v48 = vadd.f32 %v5424_v8, %v2181_v22 }
 0x27f   :  { %v3717_v31 = vpop.eup %3716  ;;  %2869 = vst.msk [vmem:[%s5882_s10 + $0x8] sm:$0xff] %vm1188_vm1, %v2805_v51  ;;  %v2804_v24 = vmul.f32 %v3715_v32, %v5988_v54  ;;  %v5989_v29 = vmax.f32 %v4358_v17, 0.0  ;;  %v5990_v32 = vmax.f32 %v4367_v23, 0.0 }
 0x280   :  { %v3621_v20 = vpop.f32.mrf.mxu0  ;;  %v3719_v62 = vpop.eup %3718  ;;  %3742 = vrcp.f32 %v2621_v18  ;;  %v2620_v55 = vadd.f32 1.0, %v3717_v31  ;;  %v3148_v49 = vmul.f32 -1.442695, %v2182_v48 }
 0x281   :  { %v2197_v43 = vadd.f32 %v3621_v20, %v5424_v8  ;;  %v3721_v47 = vpop.eup %3720  ;;  %2868 = vst.msk [vmem:[%s5882_s10] sm:$0xff] %vm1188_vm1, %v2804_v24  ;;  %v2807_v34 = vmul.f32 %v3719_v62, %v5989_v29  ;;  %3744 = vpow2.f32 %v3149_v19  ;;  %v5991_v62 = vmax.f32 %v4389_v40, 0.0 }
 0x282   :  { %v2191_v13 = vpop.f32.mrf.mxu0  ;;  %v3723_v2 = vpop.eup %3722  ;;  %3746 = vrcp.f32 %v2620_v55  ;;  %v2623_v57 = vadd.f32 1.0, %v3721_v47 }
 0x283   :  { %v3151_v51 = vmul.f32 -1.442695, %v2197_v43  ;;  %v2192_v18 = vadd.f32 %v5424_v8, %v2191_v13  ;;  %v3725_v22 = vpop.eup %3724  ;;  %2871 = vst.msk [vmem:[%s5882_s10 + $0x18] sm:$0xff] %vm1188_vm1, %v2807_v34  ;;  %v2806_v48 = vmul.f32 %v3723_v2, %v5990_v32  ;;  %3748 = vpow2.f32 %v3148_v49 }
 0x284   :  { %v3624_v17 = vpop.f32.mrf.mxu0  ;;  %v3727_v31 = vpop.eup %3726  ;;  %3750 = vrcp.f32 %v2623_v57  ;;  %v2622_v19 = vadd.f32 1.0, %v3725_v22  ;;  %v5992_v13 = vmax.f32 %v4399_v46, 0.0 }
 0x285   :  { %v3150_v54 = vmul.f32 -1.442695, %v2192_v18  ;;  %v2207_v24 = vadd.f32 %v3624_v17, %v5424_v8  ;;  %v3729_v20 = vpop.eup %3728  ;;  %2870 = vst.msk [vmem:[%s5882_s10 + $0x10] sm:$0xff] %vm1188_vm1, %v2806_v48  ;;  %v2809_v55 = vmul.f32 %v3727_v31, %v5991_v62  ;;  %3752 = vpow2.f32 %v3151_v51 }
 0x286   :  { %v2201_v23 = vpop.f32.mrf.mxu0  ;;  %v3731_v43 = vpop.eup %3730  ;;  %3754 = vrcp.f32 %v2622_v19  ;;  %v2625_v49 = vadd.f32 1.0, %v3729_v20  ;;  %v5993_v48 = vmax.f32 %v4423_v61, 0.0  ;;  %v5994_v62 = vmax.f32 %v4430_v4, 0.0 }
 0x287   :  { %v3153_v47 = vmul.f32 -1.442695, %v2207_v24  ;;  %v2202_v29 = vadd.f32 %v5424_v8, %v2201_v23  ;;  %v3733_v34 = vpop.eup %3732  ;;  %2873 = vst.msk [vmem:[%s5882_s10 + $0x28] sm:$0xff] %vm1188_vm1, %v2809_v55  ;;  %v2808_v2 = vmul.f32 %v3731_v43, %v5992_v13  ;;  %3756 = vpow2.f32 %v3150_v54 }
 0x288   :  { %v3627_v40 = vpop.f32.mrf.mxu0  ;;  %v3735_v57 = vpop.eup %3734  ;;  %3758 = vrcp.f32 %v2625_v49  ;;  %v2624_v51 = vadd.f32 1.0, %v3733_v34  ;;  %v5995_v13 = vmax.f32 %v4453_v25, 0.0 }
 0x289   :  { %v3152_v18 = vmul.f32 -1.442695, %v2202_v29  ;;  %v2217_v22 = vadd.f32 %v3627_v40, %v5424_v8  ;;  %v3737_v32 = vpop.eup %3736  ;;  %2872 = vst.msk [vmem:[%s5882_s10 + $0x20] sm:$0xff] %vm1188_vm1, %v2808_v2  ;;  %v2811_v17 = vmul.f32 %v3735_v57, %v5993_v48  ;;  %3760 = vpow2.f32 %v3153_v47 }
 0x28a   :  { %v2211_v46 = vpop.f32.mrf.mxu0  ;;  %v3739_v31 = vpop.eup %3738  ;;  %3762 = vrcp.f32 %v2624_v51  ;;  %v2627_v19 = vadd.f32 1.0, %v3737_v32  ;;  %v5996_v32 = vmax.f32 %v4470_v42, 0.0 }
 0x28b   :  { %v3155_v54 = vmul.f32 -1.442695, %v2217_v22  ;;  %v2212_v24 = vadd.f32 %v5424_v8, %v2211_v46  ;;  %v3741_v20 = vpop.eup %3740  ;;  %2875 = vst.msk [vmem:[%s5882_s10 + $0x38] sm:$0xff] %vm1188_vm1, %v2811_v17  ;;  %v2810_v55 = vmul.f32 %v3739_v31, %v5994_v62  ;;  %3764 = vpow2.f32 %v3152_v18 }
 0x28c   :  { %v3630_v61 = vpop.f32.mrf.mxu0  ;;  %3766 = vrcp.f32 %v2627_v19  ;;  %v2626_v23 = vadd.f32 1.0, %v3741_v20 }
 0x28d   :  { %v3154_v43 = vmul.f32 -1.442695, %v2212_v24  ;;  %v2227_v49 = vadd.f32 %v3630_v61, %v5424_v8  ;;  %v3743_v47 = vpop.eup %3742  ;;  %2874 = vst.msk [vmem:[%s5882_s10 + $0x30] sm:$0xff] %vm1188_vm1, %v2810_v55  ;;  %3768 = vpow2.f32 %v3155_v54  ;;  %v5997_v24 = vmax.f32 %v4491_v1, 0.0 }
 0x28e   :  { %v2221_v29 = vpop.f32.mrf.mxu0  ;;  %v3745_v34 = vpop.eup %3744  ;;  %v2813_v4 = vmul.f32 %v3743_v47, %v5995_v13  ;;  %3770 = vrcp.f32 %v2626_v23 }
 0x28f   :  { %v3157_v2 = vmul.f32 -1.442695, %v2227_v49  ;;  %v2222_v40 = vadd.f32 %v5424_v8, %v2221_v29  ;;  %v3747_v57 = vpop.eup %3746  ;;  %v2629_v51 = vadd.f32 1.0, %v3745_v34  ;;  %3772 = vpow2.f32 %v3154_v43 }
 0x290   :  { %v3633_v18 = vpop.f32.mrf.mxu0  ;;  %v3749_v22 = vpop.eup %3748  ;;  %2877 = vst.msk [vmem:[%s5882_s10 + $0x48] sm:$0xff] %vm1188_vm1, %v2813_v4  ;;  %v2812_v48 = vmul.f32 %v3747_v57, %v5996_v32  ;;  %v5998_v49 = vmax.f32 %v4494_v5, 0.0 }
 0x291   :  { %3774 = vpow2.f32 %v3157_v2  ;;  %v3156_v25 = vmul.f32 -1.442695, %v2222_v40  ;;  %v2237_v17 = vadd.f32 %v3633_v18, %v5424_v8  ;;  %v3751_v46 = vpop.eup %3750  ;;  %v2628_v31 = vadd.f32 1.0, %v3749_v22 }
 0x292   :  { %3776 = vrcp.f32 %v2629_v51  ;;  %v2231_v19 = vpop.f32.mrf.mxu0  ;;  %v3753_v54 = vpop.eup %3752  ;;  %2876 = vst.msk [vmem:[%s5882_s10 + $0x40] sm:$0xff] %vm1188_vm1, %v2812_v48  ;;  %v2815_v20 = vmul.f32 %v3751_v46, %v5997_v24  ;;  %v5999_v40 = vmax.f32 %v4521_v37, 0.0 }
 0x293   :  { %3778 = vpow2.f32 %v3156_v25  ;;  %v3159_v42 = vmul.f32 -1.442695, %v2237_v17  ;;  %v2232_v62 = vadd.f32 %v5424_v8, %v2231_v19  ;;  %v3755_v55 = vpop.eup %3754  ;;  %v2631_v61 = vadd.f32 1.0, %v3753_v54 }
 0x294   :  { %3780 = vrcp.f32 %v2628_v31  ;;  %v3636_v23 = vpop.f32.mrf.mxu0  ;;  %v3757_v43 = vpop.eup %3756  ;;  %2879 = vst.msk [vmem:[%s5882_s10 + $0x58] sm:$0xff] %vm1188_vm1, %v2815_v20  ;;  %v2814_v47 = vmul.f32 %v3755_v55, %v5998_v49  ;;  %v6000_v25 = vmax.f32 %v4528_v50, 0.0  ;;  %v6001_v20 = vmax.f32 %v4551_v27, 0.0  ;;  %v6002_v49 = vld [vmem:[#allocation2_spill] sm:$0xff] }
 0x295   :  { %3782 = vpow2.f32 %v3159_v42  ;;  %v3158_v1 = vmul.f32 -1.442695, %v2232_v62  ;;  %v2247_v29 = vadd.f32 %v3636_v23, %v5424_v8  ;;  %v3759_v34 = vpop.eup %3758  ;;  %v2630_v13 = vadd.f32 1.0, %v3757_v43 }
 0x296   :  { %3784 = vrcp.f32 %v2631_v61  ;;  %v2241_v4 = vpop.f32.mrf.mxu0  ;;  %v3761_v2 = vpop.eup %3760  ;;  %2878 = vst.msk [vmem:[%s5882_s10 + $0x50] sm:$0xff] %vm1188_vm1, %v2814_v47  ;;  %v2817_v57 = vmul.f32 %v3759_v34, %v5999_v40  ;;  %v6003_v47 = vmax.f32 %v6002_v49, 0.0 }
 0x297   :  { %3786 = vpow2.f32 %v3158_v1  ;;  %v3161_v5 = vmul.f32 -1.442695, %v2247_v29  ;;  %v2242_v51 = vadd.f32 %v5424_v8, %v2241_v4  ;;  %v3763_v18 = vpop.eup %3762  ;;  %v2633_v22 = vadd.f32 1.0, %v3761_v2 }
 0x298   :  { %3788 = vrcp.f32 %v2630_v13  ;;  %v3639_v32 = vpop.f32.mrf.mxu0  ;;  %v3765_v48 = vpop.eup %3764  ;;  %2881 = vst.msk [vmem:[%s5882_s10 + $0x68] sm:$0xff] %vm1188_vm1, %v2817_v57  ;;  %v2816_v17 = vmul.f32 %v3763_v18, %v6000_v25  ;;  %v6004_v18 = vld [vmem:[#allocation3_spill] sm:$0xff] }
 0x299   :  { %3790 = vpow2.f32 %v3161_v5  ;;  %v3160_v37 = vmul.f32 -1.442695, %v2242_v51  ;;  %v2257_v46 = vadd.f32 %v3639_v32, %v5424_v8  ;;  %v3767_v31 = vpop.eup %3766  ;;  %v2632_v19 = vadd.f32 1.0, %v3765_v48 }
 0x29a   :  { %3792 = vrcp.f32 %v2633_v22  ;;  %v2251_v54 = vpop.f32.mrf.mxu0  ;;  %v3769_v24 = vpop.eup %3768  ;;  %2880 = vst.msk [vmem:[%s5882_s10 + $0x60] sm:$0xff] %vm1188_vm1, %v2816_v17  ;;  %v2819_v42 = vmul.f32 %v3767_v31, %v6001_v20  ;;  %v6005_v22 = vmax.f32 %v6004_v18, 0.0 }
 0x29b   :  { %3794 = vpow2.f32 %v3160_v37  ;;  %v3163_v50 = vmul.f32 -1.442695, %v2257_v46  ;;  %v2252_v62 = vadd.f32 %v5424_v8, %v2251_v54  ;;  %v3771_v55 = vpop.eup %3770  ;;  %v2635_v61 = vadd.f32 1.0, %v3769_v24 }
 0x29c   :  { %3796 = vrcp.f32 %v2632_v19  ;;  %v3642_v23 = vpop.f32.mrf.mxu0  ;;  %v3773_v43 = vpop.eup %3772  ;;  %2883 = vst.msk [vmem:[%s5882_s10 + $0x78] sm:$0xff] %vm1188_vm1, %v2819_v42  ;;  %v2818_v1 = vmul.f32 %v3771_v55, %v6003_v47  ;;  %v6006_v19 = vld [vmem:[#allocation4_spill] sm:$0xff] }
 0x29d   :  { %3798 = vpow2.f32 %v3163_v50  ;;  %v3162_v27 = vmul.f32 -1.442695, %v2252_v62  ;;  %v2267_v29 = vadd.f32 %v3642_v23, %v5424_v8  ;;  %v2634_v13 = vadd.f32 1.0, %v3773_v43  ;;  %v6008_v23 = vld [vmem:[#allocation5_spill] sm:$0xff] }
 0x29e   :  { %v3775_v34 = vpop.eup %3774  ;;  %3800 = vrcp.f32 %v2635_v61  ;;  %v2261_v4 = vpop.f32.mrf.mxu0  ;;  %2882 = vst.msk [vmem:[%s5882_s10 + $0x70] sm:$0xff] %vm1188_vm1, %v2818_v1  ;;  %v6007_v54 = vmax.f32 %v6006_v19, 0.0  ;;  %v6009_v43 = vmax.f32 %v6008_v23, 0.0 }
 0x29f   :  { %v3777_v2 = vpop.eup %3776  ;;  %v2637_v40 = vadd.f32 1.0, %v3775_v34  ;;  %3802 = vpow2.f32 %v3162_v27  ;;  %v3165_v57 = vmul.f32 -1.442695, %v2267_v29  ;;  %v2262_v5 = vadd.f32 %v5424_v8, %v2261_v4  ;;  %v6010_v4 = vld [vmem:[#allocation6_spill] sm:$0xff] }
 0x2a0   :  { %v3779_v51 = vpop.eup %3778  ;;  %v2821_v32 = vmul.f32 %v3777_v2, %v6005_v22  ;;  %3804 = vrcp.f32 %v2634_v13  ;;  %v3645_v48 = vpop.f32.mrf.mxu0  ;;  %v6011_v2 = vmax.f32 %v6010_v4, 0.0 }
 0x2a1   :  { %v3781_v25 = vpop.eup %3780  ;;  %3806 = vrcp.f32 %v2637_v40  ;;  %v2636_v17 = vadd.f32 1.0, %v3779_v51  ;;  %v3164_v37 = vmul.f32 -1.442695, %v2262_v5  ;;  %v2277_v46 = vadd.f32 %v3645_v48, %v5424_v8  ;;  %v6012_v48 = vld [vmem:[#allocation7_spill] sm:$0xff] }
 0x2a2   :  { %v3783_v31 = vpop.eup %3782  ;;  %2885 = vst.msk [vmem:[%s5882_s10 + $0x88] sm:$0xff] %vm1188_vm1, %v2821_v32  ;;  %v2820_v24 = vmul.f32 %v3781_v25, %v6007_v54  ;;  %3808 = vpow2.f32 %v3165_v57  ;;  %v2271_v20 = vpop.f32.mrf.mxu0  ;;  %v6013_v25 = vmax.f32 %v6012_v48, 0.0 }
 0x2a3   :  { %v3785_v42 = vpop.eup %3784  ;;  %3810 = vrcp.f32 %v2636_v17  ;;  %v2639_v50 = vadd.f32 1.0, %v3783_v31  ;;  %v3167_v62 = vmul.f32 -1.442695, %v2277_v46  ;;  %v2272_v55 = vadd.f32 %v5424_v8, %v2271_v20  ;;  %v6014_v20 = vld [vmem:[#allocation8_spill] sm:$0xff] }
 0x2a4   :  { %v3787_v61 = vpop.eup %3786  ;;  %2884 = vst.msk [vmem:[%s5882_s10 + $0x80] sm:$0xff] %vm1188_vm1, %v2820_v24  ;;  %v2823_v49 = vmul.f32 %v3785_v42, %v6009_v43  ;;  %3812 = vpow2.f32 %v3164_v37  ;;  %v3648_v47 = vpop.f32.mrf.mxu0  ;;  %v6015_v42 = vmax.f32 %v6014_v20, 0.0 }
 0x2a5   :  { %v3789_v1 = vpop.eup %3788  ;;  %3814 = vrcp.f32 %v2639_v50  ;;  %v2638_v27 = vadd.f32 1.0, %v3787_v61  ;;  %v3166_v29 = vmul.f32 -1.442695, %v2272_v55  ;;  %v2287_v34 = vadd.f32 %v3648_v47, %v5424_v8  ;;  %v6016_v47 = vld [vmem:[#allocation9_spill] sm:$0xff] }
 0x2a6   :  { %v3791_v13 = vpop.eup %3790  ;;  %2887 = vst.msk [vmem:[%s5882_s10 + $0x98] sm:$0xff] %vm1188_vm1, %v2823_v49  ;;  %v2822_v40 = vmul.f32 %v3789_v1, %v6011_v2  ;;  %3816 = vpow2.f32 %v3167_v62  ;;  %v2281_v57 = vpop.f32.mrf.mxu0  ;;  %v6017_v1 = vmax.f32 %v6016_v47, 0.0 }
 0x2a7   :  { %v3793_v5 = vpop.eup %3792  ;;  %3818 = vrcp.f32 %v2638_v27  ;;  %v2641_v51 = vadd.f32 1.0, %v3791_v13  ;;  %v3169_v18 = vmul.f32 -1.442695, %v2287_v34  ;;  %v2282_v22 = vadd.f32 %v5424_v8, %v2281_v57  ;;  %v6018_v57 = vld [vmem:[#allocation10_spill] sm:$0xff] }
 0x2a8   :  { %v3795_v32 = vpop.eup %3794  ;;  %2886 = vst.msk [vmem:[%s5882_s10 + $0x90] sm:$0xff] %vm1188_vm1, %v2822_v40  ;;  %v2825_v17 = vmul.f32 %v3793_v5, %v6013_v25  ;;  %3820 = vpow2.f32 %v3166_v29  ;;  %v3651_v37 = vpop.f32.mrf.mxu0  ;;  %v6019_v5 = vmax.f32 %v6018_v57, 0.0 }
 0x2a9   :  { %v3797_v46 = vpop.eup %3796  ;;  %3822 = vrcp.f32 %v2641_v51  ;;  %v2640_v31 = vadd.f32 1.0, %v3795_v32  ;;  %v3168_v19 = vmul.f32 -1.442695, %v2282_v22  ;;  %v2297_v54 = vadd.f32 %v3651_v37, %v5424_v8  ;;  %v6020_v32 = vld [vmem:[#allocation11_spill] sm:$0xff] }
 0x2aa   :  { %v3799_v24 = vpop.eup %3798  ;;  %2889 = vst.msk [vmem:[%s5882_s10 + $0xa8] sm:$0xff] %vm1188_vm1, %v2825_v17  ;;  %v2824_v50 = vmul.f32 %v3797_v46, %v6015_v42  ;;  %3824 = vpow2.f32 %v3169_v18  ;;  %v2291_v62 = vpop.f32.mrf.mxu0  ;;  %v6021_v48 = vmax.f32 %v6020_v32, 0.0  ;;  %v6026_v32 = vmax.f32 %v4796_v44, 0.0 }
 0x2ab   :  { %v3801_v55 = vpop.eup %3800  ;;  %3826 = vrcp.f32 %v2640_v31  ;;  %v2643_v61 = vadd.f32 1.0, %v3799_v24  ;;  %v3171_v23 = vmul.f32 -1.442695, %v2297_v54  ;;  %v2292_v43 = vadd.f32 %v5424_v8, %v2291_v62  ;;  %v6022_v24 = vld [vmem:[#allocation12_spill] sm:$0xff] }
 0x2ac   :  { %v3803_v49 = vpop.eup %3802  ;;  %2888 = vst.msk [vmem:[%s5882_s10 + $0xa0] sm:$0xff] %vm1188_vm1, %v2824_v50  ;;  %v2827_v27 = vmul.f32 %v3801_v55, %v6017_v1  ;;  %3828 = vpow2.f32 %v3168_v19  ;;  %v3654_v29 = vpop.f32.mrf.mxu0  ;;  %v6023_v20 = vmax.f32 %v6022_v24, 0.0 }
 0x2ad   :  { %v3805_v34 = vpop.eup %3804  ;;  %3830 = vrcp.f32 %v2643_v61  ;;  %v2642_v13 = vadd.f32 1.0, %v3803_v49  ;;  %v3170_v4 = vmul.f32 -1.442695, %v2292_v43  ;;  %v2307_v2 = vadd.f32 %v3654_v29, %v5424_v8 }
 0x2ae   :  { %v3807_v40 = vpop.eup %3806  ;;  %2891 = vst.msk [vmem:[%s5882_s10 + $0xb8] sm:$0xff] %vm1188_vm1, %v2827_v27  ;;  %v2826_v51 = vmul.f32 %v3805_v34, %v6019_v5  ;;  %3832 = vpow2.f32 %v3171_v23  ;;  %v2301_v18 = vpop.f32.mrf.mxu0  ;;  %v6024_v49 = vmax.f32 %v4761_v6, 0.0 }
 0x2af   :  { %v3809_v22 = vpop.eup %3808  ;;  %v2829_v25 = vmul.f32 %v3807_v40, %v6021_v48  ;;  %3834 = vrcp.f32 %v2642_v13  ;;  %v3173_v17 = vmul.f32 -1.442695, %v2307_v2  ;;  %v2302_v37 = vadd.f32 %v5424_v8, %v2301_v18 }
 0x2b0   :  { %v3811_v46 = vpop.eup %3810  ;;  %2890 = vst.msk [vmem:[%s5882_s10 + $0xb0] sm:$0xff] %vm1188_vm1, %v2826_v51  ;;  %v2645_v31 = vadd.f32 1.0, %v3809_v22  ;;  %3836 = vpow2.f32 %v3170_v4  ;;  %v3657_v19 = vpop.f32.mrf.mxu0  ;;  %v6025_v2 = vmax.f32 %v4764_v30, 0.0 }
 0x2b1   :  { %v3813_v54 = vpop.eup %3812  ;;  %2893 = vst.msk [vmem:[%s5882_s10 + $0xc8] sm:$0xff] %vm1188_vm1, %v2829_v25  ;;  %v2828_v42 = vmul.f32 %v3811_v46, %v6023_v20  ;;  %3838 = vpow2.f32 %v3173_v17  ;;  %v3172_v50 = vmul.f32 -1.442695, %v2302_v37  ;;  %v2317_v62 = vadd.f32 %v3657_v19, %v5424_v8 }
 0x2b2   :  { %v3815_v55 = vpop.eup %3814  ;;  %3840 = vrcp.f32 %v2645_v31  ;;  %v2644_v61 = vadd.f32 1.0, %v3813_v54  ;;  %v2311_v23 = vpop.f32.mrf.mxu0  ;;  %v6027_v19 = vmax.f32 %v4806_v36, 0.0 }
 0x2b3   :  { %v3817_v43 = vpop.eup %3816  ;;  %2892 = vst.msk [vmem:[%s5882_s10 + $0xc0] sm:$0xff] %vm1188_vm1, %v2828_v42  ;;  %v2831_v47 = vmul.f32 %v3815_v55, %v6024_v49  ;;  %3842 = vpow2.f32 %v3172_v50  ;;  %v3175_v1 = vmul.f32 -1.442695, %v2317_v62  ;;  %v2312_v27 = vadd.f32 %v5424_v8, %v2311_v23 }
 0x2b4   :  { %v3819_v29 = vpop.eup %3818  ;;  %3844 = vrcp.f32 %v2644_v61  ;;  %v2647_v34 = vadd.f32 1.0, %v3817_v43  ;;  %v3660_v13 = vpop.f32.mrf.mxu0  ;;  %v6028_v55 = vmax.f32 %v4831_v38, 0.0 }
 0x2b5   :  { %v3821_v4 = vpop.eup %3820  ;;  %2895 = vst.msk [vmem:[%s5882_s10 + $0xd8] sm:$0xff] %vm1188_vm1, %v2831_v47  ;;  %v2830_v40 = vmul.f32 %v3819_v29, %v6025_v2  ;;  %3846 = vpow2.f32 %v3175_v1  ;;  %v3174_v6 = vmul.f32 -1.442695, %v2312_v27  ;;  %v2327_v57 = vadd.f32 %v3660_v13, %v5424_v8 }
 0x2b6   :  { %v3823_v5 = vpop.eup %3822  ;;  %3848 = vrcp.f32 %v2647_v34  ;;  %v2646_v51 = vadd.f32 1.0, %v3821_v4  ;;  %v2321_v18 = vpop.f32.mrf.mxu0  ;;  %v6029_v27 = vmax.f32 %v4834_v15, 0.0 }
 0x2b7   :  { %v3825_v22 = vpop.eup %3824  ;;  %2894 = vst.msk [vmem:[%s5882_s10 + $0xd0] sm:$0xff] %vm1188_vm1, %v2830_v40  ;;  %v2833_v48 = vmul.f32 %v3823_v5, %v6026_v32  ;;  %3850 = vpow2.f32 %v3174_v6  ;;  %v3177_v30 = vmul.f32 -1.442695, %v2327_v57  ;;  %v2322_v25 = vadd.f32 %v5424_v8, %v2321_v18 }
 0x2b8   :  { %v3827_v17 = vpop.eup %3826  ;;  %3852 = vrcp.f32 %v2646_v51  ;;  %v2649_v37 = vadd.f32 1.0, %v3825_v22  ;;  %v3663_v46 = vpop.f32.mrf.mxu0  ;;  %v6030_v51 = vmax.f32 %v4866_v33, 0.0 }
 0x2b9   :  { %v3829_v31 = vpop.eup %3828  ;;  %2897 = vst.msk [vmem:[%s5882_s10 + $0xe8] sm:$0xff] %vm1188_vm1, %v2833_v48  ;;  %v2832_v54 = vmul.f32 %v3827_v17, %v6027_v19  ;;  %3854 = vpow2.f32 %v3177_v30  ;;  %v3176_v44 = vmul.f32 -1.442695, %v2322_v25  ;;  %v2337_v24 = vadd.f32 %v3663_v46, %v5424_v8 }
 0x2ba   :  { %v3831_v20 = vpop.eup %3830  ;;  %3856 = vrcp.f32 %v2649_v37  ;;  %v2648_v42 = vadd.f32 1.0, %v3829_v31  ;;  %v2331_v50 = vpop.f32.mrf.mxu0  ;;  %v6031_v37 = vld [vmem:[#allocation13_spill] sm:$0xff] }
 0x2bb   :  { %v3833_v62 = vpop.eup %3832  ;;  %2896 = vst.msk [vmem:[%s5882_s10 + $0xe0] sm:$0xff] %vm1188_vm1, %v2832_v54  ;;  %v2835_v61 = vmul.f32 %v3831_v20, %v6028_v55  ;;  %3858 = vpow2.f32 %v3176_v44  ;;  %v3179_v36 = vmul.f32 -1.442695, %v2337_v24  ;;  %v2332_v23 = vadd.f32 %v5424_v8, %v2331_v50 }
 0x2bc   :  { %v3835_v43 = vpop.eup %3834  ;;  %3860 = vrcp.f32 %v2648_v42  ;;  %v2651_v49 = vadd.f32 1.0, %v3833_v62  ;;  %v3666_v47 = vpop.f32.mrf.mxu0  ;;  %v6032_v46 = vmax.f32 %v6031_v37, 0.0  ;;  %v6033_v42 = vmax.f32 %v4879_v7, 0.0 }
 0x2bd   :  { %v3837_v1 = vpop.eup %3836  ;;  %2899 = vst.msk [vmem:[%s5882_s10 + $0xf8] sm:$0xff] %vm1188_vm1, %v2835_v61  ;;  %v2834_v29 = vmul.f32 %v3835_v43, %v6029_v27  ;;  %3862 = vpow2.f32 %v3179_v36  ;;  %v3178_v38 = vmul.f32 -1.442695, %v2332_v23  ;;  %v2347_v34 = vadd.f32 %v3666_v47, %v5424_v8 }
 0x2be   :  { %v3839_v13 = vpop.eup %3838  ;;  %3864 = vrcp.f32 %v2651_v49  ;;  %v2650_v4 = vadd.f32 1.0, %v3837_v1  ;;  %v2341_v2 = vpop.f32.mrf.mxu0  ;;  %v6034_v49 = vld [vmem:[#allocation14_spill] sm:$0xff] }
 0x2bf   :  { %v3841_v40 = vpop.eup %3840  ;;  %2898 = vst.msk [vmem:[%s5882_s10 + $0xf0] sm:$0xff] %vm1188_vm1, %v2834_v29  ;;  %v2653_v6 = vadd.f32 1.0, %v3839_v13  ;;  %3866 = vpow2.f32 %v3178_v38  ;;  %v3181_v57 = vmul.f32 -1.442695, %v2347_v34  ;;  %v2342_v15 = vadd.f32 %v5424_v8, %v2341_v2 }
 0x2c0   :  { %v3843_v5 = vpop.eup %3842  ;;  %v2837_v18 = vmul.f32 %v3841_v40, %v6030_v51  ;;  %3868 = vrcp.f32 %v2650_v4  ;;  %v3669_v22 = vpop.f32.mrf.mxu0  ;;  %v6035_v47 = vmax.f32 %v6034_v49, 0.0  ;;  %v6036_v4 = vmax.f32 %v4933_v14, 0.0 }
 0x2c1   :  { %v3845_v32 = vpop.eup %3844  ;;  %3870 = vrcp.f32 %v2653_v6  ;;  %v2652_v48 = vadd.f32 1.0, %v3843_v5  ;;  %v3180_v30 = vmul.f32 -1.442695, %v2342_v15  ;;  %v2357_v25 = vadd.f32 %v3669_v22, %v5424_v8 }
 0x2c2   :  { %v3847_v17 = vpop.eup %3846  ;;  %2901 = vst.msk [vmem:[%s5882_s10 + $0x108] sm:$0xff] %vm1188_vm1, %v2837_v18  ;;  %v2836_v31 = vmul.f32 %v3845_v32, %v6032_v46  ;;  %3872 = vpow2.f32 %v3181_v57  ;;  %v2351_v33 = vpop.f32.mrf.mxu0  ;;  %v6037_v18 = vld [vmem:[#allocation15_spill] sm:$0xff]  ;;  %v6039_v46 = vmax.f32 %v4967_v21, 0.0 }
 0x2c3   :  { %v3849_v19 = vpop.eup %3848  ;;  %3874 = vrcp.f32 %v2652_v48  ;;  %v2655_v54 = vadd.f32 1.0, %v3847_v17  ;;  %v3183_v44 = vmul.f32 -1.442695, %v2357_v25  ;;  %v2352_v24 = vadd.f32 %v5424_v8, %v2351_v33 }
 0x2c4   :  { %v3851_v20 = vpop.eup %3850  ;;  %2900 = vst.msk [vmem:[%s5882_s10 + $0x100] sm:$0xff] %vm1188_vm1, %v2836_v31  ;;  %v2839_v50 = vmul.f32 %v3849_v19, %v6033_v42  ;;  %3876 = vpow2.f32 %v3180_v30  ;;  %v3672_v62 = vpop.f32.mrf.mxu0  ;;  %v6038_v22 = vmax.f32 %v6037_v18, 0.0  ;;  %v6040_v42 = vmax.f32 %v4923_v11, 0.0 }
 0x2c5   :  { %v3853_v55 = vpop.eup %3852  ;;  %3878 = vrcp.f32 %v2655_v54  ;;  %v2654_v61 = vadd.f32 1.0, %v3851_v20  ;;  %v3182_v36 = vmul.f32 -1.442695, %v2352_v24  ;;  %v2367_v23 = vadd.f32 %v3672_v62, %v5424_v8 }
 0x2c6   :  { %v3855_v43 = vpop.eup %3854  ;;  %2903 = vst.msk [vmem:[%s5882_s10 + $0x118] sm:$0xff] %vm1188_vm1, %v2839_v50  ;;  %v2838_v1 = vmul.f32 %v3853_v55, %v6035_v47  ;;  %3880 = vpow2.f32 %v3183_v44  ;;  %v2361_v7 = vpop.f32.mrf.mxu0  ;;  %v6041_v55 = vmax.f32 %v4998_v52, 0.0  ;;  %v6042_v52 = vld [vmem:[#allocation16_spill] sm:$0xff] }
 0x2c7   :  { %v3857_v27 = vpop.eup %3856  ;;  %3882 = vrcp.f32 %v2654_v61  ;;  %v2657_v29 = vadd.f32 1.0, %v3855_v43  ;;  %v3185_v38 = vmul.f32 -1.442695, %v2367_v23  ;;  %v2362_v34 = vadd.f32 %v5424_v8, %v2361_v7 }
 0x2c8   :  { %v3859_v13 = vpop.eup %3858  ;;  %2902 = vst.msk [vmem:[%s5882_s10 + $0x110] sm:$0xff] %vm1188_vm1, %v2838_v1  ;;  %v2841_v2 = vmul.f32 %v3857_v27, %v6036_v4  ;;  %3884 = vpow2.f32 %v3182_v36  ;;  %v3675_v40 = vpop.f32.mrf.mxu0  ;;  %v6043_v1 = vmax.f32 %v6042_v52, 0.0 }
 0x2c9   :  { %v3861_v6 = vpop.eup %3860  ;;  %3886 = vrcp.f32 %v2657_v29  ;;  %v2656_v57 = vadd.f32 1.0, %v3859_v13  ;;  %v3184_v15 = vmul.f32 -1.442695, %v2362_v34  ;;  %v2377_v5 = vadd.f32 %v3675_v40, %v5424_v8 }
 0x2ca   :  { %v3863_v51 = vpop.eup %3862  ;;  %2905 = vst.msk [vmem:[%s5882_s10 + $0x128] sm:$0xff] %vm1188_vm1, %v2841_v2  ;;  %v2840_v32 = vmul.f32 %v3861_v6, %v6038_v22  ;;  %3888 = vpow2.f32 %v3185_v38  ;;  %v2371_v14 = vpop.f32.mrf.mxu0  ;;  %v6044_v2 = vld [vmem:[#allocation19_spill] sm:$0xff] }
 0x2cb   :  { %v3865_v48 = vpop.eup %3864  ;;  %3890 = vrcp.f32 %v2656_v57  ;;  %v2659_v30 = vadd.f32 1.0, %v3863_v51  ;;  %v3187_v25 = vmul.f32 -1.442695, %v2377_v5  ;;  %v2372_v17 = vadd.f32 %v5424_v8, %v2371_v14 }
 0x2cc   :  { %v3867_v37 = vpop.eup %3866  ;;  %2904 = vst.msk [vmem:[%s5882_s10 + $0x120] sm:$0xff] %vm1188_vm1, %v2840_v32  ;;  %v2843_v31 = vmul.f32 %v3865_v48, %v6039_v46  ;;  %3892 = vpow2.f32 %v3184_v15  ;;  %v3678_v33 = vpop.f32.mrf.mxu0  ;;  %v6045_v40 = vmax.f32 %v6044_v2, 0.0  ;;  %v3951_v15 = vld [vmem:[%s5881_s9] ss:$0 sm:$0xff]  ;;  %v6046_v32 = vld [vmem:[#allocation17_spill] sm:$0xff] }
 0x2cd   :  { %v3869_v19 = vpop.eup %3868  ;;  %3894 = vrcp.f32 %v2659_v30  ;;  %v2658_v54 = vadd.f32 1.0, %v3867_v37  ;;  %v3186_v44 = vmul.f32 -1.442695, %v2372_v17  ;;  %v2387_v24 = vadd.f32 %v3678_v33, %v5424_v8 }
 0x2ce   :  { %v3871_v20 = vpop.eup %3870  ;;  %2907 = vst.msk [vmem:[%s5882_s10 + $0x138] sm:$0xff] %vm1188_vm1, %v2843_v31  ;;  %v2842_v50 = vmul.f32 %v3869_v19, %v6040_v42  ;;  %3896 = vpow2.f32 %v3187_v25  ;;  %v2381_v21 = vpop.f32.mrf.mxu0  ;;  %v6047_v14 = vmax.f32 %v6046_v32, 0.0  ;;  %v6048_v33 = vmax.f32 %v5039_v0, 0.0 }
 0x2cf   :  { %v3873_v62 = vpop.eup %3872  ;;  %v2845_v61 = vmul.f32 %v3871_v20, %v6041_v55  ;;  %3898 = vrcp.f32 %v2658_v54  ;;  %v3189_v36 = vmul.f32 -1.442695, %v2387_v24  ;;  %v2382_v23 = vadd.f32 %v5424_v8, %v2381_v21  ;;  %v6049_v21 = vld [vmem:[#allocation18_spill] sm:$0xff] }
 0x2d0   :  { %v3875_v43 = vpop.eup %3874  ;;  %2906 = vst.msk [vmem:[%s5882_s10 + $0x130] sm:$0xff] %vm1188_vm1, %v2842_v50  ;;  %v2661_v49 = vadd.f32 1.0, %v3873_v62  ;;  %3900 = vpow2.f32 %v3186_v44  ;;  %v3681_v11 = vpop.f32.mrf.mxu0  ;;  %v6050_v62 = vmax.f32 %v6049_v21, 0.0 }
 0x2d1   :  { %v3877_v47 = vpop.eup %3876  ;;  %2909 = vst.msk [vmem:[%s5882_s10 + $0x148] sm:$0xff] %vm1188_vm1, %v2845_v61  ;;  %v2844_v7 = vmul.f32 %v3875_v43, %v6043_v1  ;;  %3902 = vpow2.f32 %v3189_v36  ;;  %v3188_v27 = vmul.f32 -1.442695, %v2382_v23  ;;  %v2397_v29 = vadd.f32 %v3681_v11, %v5424_v8 }
 0x2d2   :  { %v3879_v38 = vpop.eup %3878  ;;  %3904 = vrcp.f32 %v2661_v49  ;;  %v2660_v34 = vadd.f32 1.0, %v3877_v47  ;;  %v2391_v13 = vpop.f32.mrf.mxu0  ;;  %v6051_v11 = vmax.f32 %v5096_v53, 0.0 }
 0x2d3   :  { %v3881_v4 = vpop.eup %3880  ;;  %2908 = vst.msk [vmem:[%s5882_s10 + $0x140] sm:$0xff] %vm1188_vm1, %v2844_v7  ;;  %v2847_v6 = vmul.f32 %v3879_v38, %v6045_v40  ;;  %3906 = vpow2.f32 %v3188_v27  ;;  %v3191_v57 = vmul.f32 -1.442695, %v2397_v29  ;;  %v2392_v8 = vadd.f32 %v3951_v15, %v2391_v13  ;;  %v6052_v38 = vld [vmem:[#allocation20_spill] sm:$0xff] }
 0x2d4   :  { %v3883_v5 = vpop.eup %3882  ;;  %3908 = vrcp.f32 %v2660_v34  ;;  %v2663_v51 = vadd.f32 1.0, %v3881_v4  ;;  %v3684_v18 = vpop.f32.mrf.mxu0  ;;  %v6053_v34 = vmax.f32 %v6052_v38, 0.0  ;;  %v6066_v38 = vmax.f32 %v5265_v12, 0.0 }
 0x2d5   :  { %v3885_v22 = vpop.eup %3884  ;;  %2911 = vst.msk [vmem:[%s5882_s10 + $0x158] sm:$0xff] %vm1188_vm1, %v2847_v6  ;;  %v2846_v48 = vmul.f32 %v3883_v5, %v6047_v14  ;;  %3910 = vpow2.f32 %v3191_v57  ;;  %v3190_v30 = vmul.f32 -1.442695, %v2392_v8  ;;  %v2407_v25 = vadd.f32 %v3951_v15, %v3684_v18 }
 0x2d6   :  { %v3887_v17 = vpop.eup %3886  ;;  %3912 = vrcp.f32 %v2663_v51  ;;  %v2662_v37 = vadd.f32 1.0, %v3885_v22  ;;  %v2401_v46 = vpop.f32.mrf.mxu0  ;;  %v6055_v22 = vmax.f32 %v5086_v60, 0.0  ;;  %v6057_v60 = vld [vmem:[#allocation21_spill] sm:$0xff] }
 0x2d7   :  { %v3889_v31 = vpop.eup %3888  ;;  %2910 = vst.msk [vmem:[%s5882_s10 + $0x150] sm:$0xff] %vm1188_vm1, %v2846_v48  ;;  %v2849_v19 = vmul.f32 %v3887_v17, %v6048_v33  ;;  %3914 = vpow2.f32 %v3190_v30  ;;  %v3193_v54 = vmul.f32 -1.442695, %v2407_v25  ;;  %v2402_v44 = vadd.f32 %v3951_v15, %v2401_v46 }
 0x2d8   :  { %v3891_v24 = vpop.eup %3890  ;;  %3916 = vrcp.f32 %v2662_v37  ;;  %v2665_v20 = vadd.f32 1.0, %v3889_v31  ;;  %v3687_v42 = vpop.f32.mrf.mxu0  ;;  %v6058_v31 = vmax.f32 %v6057_v60, 0.0 }
 0x2d9   :  { %v3893_v50 = vpop.eup %3892  ;;  %2913 = vst.msk [vmem:[%s5882_s10 + $0x168] sm:$0xff] %vm1188_vm1, %v2849_v19  ;;  %v2848_v55 = vmul.f32 %v3891_v24, %v6050_v62  ;;  %3918 = vpow2.f32 %v3193_v54  ;;  %v3192_v61 = vmul.f32 -1.442695, %v2402_v44  ;;  %v2417_v0 = vadd.f32 %v3951_v15, %v3687_v42 }
 0x2da   :  { %v3895_v36 = vpop.eup %3894  ;;  %3920 = vrcp.f32 %v2665_v20  ;;  %v2664_v23 = vadd.f32 1.0, %v3893_v50  ;;  %v2411_v43 = vpop.f32.mrf.mxu0  ;;  %v6059_v50 = vld [vmem:[#allocation22_spill] sm:$0xff] }
 0x2db   :  { %v3897_v49 = vpop.eup %3896  ;;  %2912 = vst.msk [vmem:[%s5882_s10 + $0x160] sm:$0xff] %vm1188_vm1, %v2848_v55  ;;  %v2851_v47 = vmul.f32 %v3895_v36, %v6051_v11  ;;  %3922 = vpow2.f32 %v3192_v61  ;;  %v3195_v52 = vmul.f32 -1.442695, %v2417_v0  ;;  %v2412_v1 = vadd.f32 %v3951_v15, %v2411_v43 }
 0x2dc   :  { %v3899_v7 = vpop.eup %3898  ;;  %3924 = vrcp.f32 %v2664_v23  ;;  %v2667_v27 = vadd.f32 1.0, %v3897_v49  ;;  %v6054_v15 = vmax.f32 %v5130_v26, 0.0  ;;  %v6056_v26 = vmax.f32 %v5158_v41, 0.0 }
 0x2dd   :  { %v3901_v29 = vpop.eup %3900  ;;  %2915 = vst.msk [vmem:[%s5882_s10 + $0x178] sm:$0xff] %vm1188_vm1, %v2851_v47  ;;  %v2850_v13 = vmul.f32 %v3899_v7, %v6053_v34  ;;  %3926 = vpow2.f32 %v3195_v52  ;;  %v3194_v4 = vmul.f32 -1.442695, %v2412_v1  ;;  %v6060_v21 = vmax.f32 %v6059_v50, 0.0 }
 0x2de   :  { %v3903_v2 = vpop.eup %3902  ;;  %3928 = vrcp.f32 %v2667_v27  ;;  %v2666_v53 = vadd.f32 1.0, %v3901_v29  ;;  %v6061_v43 = vmax.f32 %v5165_v16, 0.0  ;;  %v6062_v11 = vmax.f32 %v5233_v59, 0.0 }
 0x2df   :  { %v3905_v40 = vpop.eup %3904  ;;  %2914 = vst.msk [vmem:[%s5882_s10 + $0x170] sm:$0xff] %vm1188_vm1, %v2850_v13  ;;  %v2669_v6 = vadd.f32 1.0, %v3903_v2  ;;  %3930 = vpow2.f32 %v3194_v4  ;;  %v6064_v59 = vmax.f32 %v5250_v10, 0.0  ;;  %v6065_v27 = vmax.f32 %v5226_v45, 0.0 }
 0x2e0   :  { %v3907_v57 = vpop.eup %3906  ;;  %v2853_v8 = vmul.f32 %v3905_v40, %v6054_v15  ;;  %3932 = vrcp.f32 %v2666_v53  ;;  %v6067_v13 = vmax.f32 %v5242_v35, 0.0  ;;  %v6068_v2 = vmax.f32 %v5276_v56, 0.0 }
 0x2e1   :  { %v3909_v5 = vpop.eup %3908  ;;  %3934 = vrcp.f32 %v2669_v6  ;;  %v2668_v51 = vadd.f32 1.0, %v3907_v57  ;;  %v6069_v40 = vmax.f32 %v5258_v28, 0.0 }
 0x2e2   :  { %v3911_v18 = vpop.eup %3910  ;;  %2917 = vst.msk [vmem:[%s5882_s10 + $0x188] sm:$0xff] %vm1188_vm1, %v2853_v8  ;;  %v2852_v32 = vmul.f32 %v3909_v5, %v6055_v22 }
 0x2e3   :  { %v3913_v14 = vpop.eup %3912  ;;  %3936 = vrcp.f32 %v2668_v51  ;;  %v2671_v48 = vadd.f32 1.0, %v3911_v18 }
 0x2e4   :  { %v3915_v30 = vpop.eup %3914  ;;  %2916 = vst.msk [vmem:[%s5882_s10 + $0x180] sm:$0xff] %vm1188_vm1, %v2852_v32  ;;  %v2855_v25 = vmul.f32 %v3913_v14, %v6056_v26 }
 0x2e5   :  { %v3917_v17 = vpop.eup %3916  ;;  %3938 = vrcp.f32 %v2671_v48  ;;  %v2670_v37 = vadd.f32 1.0, %v3915_v30 }
 0x2e6   :  { %v3919_v46 = vpop.eup %3918  ;;  %2919 = vst.msk [vmem:[%s5882_s10 + $0x198] sm:$0xff] %vm1188_vm1, %v2855_v25  ;;  %v2854_v33 = vmul.f32 %v3917_v17, %v6058_v31 }
 0x2e7   :  { %v3921_v19 = vpop.eup %3920  ;;  %3940 = vrcp.f32 %v2670_v37  ;;  %v2673_v54 = vadd.f32 1.0, %v3919_v46 }
 0x2e8   :  { %v3923_v44 = vpop.eup %3922  ;;  %2918 = vst.msk [vmem:[%s5882_s10 + $0x190] sm:$0xff] %vm1188_vm1, %v2854_v33  ;;  %v2857_v41 = vmul.f32 %v3921_v19, %v1168_v9 }
 0x2e9   :  { %v3925_v24 = vpop.eup %3924  ;;  %3942 = vrcp.f32 %v2673_v54  ;;  %v2672_v20 = vadd.f32 1.0, %v3923_v44 }
 0x2ea   :  { %v3927_v42 = vpop.eup %3926  ;;  %2921 = vst.msk [vmem:[%s5882_s10 + $0x1a8] sm:$0xff] %vm1188_vm1, %v2857_v41  ;;  %v2856_v62 = vmul.f32 %v3925_v24, %v6060_v21 }
 0x2eb   :  { %v3929_v55 = vpop.eup %3928  ;;  %3944 = vrcp.f32 %v2672_v20  ;;  %v2675_v61 = vadd.f32 1.0, %v3927_v42 }
 0x2ec   :  { %v3931_v0 = vpop.eup %3930  ;;  %2920 = vst.msk [vmem:[%s5882_s10 + $0x1a0] sm:$0xff] %vm1188_vm1, %v2856_v62  ;;  %v2859_v58 = vmul.f32 %v3929_v55, %v1170_v63  ;;  %v6063_v63 = vmax.f32 %v5203_v39, 0.0 }
 0x2ed   :  { %v3933_v9 = vpop.eup %3932  ;;  %3946 = vrcp.f32 %v2675_v61  ;;  %v2674_v36 = vadd.f32 1.0, %v3931_v0 }
 0x2ee   :  { %v3935_v23 = vpop.eup %3934  ;;  %2923 = vst.msk [vmem:[%s5882_s10 + $0x1b8] sm:$0xff] %vm1188_vm1, %v2859_v58  ;;  %v2858_v49 = vmul.f32 %v3933_v9, %v6061_v43 }
 0x2ef   :  { %v2861_v47 = vmul.f32 %v3935_v23, %v6062_v11  ;;  %3948 = vrcp.f32 %v2674_v36 }
 0x2f0   :  { %v3937_v52 = vpop.eup %3936  ;;  %2922 = vst.msk [vmem:[%s5882_s10 + $0x1b0] sm:$0xff] %vm1188_vm1, %v2858_v49 }
 0x2f1   :  { %2925 = vst.msk [vmem:[%s5882_s10 + $0x1c8] sm:$0xff] %vm1188_vm1, %v2861_v47  ;;  %v2860_v3 = vmul.f32 %v3937_v52, %v6063_v63 }
 0x2f2   :  { %v3939_v16 = vpop.eup %3938 }
 0x2f3   :  { %2924 = vst.msk [vmem:[%s5882_s10 + $0x1c0] sm:$0xff] %vm1188_vm1, %v2860_v3  ;;  %v2863_v1 = vmul.f32 %v3939_v16, %v6064_v59 }
 0x2f4   :  { %v3941_v7 = vpop.eup %3940 }
 0x2f5   :  { %2927 = vst.msk [vmem:[%s5882_s10 + $0x1d8] sm:$0xff] %vm1188_vm1, %v2863_v1  ;;  %v2862_v29 = vmul.f32 %v3941_v7, %v6065_v27 }
 0x2f6   :  { %v3943_v39 = vpop.eup %3942 }
 0x2f7   :  { %2926 = vst.msk [vmem:[%s5882_s10 + $0x1d0] sm:$0xff] %vm1188_vm1, %v2862_v29  ;;  %v2865_v34 = vmul.f32 %v3943_v39, %v6066_v38 }
 0x2f8   :  { %v3945_v10 = vpop.eup %3944 }
 0x2f9   :  { %2929 = vst.msk [vmem:[%s5882_s10 + $0x1e8] sm:$0xff] %vm1188_vm1, %v2865_v34  ;;  %v2864_v4 = vmul.f32 %v3945_v10, %v6067_v13 }
 0x2fa   :  { %v3947_v45 = vpop.eup %3946 }
 0x2fb   :  { %2928 = vst.msk [vmem:[%s5882_s10 + $0x1e0] sm:$0xff] %vm1188_vm1, %v2864_v4  ;;  %v2867_v53 = vmul.f32 %v3947_v45, %v6068_v2 }
 0x2fc   :  { %v3949_v12 = vpop.eup %3948 }
 0x2fd   :  { %2931 = vst.msk [vmem:[%s5882_s10 + $0x1f8] sm:$0xff] %vm1188_vm1, %v2867_v53  ;;  %v2866_v6 = vmul.f32 %v3949_v12, %v6069_v40 }
 0x2ff   :  { %2930 = vst.msk [vmem:[%s5882_s10 + $0x1f0] sm:$0xff] %vm1188_vm1, %v2866_v6 }

// kernel: resnet_block_forward.3
= control target key start
LH: loop header
LB: loop body
LE: loop exit
PB: predicated region body
PF: predicated region fallthrough
CT: control target
= control target key end

     0   :  { %s3312_s17 = smov 0   ;;  %s4982_s0 = inlined_call_operand.vmem [shape: f32[2,16,16,8], index: 0, kind: input, shape index: {}]   ;;  %s4983_s1 = inlined_call_operand.vmem [shape: f32[3,3,8], index: 1, kind: input, shape index: {}]   ;;  %s4984_s2 = inlined_call_operand.vmem [shape: f32[1,1,8], index: 2, kind: input, shape index: {}]   ;;  %s4985_s3 = inlined_call_operand.vmem [shape: f32[8,16], index: 3, kind: input, shape index: {}]   ;;  %s4986_s4 = inlined_call_operand.vmem [shape: f32[1,16], index: 4, kind: input, shape index: {}]   ;;  %s4987_s5 = inlined_call_operand.vmem [shape: f32[8,16], index: 5, kind: input, shape index: {}]   ;;  %s4988_s6 = inlined_call_operand.vmem [shape: f32[1,16], index: 6, kind: input, shape index: {}]   ;;  %s4989_s7 = inlined_call_operand.vmem [shape: f32[2,16,16,16], index: 7, kind: output, shape index: {0}]   ;;  %s4990_s8 = inlined_call_operand.vmem [shape: f32[2,1,16], index: 8, kind: output, shape index: {1}]   ;;  %s4991_s9 = inlined_call_operand.vmem [shape: f32[2,1,16], index: 9, kind: output, shape index: {2}]   ;;  %s4992_s10 = inlined_call_operand.vmem [shape: f32[2,1,16], index: 10, kind: output, shape index: {3}]   ;;  %s4993_s11 = inlined_call_operand.vmem [shape: f32[2,1,16], index: 11, kind: output, shape index: {4}]  }
   0x1 LB: > { %s2987_s18 = sadd.s32 4294967295, %s3249_s17   ;;  %p2991_p0 = scmp.ge.s32.totalorder %s3249_s17, 1  ;;  %s3249_s17 = sphi %s3312_s17, %s22_s17  }
   0x2   : > { %p346_p1 = scmp.lt.s32.totalorder %s3249_s17, 3 }
   0x4   : > { %p347_p2 = pnand %p2991_p0, %p346_p1 }
   0x6   : > { %350 = sbr.rel (%p347_p2) target bundleno = 439 (0x1b7), region = 48 }
   0xb   : > { %v2125_v0 = vld [vmem:[%s4987_s5] sm:$0xff]  ;;  %p398_p3 = scmp.lt.s32.totalorder %s2987_s18, 1  ;;  %vm452_vm0 = vcmask 64512   ;;  %v495_v2 = vlaneseq  ;;  %v3251_v3 = vmov 0.0   ;;  %v3360_v12 = vld [vmem:[%s4983_s1 + $0x8] sm:$0x7] }
   0xc   : > { %v1796_v1 = vld [vmem:[%s4985_s3] sm:$0xff]  ;;  %3183 = vmatprep.subr.mxu1 %v2125_v0  ;;  %453 = vst.msk [vmem:[#allocation2] sm:$0xff] %vm452_vm0, %v3251_v3  ;;  %454 = vst.msk [vmem:[#allocation2 + $0x8] sm:$0xff] %vm452_vm0, %v3251_v3  ;;  %vm2454_vm5 = vcmask 130048   ;;  %vm2556_vm6 = vcmask 122880  }
   0xd   : > { %3133 = vmatprep.subr.mxu0 %v1796_v1  ;;  %456 = vst.msk [vmem:[#allocation2 + $0x110] sm:$0xff] %vm452_vm0, %v3251_v3  ;;  %457 = vst.msk [vmem:[#allocation2 + $0x118] sm:$0xff] %vm452_vm0, %v3251_v3  ;;  %3184 = vmatpush3.msra.mxu1 %v2125_v0  ;;  %s4998_s18 = smov (!%p398_p3, %s2987_s18), 1  ;;  %v3332_v4 = vshrl.u32 %v495_v2, 7  ;;  %v491_v6 = vld [vmem:[%s4983_s1] sm:$0x7] }
   0xe   : > { %3134 = vmatpush3.msra.mxu0 %v1796_v1  ;;  %s3065_s23 = sshll.u32 %s4998_s18, 8  ;;  %v3349_v7 = vld [vmem:[%s4983_s1 + $0x4] sm:$0x7]  ;;  %v3411_v29 = vld [vmem:[%s4984_s2] ss:$0 sm:$0xff]  ;;  %s416_s29 = scalar_lea.vmem %s4992_s10, %s4998_s18 }
   0xf   : > { %v640_v5 = vsub.s32 0, %v3332_v4  ;;  %s3341_s26 = scalar_lea.vmem %s4982_s0, %s3065_s23  ;;  %v3352_v8 = vsub.s32 1, %v3332_v4  ;;  %v3363_v13 = vadd.s32 8, %v3332_v4  ;;  %v3366_v14 = vsub.s32 2, %v3332_v4  ;;  %s4739_s27 = scalar_lea.vmem %s4989_s7, %s3065_s23 }
  0x10   : > { %v420_v9 = vld [vmem:[%s3341_s26] sm:$0xff]  ;;  %v421_v10 = vld [vmem:[%s3341_s26 + $0x8] sm:$0xff]  ;;  %v422_v11 = vld [vmem:[%s3341_s26 + $0x10] sm:$0xff]  ;;  %vm498_vm1 = vcmp.ge.s32.totalorder %v3332_v4, 1  ;;  %vm573_vm2 = vcmp.lt.s32.totalorder %v3332_v4, 1  ;;  %vm806_vm3 = vcmp.lt.s32.totalorder %v3332_v4, 7  ;;  %s419_s13 = scalar_lea.vmem %s4993_s11, %s4998_s18  ;;  %s410_s16 = scalar_lea.vmem %s4990_s8, %s4998_s18 }
  0x11   : > { %459 = vst.msk [vmem:[#allocation2 + $0x10] sm:$0xff] %vm452_vm0, %v420_v9  ;;  %3185 = vmatprep.mubr.msk.f32.mxu1 %vm452_vm0, %v420_v9  ;;  %460 = vst.msk [vmem:[#allocation2 + $0x18] sm:$0xff] %vm452_vm0, %v421_v10  ;;  %v423_v15 = vld [vmem:[%s3341_s26 + $0x18] sm:$0xff]  ;;  %v424_v16 = vld [vmem:[%s3341_s26 + $0x20] sm:$0xff]  ;;  %v3383_v20 = vrot.slane %v491_v6, %v640_v5  ;;  %v3395_v24 = vrot.slane %v491_v6, %v3352_v8  ;;  %vm501_vm4 = vcmp.lt.s32.totalorder %v3363_v13, 15  ;;  %s413_s21 = scalar_lea.vmem %s4991_s9, %s4998_s18 }
  0x12   : > { %461 = vst.msk [vmem:[#allocation2 + $0x20] sm:$0xff] %vm452_vm0, %v422_v11  ;;  %v3375_v17 = vld [vmem:[%s3341_s26 + $0x28] sm:$0xff]  ;;  %3186 = vmatmul.mubr.msk.f32.vlgmr.msra.gmra.mxu1 %vm452_vm0, %v421_v10  ;;  %462 = vst.msk [vmem:[#allocation2 + $0x28] sm:$0xff] %vm452_vm0, %v423_v15  ;;  %v3390_v21 = vld [vmem:[%s3341_s26 + $0x30] sm:$0xff]  ;;  %v3416_v31 = vrot.slane %v491_v6, %v3366_v14  ;;  %v3419_v32 = vrot.slane %v3349_v7, %v640_v5  ;;  %v3440_v37 = vrot.slane %v3349_v7, %v3352_v8 }
  0x13   : > { %v509_v18 = vld [vmem:[#allocation2] sm:$0xff]  ;;  %v3380_v19 = vld [vmem:[#allocation2 + $0x8] sm:$0xff]  ;;  %463 = vst.msk [vmem:[#allocation2 + $0x30] sm:$0xff] %vm452_vm0, %v424_v16  ;;  %464 = vst.msk [vmem:[#allocation2 + $0x38] sm:$0xff] %vm452_vm0, %v3375_v17  ;;  %3188 = vmatprep.mubr.msk.f32.mxu1 %vm452_vm0, %v422_v11  ;;  %v3443_v38 = vrot.slane %v3360_v12, %v640_v5  ;;  %v3489_v52 = vrot.slane %v3349_v7, %v3366_v14  ;;  %v3493_v53 = vrot.slane %v3360_v12, %v3352_v8 }
  0x14   : > { %v541_v22 = vrot.slane %v509_v18, 7  ;;  %v557_v23 = vrot.slane %v3380_v19, 7  ;;  %v774_v25 = vrot.slane %v509_v18, 1  ;;  %465 = vst.msk [vmem:[#allocation2 + $0x40] sm:$0xff] %vm452_vm0, %v3390_v21  ;;  %v3400_v26 = vld [vmem:[%s3341_s26 + $0x38] sm:$0xff]  ;;  %v3403_v27 = vld [vmem:[%s3341_s26 + $0x40] sm:$0xff]  ;;  %v710_v51 = vmul.f32 %v3395_v24, %v509_v18 }
  0x15   : > { %v3406_v28 = vld [vmem:[%s3341_s26 + $0x48] sm:$0xff]  ;;  %v790_v30 = vrot.slane %v3380_v19, 1  ;;  %466 = vst.msk [vmem:[#allocation2 + $0x48] sm:$0xff] %vm452_vm0, %v3400_v26  ;;  %467 = vst.msk [vmem:[#allocation2 + $0x50] sm:$0xff] %vm452_vm0, %v3403_v27  ;;  %v3428_v33 = vld [vmem:[%s3341_s26 + $0x50] sm:$0xff]  ;;  %v3520_v61 = vrot.slane %v3360_v12, %v3366_v14  ;;  %v711_v62 = vmul.f32 %v3395_v24, %v3380_v19 }
  0x16   : > { %468 = vst.msk [vmem:[#allocation2 + $0x58] sm:$0xff] %vm452_vm0, %v3406_v28  ;;  %v3431_v34 = vld [vmem:[%s3341_s26 + $0x58] sm:$0xff]  ;;  %v3434_v35 = vld [vmem:[%s3341_s26 + $0x60] sm:$0xff]  ;;  %v590_v36 = vsel %vm573_vm2, %v557_v23, %v541_v22  ;;  %v574_v39 = vsel %vm573_vm2, %v541_v22, %v557_v23  ;;  %469 = vst.msk [vmem:[#allocation2 + $0x60] sm:$0xff] %vm452_vm0, %v3428_v33  ;;  %3189 = vmatmul.mubr.msk.f32.gmra.mxu1 %vm452_vm0, %v423_v15 }
  0x17   : > { %470 = vst.msk [vmem:[#allocation2 + $0x68] sm:$0xff] %vm452_vm0, %v3431_v34  ;;  %471 = vst.msk [vmem:[#allocation2 + $0x70] sm:$0xff] %vm452_vm0, %v3434_v35  ;;  %v3454_v40 = vld [vmem:[%s3341_s26 + $0x68] sm:$0xff]  ;;  %v3457_v41 = vld [vmem:[%s3341_s26 + $0x70] sm:$0xff]  ;;  %v606_v43 = vsel %vm498_vm1, %v590_v36, 0.0  ;;  %v807_v44 = vsel %vm806_vm3, %v774_v25, %v790_v30  ;;  %v643_v45 = vmul.f32 %v3383_v20, %v574_v39  ;;  %v823_v46 = vsel %vm806_vm3, %v790_v30, %v774_v25 }
  0x18   : > { %v3460_v42 = vld [vmem:[%s3341_s26 + $0x78] sm:$0xff]  ;;  %472 = vst.msk [vmem:[#allocation2 + $0x78] sm:$0xff] %vm452_vm0, %v3454_v40  ;;  %473 = vst.msk [vmem:[#allocation2 + $0x80] sm:$0xff] %vm452_vm0, %v3457_v41  ;;  %v3477_v47 = vld [vmem:[%s3341_s26 + $0x80] sm:$0xff]  ;;  %v642_v50 = vmul.f32 %v3383_v20, %v606_v43  ;;  %3191 = vmatprep.mubr.msk.f32.mxu1 %vm452_vm0, %v424_v16  ;;  %v875_v57 = vmul.f32 %v3416_v31, %v807_v44  ;;  %v840_v63 = vsel %vm501_vm4, %v823_v46, 0.0 }
  0x19   : > { %474 = vst.msk [vmem:[#allocation2 + $0x88] sm:$0xff] %vm452_vm0, %v3460_v42  ;;  %v3480_v48 = vld [vmem:[%s3341_s26 + $0x88] sm:$0xff]  ;;  %v3483_v49 = vld [vmem:[%s3341_s26 + $0x90] sm:$0xff]  ;;  %475 = vst.msk [vmem:[#allocation2 + $0x90] sm:$0xff] %vm452_vm0, %v3477_v47  ;;  %v675_v5 = vadd.f32 %v3411_v29, %v643_v45  ;;  %v876_v15 = vmul.f32 %v3416_v31, %v840_v63 }
  0x1a   : > { %476 = vst.msk [vmem:[#allocation2 + $0x98] sm:$0xff] %vm452_vm0, %v3480_v48  ;;  %477 = vst.msk [vmem:[#allocation2 + $0xa0] sm:$0xff] %vm452_vm0, %v3483_v49  ;;  %v3503_v54 = vld [vmem:[%s3341_s26 + $0x98] sm:$0xff]  ;;  %v3506_v55 = vld [vmem:[%s3341_s26 + $0xa0] sm:$0xff]  ;;  %v674_v0 = vadd.f32 %v3411_v29, %v642_v50  ;;  %3192 = vmatmul.mubr.msk.f32.gmra.mxu1 %vm452_vm0, %v3375_v17 }
  0x1b   : > { %v3509_v56 = vld [vmem:[%s3341_s26 + $0xa8] sm:$0xff]  ;;  %v3512_v58 = vld [vmem:[#allocation2 + $0x10] sm:$0xff]  ;;  %v3514_v59 = vld [vmem:[#allocation2 + $0x18] sm:$0xff]  ;;  %478 = vst.msk [vmem:[#allocation2 + $0xa8] sm:$0xff] %vm452_vm0, %v3503_v54  ;;  %3194 = vmatprep.mubr.msk.f32.mxu1 %vm452_vm0, %v3390_v21  ;;  %v743_v39 = vadd.f32 %v711_v62, %v675_v5 }
  0x1c   : > { %v3516_v60 = vld [vmem:[#allocation2 + $0x20] sm:$0xff]  ;;  %479 = vst.msk [vmem:[#allocation2 + $0xb0] sm:$0xff] %vm452_vm0, %v3506_v55  ;;  %480 = vst.msk [vmem:[#allocation2 + $0xb8] sm:$0xff] %vm452_vm0, %v3509_v56  ;;  %v971_v1 = vrot.slane %v3512_v58, 7  ;;  %v987_v2 = vrot.slane %v3514_v59, 7  ;;  %v3535_v3 = vld [vmem:[#allocation2 + $0x28] sm:$0xff]  ;;  %v742_v11 = vadd.f32 %v710_v51, %v674_v0  ;;  %v1139_v21 = vmul.f32 %v3440_v37, %v3512_v58 }
  0x1d   : > { %v1203_v6 = vrot.slane %v3512_v58, 1  ;;  %v1219_v7 = vrot.slane %v3514_v59, 1  ;;  %v1400_v8 = vrot.slane %v3516_v60, 7  ;;  %v1416_v9 = vrot.slane %v3535_v3, 7  ;;  %v3545_v10 = vld [vmem:[%s3341_s26 + $0xb0] sm:$0xff]  ;;  %v3586_v51 = vld [vmem:[%s3341_s26 + $0xb8] sm:$0xff] }
  0x1e   : > { %v1019_v12 = vsel %vm573_vm2, %v987_v2, %v971_v1  ;;  %v1632_v14 = vrot.slane %v3516_v60, 1  ;;  %481 = vst.msk [vmem:[#allocation2 + $0xc0] sm:$0xff] %vm452_vm0, %v3545_v10  ;;  %v1648_v19 = vrot.slane %v3535_v3, 1  ;;  %v907_v22 = vadd.f32 %v875_v57, %v742_v11  ;;  %3195 = vmatmul.mubr.msk.f32.gmra.mxu1 %vm452_vm0, %v3400_v26  ;;  %482 = vst.msk [vmem:[#allocation2 + $0xc8] sm:$0xff] %vm452_vm0, %v3586_v51  ;;  %v3597_v0 = vld [vmem:[%s3341_s26 + $0xc0] sm:$0xff] }
  0x1f   : > { %v1035_v16 = vsel %vm498_vm1, %v1019_v12, 0.0  ;;  %v1235_v17 = vsel %vm806_vm3, %v1203_v6, %v1219_v7  ;;  %v1448_v18 = vsel %vm573_vm2, %v1416_v9, %v1400_v8  ;;  %v1568_v25 = vmul.f32 %v3493_v53, %v3516_v60  ;;  %3197 = vmatprep.mubr.msk.f32.mxu1 %vm452_vm0, %v3403_v27  ;;  %v3600_v27 = vld [vmem:[%s3341_s26 + $0xc8] sm:$0xff]  ;;  %483 = vst.msk [vmem:[#allocation2 + $0xd0] sm:$0xff] %vm452_vm0, %v3597_v0  ;;  %v3621_v12 = vld [vmem:[%s3341_s26 + $0xe0] sm:$0xff] }
  0x20   : > { %v1071_v23 = vmul.f32 %v3419_v32, %v1035_v16  ;;  %v1303_v30 = vmul.f32 %v3489_v52, %v1235_v17  ;;  %v3570_v36 = vsel %vm498_vm1, %v1448_v18, 0.0  ;;  %v1003_v43 = vsel %vm573_vm2, %v971_v1, %v987_v2  ;;  %484 = vst.msk [vmem:[#allocation2 + $0xd8] sm:$0xff] %vm452_vm0, %v3600_v27  ;;  %v3627_v18 = vld [vmem:[#allocation2 + $0x30] sm:$0xff]  ;;  %487 = vst.msk [vmem:[#allocation2 + $0xf0] sm:$0xff] %vm452_vm0, %v3621_v12 }
  0x21   : > { %v1500_v45 = vmul.f32 %v3443_v38, %v3570_v36  ;;  %v3580_v46 = vsel %vm806_vm3, %v1632_v14, %v1648_v19  ;;  %v1072_v50 = vmul.f32 %v3419_v32, %v1003_v43  ;;  %v908_v57 = vadd.f32 %v876_v15, %v743_v39 }
  0x22   : > { %v1103_v44 = vadd.f32 %v1071_v23, %v907_v22  ;;  %v1732_v26 = vmul.f32 %v3520_v61, %v3580_v46  ;;  %v1140_v62 = vmul.f32 %v3440_v37, %v3514_v59  ;;  %v1251_v63 = vsel %vm806_vm3, %v1219_v7, %v1203_v6  ;;  %v3615_v6 = vld [vmem:[%s3341_s26 + $0xd0] sm:$0xff]  ;;  %v3618_v7 = vld [vmem:[%s3341_s26 + $0xd8] sm:$0xff]  ;;  %3198 = vmatmul.mubr.msk.f32.gmra.mxu1 %vm452_vm0, %v3406_v28  ;;  %v3640_v22 = vld [vmem:[%s3341_s26 + $0xe8] sm:$0xff] }
  0x23   : > { %v1268_v2 = vsel %vm501_vm4, %v1251_v63, 0.0  ;;  %v3606_v5 = vsel %vm573_vm2, %v1400_v8, %v1416_v9  ;;  %v1680_v11 = vsel %vm806_vm3, %v1648_v19, %v1632_v14  ;;  %v1104_v15 = vadd.f32 %v1072_v50, %v908_v57  ;;  %v3629_v19 = vld [vmem:[#allocation2 + $0x38] sm:$0xff]  ;;  %485 = vst.msk [vmem:[#allocation2 + $0xe0] sm:$0xff] %vm452_vm0, %v3615_v6  ;;  %486 = vst.msk [vmem:[#allocation2 + $0xe8] sm:$0xff] %vm452_vm0, %v3618_v7 }
  0x24   : > { %v1171_v1 = vadd.f32 %v1139_v21, %v1103_v44  ;;  %v1304_v8 = vmul.f32 %v3489_v52, %v1268_v2  ;;  %v1569_v9 = vmul.f32 %v3493_v53, %v3535_v3  ;;  %v644_v14 = vmul.f32 %v1035_v16, %v3383_v20  ;;  %4995 = vst [vmem:[#allocation3_spill] sm:$0xff] %v3640_v22 }
  0x25   : > { %v1501_v16 = vmul.f32 %v3443_v38, %v3606_v5  ;;  %v3646_v21 = vsel %vm501_vm4, %v1680_v11, 0.0  ;;  %v712_v28 = vmul.f32 %v3512_v58, %v3395_v24  ;;  %3200 = vmatprep.mubr.msk.f32.mxu1 %vm452_vm0, %v3428_v33  ;;  %488 = vst.msk [vmem:[#allocation2 + $0xf8] sm:$0xff] %vm452_vm0, %v3640_v22  ;;  %v1172_v39 = vadd.f32 %v1140_v62, %v1104_v15 }
  0x26   : > { %v1335_v23 = vadd.f32 %v1303_v30, %v1171_v1  ;;  %v1733_v30 = vmul.f32 %v3520_v61, %v3646_v21  ;;  %v676_v44 = vadd.f32 %v3411_v29, %v644_v14  ;;  %v877_v50 = vmul.f32 %v1235_v17, %v3416_v31  ;;  %3201 = vmatmul.mubr.msk.f32.gmra.mxu1 %vm452_vm0, %v3431_v34 }
  0x27   : > { %v1073_v63 = vmul.f32 %v3570_v36, %v3419_v32  ;;  %v1401_v58 = vrot.slane %v3627_v18, 7  ;;  %v1417_v1 = vrot.slane %v3629_v19, 7  ;;  %v1336_v33 = vadd.f32 %v1304_v8, %v1172_v39  ;;  %3203 = vmatprep.mubr.msk.f32.mxu1 %vm452_vm0, %v3434_v35 }
  0x28   : > { %v1532_v57 = vadd.f32 %v1500_v45, %v1335_v23  ;;  %v744_v11 = vadd.f32 %v712_v28, %v676_v44  ;;  %v1141_v62 = vmul.f32 %v3516_v60, %v3440_v37  ;;  %v1633_v15 = vrot.slane %v3627_v18, 1 }
  0x29   : > { %v1449_v17 = vsel %vm573_vm2, %v1417_v1, %v1401_v58  ;;  %v1649_v45 = vrot.slane %v3629_v19, 1  ;;  %v645_v23 = vmul.f32 %v1003_v43, %v3383_v20  ;;  %v1533_v8 = vadd.f32 %v1501_v16, %v1336_v33 }
  0x2a   : > { %v1600_v14 = vadd.f32 %v1568_v25, %v1532_v57  ;;  %v909_v28 = vadd.f32 %v877_v50, %v744_v11  ;;  %v1305_v39 = vmul.f32 %v3580_v46, %v3489_v52  ;;  %v713_v34 = vmul.f32 %v3514_v59, %v3395_v24  ;;  %3204 = vmatmul.mubr.msk.f32.gmra.mxu1 %vm452_vm0, %v3454_v40  ;;  %v3692_v59 = vld [vmem:[%s3341_s26 + $0xf0] sm:$0xff] }
  0x2b   : > { %v3679_v44 = vsel %vm498_vm1, %v1449_v17, 0.0  ;;  %v1570_v43 = vmul.f32 %v3493_v53, %v3627_v18  ;;  %v677_v57 = vadd.f32 %v3411_v29, %v645_v23  ;;  %v1601_v22 = vadd.f32 %v1569_v9, %v1533_v8  ;;  %489 = vst.msk [vmem:[#allocation2 + $0x100] sm:$0xff] %vm452_vm0, %v3692_v59  ;;  %3206 = vmatprep.mubr.msk.f32.mxu1 %vm452_vm0, %v3457_v41 }
  0x2c   : > { %v1764_v25 = vadd.f32 %v1732_v26, %v1600_v14  ;;  %v1105_v35 = vadd.f32 %v1073_v63, %v909_v28  ;;  %v3686_v16 = vsel %vm806_vm3, %v1633_v15, %v1649_v45  ;;  %v878_v50 = vmul.f32 %v1268_v2, %v3416_v31  ;;  %v3695_v26 = vld [vmem:[%s3341_s26 + $0xf8] sm:$0xff] }
  0x2d   : > { %v1502_v33 = vmul.f32 %v3443_v38, %v3679_v44  ;;  %v1734_v9 = vmul.f32 %v3520_v61, %v3686_v16  ;;  %v745_v63 = vadd.f32 %v713_v34, %v677_v57  ;;  %v1074_v11 = vmul.f32 %v3606_v5, %v3419_v32  ;;  %490 = vst.msk [vmem:[#allocation2 + $0x108] sm:$0xff] %vm452_vm0, %v3695_v26 }
  0x2e   : > { %3135 = vmatprep.mubr.msk.f32.mxu0 %vm452_vm0, %v1764_v25  ;;  %v1765_v40 = vadd.f32 %v1733_v30, %v1601_v22  ;;  %v1173_v2 = vadd.f32 %v1141_v62, %v1105_v35  ;;  %v1142_v14 = vmul.f32 %v3535_v3, %v3440_v37  ;;  %v1306_v17 = vmul.f32 %v3646_v21, %v3489_v52  ;;  %v3722_v30 = vld [vmem:[#allocation2 + $0x40] sm:$0xff]  ;;  %v3729_v25 = vld [vmem:[#allocation2 + $0x48] sm:$0xff] }
  0x2f   : > { %v910_v23 = vadd.f32 %v878_v50, %v745_v63  ;;  %v3716_v8 = vsel %vm573_vm2, %v1401_v58, %v1417_v1  ;;  %v1681_v28 = vsel %vm806_vm3, %v1649_v45, %v1633_v15  ;;  %v646_v22 = vmul.f32 %v3570_v36, %v3383_v20  ;;  %3207 = vmatmul.mubr.msk.f32.gmra.mxu1 %vm452_vm0, %v3460_v42 }
  0x30   : > { %3136 = vmatmul.mubr.msk.f32.vlgmr.msra.gmra.mxu0 %vm452_vm0, %v1765_v40  ;;  %v1337_v62 = vadd.f32 %v1305_v39, %v1173_v2  ;;  %v1571_v34 = vmul.f32 %v3493_v53, %v3629_v19  ;;  %v714_v41 = vmul.f32 %v3516_v60, %v3395_v24  ;;  %v1503_v36 = vmul.f32 %v3443_v38, %v3716_v8 }
  0x31   : > { %v1106_v58 = vadd.f32 %v1074_v11, %v910_v23  ;;  %v678_v1 = vadd.f32 %v3411_v29, %v646_v22  ;;  %v879_v15 = vmul.f32 %v3580_v46, %v3416_v31  ;;  %3209 = vmatprep.mubr.msk.f32.mxu1 %vm452_vm0, %v3477_v47  ;;  %v3742_v60 = vsel %vm501_vm4, %v1681_v28, 0.0 }
  0x32   : > { %v1534_v45 = vadd.f32 %v1502_v33, %v1337_v62  ;;  %v1075_v42 = vmul.f32 %v3679_v44, %v3419_v32  ;;  %v1402_v39 = vrot.slane %v3722_v30, 7  ;;  %v1143_v50 = vmul.f32 %v3627_v18, %v3440_v37 }
  0x33   : > { %v1174_v57 = vadd.f32 %v1142_v14, %v1106_v58  ;;  %v746_v35 = vadd.f32 %v714_v41, %v678_v1  ;;  %v1418_v46 = vrot.slane %v3729_v25, 7  ;;  %v1634_v47 = vrot.slane %v3722_v30, 1  ;;  %3210 = vmatmul.mubr.msk.f32.gmra.mxu1 %vm452_vm0, %v3480_v48 }
  0x34   : > { %v1602_v63 = vadd.f32 %v1570_v43, %v1534_v45  ;;  %v1650_v33 = vrot.slane %v3729_v25, 1  ;;  %v647_v11 = vmul.f32 %v3606_v5, %v3383_v20  ;;  %v715_v23 = vmul.f32 %v3535_v3, %v3395_v24  ;;  %3212 = vmatprep.mubr.msk.f32.mxu1 %vm452_vm0, %v3483_v49 }
  0x35   : > { %v1338_v40 = vadd.f32 %v1306_v17, %v1174_v57  ;;  %v911_v2 = vadd.f32 %v879_v15, %v746_v35  ;;  %v1450_v14 = vsel %vm573_vm2, %v1418_v46, %v1402_v39  ;;  %v1735_v28 = vmul.f32 %v3520_v61, %v3742_v60 }
  0x36   : > { %v1766_v43 = vadd.f32 %v1734_v9, %v1602_v63  ;;  %v679_v5 = vadd.f32 %v3411_v29, %v647_v11  ;;  %v1307_v48 = vmul.f32 %v3686_v16, %v3489_v52  ;;  %v1572_v17 = vmul.f32 %v3493_v53, %v3722_v30  ;;  %v3800_v63 = vld [vmem:[#allocation2 + $0x50] sm:$0xff]  ;;  %v3802_v11 = vld [vmem:[#allocation2 + $0x58] sm:$0xff] }
  0x37   : > { %v1535_v22 = vadd.f32 %v1503_v36, %v1338_v40  ;;  %v1107_v62 = vadd.f32 %v1075_v42, %v911_v2  ;;  %v3772_v3 = vsel %vm498_vm1, %v1450_v14, 0.0  ;;  %v880_v9 = vmul.f32 %v3646_v21, %v3416_v31  ;;  %3213 = vmatmul.mubr.msk.f32.gmra.mxu1 %vm452_vm0, %v3503_v54 }
  0x38   : > { %3138 = vmatprep.mubr.msk.f32.mxu0 %vm452_vm0, %v1766_v43  ;;  %v747_v49 = vadd.f32 %v715_v23, %v679_v5  ;;  %v1076_v41 = vmul.f32 %v3716_v8, %v3419_v32  ;;  %v1504_v1 = vmul.f32 %v3443_v38, %v3772_v3  ;;  %v3782_v15 = vsel %vm806_vm3, %v1634_v47, %v1650_v33 }
  0x39   : > { %v1603_v58 = vadd.f32 %v1571_v34, %v1535_v22  ;;  %v1175_v36 = vadd.f32 %v1143_v50, %v1107_v62  ;;  %v1736_v45 = vmul.f32 %v3520_v61, %v3782_v15  ;;  %v1144_v21 = vmul.f32 %v3629_v19, %v3440_v37  ;;  %3215 = vmatprep.mubr.msk.f32.mxu1 %vm452_vm0, %v3506_v55 }
  0x3a   : > { %v912_v42 = vadd.f32 %v880_v9, %v747_v49  ;;  %v3792_v34 = vsel %vm573_vm2, %v1402_v39, %v1418_v46  ;;  %v1682_v50 = vsel %vm806_vm3, %v1650_v33, %v1634_v47  ;;  %v648_v54 = vmul.f32 %v3679_v44, %v3383_v20 }
  0x3b   : > { %v1767_v57 = vadd.f32 %v1735_v28, %v1603_v58  ;;  %v1339_v35 = vadd.f32 %v1307_v48, %v1175_v36  ;;  %v1308_v39 = vmul.f32 %v3742_v60, %v3489_v52  ;;  %v1505_v46 = vmul.f32 %v3443_v38, %v3792_v34  ;;  %3216 = vmatmul.mubr.msk.f32.gmra.mxu1 %vm452_vm0, %v3509_v56 }
  0x3c   : > { %v1108_v40 = vadd.f32 %v1076_v41, %v912_v42  ;;  %v716_v55 = vmul.f32 %v3627_v18, %v3395_v24  ;;  %v1573_v44 = vmul.f32 %v3493_v53, %v3729_v25  ;;  %v680_v33 = vadd.f32 %v3411_v29, %v648_v54  ;;  %3218 = vmatprep.mubr.msk.f32.mxu1 %vm452_vm0, %v3545_v10 }
  0x3d   : > { %3139 = vmatmul.mubr.msk.f32.gmra.mxu0 %vm452_vm0, %v1767_v57  ;;  %v1536_v47 = vadd.f32 %v1504_v1, %v1339_v35  ;;  %v881_v2 = vmul.f32 %v3686_v16, %v3416_v31  ;;  %v3818_v23 = vsel %vm501_vm4, %v1682_v50, 0.0  ;;  %v1403_v43 = vrot.slane %v3800_v63, 7 }
  0x3e   : > { %v1176_v14 = vadd.f32 %v1144_v21, %v1108_v40  ;;  %v1419_v18 = vrot.slane %v3802_v11, 7  ;;  %v748_v5 = vadd.f32 %v716_v55, %v680_v33  ;;  %v1077_v22 = vmul.f32 %v3772_v3, %v3419_v32  ;;  %v3872_v33 = vld [vmem:[#allocation2 + $0x60] sm:$0xff] }
  0x3f   : > { %v1604_v28 = vadd.f32 %v1572_v17, %v1536_v47  ;;  %v1635_v62 = vrot.slane %v3800_v63, 1  ;;  %v1651_v49 = vrot.slane %v3802_v11, 1  ;;  %v649_v9 = vmul.f32 %v3716_v8, %v3383_v20  ;;  %3219 = vmatmul.mubr.msk.f32.gmra.mxu1 %vm452_vm0, %v3586_v51 }
  0x40   : > { %v1340_v16 = vadd.f32 %v1308_v39, %v1176_v14  ;;  %v1451_v48 = vsel %vm573_vm2, %v1419_v18, %v1403_v43  ;;  %v913_v17 = vadd.f32 %v881_v2, %v748_v5  ;;  %v1145_v41 = vmul.f32 %v3722_v30, %v3440_v37  ;;  %3221 = vmatprep.mubr.msk.f32.mxu1 %vm452_vm0, %v3597_v0  ;;  %v3884_v5 = vld [vmem:[#allocation2 + $0x68] sm:$0xff] }
  0x41   : > { %v1768_v56 = vadd.f32 %v1736_v45, %v1604_v28  ;;  %v717_v58 = vmul.f32 %v3629_v19, %v3395_v24  ;;  %v1737_v10 = vmul.f32 %v3520_v61, %v3818_v23  ;;  %v1309_v1 = vmul.f32 %v3782_v15, %v3489_v52 }
  0x42   : > { %v1537_v36 = vadd.f32 %v1505_v46, %v1340_v16  ;;  %v681_v42 = vadd.f32 %v3411_v29, %v649_v9  ;;  %v1109_v8 = vadd.f32 %v1077_v22, %v913_v17  ;;  %v3848_v45 = vsel %vm498_vm1, %v1451_v48, 0.0 }
  0x43   : > { %3141 = vmatprep.mubr.msk.f32.mxu0 %vm452_vm0, %v1768_v56  ;;  %v1574_v19 = vmul.f32 %v3493_v53, %v3800_v63  ;;  %v882_v21 = vmul.f32 %v3742_v60, %v3416_v31  ;;  %v3856_v35 = vsel %vm806_vm3, %v1635_v62, %v1651_v49  ;;  %v1078_v51 = vmul.f32 %v3792_v34, %v3419_v32 }
  0x44   : > { %v1605_v57 = vadd.f32 %v1573_v44, %v1537_v36  ;;  %v749_v50 = vadd.f32 %v717_v58, %v681_v42  ;;  %v1177_v54 = vadd.f32 %v1145_v41, %v1109_v8  ;;  %v1506_v40 = vmul.f32 %v3443_v38, %v3848_v45  ;;  %3222 = vmatmul.mubr.msk.f32.gmra.mxu1 %vm452_vm0, %v3600_v27 }
  0x45   : > { %v1738_v39 = vmul.f32 %v3520_v61, %v3856_v35  ;;  %v1683_v60 = vsel %vm806_vm3, %v1651_v49, %v1635_v62  ;;  %v1146_v47 = vmul.f32 %v3729_v25, %v3440_v37  ;;  %v1310_v44 = vmul.f32 %v3818_v23, %v3489_v52  ;;  %3224 = vmatprep.mubr.msk.f32.mxu1 %vm452_vm0, %v3615_v6 }
  0x46   : > { %v1769_v46 = vadd.f32 %v1737_v10, %v1605_v57  ;;  %v914_v55 = vadd.f32 %v882_v21, %v749_v50  ;;  %v1341_v0 = vadd.f32 %v1309_v1, %v1177_v54  ;;  %v3878_v2 = vsel %vm573_vm2, %v1403_v43, %v1419_v18  ;;  %v4996_v50 = vld [vmem:[#allocation3_spill] sm:$0xff] }
  0x47   : > { %v650_v14 = vmul.f32 %v3772_v3, %v3383_v20  ;;  %v718_v28 = vmul.f32 %v3722_v30, %v3395_v24  ;;  %v1507_v27 = vmul.f32 %v3443_v38, %v3878_v2  ;;  %v1575_v43 = vmul.f32 %v3493_v53, %v3802_v11 }
  0x48   : > { %3142 = vmatmul.mubr.msk.f32.gmra.mxu0 %vm452_vm0, %v1769_v46  ;;  %v1110_v22 = vadd.f32 %v1078_v51, %v914_v55  ;;  %v3895_v3 = vsel %vm501_vm4, %v1683_v60, 0.0  ;;  %v1538_v18 = vadd.f32 %v1506_v40, %v1341_v0  ;;  %v883_v62 = vmul.f32 %v3782_v15, %v3416_v31  ;;  %3225 = vmatmul.mubr.msk.f32.gmra.mxu1 %vm452_vm0, %v3618_v7 }
  0x49   : > { %v682_v30 = vadd.f32 %v3411_v29, %v650_v14  ;;  %v1404_v6 = vrot.slane %v3872_v33, 7  ;;  %v1079_v48 = vmul.f32 %v3848_v45, %v3419_v32  ;;  %v1420_v49 = vrot.slane %v3884_v5, 7  ;;  %3227 = vmatprep.mubr.msk.f32.mxu1 %vm452_vm0, %v3621_v12 }
  0x4a   : > { %v1178_v16 = vadd.f32 %v1146_v47, %v1110_v22  ;;  %v1636_v9 = vrot.slane %v3872_v33, 1  ;;  %v1606_v56 = vadd.f32 %v1574_v19, %v1538_v18  ;;  %v1652_v41 = vrot.slane %v3884_v5, 1 }
  0x4b   : > { %v750_v17 = vadd.f32 %v718_v28, %v682_v30  ;;  %v651_v15 = vmul.f32 %v3792_v34, %v3383_v20  ;;  %v1739_v36 = vmul.f32 %v3520_v61, %v3895_v3  ;;  %v1452_v10 = vsel %vm573_vm2, %v1420_v49, %v1404_v6 }
  0x4c   : > { %v1342_v58 = vadd.f32 %v1310_v44, %v1178_v16  ;;  %v719_v7 = vmul.f32 %v3729_v25, %v3395_v24  ;;  %v1770_v1 = vadd.f32 %v1738_v39, %v1606_v56  ;;  %v1147_v8 = vmul.f32 %v3800_v63, %v3440_v37  ;;  %3228 = vmatmul.mubr.msk.f32.gmra.mxu1 %vm452_vm0, %v4996_v50 }
  0x4d   : > { %v915_v42 = vadd.f32 %v883_v62, %v750_v17  ;;  %v1311_v34 = vmul.f32 %v3856_v35, %v3489_v52  ;;  %v3924_v12 = vsel %vm498_vm1, %v1452_v10, 0.0  ;;  %v683_v21 = vadd.f32 %v3411_v29, %v651_v15  ;;  %3230 = vmatprep.mubr.msk.f32.mxu1 %vm452_vm0, %v3692_v59  ;;  %v3958_v59 = vld [vmem:[#allocation2 + $0x78] sm:$0xff] }
  0x4e   : > { %v1539_v19 = vadd.f32 %v1507_v27, %v1342_v58  ;;  %v884_v57 = vmul.f32 %v3818_v23, %v3416_v31  ;;  %3144 = vmatprep.mubr.msk.f32.mxu0 %vm452_vm0, %v1770_v1  ;;  %v1508_v51 = vmul.f32 %v3443_v38, %v3924_v12  ;;  %v1576_v54 = vmul.f32 %v3493_v53, %v3872_v33 }
  0x4f   : > { %v1111_v25 = vadd.f32 %v1079_v48, %v915_v42  ;;  %v3938_v40 = vsel %vm806_vm3, %v1636_v9, %v1652_v41  ;;  %v751_v60 = vadd.f32 %v719_v7, %v683_v21  ;;  %v1080_v46 = vmul.f32 %v3878_v2, %v3419_v32 }
  0x50   : > { %v1607_v39 = vadd.f32 %v1575_v43, %v1539_v19  ;;  %v1740_v23 = vmul.f32 %v3520_v61, %v3938_v40  ;;  %v1148_v47 = vmul.f32 %v3802_v11, %v3440_v37  ;;  %v1684_v44 = vsel %vm806_vm3, %v1652_v41, %v1636_v9  ;;  %v3956_v43 = vld [vmem:[#allocation2 + $0x70] sm:$0xff]  ;;  %3231 = vmatmul.mubr.msk.f32.gmra.mxu1 %vm452_vm0, %v3695_v26 }
  0x51   : > { %v1179_v55 = vadd.f32 %v1147_v8, %v1111_v25  ;;  %v652_v0 = vmul.f32 %v3848_v45, %v3383_v20  ;;  %v916_v28 = vadd.f32 %v884_v57, %v751_v60  ;;  %v1312_v22 = vmul.f32 %v3895_v3, %v3489_v52 }
  0x52   : > { %v1771_v14 = vadd.f32 %v1739_v36, %v1607_v39  ;;  %v720_v27 = vmul.f32 %v3800_v63, %v3395_v24  ;;  %v3964_v30 = vsel %vm573_vm2, %v1404_v6, %v1420_v49  ;;  %v885_v62 = vmul.f32 %v3856_v35, %v3416_v31 }
  0x53   : > { %v1343_v18 = vadd.f32 %v1311_v34, %v1179_v55  ;;  %v684_v45 = vadd.f32 %v3411_v29, %v652_v0  ;;  %v1112_v63 = vadd.f32 %v1080_v46, %v916_v28  ;;  %v1509_v16 = vmul.f32 %v3443_v38, %v3964_v30 }
  0x54   : > { %3145 = vmatmul.mubr.msk.f32.gmra.mxu0 %vm452_vm0, %v1771_v14  ;;  %v3974_v48 = vsel %vm501_vm4, %v1684_v44, 0.0  ;;  %v1081_v26 = vmul.f32 %v3924_v12, %v3419_v32  ;;  %v1405_v9 = vrot.slane %v3956_v43, 7  ;;  %v1421_v56 = vrot.slane %v3958_v59, 7 }
  0x55   : > { %v1540_v6 = vadd.f32 %v1508_v51, %v1343_v18  ;;  %v752_v49 = vadd.f32 %v720_v27, %v684_v45  ;;  %v1180_v35 = vadd.f32 %v1148_v47, %v1112_v63  ;;  %v1149_v17 = vmul.f32 %v3872_v33, %v3440_v37  ;;  %v4032_v63 = vld [vmem:[#allocation2 + $0x88] sm:$0xff] }
  0x56   : > { %v1637_v41 = vrot.slane %v3956_v43, 1  ;;  %v1653_v15 = vrot.slane %v3958_v59, 1  ;;  %v1453_v10 = vsel %vm573_vm2, %v1421_v56, %v1405_v9  ;;  %v653_v7 = vmul.f32 %v3878_v2, %v3383_v20 }
  0x57   : > { %v1608_v58 = vadd.f32 %v1576_v54, %v1540_v6  ;;  %v917_v36 = vadd.f32 %v885_v62, %v752_v49  ;;  %v1344_v1 = vadd.f32 %v1312_v22, %v1180_v35  ;;  %v1577_v42 = vmul.f32 %v3493_v53, %v3884_v5  ;;  %v4024_v22 = vld [vmem:[#allocation2 + $0x80] sm:$0xff] }
  0x58   : > { %v1741_v8 = vmul.f32 %v3520_v61, %v3974_v48  ;;  %v721_v34 = vmul.f32 %v3802_v11, %v3395_v24  ;;  %v1313_v57 = vmul.f32 %v3938_v40, %v3489_v52  ;;  %v3998_v50 = vsel %vm498_vm1, %v1453_v10, 0.0 }
  0x59   : > { %v1772_v19 = vadd.f32 %v1740_v23, %v1608_v58  ;;  %v1113_v21 = vadd.f32 %v1081_v26, %v917_v36  ;;  %v1541_v2 = vadd.f32 %v1509_v16, %v1344_v1  ;;  %v4002_v25 = vsel %vm806_vm3, %v1637_v41, %v1653_v15 }
  0x5a   : > { %v685_v51 = vadd.f32 %v3411_v29, %v653_v7  ;;  %v886_v54 = vmul.f32 %v3895_v3, %v3416_v31  ;;  %v1510_v39 = vmul.f32 %v3443_v38, %v3998_v50  ;;  %v1578_v23 = vmul.f32 %v3493_v53, %v3956_v43 }
  0x5b   : > { %3147 = vmatprep.mubr.msk.f32.mxu0 %vm452_vm0, %v1772_v19  ;;  %v1181_v11 = vadd.f32 %v1149_v17, %v1113_v21  ;;  %v1742_v60 = vmul.f32 %v3520_v61, %v4002_v25  ;;  %v1609_v46 = vadd.f32 %v1577_v42, %v1541_v2  ;;  %v1082_v47 = vmul.f32 %v3964_v30, %v3419_v32 }
  0x5c   : > { %v753_v55 = vadd.f32 %v721_v34, %v685_v51  ;;  %v1150_v3 = vmul.f32 %v3884_v5, %v3440_v37  ;;  %v1685_v0 = vsel %vm806_vm3, %v1653_v15, %v1637_v41  ;;  %v654_v14 = vmul.f32 %v3924_v12, %v3383_v20 }
  0x5d   : > { %v1345_v44 = vadd.f32 %v1313_v57, %v1181_v11  ;;  %v722_v28 = vmul.f32 %v3872_v33, %v3395_v24  ;;  %v1773_v27 = vadd.f32 %v1741_v8, %v1609_v46  ;;  %v1314_v45 = vmul.f32 %v3974_v48, %v3489_v52 }
  0x5e   : > { %v918_v18 = vadd.f32 %v886_v54, %v753_v55  ;;  %v4030_v62 = vsel %vm573_vm2, %v1405_v9, %v1421_v56  ;;  %v686_v26 = vadd.f32 %v3411_v29, %v654_v14  ;;  %v887_v33 = vmul.f32 %v3938_v40, %v3416_v31 }
  0x5f   : > { %v1542_v16 = vadd.f32 %v1510_v39, %v1345_v44  ;;  %v1511_v12 = vmul.f32 %v3443_v38, %v4030_v62  ;;  %3148 = vmatmul.mubr.msk.f32.gmra.mxu0 %vm452_vm0, %v1773_v27  ;;  %v4042_v49 = vsel %vm501_vm4, %v1685_v0, 0.0  ;;  %v1083_v9 = vmul.f32 %v3998_v50, %v3419_v32 }
  0x60   : > { %v1114_v6 = vadd.f32 %v1082_v47, %v918_v18  ;;  %v1406_v56 = vrot.slane %v4024_v22, 7  ;;  %v754_v17 = vadd.f32 %v722_v28, %v686_v26  ;;  %v1151_v41 = vmul.f32 %v3956_v43, %v3440_v37 }
  0x61   : > { %v1610_v35 = vadd.f32 %v1578_v23, %v1542_v16  ;;  %v1422_v15 = vrot.slane %v4032_v63, 7  ;;  %v1638_v58 = vrot.slane %v4024_v22, 1  ;;  %v1654_v36 = vrot.slane %v4032_v63, 1  ;;  %v4096_v16 = vld [vmem:[#allocation2 + $0x98] sm:$0xff] }
  0x62   : > { %v1182_v40 = vadd.f32 %v1150_v3, %v1114_v6  ;;  %v655_v10 = vmul.f32 %v3964_v30, %v3383_v20  ;;  %v919_v1 = vadd.f32 %v887_v33, %v754_v17  ;;  %v723_v8 = vmul.f32 %v3884_v5, %v3395_v24 }
  0x63   : > { %v1774_v7 = vadd.f32 %v1742_v60, %v1610_v35  ;;  %v1454_v42 = vsel %vm573_vm2, %v1422_v15, %v1406_v56  ;;  %v1579_v19 = vmul.f32 %v3493_v53, %v3958_v59  ;;  %v1743_v21 = vmul.f32 %v3520_v61, %v4042_v49 }
  0x64   : > { %v1346_v34 = vadd.f32 %v1314_v45, %v1182_v40  ;;  %v687_v57 = vadd.f32 %v3411_v29, %v655_v10  ;;  %v1115_v30 = vadd.f32 %v1083_v9, %v919_v1  ;;  %v1315_v2 = vmul.f32 %v4002_v25, %v3489_v52  ;;  %v4094_v45 = vld [vmem:[#allocation2 + $0x90] sm:$0xff] }
  0x65   : > { %3150 = vmatprep.mubr.msk.f32.mxu0 %vm452_vm0, %v1774_v7  ;;  %v4068_v51 = vsel %vm498_vm1, %v1454_v42, 0.0  ;;  %v888_v5 = vmul.f32 %v3974_v48, %v3416_v31  ;;  %v4074_v11 = vsel %vm806_vm3, %v1638_v58, %v1654_v36  ;;  %v1084_v23 = vmul.f32 %v4030_v62, %v3419_v32 }
  0x66   : > { %v1543_v54 = vadd.f32 %v1511_v12, %v1346_v34  ;;  %v755_v39 = vadd.f32 %v723_v8, %v687_v57  ;;  %v1183_v60 = vadd.f32 %v1151_v41, %v1115_v30  ;;  %v1512_v46 = vmul.f32 %v3443_v38, %v4068_v51 }
  0x67   : > { %v1580_v55 = vmul.f32 %v3493_v53, %v4024_v22  ;;  %v1744_v47 = vmul.f32 %v3520_v61, %v4074_v11  ;;  %v1152_v44 = vmul.f32 %v3958_v59, %v3440_v37  ;;  %v1316_v0 = vmul.f32 %v4042_v49, %v3489_v52 }
  0x68   : > { %v1611_v48 = vadd.f32 %v1579_v19, %v1543_v54  ;;  %v920_v3 = vadd.f32 %v888_v5, %v755_v39  ;;  %v1347_v14 = vadd.f32 %v1315_v2, %v1183_v60  ;;  %v1686_v28 = vsel %vm806_vm3, %v1654_v36, %v1638_v58 }
  0x69   : > { %v656_v27 = vmul.f32 %v3998_v50, %v3383_v20  ;;  %v724_v18 = vmul.f32 %v3956_v43, %v3395_v24  ;;  %v4100_v33 = vsel %vm573_vm2, %v1406_v56, %v1422_v15  ;;  %v1581_v6 = vmul.f32 %v3493_v53, %v4032_v63 }
  0x6a   : > { %v1775_v12 = vadd.f32 %v1743_v21, %v1611_v48  ;;  %v1116_v26 = vadd.f32 %v1084_v23, %v920_v3  ;;  %v1544_v9 = vadd.f32 %v1512_v46, %v1347_v14  ;;  %v1513_v50 = vmul.f32 %v3443_v38, %v4100_v33 }
  0x6b   : > { %v688_v35 = vadd.f32 %v3411_v29, %v656_v27  ;;  %v889_v43 = vmul.f32 %v4002_v25, %v3416_v31  ;;  %v4112_v41 = vsel %vm501_vm4, %v1686_v28, 0.0  ;;  %v1407_v56 = vrot.slane %v4094_v45, 7  ;;  %v4158_v27 = vld [vmem:[#allocation2 + $0xa0] sm:$0xff] }
  0x6c   : > { %3151 = vmatmul.mubr.msk.f32.gmra.mxu0 %vm452_vm0, %v1775_v12  ;;  %v1184_v17 = vadd.f32 %v1152_v44, %v1116_v26  ;;  %v1423_v15 = vrot.slane %v4096_v16, 7  ;;  %v1612_v40 = vadd.f32 %v1580_v55, %v1544_v9  ;;  %v1085_v36 = vmul.f32 %v4068_v51, %v3419_v32  ;;  %v4168_v9 = vld [vmem:[#allocation2 + $0xa8] sm:$0xff] }
  0x6d   : > { %v756_v58 = vadd.f32 %v724_v18, %v688_v35  ;;  %v1639_v10 = vrot.slane %v4094_v45, 1  ;;  %v1655_v1 = vrot.slane %v4096_v16, 1  ;;  %v657_v42 = vmul.f32 %v4030_v62, %v3383_v20 }
  0x6e   : > { %v1348_v7 = vadd.f32 %v1316_v0, %v1184_v17  ;;  %v1455_v25 = vsel %vm573_vm2, %v1423_v15, %v1407_v56  ;;  %v1776_v8 = vadd.f32 %v1744_v47, %v1612_v40  ;;  %v1153_v19 = vmul.f32 %v4024_v22, %v3440_v37 }
  0x6f   : > { %v921_v34 = vadd.f32 %v889_v43, %v756_v58  ;;  %v725_v21 = vmul.f32 %v3958_v59, %v3395_v24  ;;  %v1745_v30 = vmul.f32 %v3520_v61, %v4112_v41  ;;  %v1317_v2 = vmul.f32 %v4074_v11, %v3489_v52 }
  0x70   : > { %v1545_v57 = vadd.f32 %v1513_v50, %v1348_v7  ;;  %v689_v5 = vadd.f32 %v3411_v29, %v657_v42  ;;  %3153 = vmatprep.mubr.msk.f32.mxu0 %vm452_vm0, %v1776_v8  ;;  %v4136_v54 = vsel %vm498_vm1, %v1455_v25, 0.0  ;;  %v1582_v39 = vmul.f32 %v3493_v53, %v4094_v45 }
  0x71   : > { %v1117_v62 = vadd.f32 %v1085_v36, %v921_v34  ;;  %v890_v59 = vmul.f32 %v4042_v49, %v3416_v31  ;;  %v4144_v60 = vsel %vm806_vm3, %v1639_v10, %v1655_v1  ;;  %v1086_v55 = vmul.f32 %v4100_v33, %v3419_v32 }
  0x72   : > { %v1613_v23 = vadd.f32 %v1581_v6, %v1545_v57  ;;  %v757_v46 = vadd.f32 %v725_v21, %v689_v5  ;;  %v1514_v48 = vmul.f32 %v3443_v38, %v4136_v54  ;;  %v1746_v3 = vmul.f32 %v3520_v61, %v4144_v60  ;;  %v4207_v5 = vld [vmem:[%s4984_s2] ss:$0 sm:$0xff] }
  0x73   : > { %v1185_v47 = vadd.f32 %v1153_v19, %v1117_v62  ;;  %v1687_v44 = vsel %vm806_vm3, %v1655_v1, %v1639_v10  ;;  %v1154_v14 = vmul.f32 %v4032_v63, %v3440_v37  ;;  %v1318_v28 = vmul.f32 %v4112_v41, %v3489_v52 }
  0x74   : > { %v1777_v49 = vadd.f32 %v1745_v30, %v1613_v23  ;;  %v922_v0 = vadd.f32 %v890_v59, %v757_v46  ;;  %v4162_v12 = vsel %vm573_vm2, %v1407_v56, %v1423_v15  ;;  %v658_v26 = vmul.f32 %v4068_v51, %v3383_v20 }
  0x75   : > { %v1349_v18 = vadd.f32 %v1317_v2, %v1185_v47  ;;  %v726_v6 = vmul.f32 %v4024_v22, %v3395_v24  ;;  %v1515_v35 = vmul.f32 %v3443_v38, %v4162_v12  ;;  %v1583_v43 = vmul.f32 %v3493_v53, %v4096_v16 }
  0x76   : > { %3154 = vmatmul.mubr.msk.f32.gmra.mxu0 %vm452_vm0, %v1777_v49  ;;  %v1118_v50 = vadd.f32 %v1086_v55, %v922_v0  ;;  %v4177_v17 = vsel %vm501_vm4, %v1687_v44, 0.0  ;;  %v690_v51 = vadd.f32 %v3411_v29, %v658_v26  ;;  %v891_v22 = vmul.f32 %v4074_v11, %v3416_v31 }
  0x77   : > { %v1546_v56 = vadd.f32 %v1514_v48, %v1349_v18  ;;  %v1408_v15 = vrot.slane %v4158_v27, 7  ;;  %v1087_v58 = vmul.f32 %v4136_v54, %v3419_v32  ;;  %v1424_v36 = vrot.slane %v4168_v9, 7 }
  0x78   : > { %v1186_v40 = vadd.f32 %v1154_v14, %v1118_v50  ;;  %v1640_v10 = vrot.slane %v4158_v27, 1  ;;  %v758_v25 = vadd.f32 %v726_v6, %v690_v51  ;;  %v1656_v1 = vrot.slane %v4168_v9, 1  ;;  %v4235_v6 = vld [vmem:[#allocation2 + $0xb0] sm:$0xff]  ;;  %v4237_v50 = vld [vmem:[#allocation2 + $0xb8] sm:$0xff] }
  0x79   : > { %v1614_v7 = vadd.f32 %v1582_v39, %v1546_v56  ;;  %v659_v29 = vmul.f32 %v4100_v33, %v3383_v20  ;;  %v1747_v11 = vmul.f32 %v3520_v61, %v4177_v17  ;;  %v1456_v8 = vsel %vm573_vm2, %v1424_v36, %v1408_v15 }
  0x7a   : > { %v1350_v42 = vadd.f32 %v1318_v28, %v1186_v40  ;;  %v727_v34 = vmul.f32 %v4032_v63, %v3395_v24  ;;  %v923_v21 = vadd.f32 %v891_v22, %v758_v25  ;;  %v1155_v57 = vmul.f32 %v4094_v45, %v3440_v37 }
  0x7b   : > { %v1778_v19 = vadd.f32 %v1746_v3, %v1614_v7  ;;  %v1319_v30 = vmul.f32 %v4144_v60, %v3489_v52  ;;  %v4202_v33 = vsel %vm498_vm1, %v1456_v8, 0.0  ;;  %v691_v63 = vadd.f32 %v4207_v5, %v659_v29 }
  0x7c   : > { %v1547_v2 = vadd.f32 %v1515_v35, %v1350_v42  ;;  %v892_v62 = vmul.f32 %v4112_v41, %v3416_v31  ;;  %v1119_v39 = vadd.f32 %v1087_v58, %v923_v21  ;;  %v1516_v59 = vmul.f32 %v3443_v38, %v4202_v33 }
  0x7d   : > { %3156 = vmatprep.mubr.msk.f32.mxu0 %vm452_vm0, %v1778_v19  ;;  %v1584_v23 = vmul.f32 %v3493_v53, %v4158_v27  ;;  %v4219_v46 = vsel %vm806_vm3, %v1640_v10, %v1656_v1  ;;  %v759_v48 = vadd.f32 %v727_v34, %v691_v63  ;;  %v1088_v41 = vmul.f32 %v4162_v12, %v3419_v32 }
  0x7e   : > { %v1615_v55 = vadd.f32 %v1583_v43, %v1547_v2  ;;  %v1748_v47 = vmul.f32 %v3520_v61, %v4219_v46  ;;  %v1187_v3 = vadd.f32 %v1155_v57, %v1119_v39  ;;  %v1156_v44 = vmul.f32 %v4096_v16, %v3440_v37 }
  0x7f   : > { %v1688_v49 = vsel %vm806_vm3, %v1656_v1, %v1640_v10  ;;  %v660_v0 = vmul.f32 %v4136_v54, %v3383_v20  ;;  %v924_v28 = vadd.f32 %v892_v62, %v759_v48  ;;  %v1320_v18 = vmul.f32 %v4177_v17, %v3489_v52 }
  0x80   : > { %v1779_v14 = vadd.f32 %v1747_v11, %v1615_v55  ;;  %v728_v26 = vmul.f32 %v4094_v45, %v3395_v24  ;;  %v1351_v35 = vadd.f32 %v1319_v30, %v1187_v3  ;;  %v4241_v43 = vsel %vm573_vm2, %v1408_v15, %v1424_v36 }
  0x81   : > { %v692_v56 = vadd.f32 %v4207_v5, %v660_v0  ;;  %v893_v54 = vmul.f32 %v4144_v60, %v3416_v31  ;;  %v1120_v51 = vadd.f32 %v1088_v41, %v924_v28  ;;  %v1517_v45 = vmul.f32 %v3443_v38, %v4241_v43 }
  0x82   : > { %3157 = vmatmul.mubr.msk.f32.gmra.mxu0 %vm452_vm0, %v1779_v14  ;;  %v4251_v22 = vsel %vm501_vm4, %v1688_v49, 0.0  ;;  %v1089_v40 = vmul.f32 %v4202_v33, %v3419_v32  ;;  %v1548_v15 = vadd.f32 %v1516_v59, %v1351_v35  ;;  %v1409_v36 = vrot.slane %v4235_v6, 7 }
  0x83   : > { %v760_v58 = vadd.f32 %v728_v26, %v692_v56  ;;  %v1425_v10 = vrot.slane %v4237_v50, 7  ;;  %v1188_v60 = vadd.f32 %v1156_v44, %v1120_v51  ;;  %v1157_v7 = vmul.f32 %v4158_v27, %v3440_v37  ;;  %v4309_v51 = vld [vmem:[#allocation2 + $0xc8] sm:$0xff] }
  0x84   : > { %v1641_v25 = vrot.slane %v4235_v6, 1  ;;  %v1657_v1 = vrot.slane %v4237_v50, 1  ;;  %v1616_v29 = vadd.f32 %v1584_v23, %v1548_v15  ;;  %v661_v8 = vmul.f32 %v4162_v12, %v3383_v20 }
  0x85   : > { %v925_v42 = vadd.f32 %v893_v54, %v760_v58  ;;  %v1457_v11 = vsel %vm573_vm2, %v1425_v10, %v1409_v36  ;;  %v1352_v34 = vadd.f32 %v1320_v18, %v1188_v60  ;;  %v1585_v19 = vmul.f32 %v3493_v53, %v4168_v9  ;;  %v4301_v18 = vld [vmem:[#allocation2 + $0xc0] sm:$0xff] }
  0x86   : > { %v1749_v21 = vmul.f32 %v3520_v61, %v4251_v22  ;;  %v729_v57 = vmul.f32 %v4096_v16, %v3395_v24  ;;  %v1780_v30 = vadd.f32 %v1748_v47, %v1616_v29  ;;  %v1321_v63 = vmul.f32 %v4219_v46, %v3489_v52 }
  0x87   : > { %v1121_v2 = vadd.f32 %v1089_v40, %v925_v42  ;;  %v4275_v62 = vsel %vm498_vm1, %v1457_v11, 0.0  ;;  %v1549_v12 = vadd.f32 %v1517_v45, %v1352_v34  ;;  %v4279_v39 = vsel %vm806_vm3, %v1641_v25, %v1657_v1 }
  0x88   : > { %v693_v59 = vadd.f32 %v4207_v5, %v661_v8  ;;  %v894_v23 = vmul.f32 %v4177_v17, %v3416_v31  ;;  %3159 = vmatprep.mubr.msk.f32.mxu0 %vm452_vm0, %v1780_v30  ;;  %v1518_v55 = vmul.f32 %v3443_v38, %v4275_v62  ;;  %v1586_v47 = vmul.f32 %v3493_v53, %v4235_v6 }
  0x89   : > { %v1189_v16 = vadd.f32 %v1157_v7, %v1121_v2  ;;  %v1750_v48 = vmul.f32 %v3520_v61, %v4279_v39  ;;  %v1617_v41 = vadd.f32 %v1585_v19, %v1549_v12  ;;  %v1090_v44 = vmul.f32 %v4241_v43, %v3419_v32 }
  0x8a   : > { %v761_v3 = vadd.f32 %v729_v57, %v693_v59  ;;  %v1158_v17 = vmul.f32 %v4168_v9, %v3440_v37  ;;  %v1689_v0 = vsel %vm806_vm3, %v1657_v1, %v1641_v25  ;;  %v662_v14 = vmul.f32 %v4202_v33, %v3383_v20 }
  0x8b   : > { %v1353_v49 = vadd.f32 %v1321_v63, %v1189_v16  ;;  %v730_v28 = vmul.f32 %v4158_v27, %v3395_v24  ;;  %v1781_v26 = vadd.f32 %v1749_v21, %v1617_v41  ;;  %v1322_v56 = vmul.f32 %v4251_v22, %v3489_v52 }
  0x8c   : > { %v926_v35 = vadd.f32 %v894_v23, %v761_v3  ;;  %v4307_v54 = vsel %vm573_vm2, %v1409_v36, %v1425_v10  ;;  %v694_v40 = vadd.f32 %v4207_v5, %v662_v14  ;;  %v895_v27 = vmul.f32 %v4219_v46, %v3416_v31 }
  0x8d   : > { %v1550_v45 = vadd.f32 %v1518_v55, %v1353_v49  ;;  %v1519_v33 = vmul.f32 %v3443_v38, %v4307_v54  ;;  %3160 = vmatmul.mubr.msk.f32.gmra.mxu0 %vm452_vm0, %v1781_v26  ;;  %v4319_v58 = vsel %vm501_vm4, %v1689_v0, 0.0  ;;  %v1091_v36 = vmul.f32 %v4275_v62, %v3419_v32 }
  0x8e   : > { %v1122_v15 = vadd.f32 %v1090_v44, %v926_v35  ;;  %v1410_v10 = vrot.slane %v4301_v18, 7  ;;  %v762_v7 = vadd.f32 %v730_v28, %v694_v40  ;;  %v1159_v25 = vmul.f32 %v4235_v6, %v3440_v37 }
  0x8f   : > { %v1618_v60 = vadd.f32 %v1586_v47, %v1550_v45  ;;  %v1426_v1 = vrot.slane %v4309_v51, 7  ;;  %v1642_v29 = vrot.slane %v4301_v18, 1  ;;  %v1658_v42 = vrot.slane %v4309_v51, 1  ;;  %v4373_v45 = vld [vmem:[#allocation2 + $0xd8] sm:$0xff] }
  0x90   : > { %v1190_v46 = vadd.f32 %v1158_v17, %v1122_v15  ;;  %v663_v11 = vmul.f32 %v4241_v43, %v3383_v20  ;;  %v927_v34 = vadd.f32 %v895_v27, %v762_v7  ;;  %v731_v21 = vmul.f32 %v4168_v9, %v3395_v24 }
  0x91   : > { %v1782_v8 = vadd.f32 %v1750_v48, %v1618_v60  ;;  %v1458_v19 = vsel %vm573_vm2, %v1426_v1, %v1410_v10  ;;  %v1587_v30 = vmul.f32 %v3493_v53, %v4237_v50  ;;  %v1751_v2 = vmul.f32 %v3520_v61, %v4319_v58 }
  0x92   : > { %v1354_v57 = vadd.f32 %v1322_v56, %v1190_v46  ;;  %v695_v63 = vadd.f32 %v4207_v5, %v663_v11  ;;  %v1123_v43 = vadd.f32 %v1091_v36, %v927_v34  ;;  %v1323_v12 = vmul.f32 %v4279_v39, %v3489_v52  ;;  %v4371_v56 = vld [vmem:[#allocation2 + $0xd0] sm:$0xff] }
  0x93   : > { %3162 = vmatprep.mubr.msk.f32.mxu0 %vm452_vm0, %v1782_v8  ;;  %v4345_v59 = vsel %vm498_vm1, %v1458_v19, 0.0  ;;  %v896_v9 = vmul.f32 %v4251_v22, %v3416_v31  ;;  %v4351_v16 = vsel %vm806_vm3, %v1642_v29, %v1658_v42  ;;  %v1092_v47 = vmul.f32 %v4307_v54, %v3419_v32 }
  0x94   : > { %v1551_v23 = vadd.f32 %v1519_v33, %v1354_v57  ;;  %v763_v55 = vadd.f32 %v731_v21, %v695_v63  ;;  %v1191_v48 = vadd.f32 %v1159_v25, %v1123_v43  ;;  %v1520_v41 = vmul.f32 %v3443_v38, %v4345_v59 }
  0x95   : > { %v1588_v3 = vmul.f32 %v3493_v53, %v4301_v18  ;;  %v1752_v44 = vmul.f32 %v3520_v61, %v4351_v16  ;;  %v1160_v49 = vmul.f32 %v4237_v50, %v3440_v37  ;;  %v1324_v0 = vmul.f32 %v4319_v58, %v3489_v52 }
  0x96   : > { %v1619_v22 = vadd.f32 %v1587_v30, %v1551_v23  ;;  %v928_v17 = vadd.f32 %v896_v9, %v763_v55  ;;  %v1355_v14 = vadd.f32 %v1323_v12, %v1191_v48  ;;  %v1690_v28 = vsel %vm806_vm3, %v1658_v42, %v1642_v29 }
  0x97   : > { %v664_v26 = vmul.f32 %v4275_v62, %v3383_v20  ;;  %v732_v35 = vmul.f32 %v4235_v6, %v3395_v24  ;;  %v4377_v27 = vsel %vm573_vm2, %v1410_v10, %v1426_v1  ;;  %v1589_v15 = vmul.f32 %v3493_v53, %v4309_v51 }
  0x98   : > { %v1783_v33 = vadd.f32 %v1751_v2, %v1619_v22  ;;  %v1124_v40 = vadd.f32 %v1092_v47, %v928_v17  ;;  %v1552_v36 = vadd.f32 %v1520_v41, %v1355_v14  ;;  %v1521_v62 = vmul.f32 %v3443_v38, %v4377_v27 }
  0x99   : > { %v696_v60 = vadd.f32 %v4207_v5, %v664_v26  ;;  %v897_v6 = vmul.f32 %v4279_v39, %v3416_v31  ;;  %v4389_v25 = vsel %vm501_vm4, %v1690_v28, 0.0  ;;  %v1411_v10 = vrot.slane %v4371_v56, 7  ;;  %v4435_v26 = vld [vmem:[#allocation2 + $0xe0] sm:$0xff] }
  0x9a   : > { %3163 = vmatmul.mubr.msk.f32.gmra.mxu0 %vm452_vm0, %v1783_v33  ;;  %v1192_v7 = vadd.f32 %v1160_v49, %v1124_v40  ;;  %v1427_v1 = vrot.slane %v4373_v45, 7  ;;  %v1620_v46 = vadd.f32 %v1588_v3, %v1552_v36  ;;  %v1093_v42 = vmul.f32 %v4345_v59, %v3419_v32  ;;  %v4445_v36 = vld [vmem:[#allocation2 + $0xe8] sm:$0xff] }
  0x9b   : > { %v764_v29 = vadd.f32 %v732_v35, %v696_v60  ;;  %v1643_v11 = vrot.slane %v4371_v56, 1  ;;  %v1659_v34 = vrot.slane %v4373_v45, 1  ;;  %v665_v19 = vmul.f32 %v4307_v54, %v3383_v20 }
  0x9c   : > { %v1356_v8 = vadd.f32 %v1324_v0, %v1192_v7  ;;  %v1459_v39 = vsel %vm573_vm2, %v1427_v1, %v1411_v10  ;;  %v1784_v21 = vadd.f32 %v1752_v44, %v1620_v46  ;;  %v1161_v30 = vmul.f32 %v4301_v18, %v3440_v37 }
  0x9d   : > { %v929_v57 = vadd.f32 %v897_v6, %v764_v29  ;;  %v733_v2 = vmul.f32 %v4237_v50, %v3395_v24  ;;  %v1753_v43 = vmul.f32 %v3520_v61, %v4389_v25  ;;  %v1325_v12 = vmul.f32 %v4351_v16, %v3489_v52 }
  0x9e   : > { %v1553_v63 = vadd.f32 %v1521_v62, %v1356_v8  ;;  %v697_v9 = vadd.f32 %v4207_v5, %v665_v19  ;;  %3165 = vmatprep.mubr.msk.f32.mxu0 %vm452_vm0, %v1784_v21  ;;  %v4413_v23 = vsel %vm498_vm1, %v1459_v39, 0.0  ;;  %v1590_v55 = vmul.f32 %v3493_v53, %v4371_v56 }
  0x9f   : > { %v1125_v54 = vadd.f32 %v1093_v42, %v929_v57  ;;  %v898_v50 = vmul.f32 %v4319_v58, %v3416_v31  ;;  %v4421_v48 = vsel %vm806_vm3, %v1643_v11, %v1659_v34  ;;  %v1094_v3 = vmul.f32 %v4377_v27, %v3419_v32 }
  0xa0   : > { %v1621_v47 = vadd.f32 %v1589_v15, %v1553_v63  ;;  %v765_v41 = vadd.f32 %v733_v2, %v697_v9  ;;  %v1522_v22 = vmul.f32 %v3443_v38, %v4413_v23  ;;  %v1754_v17 = vmul.f32 %v3520_v61, %v4421_v48 }
  0xa1   : > { %v1193_v44 = vadd.f32 %v1161_v30, %v1125_v54  ;;  %v1691_v49 = vsel %vm806_vm3, %v1659_v34, %v1643_v11  ;;  %v1162_v14 = vmul.f32 %v4309_v51, %v3440_v37  ;;  %v1326_v28 = vmul.f32 %v4389_v25, %v3489_v52 }
  0xa2   : > { %v1785_v58 = vadd.f32 %v1753_v43, %v1621_v47  ;;  %v930_v0 = vadd.f32 %v898_v50, %v765_v41  ;;  %v4439_v33 = vsel %vm573_vm2, %v1411_v10, %v1427_v1  ;;  %v666_v40 = vmul.f32 %v4345_v59, %v3383_v20 }
  0xa3   : > { %v1357_v35 = vadd.f32 %v1325_v12, %v1193_v44  ;;  %v734_v15 = vmul.f32 %v4301_v18, %v3395_v24  ;;  %v1523_v60 = vmul.f32 %v3443_v38, %v4439_v33  ;;  %v1591_v6 = vmul.f32 %v3493_v53, %v4373_v45 }
  0xa4   : > { %3166 = vmatmul.mubr.msk.f32.gmra.mxu0 %vm452_vm0, %v1785_v58  ;;  %v1126_v62 = vadd.f32 %v1094_v3, %v930_v0  ;;  %v4454_v7 = vsel %vm501_vm4, %v1691_v49, 0.0  ;;  %v698_v59 = vadd.f32 %v4207_v5, %v666_v40  ;;  %v899_v18 = vmul.f32 %v4351_v16, %v3416_v31 }
  0xa5   : > { %v1554_v10 = vadd.f32 %v1522_v22, %v1357_v35  ;;  %v1412_v1 = vrot.slane %v4435_v26, 7  ;;  %v1095_v29 = vmul.f32 %v4413_v23, %v3419_v32  ;;  %v1428_v42 = vrot.slane %v4445_v36, 7 }
  0xa6   : > { %v1194_v46 = vadd.f32 %v1162_v14, %v1126_v62  ;;  %v1644_v11 = vrot.slane %v4435_v26, 1  ;;  %v766_v39 = vadd.f32 %v734_v15, %v698_v59  ;;  %v1660_v34 = vrot.slane %v4445_v36, 1  ;;  %v4507_v15 = vld [vmem:[#allocation2 + $0xf0] sm:$0xff]  ;;  %v4509_v62 = vld [vmem:[#allocation2 + $0xf8] sm:$0xff] }
  0xa7   : > { %v1622_v8 = vadd.f32 %v1590_v55, %v1554_v10  ;;  %v667_v19 = vmul.f32 %v4377_v27, %v3383_v20  ;;  %v1755_v16 = vmul.f32 %v3520_v61, %v4454_v7  ;;  %v1460_v57 = vsel %vm573_vm2, %v1428_v42, %v1412_v1 }
  0xa8   : > { %v1358_v21 = vadd.f32 %v1326_v28, %v1194_v46  ;;  %v735_v30 = vmul.f32 %v4309_v51, %v3395_v24  ;;  %v931_v63 = vadd.f32 %v899_v18, %v766_v39  ;;  %v1163_v43 = vmul.f32 %v4371_v56, %v3440_v37 }
  0xa9   : > { %v1786_v2 = vadd.f32 %v1754_v17, %v1622_v8  ;;  %v1327_v12 = vmul.f32 %v4421_v48, %v3489_v52  ;;  %v4479_v27 = vsel %vm498_vm1, %v1460_v57, 0.0  ;;  %v699_v54 = vadd.f32 %v4207_v5, %v667_v19 }
  0xaa   : > { %v1555_v9 = vadd.f32 %v1523_v60, %v1358_v21  ;;  %v900_v55 = vmul.f32 %v4389_v25, %v3416_v31  ;;  %v1127_v51 = vadd.f32 %v1095_v29, %v931_v63  ;;  %v1524_v50 = vmul.f32 %v3443_v38, %v4479_v27 }
  0xab   : > { %3168 = vmatprep.mubr.msk.f32.mxu0 %vm452_vm0, %v1786_v2  ;;  %v1592_v47 = vmul.f32 %v3493_v53, %v4435_v26  ;;  %v4491_v41 = vsel %vm806_vm3, %v1644_v11, %v1660_v34  ;;  %v767_v22 = vadd.f32 %v735_v30, %v699_v54  ;;  %v1096_v25 = vmul.f32 %v4439_v33, %v3419_v32 }
  0xac   : > { %v1623_v3 = vadd.f32 %v1591_v6, %v1555_v9  ;;  %v1756_v44 = vmul.f32 %v3520_v61, %v4491_v41  ;;  %v1195_v17 = vadd.f32 %v1163_v43, %v1127_v51  ;;  %v1164_v49 = vmul.f32 %v4373_v45, %v3440_v37 }
  0xad   : > { %v1692_v58 = vsel %vm806_vm3, %v1660_v34, %v1644_v11  ;;  %v668_v0 = vmul.f32 %v4413_v23, %v3383_v20  ;;  %v932_v28 = vadd.f32 %v900_v55, %v767_v22  ;;  %v1328_v35 = vmul.f32 %v4454_v7, %v3489_v52 }
  0xae   : > { %v1787_v14 = vadd.f32 %v1755_v16, %v1623_v3  ;;  %v736_v40 = vmul.f32 %v4371_v56, %v3395_v24  ;;  %v1359_v60 = vadd.f32 %v1327_v12, %v1195_v17  ;;  %v4513_v6 = vsel %vm573_vm2, %v1412_v1, %v1428_v42 }
  0xaf   : > { %v700_v10 = vadd.f32 %v4207_v5, %v668_v0  ;;  %v901_v23 = vmul.f32 %v4421_v48, %v3416_v31  ;;  %v1128_v59 = vadd.f32 %v1096_v25, %v932_v28  ;;  %v1525_v56 = vmul.f32 %v3443_v38, %v4513_v6 }
  0xb0   : > { %3169 = vmatmul.mubr.msk.f32.gmra.mxu0 %vm452_vm0, %v1787_v14  ;;  %v4523_v18 = vsel %vm501_vm4, %v1692_v58, 0.0  ;;  %v1097_v46 = vmul.f32 %v4479_v27, %v3419_v32  ;;  %v1556_v1 = vadd.f32 %v1524_v50, %v1359_v60  ;;  %v1413_v42 = vrot.slane %v4507_v15, 7 }
  0xb1   : > { %v768_v29 = vadd.f32 %v736_v40, %v700_v10  ;;  %v1429_v11 = vrot.slane %v4509_v62, 7  ;;  %v1196_v48 = vadd.f32 %v1164_v49, %v1128_v59  ;;  %v1165_v8 = vmul.f32 %v4435_v26, %v3440_v37  ;;  %v4581_v59 = vld [vmem:[#allocation2 + $0x108] sm:$0xff] }
  0xb2   : > { %v1645_v39 = vrot.slane %v4507_v15, 1  ;;  %v1661_v34 = vrot.slane %v4509_v62, 1  ;;  %v1624_v19 = vadd.f32 %v1592_v47, %v1556_v1  ;;  %v669_v57 = vmul.f32 %v4439_v33, %v3383_v20 }
  0xb3   : > { %v933_v21 = vadd.f32 %v901_v23, %v768_v29  ;;  %v1461_v16 = vsel %vm573_vm2, %v1429_v11, %v1413_v42  ;;  %v1360_v30 = vadd.f32 %v1328_v35, %v1196_v48  ;;  %v1593_v2 = vmul.f32 %v3493_v53, %v4445_v36  ;;  %v4573_v35 = vld [vmem:[#allocation2 + $0x100] sm:$0xff] }
  0xb4   : > { %v1757_v63 = vmul.f32 %v3520_v61, %v4523_v18  ;;  %v737_v43 = vmul.f32 %v4373_v45, %v3395_v24  ;;  %v1788_v12 = vadd.f32 %v1756_v44, %v1624_v19  ;;  %v1329_v54 = vmul.f32 %v4491_v41, %v3489_v52 }
  0xb5   : > { %v1129_v9 = vadd.f32 %v1097_v46, %v933_v21  ;;  %v4547_v55 = vsel %vm498_vm1, %v1461_v16, 0.0  ;;  %v1557_v33 = vadd.f32 %v1525_v56, %v1360_v30  ;;  %v4551_v51 = vsel %vm806_vm3, %v1645_v39, %v1661_v34 }
  0xb6   : > { %v701_v50 = vadd.f32 %v4207_v5, %v669_v57  ;;  %v902_v47 = vmul.f32 %v4454_v7, %v3416_v31  ;;  %3171 = vmatprep.mubr.msk.f32.mxu0 %vm452_vm0, %v1788_v12  ;;  %v1526_v3 = vmul.f32 %v3443_v38, %v4547_v55  ;;  %v1594_v44 = vmul.f32 %v3493_v53, %v4507_v15 }
  0xb7   : > { %v1197_v45 = vadd.f32 %v1165_v8, %v1129_v9  ;;  %v1758_v22 = vmul.f32 %v3520_v61, %v4551_v51  ;;  %v1625_v25 = vadd.f32 %v1593_v2, %v1557_v33  ;;  %v1098_v49 = vmul.f32 %v4513_v6, %v3419_v32 }
  0xb8   : > { %v769_v17 = vadd.f32 %v737_v43, %v701_v50  ;;  %v1166_v7 = vmul.f32 %v4445_v36, %v3440_v37  ;;  %v1693_v0 = vsel %vm806_vm3, %v1661_v34, %v1645_v39  ;;  %v670_v14 = vmul.f32 %v4479_v27, %v3383_v20 }
  0xb9   : > { %v1361_v58 = vadd.f32 %v1329_v54, %v1197_v45  ;;  %v738_v28 = vmul.f32 %v4435_v26, %v3395_v24  ;;  %v1789_v40 = vadd.f32 %v1757_v63, %v1625_v25  ;;  %v1330_v10 = vmul.f32 %v4523_v18, %v3489_v52 }
  0xba   : > { %v934_v60 = vadd.f32 %v902_v47, %v769_v17  ;;  %v4579_v23 = vsel %vm573_vm2, %v1413_v42, %v1429_v11  ;;  %v702_v46 = vadd.f32 %v4207_v5, %v670_v14  ;;  %v903_v26 = vmul.f32 %v4491_v41, %v3416_v31 }
  0xbb   : > { %v1558_v56 = vadd.f32 %v1526_v3, %v1361_v58  ;;  %v1527_v27 = vmul.f32 %v3443_v38, %v4579_v23  ;;  %3172 = vmatmul.mubr.msk.f32.gmra.mxu0 %vm452_vm0, %v1789_v40  ;;  %v4591_v29 = vsel %vm501_vm4, %v1693_v0, 0.0  ;;  %v1099_v42 = vmul.f32 %v4547_v55, %v3419_v32 }
  0xbc   : > { %v1130_v1 = vadd.f32 %v1098_v49, %v934_v60  ;;  %v1414_v11 = vrot.slane %v4573_v35, 7  ;;  %v770_v8 = vadd.f32 %v738_v28, %v702_v46  ;;  %v1167_v39 = vmul.f32 %v4507_v15, %v3440_v37 }
  0xbd   : > { %v1626_v48 = vadd.f32 %v1594_v44, %v1558_v56  ;;  %v1430_v34 = vrot.slane %v4581_v59, 7  ;;  %v1646_v19 = vrot.slane %v4573_v35, 1  ;;  %v1662_v21 = vrot.slane %v4581_v59, 1  ;;  %v1399_v56 = vld [vmem:[#allocation2 + $0x118] sm:$0xff] }
  0xbe   : > { %v1198_v41 = vadd.f32 %v1166_v7, %v1130_v1  ;;  %v671_v16 = vmul.f32 %v4513_v6, %v3383_v20  ;;  %v935_v30 = vadd.f32 %v903_v26, %v770_v8  ;;  %v739_v63 = vmul.f32 %v4445_v36, %v3395_v24 }
  0xbf   : > { %v1790_v57 = vadd.f32 %v1758_v22, %v1626_v48  ;;  %v1462_v2 = vsel %vm573_vm2, %v1430_v34, %v1414_v11  ;;  %v1595_v12 = vmul.f32 %v3493_v53, %v4509_v62  ;;  %v1759_v9 = vmul.f32 %v3520_v61, %v4591_v29 }
  0xc0   : > { %v1362_v43 = vadd.f32 %v1330_v10, %v1198_v41  ;;  %v703_v54 = vadd.f32 %v4207_v5, %v671_v16  ;;  %v1131_v6 = vadd.f32 %v1099_v42, %v935_v30  ;;  %v1331_v33 = vmul.f32 %v4551_v51, %v3489_v52  ;;  %v1398_v10 = vld [vmem:[#allocation2 + $0x110] sm:$0xff] }
  0xc1   : > { %3174 = vmatprep.mubr.msk.f32.mxu0 %vm452_vm0, %v1790_v57  ;;  %v1492_v50 = vsel %vm498_vm1, %v1462_v2, 0.0  ;;  %v904_v36 = vmul.f32 %v4523_v18, %v3416_v31  ;;  %v1678_v45 = vsel %vm806_vm3, %v1646_v19, %v1662_v21  ;;  %v1100_v44 = vmul.f32 %v4579_v23, %v3419_v32 }
  0xc2   : > { %v1559_v47 = vadd.f32 %v1527_v27, %v1362_v43  ;;  %v771_v3 = vadd.f32 %v739_v63, %v703_v54  ;;  %v1199_v22 = vadd.f32 %v1167_v39, %v1131_v6  ;;  %v1528_v25 = vmul.f32 %v3443_v38, %v1492_v50 }
  0xc3   : > { %v1596_v17 = vmul.f32 %v3493_v53, %v4573_v35  ;;  %v1760_v49 = vmul.f32 %v3520_v61, %v1678_v45  ;;  %v1168_v18 = vmul.f32 %v4509_v62, %v3440_v37  ;;  %v1332_v0 = vmul.f32 %v4591_v29, %v3489_v52 }
  0xc4   : > { %v1627_v7 = vadd.f32 %v1595_v12, %v1559_v47  ;;  %v936_v58 = vadd.f32 %v904_v36, %v771_v3  ;;  %v1363_v14 = vadd.f32 %v1331_v33, %v1199_v22  ;;  %v1694_v28 = vsel %vm806_vm3, %v1662_v21, %v1646_v19 }
  0xc5   : > { %v672_v40 = vmul.f32 %v4547_v55, %v3383_v20  ;;  %v740_v60 = vmul.f32 %v4507_v15, %v3395_v24  ;;  %v1446_v26 = vsel %vm573_vm2, %v1414_v11, %v1430_v34  ;;  %v1597_v1 = vmul.f32 %v3493_v53, %v4581_v59 }
  0xc6   : > { %v1791_v27 = vadd.f32 %v1759_v9, %v1627_v7  ;;  %v1132_v46 = vadd.f32 %v1100_v44, %v936_v58  ;;  %v1560_v42 = vadd.f32 %v1528_v25, %v1363_v14  ;;  %v1529_v48 = vmul.f32 %v3443_v38, %v1446_v26  ;;  %v4681_v7 = vld [vmem:[%s4988_s6] ss:$0 sm:$0xff] }
  0xc7   : > { %v704_v8 = vadd.f32 %v4207_v5, %v672_v40  ;;  %v905_v55 = vmul.f32 %v4551_v51, %v3416_v31  ;;  %v1725_v39 = vsel %vm501_vm4, %v1694_v28, 0.0  ;;  %v1415_v41 = vrot.slane %v1398_v10, 7 }
  0xc8   : > { %3175 = vmatmul.mubr.msk.f32.gmra.mxu0 %vm452_vm0, %v1791_v27  ;;  %v1200_v15 = vadd.f32 %v1168_v18, %v1132_v46  ;;  %v1431_v19 = vrot.slane %v1399_v56, 7  ;;  %v1628_v11 = vadd.f32 %v1596_v17, %v1560_v42  ;;  %v1761_v34 = vmul.f32 %v3520_v61, %v1725_v39 }
  0xc9   : > { %v772_v21 = vadd.f32 %v740_v60, %v704_v8  ;;  %v1101_v16 = vmul.f32 %v1492_v50, %v3419_v32  ;;  %v1169_v30 = vmul.f32 %v4573_v35, %v3440_v37  ;;  %v673_v2 = vmul.f32 %v4579_v23, %v3383_v20 }
  0xca   : > { %v1364_v57 = vadd.f32 %v1332_v0, %v1200_v15  ;;  %v1463_v51 = vsel %vm573_vm2, %v1431_v19, %v1415_v41  ;;  %v1792_v63 = vadd.f32 %v1760_v49, %v1628_v11  ;;  %v1647_v12 = vrot.slane %v1398_v10, 1 }
  0xcb   : > { %v937_v43 = vadd.f32 %v905_v55, %v772_v21  ;;  %v741_v9 = vmul.f32 %v4509_v62, %v3395_v24  ;;  %v1494_v6 = vsel %vm498_vm1, %v1463_v51, 0.0  ;;  %v1663_v33 = vrot.slane %v1399_v56, 1 }
  0xcc   : > { %v1561_v54 = vadd.f32 %v1529_v48, %v1364_v57  ;;  %v705_v50 = vadd.f32 %v4207_v5, %v673_v2  ;;  %3177 = vmatprep.mubr.msk.f32.mxu0 %vm452_vm0, %v1792_v63  ;;  %v1333_v36 = vmul.f32 %v1678_v45, %v3489_v52  ;;  %v906_v20 = vmul.f32 %v4591_v29, %v3416_v31 }
  0xcd   : > { %v1133_v35 = vadd.f32 %v1101_v16, %v937_v43  ;;  %v1102_v3 = vmul.f32 %v1446_v26, %v3419_v32  ;;  %v1530_v62 = vmul.f32 %v3443_v38, %v1494_v6  ;;  %v1679_v22 = vsel %vm806_vm3, %v1647_v12, %v1663_v33 }
  0xce   : > { %v1629_v23 = vadd.f32 %v1597_v1, %v1561_v54  ;;  %v773_v47 = vadd.f32 %v741_v9, %v705_v50  ;;  %v1170_v25 = vmul.f32 %v4581_v59, %v3440_v37  ;;  %v1598_v45 = vmul.f32 %v3493_v53, %v1398_v10 }
  0xcf   : > { %v1201_v24 = vadd.f32 %v1169_v30, %v1133_v35  ;;  %v1447_v31 = vsel %vm573_vm2, %v1415_v41, %v1431_v19  ;;  %v1334_v29 = vmul.f32 %v1725_v39, %v3489_v52  ;;  %v1695_v49 = vsel %vm806_vm3, %v1663_v33, %v1647_v12 }
  0xd0   : > { %v1793_v44 = vadd.f32 %v1761_v34, %v1629_v23  ;;  %v938_v5 = vadd.f32 %v906_v20, %v773_v47  ;;  %v1762_v59 = vmul.f32 %v3520_v61, %v1679_v22  ;;  %v1531_v18 = vmul.f32 %v3443_v38, %v1447_v31 }
  0xd1   : > { %v1365_v17 = vadd.f32 %v1333_v36, %v1201_v24  ;;  %v1727_v52 = vsel %vm501_vm4, %v1695_v49, 0.0  ;;  %v1599_v40 = vmul.f32 %v3493_v53, %v1399_v56 }
  0xd2   : > { %3178 = vmatmul.mubr.msk.f32.gmra.mxu0 %vm452_vm0, %v1793_v44  ;;  %v1134_v32 = vadd.f32 %v1102_v3, %v938_v5  ;;  %v3187_v0 = vpop.f32.mrf.mxu1  ;;  %v1763_v38 = vmul.f32 %v3520_v61, %v1727_v52 }
  0xd3   : > { %v1562_v37 = vadd.f32 %v1530_v62, %v1365_v17  ;;  %v2301_v4 = vadd.f32 %v3187_v0, %v4681_v7 }
  0xd4   : > { %v1202_v58 = vadd.f32 %v1170_v25, %v1134_v32  ;;  %v2295_v60 = vpop.f32.mrf.mxu1 }
  0xd5   : > { %v1630_v14 = vadd.f32 %v1598_v45, %v1562_v37  ;;  %v2661_v27 = vsel %vm2454_vm5, %v2301_v4, 0.0  ;;  %v2731_v46 = vmul.f32 %v2301_v4, %v2301_v4  ;;  %v2296_v26 = vadd.f32 %v4681_v7, %v2295_v60 }
  0xd6   : > { %v1366_v28 = vadd.f32 %v1334_v29, %v1202_v58  ;;  %v3190_v42 = vpop.f32.mrf.mxu1 }
  0xd7   : > { %v1794_v10 = vadd.f32 %v1762_v59, %v1630_v14  ;;  %v2763_v13 = vsel %vm2454_vm5, %v2731_v46, 0.0  ;;  %v2660_v48 = vsel %vm2454_vm5, %v2296_v26, 0.0  ;;  %v2730_v8 = vmul.f32 %v2296_v26, %v2296_v26 }
  0xd8   : > { %v1563_v1 = vadd.f32 %v1531_v18, %v1366_v28  ;;  %v2311_v53 = vadd.f32 %v3190_v42, %v4681_v7  ;;  %v2662_v55 = vadd.f32 %v2661_v27, %v2660_v48  ;;  %v2305_v15 = vpop.f32.mrf.mxu1 }
  0xd9   : > { %3180 = vmatprep.mubr.msk.f32.mxu0 %vm452_vm0, %v1794_v10  ;;  %v2762_v39 = vsel %vm2454_vm5, %v2730_v8, 0.0  ;;  %v2306_v19 = vadd.f32 %v4681_v7, %v2305_v15 }
  0xda   : > { %v1631_v56 = vadd.f32 %v1599_v40, %v1563_v1  ;;  %v2733_v41 = vmul.f32 %v2311_v53, %v2311_v53  ;;  %v2764_v61 = vadd.f32 %v2763_v13, %v2762_v39  ;;  %v3193_v34 = vpop.f32.mrf.mxu1  ;;  %v2665_v21 = vsel %vm2454_vm5, %v2311_v53, 0.0 }
  0xdb   : > { %v2663_v16 = vsel %vm2454_vm5, %v2306_v19, 0.0  ;;  %v2732_v57 = vmul.f32 %v2306_v19, %v2306_v19  ;;  %v2321_v30 = vadd.f32 %v3193_v34, %v4681_v7  ;;  %v4729_v19 = vld [vmem:[%s4986_s4] ss:$0 sm:$0xff] }
  0xdc   : > { %v1795_v11 = vadd.f32 %v1763_v38, %v1631_v56  ;;  %v2664_v51 = vadd.f32 %v2663_v16, %v2662_v55  ;;  %v2315_v2 = vpop.f32.mrf.mxu1  ;;  %v2767_v63 = vsel %vm2454_vm5, %v2733_v41, 0.0 }
  0xdd   : > { %v2765_v43 = vsel %vm2454_vm5, %v2732_v57, 0.0  ;;  %v2735_v12 = vmul.f32 %v2321_v30, %v2321_v30  ;;  %v2316_v9 = vadd.f32 %v4681_v7, %v2315_v2  ;;  %v2669_v50 = vsel %vm2454_vm5, %v2321_v30, 0.0 }
  0xde   : > { %3181 = vmatmul.mubr.msk.f32.gmra.mxu0 %vm452_vm0, %v1795_v11  ;;  %v2766_v54 = vadd.f32 %v2765_v43, %v2764_v61  ;;  %v2666_v6 = vadd.f32 %v2665_v21, %v2664_v51  ;;  %v3196_v33 = vpop.f32.mrf.mxu1 }
  0xdf   : > { %v2667_v35 = vsel %vm2454_vm5, %v2316_v9, 0.0  ;;  %v2734_v36 = vmul.f32 %v2316_v9, %v2316_v9  ;;  %v2331_v20 = vadd.f32 %v3196_v33, %v4681_v7  ;;  %v2771_v24 = vsel %vm2454_vm5, %v2735_v12, 0.0 }
  0xe0   : > { %v2668_v23 = vadd.f32 %v2667_v35, %v2666_v6  ;;  %v2768_v47 = vadd.f32 %v2767_v63, %v2766_v54  ;;  %v2325_v3 = vpop.f32.mrf.mxu1 }
  0xe1   : > { %v2769_v62 = vsel %vm2454_vm5, %v2734_v36, 0.0  ;;  %v2737_v44 = vmul.f32 %v2331_v20, %v2331_v20  ;;  %v2326_v22 = vadd.f32 %v4681_v7, %v2325_v3  ;;  %v2673_v45 = vsel %vm2454_vm5, %v2331_v20, 0.0 }
  0xe2   : > { %v2770_v5 = vadd.f32 %v2769_v62, %v2768_v47  ;;  %v2670_v25 = vadd.f32 %v2669_v50, %v2668_v23  ;;  %v3199_v17 = vpop.f32.mrf.mxu1 }
  0xe3   : > { %v2671_v31 = vsel %vm2454_vm5, %v2326_v22, 0.0  ;;  %v2736_v32 = vmul.f32 %v2326_v22, %v2326_v22  ;;  %v2341_v29 = vadd.f32 %v3199_v17, %v4681_v7  ;;  %v2775_v58 = vsel %vm2454_vm5, %v2737_v44, 0.0 }
  0xe4   : > { %v2672_v49 = vadd.f32 %v2671_v31, %v2670_v25  ;;  %v2772_v37 = vadd.f32 %v2771_v24, %v2770_v5  ;;  %v2335_v59 = vpop.f32.mrf.mxu1 }
  0xe5   : > { %v2773_v18 = vsel %vm2454_vm5, %v2736_v32, 0.0  ;;  %v2739_v0 = vmul.f32 %v2341_v29, %v2341_v29  ;;  %v2336_v14 = vadd.f32 %v4681_v7, %v2335_v59  ;;  %v2677_v40 = vsel %vm2454_vm5, %v2341_v29, 0.0 }
  0xe6   : > { %v2774_v52 = vadd.f32 %v2773_v18, %v2772_v37  ;;  %v2674_v4 = vadd.f32 %v2673_v45, %v2672_v49  ;;  %v3202_v28 = vpop.f32.mrf.mxu1 }
  0xe7   : > { %v2675_v60 = vsel %vm2454_vm5, %v2336_v14, 0.0  ;;  %v2738_v10 = vmul.f32 %v2336_v14, %v2336_v14  ;;  %v2351_v27 = vadd.f32 %v3202_v28, %v4681_v7  ;;  %v2779_v38 = vsel %vm2454_vm5, %v2739_v0, 0.0 }
  0xe8   : > { %v2676_v46 = vadd.f32 %v2675_v60, %v2674_v4  ;;  %v2776_v26 = vadd.f32 %v2775_v58, %v2774_v52  ;;  %v2345_v1 = vpop.f32.mrf.mxu1 }
  0xe9   : > { %v2777_v42 = vsel %vm2454_vm5, %v2738_v10, 0.0  ;;  %v2741_v13 = vmul.f32 %v2351_v27, %v2351_v27  ;;  %v2346_v48 = vadd.f32 %v4681_v7, %v2345_v1  ;;  %v2681_v55 = vsel %vm2454_vm5, %v2351_v27, 0.0 }
  0xea   : > { %v2778_v8 = vadd.f32 %v2777_v42, %v2776_v26  ;;  %v2678_v53 = vadd.f32 %v2677_v40, %v2676_v46  ;;  %v3205_v56 = vpop.f32.mrf.mxu1 }
  0xeb   : > { %v2679_v15 = vsel %vm2454_vm5, %v2346_v48, 0.0  ;;  %v2740_v39 = vmul.f32 %v2346_v48, %v2346_v48  ;;  %v2361_v41 = vadd.f32 %v3205_v56, %v4681_v7  ;;  %v2783_v21 = vsel %vm2454_vm5, %v2741_v13, 0.0 }
  0xec   : > { %v2680_v11 = vadd.f32 %v2679_v15, %v2678_v53  ;;  %v2780_v61 = vadd.f32 %v2779_v38, %v2778_v8  ;;  %v2355_v34 = vpop.f32.mrf.mxu1 }
  0xed   : > { %v2781_v16 = vsel %vm2454_vm5, %v2740_v39, 0.0  ;;  %v2356_v57 = vadd.f32 %v4681_v7, %v2355_v34  ;;  %v2743_v2 = vmul.f32 %v2361_v41, %v2361_v41  ;;  %v2685_v33 = vsel %vm2454_vm5, %v2361_v41, 0.0 }
  0xee   : > { %v2782_v51 = vadd.f32 %v2781_v16, %v2780_v61  ;;  %v2682_v63 = vadd.f32 %v2681_v55, %v2680_v11 }
  0xef   : > { %v3208_v43 = vpop.f32.mrf.mxu1  ;;  %v2683_v9 = vsel %vm2454_vm5, %v2356_v57, 0.0  ;;  %v2742_v54 = vmul.f32 %v2356_v57, %v2356_v57  ;;  %v2787_v62 = vsel %vm2454_vm5, %v2743_v2, 0.0 }
  0xf0   : > { %v3137_v30 = vpop.f32.mrf.mxu0  ;;  %v2684_v50 = vadd.f32 %v2683_v9, %v2682_v63  ;;  %v2784_v35 = vadd.f32 %v2783_v21, %v2782_v51  ;;  %v2371_v36 = vadd.f32 %v3208_v43, %v4681_v7 }
  0xf1   : > { %v1972_v12 = vadd.f32 %v3137_v30, %v4729_v19  ;;  %v2365_v20 = vpop.f32.mrf.mxu1  ;;  %v2785_v24 = vsel %vm2454_vm5, %v2742_v54, 0.0 }
  0xf2   : > { %v1966_v6 = vpop.f32.mrf.mxu0  ;;  %v2786_v44 = vadd.f32 %v2785_v24, %v2784_v35  ;;  %v2745_v22 = vmul.f32 %v2371_v36, %v2371_v36  ;;  %v2366_v5 = vadd.f32 %v4681_v7, %v2365_v20  ;;  %v2686_v32 = vadd.f32 %v2685_v33, %v2684_v50 }
  0xf3   : > { %2456 = vst.msk [vmem:[%s4739_s27 + $0x8] sm:$0xff] %vm2454_vm5, %v1972_v12  ;;  %v2488_v23 = vsel %vm2454_vm5, %v1972_v12, 0.0  ;;  %v2559_v47 = vmul.f32 %v1972_v12, %v1972_v12  ;;  %v1967_v3 = vadd.f32 %v4729_v19, %v1966_v6  ;;  %v3211_v25 = vpop.f32.mrf.mxu1  ;;  %v2689_v49 = vsel %vm2454_vm5, %v2371_v36, 0.0 }
  0xf4   : > { %v2687_v37 = vsel %vm2454_vm5, %v2366_v5, 0.0  ;;  %v2744_v59 = vmul.f32 %v2366_v5, %v2366_v5  ;;  %v2788_v14 = vadd.f32 %v2787_v62, %v2786_v44  ;;  %v2381_v52 = vadd.f32 %v3211_v25, %v4681_v7 }
  0xf5   : > { %v2591_v17 = vsel %vm2454_vm5, %v2559_v47, 0.0  ;;  %2455 = vst.msk [vmem:[%s4739_s27] sm:$0xff] %vm2454_vm5, %v1967_v3  ;;  %v2487_v45 = vsel %vm2454_vm5, %v1967_v3, 0.0  ;;  %v2558_v31 = vmul.f32 %v1967_v3, %v1967_v3  ;;  %v2375_v58 = vpop.f32.mrf.mxu1  ;;  %v2688_v0 = vadd.f32 %v2687_v37, %v2686_v32 }
  0xf6   : > { %v2489_v29 = vadd.f32 %v2488_v23, %v2487_v45  ;;  %v2791_v28 = vsel %vm2454_vm5, %v2745_v22, 0.0  ;;  %v2789_v40 = vsel %vm2454_vm5, %v2744_v59, 0.0  ;;  %v2376_v60 = vadd.f32 %v4681_v7, %v2375_v58 }
  0xf7   : > { %v2590_v18 = vsel %vm2454_vm5, %v2558_v31, 0.0  ;;  %v2790_v10 = vadd.f32 %v2789_v40, %v2788_v14  ;;  %v2747_v27 = vmul.f32 %v2381_v52, %v2381_v52  ;;  %v2690_v46 = vadd.f32 %v2689_v49, %v2688_v0  ;;  %v3214_v26 = vpop.f32.mrf.mxu1 }
  0xf8   : > { %v2592_v4 = vadd.f32 %v2591_v17, %v2590_v18  ;;  %v2693_v1 = vsel %vm2454_vm5, %v2381_v52, 0.0  ;;  %v2691_v38 = vsel %vm2454_vm5, %v2376_v60, 0.0  ;;  %v2746_v42 = vmul.f32 %v2376_v60, %v2376_v60 }
  0xf9   : > { %v2391_v13 = vadd.f32 %v3214_v26, %v4681_v7  ;;  %v2692_v48 = vadd.f32 %v2691_v38, %v2690_v46  ;;  %v2792_v8 = vadd.f32 %v2791_v28, %v2790_v10  ;;  %v2385_v53 = vpop.f32.mrf.mxu1  ;;  %v2795_v56 = vsel %vm2454_vm5, %v2747_v27, 0.0 }
  0xfa   : > { %v2793_v55 = vsel %vm2454_vm5, %v2746_v42, 0.0  ;;  %v2386_v39 = vadd.f32 %v4681_v7, %v2385_v53 }
  0xfb   : > { %v2749_v15 = vmul.f32 %v2391_v13, %v2391_v13  ;;  %v2794_v11 = vadd.f32 %v2793_v55, %v2792_v8  ;;  %v2694_v61 = vadd.f32 %v2693_v1, %v2692_v48  ;;  %v2697_v21 = vsel %vm2454_vm5, %v2391_v13, 0.0  ;;  %v3217_v30 = vpop.f32.mrf.mxu1 }
  0xfc   : > { %v2695_v16 = vsel %vm2454_vm5, %v2386_v39, 0.0  ;;  %v2748_v57 = vmul.f32 %v2386_v39, %v2386_v39  ;;  %v2401_v12 = vadd.f32 %v3217_v30, %v4681_v7 }
  0xfd   : > { %v3140_v41 = vpop.f32.mrf.mxu0  ;;  %v2799_v2 = vsel %vm2454_vm5, %v2749_v15, 0.0  ;;  %v2696_v63 = vadd.f32 %v2695_v16, %v2694_v61  ;;  %v2796_v43 = vadd.f32 %v2795_v56, %v2794_v11  ;;  %v2395_v50 = vpop.f32.mrf.mxu1 }
  0xfe   : > { %v1982_v34 = vadd.f32 %v3140_v41, %v4729_v19  ;;  %v2797_v33 = vsel %vm2454_vm5, %v2748_v57, 0.0  ;;  %v2701_v36 = vsel %vm2454_vm5, %v2401_v12, 0.0  ;;  %v2751_v20 = vmul.f32 %v2401_v12, %v2401_v12 }
  0xff   : > { %v1976_v51 = vpop.f32.mrf.mxu0  ;;  %v2798_v35 = vadd.f32 %v2797_v33, %v2796_v43  ;;  %v2396_v23 = vadd.f32 %v4681_v7, %v2395_v50  ;;  %v2698_v62 = vadd.f32 %v2697_v21, %v2696_v63  ;;  %v3220_v44 = vpop.f32.mrf.mxu1 }
 0x100   : > { %2458 = vst.msk [vmem:[%s4739_s27 + $0x18] sm:$0xff] %vm2454_vm5, %v1982_v34  ;;  %v2492_v9 = vsel %vm2454_vm5, %v1982_v34, 0.0  ;;  %v2561_v54 = vmul.f32 %v1982_v34, %v1982_v34  ;;  %v1977_v6 = vadd.f32 %v4729_v19, %v1976_v51  ;;  %v2803_v5 = vsel %vm2454_vm5, %v2751_v20, 0.0 }
 0x101   : > { %v2699_v25 = vsel %vm2454_vm5, %v2396_v23, 0.0  ;;  %v2750_v17 = vmul.f32 %v2396_v23, %v2396_v23  ;;  %v2800_v32 = vadd.f32 %v2799_v2, %v2798_v35  ;;  %v2411_v49 = vadd.f32 %v3220_v44, %v4681_v7  ;;  %v2405_v37 = vpop.f32.mrf.mxu1 }
 0x102   : > { %v2595_v47 = vsel %vm2454_vm5, %v2561_v54, 0.0  ;;  %2457 = vst.msk [vmem:[%s4739_s27 + $0x10] sm:$0xff] %vm2454_vm5, %v1977_v6  ;;  %v2490_v3 = vsel %vm2454_vm5, %v1977_v6, 0.0  ;;  %v2560_v24 = vmul.f32 %v1977_v6, %v1977_v6  ;;  %v2700_v31 = vadd.f32 %v2699_v25, %v2698_v62 }
 0x103   : > { %v2491_v22 = vadd.f32 %v2490_v3, %v2489_v29  ;;  %v2801_v18 = vsel %vm2454_vm5, %v2750_v17, 0.0  ;;  %v2406_v0 = vadd.f32 %v4681_v7, %v2405_v37  ;;  %v2705_v29 = vsel %vm2454_vm5, %v2411_v49, 0.0 }
 0x104   : > { %v2593_v45 = vsel %vm2454_vm5, %v2560_v24, 0.0  ;;  %v2802_v14 = vadd.f32 %v2801_v18, %v2800_v32  ;;  %v2753_v52 = vmul.f32 %v2411_v49, %v2411_v49  ;;  %v2702_v28 = vadd.f32 %v2701_v36, %v2700_v31  ;;  %v3223_v40 = vpop.f32.mrf.mxu1 }
 0x105   : > { %v2594_v59 = vadd.f32 %v2593_v45, %v2592_v4  ;;  %v2493_v58 = vadd.f32 %v2492_v9, %v2491_v22  ;;  %v2703_v10 = vsel %vm2454_vm5, %v2406_v0, 0.0  ;;  %v2752_v27 = vmul.f32 %v2406_v0, %v2406_v0 }
 0x106   : > { %v2421_v46 = vadd.f32 %v3223_v40, %v4681_v7  ;;  %v2704_v4 = vadd.f32 %v2703_v10, %v2702_v28  ;;  %v2804_v1 = vadd.f32 %v2803_v5, %v2802_v14  ;;  %v2415_v38 = vpop.f32.mrf.mxu1  ;;  %v2807_v13 = vsel %vm2454_vm5, %v2753_v52, 0.0 }
 0x107   : > { %v2596_v60 = vadd.f32 %v2595_v47, %v2594_v59  ;;  %v2805_v48 = vsel %vm2454_vm5, %v2752_v27, 0.0  ;;  %v2416_v55 = vadd.f32 %v4681_v7, %v2415_v38 }
 0x108   : > { %v3143_v26 = vpop.f32.mrf.mxu0  ;;  %v2755_v8 = vmul.f32 %v2421_v46, %v2421_v46  ;;  %v2806_v56 = vadd.f32 %v2805_v48, %v2804_v1  ;;  %v2706_v15 = vadd.f32 %v2705_v29, %v2704_v4  ;;  %v3226_v39 = vpop.f32.mrf.mxu1  ;;  %v2709_v34 = vsel %vm2454_vm5, %v2421_v46, 0.0 }
 0x109   : > { %v1992_v42 = vadd.f32 %v3143_v26, %v4729_v19  ;;  %v2707_v21 = vsel %vm2454_vm5, %v2416_v55, 0.0  ;;  %v2754_v16 = vmul.f32 %v2416_v55, %v2416_v55  ;;  %v2431_v30 = vadd.f32 %v3226_v39, %v4681_v7 }
 0x10a   : > { %v1986_v53 = vpop.f32.mrf.mxu0  ;;  %v2808_v57 = vadd.f32 %v2807_v13, %v2806_v56  ;;  %v2425_v51 = vpop.f32.mrf.mxu1  ;;  %v2811_v43 = vsel %vm2454_vm5, %v2755_v8, 0.0  ;;  %v2708_v12 = vadd.f32 %v2707_v21, %v2706_v15 }
 0x10b   : > { %2460 = vst.msk [vmem:[%s4739_s27 + $0x28] sm:$0xff] %vm2454_vm5, %v1992_v42  ;;  %v2496_v41 = vsel %vm2454_vm5, %v1992_v42, 0.0  ;;  %v2563_v11 = vmul.f32 %v1992_v42, %v1992_v42  ;;  %v1987_v61 = vadd.f32 %v4729_v19, %v1986_v53  ;;  %v2809_v6 = vsel %vm2454_vm5, %v2754_v16, 0.0 }
 0x10c   : > { %v2757_v33 = vmul.f32 %v2431_v30, %v2431_v30  ;;  %v3229_v50 = vpop.f32.mrf.mxu1  ;;  %v2810_v36 = vadd.f32 %v2809_v6, %v2808_v57  ;;  %v2426_v20 = vadd.f32 %v4681_v7, %v2425_v51  ;;  %v2710_v23 = vadd.f32 %v2709_v34, %v2708_v12 }
 0x10d   : > { %2459 = vst.msk [vmem:[%s4739_s27 + $0x20] sm:$0xff] %vm2454_vm5, %v1987_v61  ;;  %v2494_v2 = vsel %vm2454_vm5, %v1987_v61, 0.0  ;;  %v2562_v63 = vmul.f32 %v1987_v61, %v1987_v61  ;;  %v2599_v9 = vsel %vm2454_vm5, %v2563_v11, 0.0  ;;  %v2713_v24 = vsel %vm2454_vm5, %v2431_v30, 0.0 }
 0x10e   : > { %v2495_v54 = vadd.f32 %v2494_v2, %v2493_v58  ;;  %v2441_v62 = vadd.f32 %v3229_v50, %v4681_v7  ;;  %v2435_v44 = vpop.f32.mrf.mxu1  ;;  %v2711_v22 = vsel %vm2454_vm5, %v2426_v20, 0.0  ;;  %v2756_v5 = vmul.f32 %v2426_v20, %v2426_v20 }
 0x10f   : > { %v2597_v35 = vsel %vm2454_vm5, %v2562_v63, 0.0  ;;  %v2812_v25 = vadd.f32 %v2811_v43, %v2810_v36  ;;  %v2436_v17 = vadd.f32 %v4681_v7, %v2435_v44  ;;  %v2815_v31 = vsel %vm2454_vm5, %v2757_v33, 0.0 }
 0x110   : > { %v2598_v47 = vadd.f32 %v2597_v35, %v2596_v60  ;;  %v2497_v3 = vadd.f32 %v2496_v41, %v2495_v54  ;;  %v2712_v32 = vadd.f32 %v2711_v22, %v2710_v23  ;;  %v2759_v49 = vmul.f32 %v2441_v62, %v2441_v62  ;;  %v3232_v37 = vpop.f32.mrf.mxu1 }
 0x111   : > { %v2813_v59 = vsel %vm2454_vm5, %v2756_v5, 0.0  ;;  %v2715_v58 = vsel %vm2454_vm5, %v2436_v17, 0.0  ;;  %v2758_v18 = vmul.f32 %v2436_v17, %v2436_v17  ;;  %v2451_v0 = vadd.f32 %v3232_v37, %v4681_v7 }
 0x112   : > { %v2600_v45 = vadd.f32 %v2599_v9, %v2598_v47  ;;  %v2814_v29 = vadd.f32 %v2813_v59, %v2812_v25  ;;  %v2714_v52 = vadd.f32 %v2713_v24, %v2712_v32  ;;  %v2445_v28 = vpop.f32.mrf.mxu1  ;;  %v2717_v60 = vsel %vm2454_vm5, %v2441_v62, 0.0 }
 0x113   : > { %v2817_v10 = vsel %vm2454_vm5, %v2758_v18, 0.0  ;;  %v2446_v4 = vadd.f32 %v4681_v7, %v2445_v28  ;;  %v2819_v38 = vsel %vm2454_vm5, %v2759_v49, 0.0  ;;  %v2761_v42 = vmul.f32 %v2451_v0, %v2451_v0 }
 0x114   : > { %v3146_v14 = vpop.f32.mrf.mxu0  ;;  %v2716_v46 = vadd.f32 %v2715_v58, %v2714_v52  ;;  %v2816_v26 = vadd.f32 %v2815_v31, %v2814_v29  ;;  %v2721_v7 = vsel %vm2454_vm5, %v2451_v0, 0.0 }
 0x115   : > { %v2002_v40 = vadd.f32 %v3146_v14, %v4729_v19  ;;  %v2719_v8 = vsel %vm2454_vm5, %v2446_v4, 0.0  ;;  %v2760_v53 = vmul.f32 %v2446_v4, %v2446_v4  ;;  %v2823_v16 = vsel %vm2454_vm5, %v2761_v42, 0.0 }
 0x116   : > { %v1996_v27 = vpop.f32.mrf.mxu0  ;;  %v2818_v13 = vadd.f32 %v2817_v10, %v2816_v26  ;;  %v2718_v48 = vadd.f32 %v2717_v60, %v2716_v46 }
 0x117   : > { %2462 = vst.msk [vmem:[%s4739_s27 + $0x38] sm:$0xff] %vm2454_vm5, %v2002_v40  ;;  %v1997_v1 = vadd.f32 %v4729_v19, %v1996_v27  ;;  %v2565_v56 = vmul.f32 %v2002_v40, %v2002_v40  ;;  %v2821_v61 = vsel %vm2454_vm5, %v2760_v53, 0.0  ;;  %v2500_v34 = vsel %vm2454_vm5, %v2002_v40, 0.0 }
 0x118   : > { %v2720_v41 = vadd.f32 %v2719_v8, %v2718_v48  ;;  %v2820_v11 = vadd.f32 %v2819_v38, %v2818_v13 }
 0x119   : > { %2461 = vst.msk [vmem:[%s4739_s27 + $0x30] sm:$0xff] %vm2454_vm5, %v1997_v1  ;;  %v2498_v55 = vsel %vm2454_vm5, %v1997_v1, 0.0  ;;  %v2564_v15 = vmul.f32 %v1997_v1, %v1997_v1  ;;  %v2603_v63 = vsel %vm2454_vm5, %v2565_v56, 0.0 }
 0x11a   : > { %v2499_v39 = vadd.f32 %v2498_v55, %v2497_v3  ;;  %v2722_v51 = vadd.f32 %v2721_v7, %v2720_v41  ;;  %v2822_v2 = vadd.f32 %v2821_v61, %v2820_v11 }
 0x11b   : > { %v2601_v21 = vsel %vm2454_vm5, %v2564_v15, 0.0 }
 0x11c   : > { %v2602_v57 = vadd.f32 %v2601_v21, %v2600_v45  ;;  %v2501_v30 = vadd.f32 %v2500_v34, %v2499_v39  ;;  %v2723_v12 = vrot.slane %v2722_v51, 4  ;;  %v2824_v9 = vadd.f32 %v2823_v16, %v2822_v2 }
 0x11e   : > { %v2604_v43 = vadd.f32 %v2603_v63, %v2602_v57  ;;  %v2724_v6 = vadd.f32 %v2723_v12, %v2722_v51  ;;  %v2825_v33 = vrot.slane %v2824_v9, 4 }
 0x11f   : > { %v3149_v54 = vpop.f32.mrf.mxu0 }
 0x120   : > { %v2012_v50 = vadd.f32 %v3149_v54, %v4729_v19  ;;  %v2725_v36 = vrot.slane %v2724_v6, 2  ;;  %v2826_v20 = vadd.f32 %v2825_v33, %v2824_v9 }
 0x121   : > { %v2006_v35 = vpop.f32.mrf.mxu0 }
 0x122   : > { %2464 = vst.msk [vmem:[%s4739_s27 + $0x48] sm:$0xff] %vm2454_vm5, %v2012_v50  ;;  %v2007_v23 = vadd.f32 %v4729_v19, %v2006_v35  ;;  %v2726_v47 = vadd.f32 %v2725_v36, %v2724_v6  ;;  %v2827_v3 = vrot.slane %v2826_v20, 2  ;;  %v2567_v24 = vmul.f32 %v2012_v50, %v2012_v50 }
 0x123   : > { %v2504_v17 = vsel %vm2454_vm5, %v2012_v50, 0.0 }
 0x124   : > { %2463 = vst.msk [vmem:[%s4739_s27 + $0x40] sm:$0xff] %vm2454_vm5, %v2007_v23  ;;  %v2502_v62 = vsel %vm2454_vm5, %v2007_v23, 0.0  ;;  %v2566_v44 = vmul.f32 %v2007_v23, %v2007_v23  ;;  %v2727_v5 = vrot.slane %v2726_v47, 1  ;;  %v2828_v25 = vadd.f32 %v2827_v3, %v2826_v20 }
 0x125   : > { %v2503_v22 = vadd.f32 %v2502_v62, %v2501_v30  ;;  %v2607_v59 = vsel %vm2454_vm5, %v2567_v24, 0.0 }
 0x126   : > { %v2605_v45 = vsel %vm2454_vm5, %v2566_v44, 0.0  ;;  %v2728_v49 = vadd.f32 %v2727_v5, %v2726_v47  ;;  %v2829_v37 = vrot.slane %v2828_v25, 1 }
 0x127   : > { %v2606_v31 = vadd.f32 %v2605_v45, %v2604_v43  ;;  %v2505_v32 = vadd.f32 %v2504_v17, %v2503_v22 }
 0x128   : > { %2729 = vst.msk [vmem:[%s416_s29] sm:$0x1] %vm2556_vm6, %v2728_v49  ;;  %v2830_v18 = vadd.f32 %v2829_v37, %v2828_v25 }
 0x129   : > { %v2608_v58 = vadd.f32 %v2607_v59, %v2606_v31 }
 0x12a   : > { %2831 = vst.msk [vmem:[%s419_s13] sm:$0x1] %vm2556_vm6, %v2830_v18 }
 0x12c   : > { %v3152_v0 = vpop.f32.mrf.mxu0 }
 0x12d   : > { %v2022_v14 = vadd.f32 %v3152_v0, %v4729_v19 }
 0x12e   : > { %v2016_v29 = vpop.f32.mrf.mxu0 }
 0x12f   : > { %2466 = vst.msk [vmem:[%s4739_s27 + $0x58] sm:$0xff] %vm2454_vm5, %v2022_v14  ;;  %v2017_v52 = vadd.f32 %v4729_v19, %v2016_v29  ;;  %v2569_v28 = vmul.f32 %v2022_v14, %v2022_v14  ;;  %v2508_v27 = vsel %vm2454_vm5, %v2022_v14, 0.0 }
 0x131   : > { %2465 = vst.msk [vmem:[%s4739_s27 + $0x50] sm:$0xff] %vm2454_vm5, %v2017_v52  ;;  %v2506_v40 = vsel %vm2454_vm5, %v2017_v52, 0.0  ;;  %v2568_v60 = vmul.f32 %v2017_v52, %v2017_v52  ;;  %v2611_v1 = vsel %vm2454_vm5, %v2569_v28, 0.0 }
 0x132   : > { %v2507_v10 = vadd.f32 %v2506_v40, %v2505_v32 }
 0x133   : > { %v2609_v46 = vsel %vm2454_vm5, %v2568_v60, 0.0 }
 0x134   : > { %v2610_v26 = vadd.f32 %v2609_v46, %v2608_v58  ;;  %v2509_v4 = vadd.f32 %v2508_v27, %v2507_v10 }
 0x136   : > { %v3155_v38 = vpop.f32.mrf.mxu0  ;;  %v2612_v42 = vadd.f32 %v2611_v1, %v2610_v26 }
 0x137   : > { %v2032_v13 = vadd.f32 %v3155_v38, %v4729_v19 }
 0x138   : > { %v2026_v48 = vpop.f32.mrf.mxu0 }
 0x139   : > { %2468 = vst.msk [vmem:[%s4739_s27 + $0x68] sm:$0xff] %vm2454_vm5, %v2032_v13  ;;  %v2027_v8 = vadd.f32 %v4729_v19, %v2026_v48  ;;  %v2571_v53 = vmul.f32 %v2032_v13, %v2032_v13  ;;  %v2512_v7 = vsel %vm2454_vm5, %v2032_v13, 0.0 }
 0x13b   : > { %2467 = vst.msk [vmem:[%s4739_s27 + $0x60] sm:$0xff] %vm2454_vm5, %v2027_v8  ;;  %v2510_v56 = vsel %vm2454_vm5, %v2027_v8, 0.0  ;;  %v2570_v55 = vmul.f32 %v2027_v8, %v2027_v8  ;;  %v2615_v61 = vsel %vm2454_vm5, %v2571_v53, 0.0 }
 0x13c   : > { %v2511_v15 = vadd.f32 %v2510_v56, %v2509_v4 }
 0x13d   : > { %v2613_v39 = vsel %vm2454_vm5, %v2570_v55, 0.0 }
 0x13e   : > { %v2614_v41 = vadd.f32 %v2613_v39, %v2612_v42  ;;  %v2513_v11 = vadd.f32 %v2512_v7, %v2511_v15 }
 0x140   : > { %v2616_v34 = vadd.f32 %v2615_v61, %v2614_v41 }
 0x142   : > { %v3158_v21 = vpop.f32.mrf.mxu0 }
 0x143   : > { %v2042_v16 = vadd.f32 %v3158_v21, %v4729_v19 }
 0x144   : > { %v2036_v57 = vpop.f32.mrf.mxu0 }
 0x145   : > { %2470 = vst.msk [vmem:[%s4739_s27 + $0x78] sm:$0xff] %vm2454_vm5, %v2042_v16  ;;  %v2037_v30 = vadd.f32 %v4729_v19, %v2036_v57  ;;  %v2573_v51 = vmul.f32 %v2042_v16, %v2042_v16  ;;  %v2516_v12 = vsel %vm2454_vm5, %v2042_v16, 0.0 }
 0x147   : > { %2469 = vst.msk [vmem:[%s4739_s27 + $0x70] sm:$0xff] %vm2454_vm5, %v2037_v30  ;;  %v2514_v2 = vsel %vm2454_vm5, %v2037_v30, 0.0  ;;  %v2572_v63 = vmul.f32 %v2037_v30, %v2037_v30  ;;  %v2619_v33 = vsel %vm2454_vm5, %v2573_v51, 0.0 }
 0x148   : > { %v2515_v43 = vadd.f32 %v2514_v2, %v2513_v11 }
 0x149   : > { %v2617_v9 = vsel %vm2454_vm5, %v2572_v63, 0.0 }
 0x14a   : > { %v2618_v54 = vadd.f32 %v2617_v9, %v2616_v34  ;;  %v2517_v6 = vadd.f32 %v2516_v12, %v2515_v43 }
 0x14c   : > { %v2620_v50 = vadd.f32 %v2619_v33, %v2618_v54 }
 0x14d   : > { %v3161_v35 = vpop.f32.mrf.mxu0 }
 0x14e   : > { %v2052_v36 = vadd.f32 %v3161_v35, %v4729_v19 }
 0x14f   : > { %v2046_v20 = vpop.f32.mrf.mxu0 }
 0x150   : > { %2472 = vst.msk [vmem:[%s4739_s27 + $0x88] sm:$0xff] %vm2454_vm5, %v2052_v36  ;;  %v2047_v23 = vadd.f32 %v4729_v19, %v2046_v20  ;;  %v2575_v49 = vmul.f32 %v2052_v36, %v2052_v36  ;;  %v2520_v59 = vsel %vm2454_vm5, %v2052_v36, 0.0 }
 0x152   : > { %2471 = vst.msk [vmem:[%s4739_s27 + $0x80] sm:$0xff] %vm2454_vm5, %v2047_v23  ;;  %v2574_v25 = vmul.f32 %v2047_v23, %v2047_v23  ;;  %v2518_v45 = vsel %vm2454_vm5, %v2047_v23, 0.0  ;;  %v2623_v14 = vsel %vm2454_vm5, %v2575_v49, 0.0 }
 0x153   : > { %v2519_v32 = vadd.f32 %v2518_v45, %v2517_v6 }
 0x154   : > { %v2621_v31 = vsel %vm2454_vm5, %v2574_v25, 0.0 }
 0x155   : > { %v2622_v37 = vadd.f32 %v2621_v31, %v2620_v50  ;;  %v2521_v18 = vadd.f32 %v2520_v59, %v2519_v32 }
 0x157   : > { %v2624_v28 = vadd.f32 %v2623_v14, %v2622_v37 }
 0x15a   : > { %v3164_v47 = vpop.f32.mrf.mxu0 }
 0x15b   : > { %v2062_v3 = vadd.f32 %v3164_v47, %v4729_v19 }
 0x15c   : > { %v2056_v24 = vpop.f32.mrf.mxu0 }
 0x15d   : > { %2474 = vst.msk [vmem:[%s4739_s27 + $0x98] sm:$0xff] %vm2454_vm5, %v2062_v3  ;;  %v2057_v62 = vadd.f32 %v4729_v19, %v2056_v24  ;;  %v2577_v46 = vmul.f32 %v2062_v3, %v2062_v3  ;;  %v2524_v4 = vsel %vm2454_vm5, %v2062_v3, 0.0 }
 0x15f   : > { %2473 = vst.msk [vmem:[%s4739_s27 + $0x90] sm:$0xff] %vm2454_vm5, %v2057_v62  ;;  %v2576_v58 = vmul.f32 %v2057_v62, %v2057_v62  ;;  %v2522_v29 = vsel %vm2454_vm5, %v2057_v62, 0.0  ;;  %v2627_v42 = vsel %vm2454_vm5, %v2577_v46, 0.0 }
 0x160   : > { %v2523_v27 = vadd.f32 %v2522_v29, %v2521_v18 }
 0x161   : > { %v2625_v60 = vsel %vm2454_vm5, %v2576_v58, 0.0 }
 0x162   : > { %v2626_v26 = vadd.f32 %v2625_v60, %v2624_v28  ;;  %v2525_v38 = vadd.f32 %v2524_v4, %v2523_v27 }
 0x164   : > { %v3167_v44 = vpop.f32.mrf.mxu0  ;;  %v2628_v48 = vadd.f32 %v2627_v42, %v2626_v26 }
 0x165   : > { %v2072_v22 = vadd.f32 %v3167_v44, %v4729_v19 }
 0x166   : > { %v2066_v5 = vpop.f32.mrf.mxu0 }
 0x167   : > { %2476 = vst.msk [vmem:[%s4739_s27 + $0xa8] sm:$0xff] %vm2454_vm5, %v2072_v22  ;;  %v2067_v17 = vadd.f32 %v4729_v19, %v2066_v5  ;;  %v2579_v55 = vmul.f32 %v2072_v22, %v2072_v22  ;;  %v2528_v41 = vsel %vm2454_vm5, %v2072_v22, 0.0 }
 0x169   : > { %2475 = vst.msk [vmem:[%s4739_s27 + $0xa0] sm:$0xff] %vm2454_vm5, %v2067_v17  ;;  %v2578_v1 = vmul.f32 %v2067_v17, %v2067_v17  ;;  %v2526_v13 = vsel %vm2454_vm5, %v2067_v17, 0.0  ;;  %v2631_v21 = vsel %vm2454_vm5, %v2579_v55, 0.0 }
 0x16a   : > { %v2527_v53 = vadd.f32 %v2526_v13, %v2525_v38 }
 0x16b   : > { %v2629_v8 = vsel %vm2454_vm5, %v2578_v1, 0.0 }
 0x16c   : > { %v2630_v7 = vadd.f32 %v2629_v8, %v2628_v48  ;;  %v2529_v34 = vadd.f32 %v2528_v41, %v2527_v53 }
 0x16e   : > { %v2632_v57 = vadd.f32 %v2631_v21, %v2630_v7 }
 0x170   : > { %v3170_v0 = vpop.f32.mrf.mxu0 }
 0x171   : > { %v2082_v52 = vadd.f32 %v3170_v0, %v4729_v19 }
 0x172   : > { %v2076_v40 = vpop.f32.mrf.mxu0 }
 0x173   : > { %2478 = vst.msk [vmem:[%s4739_s27 + $0xb8] sm:$0xff] %vm2454_vm5, %v2082_v52  ;;  %v2077_v10 = vadd.f32 %v4729_v19, %v2076_v40  ;;  %v2581_v2 = vmul.f32 %v2082_v52, %v2082_v52  ;;  %v2532_v43 = vsel %vm2454_vm5, %v2082_v52, 0.0 }
 0x175   : > { %2477 = vst.msk [vmem:[%s4739_s27 + $0xb0] sm:$0xff] %vm2454_vm5, %v2077_v10  ;;  %v2580_v11 = vmul.f32 %v2077_v10, %v2077_v10  ;;  %v2530_v16 = vsel %vm2454_vm5, %v2077_v10, 0.0  ;;  %v2635_v6 = vsel %vm2454_vm5, %v2581_v2, 0.0 }
 0x176   : > { %v2531_v51 = vadd.f32 %v2530_v16, %v2529_v34 }
 0x177   : > { %v2633_v30 = vsel %vm2454_vm5, %v2580_v11, 0.0 }
 0x178   : > { %v2634_v63 = vadd.f32 %v2633_v30, %v2632_v57  ;;  %v2533_v9 = vadd.f32 %v2532_v43, %v2531_v51 }
 0x17a   : > { %v2636_v35 = vadd.f32 %v2635_v6, %v2634_v63 }
 0x17b   : > { %v3173_v56 = vpop.f32.mrf.mxu0 }
 0x17c   : > { %v2092_v15 = vadd.f32 %v3173_v56, %v4729_v19 }
 0x17d   : > { %v2086_v39 = vpop.f32.mrf.mxu0 }
 0x17e   : > { %2480 = vst.msk [vmem:[%s4739_s27 + $0xc8] sm:$0xff] %vm2454_vm5, %v2092_v15  ;;  %v2087_v61 = vadd.f32 %v4729_v19, %v2086_v39  ;;  %v2583_v3 = vmul.f32 %v2092_v15, %v2092_v15  ;;  %v2536_v62 = vsel %vm2454_vm5, %v2092_v15, 0.0 }
 0x180   : > { %2479 = vst.msk [vmem:[%s4739_s27 + $0xc0] sm:$0xff] %vm2454_vm5, %v2087_v61  ;;  %v2582_v12 = vmul.f32 %v2087_v61, %v2087_v61  ;;  %v2534_v33 = vsel %vm2454_vm5, %v2087_v61, 0.0  ;;  %v2639_v5 = vsel %vm2454_vm5, %v2583_v3, 0.0 }
 0x181   : > { %v2535_v47 = vadd.f32 %v2534_v33, %v2533_v9 }
 0x182   : > { %v2637_v20 = vsel %vm2454_vm5, %v2582_v12, 0.0 }
 0x183   : > { %v2638_v24 = vadd.f32 %v2637_v20, %v2636_v35  ;;  %v2537_v22 = vadd.f32 %v2536_v62, %v2535_v47 }
 0x185   : > { %v2640_v17 = vadd.f32 %v2639_v5, %v2638_v24 }
 0x188   : > { %v3176_v54 = vpop.f32.mrf.mxu0 }
 0x189   : > { %v2102_v50 = vadd.f32 %v3176_v54, %v4729_v19 }
 0x18a   : > { %v2096_v36 = vpop.f32.mrf.mxu0 }
 0x18b   : > { %2482 = vst.msk [vmem:[%s4739_s27 + $0xd8] sm:$0xff] %vm2454_vm5, %v2102_v50  ;;  %v2097_v23 = vadd.f32 %v4729_v19, %v2096_v36  ;;  %v2585_v59 = vmul.f32 %v2102_v50, %v2102_v50  ;;  %v2540_v0 = vsel %vm2454_vm5, %v2102_v50, 0.0 }
 0x18d   : > { %2481 = vst.msk [vmem:[%s4739_s27 + $0xd0] sm:$0xff] %vm2454_vm5, %v2097_v23  ;;  %v2584_v44 = vmul.f32 %v2097_v23, %v2097_v23  ;;  %v2538_v25 = vsel %vm2454_vm5, %v2097_v23, 0.0  ;;  %v2643_v52 = vsel %vm2454_vm5, %v2585_v59, 0.0 }
 0x18e   : > { %v2539_v49 = vadd.f32 %v2538_v25, %v2537_v22 }
 0x18f   : > { %v2641_v31 = vsel %vm2454_vm5, %v2584_v44, 0.0 }
 0x190   : > { %v2642_v18 = vadd.f32 %v2641_v31, %v2640_v17  ;;  %v2541_v29 = vadd.f32 %v2540_v0, %v2539_v49 }
 0x192   : > { %v3179_v45 = vpop.f32.mrf.mxu0  ;;  %v2644_v40 = vadd.f32 %v2643_v52, %v2642_v18 }
 0x193   : > { %v2112_v32 = vadd.f32 %v3179_v45, %v4729_v19 }
 0x194   : > { %v2106_v37 = vpop.f32.mrf.mxu0 }
 0x195   : > { %2484 = vst.msk [vmem:[%s4739_s27 + $0xe8] sm:$0xff] %vm2454_vm5, %v2112_v32  ;;  %v2107_v58 = vadd.f32 %v4729_v19, %v2106_v37  ;;  %v2587_v27 = vmul.f32 %v2112_v32, %v2112_v32  ;;  %v2544_v4 = vsel %vm2454_vm5, %v2112_v32, 0.0 }
 0x197   : > { %2483 = vst.msk [vmem:[%s4739_s27 + $0xe0] sm:$0xff] %vm2454_vm5, %v2107_v58  ;;  %v2586_v14 = vmul.f32 %v2107_v58, %v2107_v58  ;;  %v2542_v28 = vsel %vm2454_vm5, %v2107_v58, 0.0  ;;  %v2647_v13 = vsel %vm2454_vm5, %v2587_v27, 0.0 }
 0x198   : > { %v2543_v10 = vadd.f32 %v2542_v28, %v2541_v29 }
 0x199   : > { %v2645_v60 = vsel %vm2454_vm5, %v2586_v14, 0.0 }
 0x19a   : > { %v2646_v46 = vadd.f32 %v2645_v60, %v2644_v40  ;;  %v2545_v42 = vadd.f32 %v2544_v4, %v2543_v10 }
 0x19c   : > { %v2648_v8 = vadd.f32 %v2647_v13, %v2646_v46 }
 0x19e   : > { %v3182_v26 = vpop.f32.mrf.mxu0 }
 0x19f   : > { %v2122_v1 = vadd.f32 %v3182_v26, %v4729_v19 }
 0x1a0   : > { %v2116_v38 = vpop.f32.mrf.mxu0 }
 0x1a1   : > { %2486 = vst.msk [vmem:[%s4739_s27 + $0xf8] sm:$0xff] %vm2454_vm5, %v2122_v1  ;;  %v2117_v48 = vadd.f32 %v4729_v19, %v2116_v38  ;;  %v2589_v53 = vmul.f32 %v2122_v1, %v2122_v1  ;;  %v2548_v7 = vsel %vm2454_vm5, %v2122_v1, 0.0 }
 0x1a3   : > { %2485 = vst.msk [vmem:[%s4739_s27 + $0xf0] sm:$0xff] %vm2454_vm5, %v2117_v48  ;;  %v2546_v56 = vsel %vm2454_vm5, %v2117_v48, 0.0  ;;  %v2588_v55 = vmul.f32 %v2117_v48, %v2117_v48  ;;  %v2651_v61 = vsel %vm2454_vm5, %v2589_v53, 0.0 }
 0x1a4   : > { %v2547_v15 = vadd.f32 %v2546_v56, %v2545_v42 }
 0x1a5   : > { %v2649_v39 = vsel %vm2454_vm5, %v2588_v55, 0.0 }
 0x1a6   : > { %v2549_v41 = vadd.f32 %v2548_v7, %v2547_v15  ;;  %v2650_v11 = vadd.f32 %v2649_v39, %v2648_v8 }
 0x1a8   : > { %v2550_v34 = vrot.slane %v2549_v41, 4  ;;  %v2652_v19 = vadd.f32 %v2651_v61, %v2650_v11 }
 0x1aa   : > { %v2551_v21 = vadd.f32 %v2550_v34, %v2549_v41  ;;  %v2653_v16 = vrot.slane %v2652_v19, 4 }
 0x1ac   : > { %v2552_v57 = vrot.slane %v2551_v21, 2  ;;  %v2654_v30 = vadd.f32 %v2653_v16, %v2652_v19 }
 0x1ae   : > { %v2553_v51 = vadd.f32 %v2552_v57, %v2551_v21  ;;  %v2655_v2 = vrot.slane %v2654_v30, 2 }
 0x1b0   : > { %v2554_v63 = vrot.slane %v2553_v51, 1  ;;  %v2656_v43 = vadd.f32 %v2655_v2, %v2654_v30 }
 0x1b2   : > { %v2555_v12 = vadd.f32 %v2554_v63, %v2553_v51  ;;  %v2657_v9 = vrot.slane %v2656_v43, 1 }
 0x1b4   : > { %2557 = vst.msk [vmem:[%s410_s16] sm:$0x1] %vm2556_vm6, %v2555_v12  ;;  %v2658_v54 = vadd.f32 %v2657_v9, %v2656_v43 }
 0x1b6   : > { %2659 = vst.msk [vmem:[%s413_s21] sm:$0x1] %vm2556_vm6, %v2658_v54 }
 0x1b7 PF: > { %s22_s17 = sadd.s32 1, %s3249_s17  }
 0x1b8   : > { %p19_p4 = scmp.ge.s32.totalorder %s22_s17, 4  }
 0x1ba   :  { %21 = sbr.rel (!%p19_p4) target bundleno = 1 (0x1), region = 129 }

</bundles_post_ra>
